<compile_context>
chip_gen: v6e
topology: v6e:2x2x1
jax: 0.10.0
libtpu: 0.0.40
codegen_flags: <defaults>
</compile_context>

<pallas_src>
import math
from functools import partial

import jax
import jax.numpy as jnp
import numpy as np
from jax.experimental import pallas as pl
from jax.experimental.pallas import tpu as pltpu


# --------------------------------------------------------------------------
# One-time (init) weight / bias folding — pure numpy layout plumbing.
# --------------------------------------------------------------------------
def _banded_weight_np(w, w_in, wo, coutp, wo_pad=None):
    """DHWIO kernel -> banded matrix folding (kd, kh, kw, Cin) into K and Wo
    into output lanes.

    Returns (kd*kh*w_in*cin, wo_pad*coutp) with
      out[((a*kh + b)*w_in + wi)*cin + ci, o*coutp + co] = w[a, b, wi - o, ci, co]
    (zero outside the kw band, above the true Cout and in padded wi/wo slots),
    so a VALID conv along W for ALL (kd, kh) taps at once is exactly ONE matmul
    against the lane-concatenated tap slab.
    """
    kd, kh, kw, cin, cout = w.shape
    wo_pad = wo if wo_pad is None else wo_pad
    band = np.zeros((kd, kh, w_in * cin, wo_pad * coutp), np.float32)
    for o in range(wo):
        for c in range(kw):
            wi = o + c
            band[:, :, wi * cin:(wi + 1) * cin,
                 o * coutp:o * coutp + cout] = w[:, :, c]
    return band.reshape(kd * kh * w_in * cin, wo_pad * coutp)


def _tile_bias_np(b, wo, coutp, wo_pad=None):
    """(Cout,) bias -> (1, wo_pad*coutp) row matching the banded output layout
    (zeros in the channel / width padding slots)."""
    wo_pad = wo if wo_pad is None else wo_pad
    b = np.asarray(b, np.float32).reshape(-1)
    row = np.zeros((wo_pad, coutp), np.float32)
    row[:wo, :b.size] = b[None, :]
    return row.reshape(1, wo_pad * coutp)


def _pad_to_lane_multiple(wo, cout):
    """Smallest wo_pad >= wo such that wo_pad*cout is a multiple of 128."""
    step = 128 // math.gcd(cout, 128)
    return -(-wo // step) * step


# --------------------------------------------------------------------------
# Pallas kernel: full ResCNN forward (3 MXU matmuls + manual weight prefetch)
# --------------------------------------------------------------------------
def _rescnn_kernel(p1_ref, w1_ref, b1_ref, b2_ref, b3_ref, w2_hbm, w3_hbm,
                   o_ref, w2_vmem, w3_vmem, dma_sem,
                   *, n, d1, d2, d3, ks2, ks3, row1, row2):
    f32, bf16 = jnp.float32, jnp.bfloat16

    # Kick off the conv2 / conv3 weight DMAs (~1.4 MiB) immediately so they
    # overlap with the conv1 / conv2 MXU work below (manual P4-style prefetch).
    cp2 = pltpu.make_async_copy(w2_hbm, w2_vmem, dma_sem.at[0])
    cp3 = pltpu.make_async_copy(w3_hbm, w3_vmem, dma_sem.at[1])
    cp2.start()
    cp3.start()

    def tap_slab(h, kd, kh, do, ho):
        # h: (n, D, H, ROW) bf16 with ROW a multiple of 128.  Lane-concatenate
        # the (kd, kh) tap windows -> (n*do*ho, kd*kh*ROW).  Every piece lands
        # at a 128-aligned lane offset, so this is pure layout plumbing.
        slab = jnp.concatenate(
            [h[:, a:a + do, b:b + ho, :] for a in range(kd) for b in range(kh)],
            axis=-1)
        return slab.reshape(n * do * ho, kd * kh * h.shape[-1])

    # ---- conv1 + relu1: ONE matmul, K = kd*kh*W*Cin = 270 ------------------
    y1 = jnp.dot(p1_ref[...], w1_ref[...], preferred_element_type=f32)
    h1 = jnp.maximum((y1 + b1_ref[...]).astype(bf16), 0)   # bias f32, ReLU bf16
    h1 = h1.reshape(n, d1[0], d1[1], row1)

    # ---- conv2 + relu2: ONE matmul, K = 9*256 = 2304 -----------------------
    s2 = tap_slab(h1, ks2[0], ks2[1], d2[0], d2[1])
    cp2.wait()
    y2 = jnp.dot(s2, w2_vmem[...], preferred_element_type=f32)
    h2 = jnp.maximum((y2 + b2_ref[...]).astype(bf16), 0)
    h2 = h2.reshape(n, d2[0], d2[1], row2)

    # ---- conv3: ONE matmul, K = 9*256 = 2304; lane-dense (32, 128) f32 store
    s3 = tap_slab(h2, ks3[0], ks3[1], d3[0], d3[1])
    cp3.wait()
    o_ref[...] = jnp.dot(s3, w3_vmem[...], preferred_element_type=f32) + b3_ref[...]


# --------------------------------------------------------------------------
# Model builder: fold parameters ONCE, return a jitted forward closure.
# --------------------------------------------------------------------------
def make_rescnn_forward(params, x_shape):
    w1, b1, w2, b2, w3, b3 = params
    N, D, H, W, Cin = x_shape
    ks1, ks2, ks3 = w1.shape[:3], w2.shape[:3], w3.shape[:3]
    c1, c2, c3 = w1.shape[-1], w2.shape[-1], w3.shape[-1]
    assert c1 == c2
    c3p = 32                       # pad conv3 Cout 6 -> 32 (lane-dense output)

    def valid(dims, ks):
        return tuple(d - k + 1 for d, k in zip(dims, ks))

    d1 = valid((D, H, W), ks1)     # (8, 8, 8)
    d2 = valid(d1, ks2)            # (6, 6, 6)
    d3 = valid(d2, ks3)            # (4, 4, 4)

    # Pad each layer's per-row (Wo * Cout) lane width up to a multiple of 128
    # so the in-kernel lane-concatenations stay 128-aligned.
    wo1p = _pad_to_lane_multiple(d1[2], c1)    # 8  -> row 256
    wo2p = _pad_to_lane_multiple(d2[2], c2)    # 8  -> row 256 (padded from 6)
    wo3p = _pad_to_lane_multiple(d3[2], c3p)   # 4  -> row 128

    # ---- one-time folding (numpy; never re-run in the per-call path) ------
    w1np, w2np, w3np = (np.asarray(w, np.float32) for w in (w1, w2, w3))
    w1f = jnp.asarray(_banded_weight_np(w1np, W,    d1[2], c1,  wo1p), jnp.bfloat16)
    w2f = jnp.asarray(_banded_weight_np(w2np, wo1p, d2[2], c2,  wo2p), jnp.bfloat16)
    w3f = jnp.asarray(_banded_weight_np(w3np, wo2p, d3[2], c3p, wo3p), jnp.bfloat16)
    b1f = jnp.asarray(_tile_bias_np(b1, d1[2], c1,  wo1p))    # (1, 256) f32
    b2f = jnp.asarray(_tile_bias_np(b2, d2[2], c2,  wo2p))    # (1, 256) f32
    b3f = jnp.asarray(_tile_bias_np(b3, d3[2], c3p, wo3p))    # (1, 128) f32

    m3 = N * d3[0] * d3[1]
    kernel = partial(_rescnn_kernel, n=N, d1=d1, d2=d2, d3=d3,
                     ks2=(int(ks2[0]), int(ks2[1])),
                     ks3=(int(ks3[0]), int(ks3[1])),
                     row1=wo1p * c1, row2=wo2p * c2)

    vspec = pl.BlockSpec(memory_space=pltpu.MemorySpace.VMEM)
    hbmspec = pl.BlockSpec(memory_space=pl.ANY)
    call = pl.pallas_call(
        kernel,
        out_shape=jax.ShapeDtypeStruct((m3, wo3p * c3p), jnp.float32),
        in_specs=[vspec, vspec, vspec, vspec, vspec, hbmspec, hbmspec],
        out_specs=vspec,
        scratch_shapes=[pltpu.VMEM(w2f.shape, jnp.bfloat16),
                        pltpu.VMEM(w3f.shape, jnp.bfloat16),
                        pltpu.SemaphoreType.DMA((2,))],
        # TODO(synk): when scaling up, add grid=(N,) with dimension_semantics=
        # ("parallel",) for the v7x 2-TC split and set vmem_limit_bytes.
    )

    @jax.jit
    def forward(x):
        # conv1 im2col over the (kd, kh) taps only (layout plumbing; the
        # (kw, Cin) contraction is folded into the banded weight).
        xr = x.reshape(N, D, H, W * Cin)
        p1 = jnp.concatenate(
            [xr[:, a:a + d1[0], b:b + d1[1], :]
             for a in range(ks1[0]) for b in range(ks1[1])], axis=-1)
        p1 = p1.reshape(N * d1[0] * d1[1],
                        ks1[0] * ks1[1] * W * Cin).astype(jnp.bfloat16)
        out = call(p1, w1f, b1f, b2f, b3f, w2f, w3f)
        out = out.reshape(N, d3[0], d3[1], wo3p, c3p)
        return out[:, :, :, :d3[2], :c3]       # drop width / channel padding

    return forward


# --------------------------------------------------------------------------
# Deterministic parameter init (PyTorch Conv3d-style uniform bounds)
# --------------------------------------------------------------------------
def init_conv(key, ksize, cin, cout):
    kd, kh, kw = ksize
    wkey, bkey = jax.random.split(key)
    fan_in = cin * kd * kh * kw
    bound = 1.0 / math.sqrt(fan_in)
    w = jax.random.uniform(wkey, (kd, kh, kw, cin, cout), jnp.float32,
                           minval=-bound, maxval=bound)
    b = jax.random.uniform(bkey, (1, cout), jnp.float32,
                           minval=-bound, maxval=bound)
    return w, b


# --------------------------------------------------------------------------
# Pure-JAX f32 reference (for correctness check)
# --------------------------------------------------------------------------
def rescnn_ref(x, params):
    w1, b1, w2, b2, w3, b3 = params
    dn = ("NDHWC", "DHWIO", "NDHWC")

    def conv(x, w, b):
        y = jax.lax.conv_general_dilated(
            x, w, window_strides=(1, 1, 1), padding="VALID",
            dimension_numbers=dn, precision=jax.lax.Precision.HIGHEST)
        return y + b.reshape(1, 1, 1, 1, -1)

    h1 = jax.nn.relu(conv(x, w1, b1))
    h2 = jax.nn.relu(conv(h1, w2, b2))
    return conv(h2, w3, b3)


if __name__ == "__main__":
    key = jax.random.PRNGKey(0)
    kx, k1, k2, k3 = jax.random.split(key, 4)

    # batch=2, Cin=3, spatial 10^3, all kernels (3, 3, 3); NDHWC layout
    # (PyTorch NCDHW equivalent input shape: [2, 3, 10, 10, 10]).
    x = jax.random.normal(kx, (2, 10, 10, 10, 3), jnp.float32)

    w1, b1 = init_conv(k1, (3, 3, 3), 3, 32)
    w2, b2 = init_conv(k2, (3, 3, 3), 32, 32)
    w3, b3 = init_conv(k3, (3, 3, 3), 32, 6)
    params = (w1, b1, w2, b2, w3, b3)

    forward = make_rescnn_forward(params, x.shape)   # folds weights once
    out = jax.block_until_ready(forward(x))          # jitted Pallas forward
    ref = jax.block_until_ready(rescnn_ref(x, params))

    assert out.shape == (2, 4, 4, 4, 6), out.shape
    # bf16 MXU operands with f32 accumulation vs. an f32 HIGHEST reference.
    max_err = float(jnp.max(jnp.abs(out - ref)))
    assert jnp.allclose(out, ref, atol=3e-2, rtol=3e-2), max_err

    print("KERNEL_OK")
</pallas_src>

<mosaic_0001>
module attributes {stable_mosaic.version = 11 : i64} {
  func.func @_rescnn_kernel(%arg0: memref<128x270xbf16, #tpu.memory_space<vmem>>, %arg1: memref<270x256xbf16, #tpu.memory_space<vmem>>, %arg2: memref<1x256xf32, #tpu.memory_space<vmem>>, %arg3: memref<1x256xf32, #tpu.memory_space<vmem>>, %arg4: memref<1x128xf32, #tpu.memory_space<vmem>>, %arg5: memref<2304x256xbf16, #tpu.memory_space<any>>, %arg6: memref<2304x128xbf16, #tpu.memory_space<any>>, %arg7: memref<32x128xf32, #tpu.memory_space<vmem>>, %arg8: memref<2304x256xbf16, #tpu.memory_space<vmem>>, %arg9: memref<2304x128xbf16, #tpu.memory_space<vmem>>, %arg10: memref<2x!tpu.dma_semaphore, #tpu.memory_space<semaphore_mem>>) attributes {dimension_semantics = [], scalar_prefetch = 0 : i64, scratch_operands = 3 : i64, tpu.core_type = #tpu.core_type<tc>} {
    %c0_i32 = arith.constant 0 : i32
    %0 = tpu.memref_slice %arg10[%c0_i32] : memref<2x!tpu.dma_semaphore, #tpu.memory_space<semaphore_mem>> -> memref<1x!tpu.dma_semaphore, #tpu.memory_space<semaphore_mem>>
    %1 = tpu.memref_squeeze %0 : memref<1x!tpu.dma_semaphore, #tpu.memory_space<semaphore_mem>> -> memref<!tpu.dma_semaphore, #tpu.memory_space<semaphore_mem>>
    tpu.enqueue_dma source(%arg5 : memref<2304x256xbf16, #tpu.memory_space<any>>) target(%arg8 : memref<2304x256xbf16, #tpu.memory_space<vmem>>) target_semaphore(%1 : memref<!tpu.dma_semaphore, #tpu.memory_space<semaphore_mem>>)
    %c1_i32 = arith.constant 1 : i32
    %2 = tpu.memref_slice %arg10[%c1_i32] : memref<2x!tpu.dma_semaphore, #tpu.memory_space<semaphore_mem>> -> memref<1x!tpu.dma_semaphore, #tpu.memory_space<semaphore_mem>>
    %3 = tpu.memref_squeeze %2 : memref<1x!tpu.dma_semaphore, #tpu.memory_space<semaphore_mem>> -> memref<!tpu.dma_semaphore, #tpu.memory_space<semaphore_mem>>
    tpu.enqueue_dma source(%arg6 : memref<2304x128xbf16, #tpu.memory_space<any>>) target(%arg9 : memref<2304x128xbf16, #tpu.memory_space<vmem>>) target_semaphore(%3 : memref<!tpu.dma_semaphore, #tpu.memory_space<semaphore_mem>>)
    %c0 = arith.constant 0 : index
    %c0_0 = arith.constant 0 : index
    %4 = vector.load %arg0[%c0, %c0_0] : memref<128x270xbf16, #tpu.memory_space<vmem>>, vector<128x270xbf16>
    %c0_1 = arith.constant 0 : index
    %c0_2 = arith.constant 0 : index
    %5 = vector.load %arg1[%c0_1, %c0_2] : memref<270x256xbf16, #tpu.memory_space<vmem>>, vector<270x256xbf16>
    %cst = arith.constant dense<0.000000e+00> : vector<128x256xf32>
    %6 = tpu.matmul %4, %5, %cst {dimension_numbers = #tpu.dot_dimension_numbers<[1], [0], [0], [1], [0, 0, 1, 1], [], []>} : vector<128x270xbf16>, vector<270x256xbf16>, vector<128x256xf32> -> vector<128x256xf32>
    %c0_3 = arith.constant 0 : index
    %c0_4 = arith.constant 0 : index
    %7 = vector.load %arg2[%c0_3, %c0_4] : memref<1x256xf32, #tpu.memory_space<vmem>>, vector<1x256xf32>
    %8 = vector.broadcast %7 : vector<1x256xf32> to vector<128x256xf32>
    %9 = arith.addf %6, %8 : vector<128x256xf32>
    %10 = arith.truncf %9 : vector<128x256xf32> to vector<128x256xbf16>
    %cst_5 = arith.constant 0.000000e+00 : bf16
    %11 = vector.broadcast %cst_5 : bf16 to vector<128x256xbf16>
    %12 = arith.maximumf %10, %11 : vector<128x256xbf16>
    %13 = vector.shape_cast %12 : vector<128x256xbf16> to vector<2x8x8x256xbf16>
    %14 = vector.extract_strided_slice %13 {offsets = [0, 0, 0, 0], sizes = [2, 6, 6, 256], strides = [1, 1, 1, 1]} : vector<2x8x8x256xbf16> to vector<2x6x6x256xbf16>
    %15 = vector.extract_strided_slice %13 {offsets = [0, 0, 1, 0], sizes = [2, 6, 6, 256], strides = [1, 1, 1, 1]} : vector<2x8x8x256xbf16> to vector<2x6x6x256xbf16>
    %16 = vector.extract_strided_slice %13 {offsets = [0, 0, 2, 0], sizes = [2, 6, 6, 256], strides = [1, 1, 1, 1]} : vector<2x8x8x256xbf16> to vector<2x6x6x256xbf16>
    %17 = vector.extract_strided_slice %13 {offsets = [0, 1, 0, 0], sizes = [2, 6, 6, 256], strides = [1, 1, 1, 1]} : vector<2x8x8x256xbf16> to vector<2x6x6x256xbf16>
    %18 = vector.extract_strided_slice %13 {offsets = [0, 1, 1, 0], sizes = [2, 6, 6, 256], strides = [1, 1, 1, 1]} : vector<2x8x8x256xbf16> to vector<2x6x6x256xbf16>
    %19 = vector.extract_strided_slice %13 {offsets = [0, 1, 2, 0], sizes = [2, 6, 6, 256], strides = [1, 1, 1, 1]} : vector<2x8x8x256xbf16> to vector<2x6x6x256xbf16>
    %20 = vector.extract_strided_slice %13 {offsets = [0, 2, 0, 0], sizes = [2, 6, 6, 256], strides = [1, 1, 1, 1]} : vector<2x8x8x256xbf16> to vector<2x6x6x256xbf16>
    %21 = vector.extract_strided_slice %13 {offsets = [0, 2, 1, 0], sizes = [2, 6, 6, 256], strides = [1, 1, 1, 1]} : vector<2x8x8x256xbf16> to vector<2x6x6x256xbf16>
    %22 = vector.extract_strided_slice %13 {offsets = [0, 2, 2, 0], sizes = [2, 6, 6, 256], strides = [1, 1, 1, 1]} : vector<2x8x8x256xbf16> to vector<2x6x6x256xbf16>
    %23 = tpu.concatenate %14, %15, %16, %17, %18, %19, %20, %21, %22 in 3 : vector<2x6x6x256xbf16>, vector<2x6x6x256xbf16>, vector<2x6x6x256xbf16>, vector<2x6x6x256xbf16>, vector<2x6x6x256xbf16>, vector<2x6x6x256xbf16>, vector<2x6x6x256xbf16>, vector<2x6x6x256xbf16>, vector<2x6x6x256xbf16> -> vector<2x6x6x2304xbf16>
    %24 = vector.shape_cast %23 : vector<2x6x6x2304xbf16> to vector<72x2304xbf16>
    %c0_i32_6 = arith.constant 0 : i32
    %25 = tpu.memref_slice %arg10[%c0_i32_6] : memref<2x!tpu.dma_semaphore, #tpu.memory_space<semaphore_mem>> -> memref<1x!tpu.dma_semaphore, #tpu.memory_space<semaphore_mem>>
    %26 = tpu.memref_squeeze %25 : memref<1x!tpu.dma_semaphore, #tpu.memory_space<semaphore_mem>> -> memref<!tpu.dma_semaphore, #tpu.memory_space<semaphore_mem>>
    tpu.wait_dma2 semaphore(%26 : memref<!tpu.dma_semaphore, #tpu.memory_space<semaphore_mem>>) src(%arg5 : memref<2304x256xbf16, #tpu.memory_space<any>>) dst(%arg8 : memref<2304x256xbf16, #tpu.memory_space<vmem>>)
    %c0_7 = arith.constant 0 : index
    %c0_8 = arith.constant 0 : index
    %27 = vector.load %arg8[%c0_7, %c0_8] : memref<2304x256xbf16, #tpu.memory_space<vmem>>, vector<2304x256xbf16>
    %cst_9 = arith.constant dense<0.000000e+00> : vector<72x256xf32>
    %28 = tpu.matmul %24, %27, %cst_9 {dimension_numbers = #tpu.dot_dimension_numbers<[1], [0], [0], [1], [0, 0, 1, 1], [], []>} : vector<72x2304xbf16>, vector<2304x256xbf16>, vector<72x256xf32> -> vector<72x256xf32>
    %c0_10 = arith.constant 0 : index
    %c0_11 = arith.constant 0 : index
    %29 = vector.load %arg3[%c0_10, %c0_11] : memref<1x256xf32, #tpu.memory_space<vmem>>, vector<1x256xf32>
    %30 = vector.broadcast %29 : vector<1x256xf32> to vector<72x256xf32>
    %31 = arith.addf %28, %30 : vector<72x256xf32>
    %32 = arith.truncf %31 : vector<72x256xf32> to vector<72x256xbf16>
    %cst_12 = arith.constant 0.000000e+00 : bf16
    %33 = vector.broadcast %cst_12 : bf16 to vector<72x256xbf16>
    %34 = arith.maximumf %32, %33 : vector<72x256xbf16>
    %35 = vector.shape_cast %34 : vector<72x256xbf16> to vector<2x6x6x256xbf16>
    %36 = vector.extract_strided_slice %35 {offsets = [0, 0, 0, 0], sizes = [2, 4, 4, 256], strides = [1, 1, 1, 1]} : vector<2x6x6x256xbf16> to vector<2x4x4x256xbf16>
    %37 = vector.extract_strided_slice %35 {offsets = [0, 0, 1, 0], sizes = [2, 4, 4, 256], strides = [1, 1, 1, 1]} : vector<2x6x6x256xbf16> to vector<2x4x4x256xbf16>
    %38 = vector.extract_strided_slice %35 {offsets = [0, 0, 2, 0], sizes = [2, 4, 4, 256], strides = [1, 1, 1, 1]} : vector<2x6x6x256xbf16> to vector<2x4x4x256xbf16>
    %39 = vector.extract_strided_slice %35 {offsets = [0, 1, 0, 0], sizes = [2, 4, 4, 256], strides = [1, 1, 1, 1]} : vector<2x6x6x256xbf16> to vector<2x4x4x256xbf16>
    %40 = vector.extract_strided_slice %35 {offsets = [0, 1, 1, 0], sizes = [2, 4, 4, 256], strides = [1, 1, 1, 1]} : vector<2x6x6x256xbf16> to vector<2x4x4x256xbf16>
    %41 = vector.extract_strided_slice %35 {offsets = [0, 1, 2, 0], sizes = [2, 4, 4, 256], strides = [1, 1, 1, 1]} : vector<2x6x6x256xbf16> to vector<2x4x4x256xbf16>
    %42 = vector.extract_strided_slice %35 {offsets = [0, 2, 0, 0], sizes = [2, 4, 4, 256], strides = [1, 1, 1, 1]} : vector<2x6x6x256xbf16> to vector<2x4x4x256xbf16>
    %43 = vector.extract_strided_slice %35 {offsets = [0, 2, 1, 0], sizes = [2, 4, 4, 256], strides = [1, 1, 1, 1]} : vector<2x6x6x256xbf16> to vector<2x4x4x256xbf16>
    %44 = vector.extract_strided_slice %35 {offsets = [0, 2, 2, 0], sizes = [2, 4, 4, 256], strides = [1, 1, 1, 1]} : vector<2x6x6x256xbf16> to vector<2x4x4x256xbf16>
    %45 = tpu.concatenate %36, %37, %38, %39, %40, %41, %42, %43, %44 in 3 : vector<2x4x4x256xbf16>, vector<2x4x4x256xbf16>, vector<2x4x4x256xbf16>, vector<2x4x4x256xbf16>, vector<2x4x4x256xbf16>, vector<2x4x4x256xbf16>, vector<2x4x4x256xbf16>, vector<2x4x4x256xbf16>, vector<2x4x4x256xbf16> -> vector<2x4x4x2304xbf16>
    %46 = vector.shape_cast %45 : vector<2x4x4x2304xbf16> to vector<32x2304xbf16>
    %c1_i32_13 = arith.constant 1 : i32
    %47 = tpu.memref_slice %arg10[%c1_i32_13] : memref<2x!tpu.dma_semaphore, #tpu.memory_space<semaphore_mem>> -> memref<1x!tpu.dma_semaphore, #tpu.memory_space<semaphore_mem>>
    %48 = tpu.memref_squeeze %47 : memref<1x!tpu.dma_semaphore, #tpu.memory_space<semaphore_mem>> -> memref<!tpu.dma_semaphore, #tpu.memory_space<semaphore_mem>>
    tpu.wait_dma2 semaphore(%48 : memref<!tpu.dma_semaphore, #tpu.memory_space<semaphore_mem>>) src(%arg6 : memref<2304x128xbf16, #tpu.memory_space<any>>) dst(%arg9 : memref<2304x128xbf16, #tpu.memory_space<vmem>>)
    %c0_14 = arith.constant 0 : index
    %c0_15 = arith.constant 0 : index
    %49 = vector.load %arg9[%c0_14, %c0_15] : memref<2304x128xbf16, #tpu.memory_space<vmem>>, vector<2304x128xbf16>
    %cst_16 = arith.constant dense<0.000000e+00> : vector<32x128xf32>
    %50 = tpu.matmul %46, %49, %cst_16 {dimension_numbers = #tpu.dot_dimension_numbers<[1], [0], [0], [1], [0, 0, 1, 1], [], []>} : vector<32x2304xbf16>, vector<2304x128xbf16>, vector<32x128xf32> -> vector<32x128xf32>
    %c0_17 = arith.constant 0 : index
    %c0_18 = arith.constant 0 : index
    %51 = vector.load %arg4[%c0_17, %c0_18] : memref<1x128xf32, #tpu.memory_space<vmem>>, vector<1x128xf32>
    %52 = vector.broadcast %51 : vector<1x128xf32> to vector<32x128xf32>
    %53 = arith.addf %50, %52 : vector<32x128xf32>
    %c0_19 = arith.constant 0 : index
    %c0_20 = arith.constant 0 : index
    %54 = vector.load %arg7[%c0_19, %c0_20] : memref<32x128xf32, #tpu.memory_space<vmem>>, vector<32x128xf32>
    tpu.vector_store %arg7[%c0_19, %c0_20], %53 {strides = array<i32>} : memref<32x128xf32, #tpu.memory_space<vmem>>, vector<32x128xf32>,
    return
  }
}

</mosaic_0001>

<bundles_post_ra>
// kernel: forward.1
= control target key start
LH: loop header
LB: loop body
LE: loop exit
PB: predicated region body
PF: predicated region fallthrough
CT: control target
= control target key end

     0   :  { %s16970_s0 = inlined_call_operand.vmem [shape: bf16[128,270], index: 0, kind: input, shape index: {}]   ;;  %s16971_s1 = inlined_call_operand.vmem [shape: bf16[270,256], index: 1, kind: input, shape index: {}]   ;;  %s16972_s2 = inlined_call_operand.vmem [shape: f32[1,256], index: 2, kind: input, shape index: {}]   ;;  %s16973_s3 = inlined_call_operand.vmem [shape: f32[1,256], index: 3, kind: input, shape index: {}]   ;;  %s16974_s4 = inlined_call_operand.vmem [shape: f32[1,128], index: 4, kind: input, shape index: {}]   ;;  %s16975_s5 = inlined_call_operand.vmem [shape: bf16[2304,256], index: 5, kind: input, shape index: {}]   ;;  %s16976_s6 = inlined_call_operand.vmem [shape: bf16[2304,128], index: 6, kind: input, shape index: {}]   ;;  %s16977_s7 = inlined_call_operand.vmem [shape: f32[32,128], index: 7, kind: output, shape index: {}]  }
   0x1   :  { %v12072_v0 = vld [vmem:[%s16975_s5] sm:$0xff]  ;;  %v12077_v1 = vld [vmem:[%s16975_s5 + $0x8] sm:$0xff]  ;;  %v12082_v2 = vld [vmem:[%s16975_s5 + $0x10] sm:$0xff] }
   0x2   :  { %17371 = vst [vmem:[#allocation9_spill] sm:$0xff] %v12072_v0  ;;  %17372 = vst [vmem:[#allocation10_spill] sm:$0xff] %v12077_v1  ;;  %v12087_v3 = vld [vmem:[%s16975_s5 + $0x18] sm:$0xff]  ;;  %v12092_v4 = vld [vmem:[%s16975_s5 + $0x20] sm:$0xff] }
   0x3   :  { %17373 = vst [vmem:[#allocation11_spill] sm:$0xff] %v12082_v2  ;;  %17374 = vst [vmem:[#allocation12_spill] sm:$0xff] %v12087_v3  ;;  %v12097_v5 = vld [vmem:[%s16975_s5 + $0x28] sm:$0xff]  ;;  %v12102_v6 = vld [vmem:[%s16975_s5 + $0x30] sm:$0xff] }
   0x4   :  { %v12107_v7 = vld [vmem:[%s16975_s5 + $0x38] sm:$0xff]  ;;  %v12112_v8 = vld [vmem:[%s16975_s5 + $0x40] sm:$0xff]  ;;  %v12117_v9 = vld [vmem:[%s16975_s5 + $0x48] sm:$0xff] }
   0x5   :  { %v12122_v10 = vld [vmem:[%s16975_s5 + $0x50] sm:$0xff]  ;;  %v12127_v11 = vld [vmem:[%s16975_s5 + $0x58] sm:$0xff]  ;;  %v12132_v12 = vld [vmem:[%s16975_s5 + $0x60] sm:$0xff] }
   0x6   :  { %v12137_v13 = vld [vmem:[%s16975_s5 + $0x68] sm:$0xff]  ;;  %v12142_v14 = vld [vmem:[%s16975_s5 + $0x70] sm:$0xff]  ;;  %v12147_v15 = vld [vmem:[%s16975_s5 + $0x78] sm:$0xff] }
   0x7   :  { %v12152_v16 = vld [vmem:[%s16975_s5 + $0x80] sm:$0xff]  ;;  %v12157_v17 = vld [vmem:[%s16975_s5 + $0x88] sm:$0xff]  ;;  %v12162_v18 = vld [vmem:[%s16975_s5 + $0x90] sm:$0xff] }
   0x8   :  { %17375 = vst [vmem:[#allocation13_spill] sm:$0xff] %v12152_v16  ;;  %17376 = vst [vmem:[#allocation14_spill] sm:$0xff] %v12157_v17  ;;  %v12167_v19 = vld [vmem:[%s16975_s5 + $0x98] sm:$0xff]  ;;  %v12172_v20 = vld [vmem:[%s16975_s5 + $0xa0] sm:$0xff] }
   0x9   :  { %17377 = vst [vmem:[#allocation15_spill] sm:$0xff] %v12162_v18  ;;  %17378 = vst [vmem:[#allocation16_spill] sm:$0xff] %v12167_v19  ;;  %v12177_v21 = vld [vmem:[%s16975_s5 + $0xa8] sm:$0xff]  ;;  %v12182_v22 = vld [vmem:[%s16975_s5 + $0xb0] sm:$0xff] }
   0xa   :  { %17379 = vst [vmem:[#allocation17_spill] sm:$0xff] %v12172_v20  ;;  %17380 = vst [vmem:[#allocation18_spill] sm:$0xff] %v12177_v21  ;;  %v12187_v23 = vld [vmem:[%s16975_s5 + $0xb8] sm:$0xff]  ;;  %v12192_v24 = vld [vmem:[%s16975_s5 + $0xc0] sm:$0xff] }
   0xb   :  { %17381 = vst [vmem:[#allocation19_spill] sm:$0xff] %v12182_v22  ;;  %17382 = vst [vmem:[#allocation20_spill] sm:$0xff] %v12187_v23  ;;  %v12197_v25 = vld [vmem:[%s16975_s5 + $0xc8] sm:$0xff]  ;;  %v12202_v26 = vld [vmem:[%s16975_s5 + $0xd0] sm:$0xff] }
   0xc   :  { %17383 = vst [vmem:[#allocation21_spill] sm:$0xff] %v12192_v24  ;;  %17384 = vst [vmem:[#allocation22_spill] sm:$0xff] %v12197_v25  ;;  %v12207_v27 = vld [vmem:[%s16975_s5 + $0xd8] sm:$0xff]  ;;  %v12212_v28 = vld [vmem:[%s16975_s5 + $0xe0] sm:$0xff] }
   0xd   :  { %17385 = vst [vmem:[#allocation23_spill] sm:$0xff] %v12202_v26  ;;  %17386 = vst [vmem:[#allocation24_spill] sm:$0xff] %v12207_v27  ;;  %v12217_v29 = vld [vmem:[%s16975_s5 + $0xe8] sm:$0xff]  ;;  %v12222_v30 = vld [vmem:[%s16975_s5 + $0xf0] sm:$0xff] }
   0xe   :  { %17387 = vst [vmem:[#allocation25_spill] sm:$0xff] %v12212_v28  ;;  %17388 = vst [vmem:[#allocation26_spill] sm:$0xff] %v12217_v29  ;;  %v12227_v31 = vld [vmem:[%s16975_s5 + $0xf8] sm:$0xff]  ;;  %v12232_v32 = vld [vmem:[%s16975_s5 + $0x100] sm:$0xff] }
   0xf   :  { %17389 = vst [vmem:[#allocation27_spill] sm:$0xff] %v12222_v30  ;;  %17390 = vst [vmem:[#allocation28_spill] sm:$0xff] %v12227_v31  ;;  %v12237_v33 = vld [vmem:[%s16975_s5 + $0x108] sm:$0xff]  ;;  %v12242_v34 = vld [vmem:[%s16975_s5 + $0x110] sm:$0xff] }
  0x10   :  { %17391 = vst [vmem:[#allocation29_spill] sm:$0xff] %v12232_v32  ;;  %17392 = vst [vmem:[#allocation30_spill] sm:$0xff] %v12237_v33  ;;  %v12247_v35 = vld [vmem:[%s16975_s5 + $0x118] sm:$0xff]  ;;  %v12252_v36 = vld [vmem:[%s16975_s5 + $0x120] sm:$0xff] }
  0x11   :  { %17393 = vst [vmem:[#allocation31_spill] sm:$0xff] %v12242_v34  ;;  %17394 = vst [vmem:[#allocation32_spill] sm:$0xff] %v12247_v35  ;;  %v12257_v37 = vld [vmem:[%s16975_s5 + $0x128] sm:$0xff]  ;;  %v12262_v38 = vld [vmem:[%s16975_s5 + $0x130] sm:$0xff] }
  0x12   :  { %17395 = vst [vmem:[#allocation33_spill] sm:$0xff] %v12252_v36  ;;  %17396 = vst [vmem:[#allocation34_spill] sm:$0xff] %v12257_v37  ;;  %v12267_v39 = vld [vmem:[%s16975_s5 + $0x138] sm:$0xff]  ;;  %v12272_v40 = vld [vmem:[%s16975_s5 + $0x140] sm:$0xff] }
  0x13   :  { %v12277_v41 = vld [vmem:[%s16975_s5 + $0x148] sm:$0xff]  ;;  %v12282_v42 = vld [vmem:[%s16975_s5 + $0x150] sm:$0xff]  ;;  %v12287_v43 = vld [vmem:[%s16975_s5 + $0x158] sm:$0xff] }
  0x14   :  { %v12292_v44 = vld [vmem:[%s16975_s5 + $0x160] sm:$0xff]  ;;  %v12297_v45 = vld [vmem:[%s16975_s5 + $0x168] sm:$0xff]  ;;  %v12302_v46 = vld [vmem:[%s16975_s5 + $0x170] sm:$0xff] }
  0x15   :  { %v12307_v47 = vld [vmem:[%s16975_s5 + $0x178] sm:$0xff]  ;;  %v12312_v48 = vld [vmem:[%s16975_s5 + $0x180] sm:$0xff]  ;;  %v12317_v49 = vld [vmem:[%s16975_s5 + $0x188] sm:$0xff] }
  0x16   :  { %17397 = vst [vmem:[#allocation35_spill] sm:$0xff] %v12312_v48  ;;  %17398 = vst [vmem:[#allocation36_spill] sm:$0xff] %v12317_v49  ;;  %v12322_v50 = vld [vmem:[%s16975_s5 + $0x190] sm:$0xff]  ;;  %v12327_v51 = vld [vmem:[%s16975_s5 + $0x198] sm:$0xff] }
  0x17   :  { %17399 = vst [vmem:[#allocation37_spill] sm:$0xff] %v12322_v50  ;;  %17400 = vst [vmem:[#allocation38_spill] sm:$0xff] %v12327_v51  ;;  %v12332_v52 = vld [vmem:[%s16975_s5 + $0x1a0] sm:$0xff]  ;;  %v12337_v53 = vld [vmem:[%s16975_s5 + $0x1a8] sm:$0xff] }
  0x18   :  { %17401 = vst [vmem:[#allocation39_spill] sm:$0xff] %v12332_v52  ;;  %17402 = vst [vmem:[#allocation40_spill] sm:$0xff] %v12337_v53  ;;  %v12342_v54 = vld [vmem:[%s16975_s5 + $0x1b0] sm:$0xff]  ;;  %v12347_v55 = vld [vmem:[%s16975_s5 + $0x1b8] sm:$0xff] }
  0x19   :  { %17403 = vst [vmem:[#allocation41_spill] sm:$0xff] %v12342_v54  ;;  %17404 = vst [vmem:[#allocation42_spill] sm:$0xff] %v12347_v55  ;;  %v12352_v56 = vld [vmem:[%s16975_s5 + $0x1c0] sm:$0xff]  ;;  %v12357_v57 = vld [vmem:[%s16975_s5 + $0x1c8] sm:$0xff] }
  0x1a   :  { %17405 = vst [vmem:[#allocation43_spill] sm:$0xff] %v12352_v56  ;;  %17406 = vst [vmem:[#allocation44_spill] sm:$0xff] %v12357_v57  ;;  %v12362_v58 = vld [vmem:[%s16975_s5 + $0x1d0] sm:$0xff]  ;;  %v12367_v59 = vld [vmem:[%s16975_s5 + $0x1d8] sm:$0xff] }
  0x1b   :  { %17407 = vst [vmem:[#allocation45_spill] sm:$0xff] %v12362_v58  ;;  %17408 = vst [vmem:[#allocation46_spill] sm:$0xff] %v12367_v59  ;;  %v12372_v60 = vld [vmem:[%s16975_s5 + $0x1e0] sm:$0xff]  ;;  %v12377_v61 = vld [vmem:[%s16975_s5 + $0x1e8] sm:$0xff] }
  0x1c   :  { %17409 = vst [vmem:[#allocation47_spill] sm:$0xff] %v12372_v60  ;;  %17410 = vst [vmem:[#allocation48_spill] sm:$0xff] %v12377_v61  ;;  %v12382_v62 = vld [vmem:[%s16975_s5 + $0x1f0] sm:$0xff]  ;;  %v12387_v63 = vld [vmem:[%s16975_s5 + $0x1f8] sm:$0xff] }
  0x1d   :  { %17411 = vst [vmem:[#allocation49_spill] sm:$0xff] %v12382_v62  ;;  %17412 = vst [vmem:[#allocation50_spill] sm:$0xff] %v12387_v63  ;;  %v12392_v48 = vld [vmem:[%s16975_s5 + $0x200] sm:$0xff]  ;;  %v12397_v49 = vld [vmem:[%s16975_s5 + $0x208] sm:$0xff] }
  0x1e   :  { %17413 = vst [vmem:[#allocation51_spill] sm:$0xff] %v12392_v48  ;;  %17414 = vst [vmem:[#allocation52_spill] sm:$0xff] %v12397_v49  ;;  %v12402_v16 = vld [vmem:[%s16975_s5 + $0x210] sm:$0xff]  ;;  %v12407_v17 = vld [vmem:[%s16975_s5 + $0x218] sm:$0xff] }
  0x1f   :  { %17415 = vst [vmem:[#allocation53_spill] sm:$0xff] %v12402_v16  ;;  %17416 = vst [vmem:[#allocation54_spill] sm:$0xff] %v12407_v17  ;;  %v12412_v50 = vld [vmem:[%s16975_s5 + $0x220] sm:$0xff]  ;;  %v12417_v48 = vld [vmem:[%s16975_s5 + $0x228] sm:$0xff] }
  0x20   :  { %17417 = vst [vmem:[#allocation55_spill] sm:$0xff] %v12412_v50  ;;  %17418 = vst [vmem:[#allocation56_spill] sm:$0xff] %v12417_v48  ;;  %v12422_v49 = vld [vmem:[%s16975_s5 + $0x230] sm:$0xff]  ;;  %v12427_v16 = vld [vmem:[%s16975_s5 + $0x238] sm:$0xff] }
  0x21   :  { %17419 = vst [vmem:[#allocation57_spill] sm:$0xff] %v12422_v49  ;;  %17420 = vst [vmem:[#allocation58_spill] sm:$0xff] %v12427_v16  ;;  %v12432_v17 = vld [vmem:[%s16975_s5 + $0x240] sm:$0xff]  ;;  %v12437_v50 = vld [vmem:[%s16975_s5 + $0x248] sm:$0xff] }
  0x22   :  { %17421 = vst [vmem:[#allocation59_spill] sm:$0xff] %v12432_v17  ;;  %17422 = vst [vmem:[#allocation60_spill] sm:$0xff] %v12437_v50  ;;  %v12442_v48 = vld [vmem:[%s16975_s5 + $0x250] sm:$0xff]  ;;  %v12447_v49 = vld [vmem:[%s16975_s5 + $0x258] sm:$0xff] }
  0x23   :  { %17423 = vst [vmem:[#allocation61_spill] sm:$0xff] %v12442_v48  ;;  %17424 = vst [vmem:[#allocation62_spill] sm:$0xff] %v12447_v49  ;;  %v12452_v16 = vld [vmem:[%s16975_s5 + $0x260] sm:$0xff]  ;;  %v12457_v17 = vld [vmem:[%s16975_s5 + $0x268] sm:$0xff] }
  0x24   :  { %17425 = vst [vmem:[#allocation63_spill] sm:$0xff] %v12452_v16  ;;  %17426 = vst [vmem:[#allocation64_spill] sm:$0xff] %v12457_v17  ;;  %v12462_v50 = vld [vmem:[%s16975_s5 + $0x270] sm:$0xff]  ;;  %v12467_v48 = vld [vmem:[%s16975_s5 + $0x278] sm:$0xff] }
  0x25   :  { %17427 = vst [vmem:[#allocation65_spill] sm:$0xff] %v12462_v50  ;;  %17428 = vst [vmem:[#allocation66_spill] sm:$0xff] %v12467_v48  ;;  %v12472_v49 = vld [vmem:[%s16975_s5 + $0x280] sm:$0xff]  ;;  %v12477_v16 = vld [vmem:[%s16975_s5 + $0x288] sm:$0xff] }
  0x26   :  { %17429 = vst [vmem:[#allocation67_spill] sm:$0xff] %v12472_v49  ;;  %17430 = vst [vmem:[#allocation68_spill] sm:$0xff] %v12477_v16  ;;  %v12482_v17 = vld [vmem:[%s16975_s5 + $0x290] sm:$0xff]  ;;  %v12487_v50 = vld [vmem:[%s16975_s5 + $0x298] sm:$0xff] }
  0x27   :  { %17431 = vst [vmem:[#allocation69_spill] sm:$0xff] %v12482_v17  ;;  %17432 = vst [vmem:[#allocation70_spill] sm:$0xff] %v12487_v50  ;;  %v12492_v48 = vld [vmem:[%s16975_s5 + $0x2a0] sm:$0xff]  ;;  %v12497_v49 = vld [vmem:[%s16975_s5 + $0x2a8] sm:$0xff] }
  0x28   :  { %17433 = vst [vmem:[#allocation71_spill] sm:$0xff] %v12492_v48  ;;  %17434 = vst [vmem:[#allocation72_spill] sm:$0xff] %v12497_v49  ;;  %v12502_v16 = vld [vmem:[%s16975_s5 + $0x2b0] sm:$0xff]  ;;  %v12507_v17 = vld [vmem:[%s16975_s5 + $0x2b8] sm:$0xff] }
  0x29   :  { %17435 = vst [vmem:[#allocation73_spill] sm:$0xff] %v12502_v16  ;;  %17436 = vst [vmem:[#allocation74_spill] sm:$0xff] %v12507_v17  ;;  %v12512_v50 = vld [vmem:[%s16975_s5 + $0x2c0] sm:$0xff]  ;;  %v12517_v48 = vld [vmem:[%s16975_s5 + $0x2c8] sm:$0xff] }
  0x2a   :  { %17437 = vst [vmem:[#allocation75_spill] sm:$0xff] %v12512_v50  ;;  %17438 = vst [vmem:[#allocation76_spill] sm:$0xff] %v12517_v48  ;;  %v12522_v49 = vld [vmem:[%s16975_s5 + $0x2d0] sm:$0xff]  ;;  %v12527_v16 = vld [vmem:[%s16975_s5 + $0x2d8] sm:$0xff] }
  0x2b   :  { %17439 = vst [vmem:[#allocation77_spill] sm:$0xff] %v12522_v49  ;;  %17440 = vst [vmem:[#allocation78_spill] sm:$0xff] %v12527_v16  ;;  %v12532_v17 = vld [vmem:[%s16975_s5 + $0x2e0] sm:$0xff]  ;;  %v12537_v50 = vld [vmem:[%s16975_s5 + $0x2e8] sm:$0xff] }
  0x2c   :  { %17441 = vst [vmem:[#allocation79_spill] sm:$0xff] %v12532_v17  ;;  %17442 = vst [vmem:[#allocation80_spill] sm:$0xff] %v12537_v50  ;;  %v12542_v48 = vld [vmem:[%s16975_s5 + $0x2f0] sm:$0xff]  ;;  %v12547_v49 = vld [vmem:[%s16975_s5 + $0x2f8] sm:$0xff] }
  0x2d   :  { %17443 = vst [vmem:[#allocation81_spill] sm:$0xff] %v12542_v48  ;;  %17444 = vst [vmem:[#allocation82_spill] sm:$0xff] %v12547_v49  ;;  %v12552_v16 = vld [vmem:[%s16975_s5 + $0x300] sm:$0xff]  ;;  %v12557_v17 = vld [vmem:[%s16975_s5 + $0x308] sm:$0xff] }
  0x2e   :  { %17445 = vst [vmem:[#allocation83_spill] sm:$0xff] %v12552_v16  ;;  %17446 = vst [vmem:[#allocation84_spill] sm:$0xff] %v12557_v17  ;;  %v12562_v50 = vld [vmem:[%s16975_s5 + $0x310] sm:$0xff]  ;;  %v12567_v48 = vld [vmem:[%s16975_s5 + $0x318] sm:$0xff] }
  0x2f   :  { %17447 = vst [vmem:[#allocation85_spill] sm:$0xff] %v12562_v50  ;;  %17448 = vst [vmem:[#allocation86_spill] sm:$0xff] %v12567_v48  ;;  %v12572_v49 = vld [vmem:[%s16975_s5 + $0x320] sm:$0xff]  ;;  %v12577_v16 = vld [vmem:[%s16975_s5 + $0x328] sm:$0xff] }
  0x30   :  { %17449 = vst [vmem:[#allocation87_spill] sm:$0xff] %v12572_v49  ;;  %17450 = vst [vmem:[#allocation88_spill] sm:$0xff] %v12577_v16  ;;  %v12582_v17 = vld [vmem:[%s16975_s5 + $0x330] sm:$0xff]  ;;  %v12587_v50 = vld [vmem:[%s16975_s5 + $0x338] sm:$0xff] }
  0x31   :  { %17451 = vst [vmem:[#allocation89_spill] sm:$0xff] %v12582_v17  ;;  %17452 = vst [vmem:[#allocation90_spill] sm:$0xff] %v12587_v50  ;;  %v12592_v48 = vld [vmem:[%s16975_s5 + $0x340] sm:$0xff]  ;;  %v12597_v49 = vld [vmem:[%s16975_s5 + $0x348] sm:$0xff] }
  0x32   :  { %17453 = vst [vmem:[#allocation91_spill] sm:$0xff] %v12592_v48  ;;  %17454 = vst [vmem:[#allocation92_spill] sm:$0xff] %v12597_v49  ;;  %v12602_v16 = vld [vmem:[%s16975_s5 + $0x350] sm:$0xff]  ;;  %v12607_v17 = vld [vmem:[%s16975_s5 + $0x358] sm:$0xff] }
  0x33   :  { %17455 = vst [vmem:[#allocation93_spill] sm:$0xff] %v12602_v16  ;;  %17456 = vst [vmem:[#allocation94_spill] sm:$0xff] %v12607_v17  ;;  %v12612_v50 = vld [vmem:[%s16975_s5 + $0x360] sm:$0xff]  ;;  %v12617_v48 = vld [vmem:[%s16975_s5 + $0x368] sm:$0xff] }
  0x34   :  { %17457 = vst [vmem:[#allocation95_spill] sm:$0xff] %v12612_v50  ;;  %17458 = vst [vmem:[#allocation96_spill] sm:$0xff] %v12617_v48  ;;  %v12622_v49 = vld [vmem:[%s16975_s5 + $0x370] sm:$0xff]  ;;  %v12627_v16 = vld [vmem:[%s16975_s5 + $0x378] sm:$0xff] }
  0x35   :  { %17459 = vst [vmem:[#allocation97_spill] sm:$0xff] %v12622_v49  ;;  %17460 = vst [vmem:[#allocation98_spill] sm:$0xff] %v12627_v16  ;;  %v12632_v17 = vld [vmem:[%s16975_s5 + $0x380] sm:$0xff]  ;;  %v12637_v50 = vld [vmem:[%s16975_s5 + $0x388] sm:$0xff] }
  0x36   :  { %17461 = vst [vmem:[#allocation99_spill] sm:$0xff] %v12632_v17  ;;  %17462 = vst [vmem:[#allocation100_spill] sm:$0xff] %v12637_v50  ;;  %v12642_v48 = vld [vmem:[%s16975_s5 + $0x390] sm:$0xff]  ;;  %v12647_v49 = vld [vmem:[%s16975_s5 + $0x398] sm:$0xff] }
  0x37   :  { %17463 = vst [vmem:[#allocation101_spill] sm:$0xff] %v12642_v48  ;;  %17464 = vst [vmem:[#allocation102_spill] sm:$0xff] %v12647_v49  ;;  %v12652_v16 = vld [vmem:[%s16975_s5 + $0x3a0] sm:$0xff]  ;;  %v12657_v17 = vld [vmem:[%s16975_s5 + $0x3a8] sm:$0xff] }
  0x38   :  { %17465 = vst [vmem:[#allocation103_spill] sm:$0xff] %v12652_v16  ;;  %17466 = vst [vmem:[#allocation104_spill] sm:$0xff] %v12657_v17  ;;  %v12662_v50 = vld [vmem:[%s16975_s5 + $0x3b0] sm:$0xff]  ;;  %v12667_v48 = vld [vmem:[%s16975_s5 + $0x3b8] sm:$0xff] }
  0x39   :  { %17467 = vst [vmem:[#allocation105_spill] sm:$0xff] %v12662_v50  ;;  %17468 = vst [vmem:[#allocation106_spill] sm:$0xff] %v12667_v48  ;;  %v12672_v49 = vld [vmem:[%s16975_s5 + $0x3c0] sm:$0xff]  ;;  %v12677_v16 = vld [vmem:[%s16975_s5 + $0x3c8] sm:$0xff] }
  0x3a   :  { %17469 = vst [vmem:[#allocation107_spill] sm:$0xff] %v12672_v49  ;;  %17470 = vst [vmem:[#allocation108_spill] sm:$0xff] %v12677_v16  ;;  %v12682_v17 = vld [vmem:[%s16975_s5 + $0x3d0] sm:$0xff]  ;;  %v12687_v50 = vld [vmem:[%s16975_s5 + $0x3d8] sm:$0xff] }
  0x3b   :  { %17471 = vst [vmem:[#allocation109_spill] sm:$0xff] %v12682_v17  ;;  %17472 = vst [vmem:[#allocation110_spill] sm:$0xff] %v12687_v50  ;;  %v12692_v48 = vld [vmem:[%s16975_s5 + $0x3e0] sm:$0xff]  ;;  %v12697_v49 = vld [vmem:[%s16975_s5 + $0x3e8] sm:$0xff] }
  0x3c   :  { %17473 = vst [vmem:[#allocation111_spill] sm:$0xff] %v12692_v48  ;;  %17474 = vst [vmem:[#allocation112_spill] sm:$0xff] %v12697_v49  ;;  %v12702_v16 = vld [vmem:[%s16975_s5 + $0x3f0] sm:$0xff]  ;;  %v12707_v17 = vld [vmem:[%s16975_s5 + $0x3f8] sm:$0xff] }
  0x3d   :  { %17475 = vst [vmem:[#allocation113_spill] sm:$0xff] %v12702_v16  ;;  %17476 = vst [vmem:[#allocation114_spill] sm:$0xff] %v12707_v17  ;;  %v12712_v50 = vld [vmem:[%s16975_s5 + $0x400] sm:$0xff]  ;;  %v12717_v48 = vld [vmem:[%s16975_s5 + $0x408] sm:$0xff] }
  0x3e   :  { %17477 = vst [vmem:[#allocation115_spill] sm:$0xff] %v12712_v50  ;;  %17478 = vst [vmem:[#allocation116_spill] sm:$0xff] %v12717_v48  ;;  %v12722_v49 = vld [vmem:[%s16975_s5 + $0x410] sm:$0xff]  ;;  %v12727_v16 = vld [vmem:[%s16975_s5 + $0x418] sm:$0xff] }
  0x3f   :  { %17479 = vst [vmem:[#allocation117_spill] sm:$0xff] %v12722_v49  ;;  %17480 = vst [vmem:[#allocation118_spill] sm:$0xff] %v12727_v16  ;;  %v12732_v17 = vld [vmem:[%s16975_s5 + $0x420] sm:$0xff]  ;;  %v12737_v50 = vld [vmem:[%s16975_s5 + $0x428] sm:$0xff] }
  0x40   :  { %17481 = vst [vmem:[#allocation119_spill] sm:$0xff] %v12732_v17  ;;  %17482 = vst [vmem:[#allocation120_spill] sm:$0xff] %v12737_v50  ;;  %v12742_v48 = vld [vmem:[%s16975_s5 + $0x430] sm:$0xff]  ;;  %v12747_v49 = vld [vmem:[%s16975_s5 + $0x438] sm:$0xff] }
  0x41   :  { %17483 = vst [vmem:[#allocation121_spill] sm:$0xff] %v12742_v48  ;;  %17484 = vst [vmem:[#allocation122_spill] sm:$0xff] %v12747_v49  ;;  %v12752_v16 = vld [vmem:[%s16975_s5 + $0x440] sm:$0xff]  ;;  %v12757_v17 = vld [vmem:[%s16975_s5 + $0x448] sm:$0xff] }
  0x42   :  { %17485 = vst [vmem:[#allocation123_spill] sm:$0xff] %v12752_v16  ;;  %17486 = vst [vmem:[#allocation124_spill] sm:$0xff] %v12757_v17  ;;  %v12762_v50 = vld [vmem:[%s16975_s5 + $0x450] sm:$0xff]  ;;  %v12767_v48 = vld [vmem:[%s16975_s5 + $0x458] sm:$0xff] }
  0x43   :  { %17487 = vst [vmem:[#allocation125_spill] sm:$0xff] %v12762_v50  ;;  %17488 = vst [vmem:[#allocation126_spill] sm:$0xff] %v12767_v48  ;;  %v12772_v49 = vld [vmem:[%s16975_s5 + $0x460] sm:$0xff]  ;;  %v12777_v16 = vld [vmem:[%s16975_s5 + $0x468] sm:$0xff] }
  0x44   :  { %17489 = vst [vmem:[#allocation127_spill] sm:$0xff] %v12772_v49  ;;  %17490 = vst [vmem:[#allocation128_spill] sm:$0xff] %v12777_v16  ;;  %v12782_v17 = vld [vmem:[%s16975_s5 + $0x470] sm:$0xff]  ;;  %v12787_v50 = vld [vmem:[%s16975_s5 + $0x478] sm:$0xff] }
  0x45   :  { %17491 = vst [vmem:[#allocation129_spill] sm:$0xff] %v12782_v17  ;;  %17492 = vst [vmem:[#allocation130_spill] sm:$0xff] %v12787_v50  ;;  %v12792_v48 = vld [vmem:[%s16975_s5 + $0x480] sm:$0xff]  ;;  %v12797_v49 = vld [vmem:[%s16975_s5 + $0x488] sm:$0xff] }
  0x46   :  { %17493 = vst [vmem:[#allocation131_spill] sm:$0xff] %v12792_v48  ;;  %17494 = vst [vmem:[#allocation132_spill] sm:$0xff] %v12797_v49  ;;  %v12802_v16 = vld [vmem:[%s16975_s5 + $0x490] sm:$0xff]  ;;  %v12807_v17 = vld [vmem:[%s16975_s5 + $0x498] sm:$0xff] }
  0x47   :  { %17495 = vst [vmem:[#allocation133_spill] sm:$0xff] %v12802_v16  ;;  %17496 = vst [vmem:[#allocation134_spill] sm:$0xff] %v12807_v17  ;;  %v12812_v50 = vld [vmem:[%s16975_s5 + $0x4a0] sm:$0xff]  ;;  %v12817_v48 = vld [vmem:[%s16975_s5 + $0x4a8] sm:$0xff] }
  0x48   :  { %17497 = vst [vmem:[#allocation135_spill] sm:$0xff] %v12812_v50  ;;  %17498 = vst [vmem:[#allocation136_spill] sm:$0xff] %v12817_v48  ;;  %v12822_v49 = vld [vmem:[%s16975_s5 + $0x4b0] sm:$0xff]  ;;  %v12827_v16 = vld [vmem:[%s16975_s5 + $0x4b8] sm:$0xff] }
  0x49   :  { %17499 = vst [vmem:[#allocation137_spill] sm:$0xff] %v12822_v49  ;;  %17500 = vst [vmem:[#allocation138_spill] sm:$0xff] %v12827_v16  ;;  %v12832_v17 = vld [vmem:[%s16975_s5 + $0x4c0] sm:$0xff]  ;;  %v12837_v50 = vld [vmem:[%s16975_s5 + $0x4c8] sm:$0xff] }
  0x4a   :  { %17501 = vst [vmem:[#allocation139_spill] sm:$0xff] %v12832_v17  ;;  %17502 = vst [vmem:[#allocation140_spill] sm:$0xff] %v12837_v50  ;;  %v12842_v48 = vld [vmem:[%s16975_s5 + $0x4d0] sm:$0xff]  ;;  %v12847_v49 = vld [vmem:[%s16975_s5 + $0x4d8] sm:$0xff] }
  0x4b   :  { %17503 = vst [vmem:[#allocation141_spill] sm:$0xff] %v12842_v48  ;;  %17504 = vst [vmem:[#allocation142_spill] sm:$0xff] %v12847_v49  ;;  %v12852_v16 = vld [vmem:[%s16975_s5 + $0x4e0] sm:$0xff]  ;;  %v12857_v17 = vld [vmem:[%s16975_s5 + $0x4e8] sm:$0xff] }
  0x4c   :  { %17505 = vst [vmem:[#allocation143_spill] sm:$0xff] %v12852_v16  ;;  %17506 = vst [vmem:[#allocation144_spill] sm:$0xff] %v12857_v17  ;;  %v12862_v50 = vld [vmem:[%s16975_s5 + $0x4f0] sm:$0xff]  ;;  %v12867_v48 = vld [vmem:[%s16975_s5 + $0x4f8] sm:$0xff] }
  0x4d   :  { %17507 = vst [vmem:[#allocation145_spill] sm:$0xff] %v12862_v50  ;;  %17508 = vst [vmem:[#allocation146_spill] sm:$0xff] %v12867_v48  ;;  %v12872_v49 = vld [vmem:[%s16975_s5 + $0x500] sm:$0xff]  ;;  %v12877_v16 = vld [vmem:[%s16975_s5 + $0x508] sm:$0xff] }
  0x4e   :  { %17509 = vst [vmem:[#allocation147_spill] sm:$0xff] %v12872_v49  ;;  %17510 = vst [vmem:[#allocation148_spill] sm:$0xff] %v12877_v16  ;;  %v12882_v17 = vld [vmem:[%s16975_s5 + $0x510] sm:$0xff]  ;;  %v12887_v50 = vld [vmem:[%s16975_s5 + $0x518] sm:$0xff] }
  0x4f   :  { %17511 = vst [vmem:[#allocation149_spill] sm:$0xff] %v12882_v17  ;;  %17512 = vst [vmem:[#allocation150_spill] sm:$0xff] %v12887_v50  ;;  %v12892_v48 = vld [vmem:[%s16975_s5 + $0x520] sm:$0xff]  ;;  %v12897_v49 = vld [vmem:[%s16975_s5 + $0x528] sm:$0xff] }
  0x50   :  { %17513 = vst [vmem:[#allocation151_spill] sm:$0xff] %v12892_v48  ;;  %17514 = vst [vmem:[#allocation152_spill] sm:$0xff] %v12897_v49  ;;  %v12902_v16 = vld [vmem:[%s16975_s5 + $0x530] sm:$0xff]  ;;  %v12907_v17 = vld [vmem:[%s16975_s5 + $0x538] sm:$0xff] }
  0x51   :  { %17515 = vst [vmem:[#allocation153_spill] sm:$0xff] %v12902_v16  ;;  %17516 = vst [vmem:[#allocation154_spill] sm:$0xff] %v12907_v17  ;;  %v12912_v50 = vld [vmem:[%s16975_s5 + $0x540] sm:$0xff]  ;;  %v12917_v48 = vld [vmem:[%s16975_s5 + $0x548] sm:$0xff] }
  0x52   :  { %17517 = vst [vmem:[#allocation155_spill] sm:$0xff] %v12912_v50  ;;  %17518 = vst [vmem:[#allocation156_spill] sm:$0xff] %v12917_v48  ;;  %v12922_v49 = vld [vmem:[%s16975_s5 + $0x550] sm:$0xff]  ;;  %v12927_v16 = vld [vmem:[%s16975_s5 + $0x558] sm:$0xff] }
  0x53   :  { %17519 = vst [vmem:[#allocation157_spill] sm:$0xff] %v12922_v49  ;;  %17520 = vst [vmem:[#allocation158_spill] sm:$0xff] %v12927_v16  ;;  %v12932_v17 = vld [vmem:[%s16975_s5 + $0x560] sm:$0xff]  ;;  %v12937_v50 = vld [vmem:[%s16975_s5 + $0x568] sm:$0xff] }
  0x54   :  { %17521 = vst [vmem:[#allocation159_spill] sm:$0xff] %v12932_v17  ;;  %17522 = vst [vmem:[#allocation160_spill] sm:$0xff] %v12937_v50  ;;  %v12942_v48 = vld [vmem:[%s16975_s5 + $0x570] sm:$0xff]  ;;  %v12947_v49 = vld [vmem:[%s16975_s5 + $0x578] sm:$0xff] }
  0x55   :  { %17523 = vst [vmem:[#allocation161_spill] sm:$0xff] %v12942_v48  ;;  %17524 = vst [vmem:[#allocation162_spill] sm:$0xff] %v12947_v49  ;;  %v12952_v16 = vld [vmem:[%s16975_s5 + $0x580] sm:$0xff]  ;;  %v12957_v17 = vld [vmem:[%s16975_s5 + $0x588] sm:$0xff] }
  0x56   :  { %17525 = vst [vmem:[#allocation163_spill] sm:$0xff] %v12952_v16  ;;  %17526 = vst [vmem:[#allocation164_spill] sm:$0xff] %v12957_v17  ;;  %v12962_v50 = vld [vmem:[%s16975_s5 + $0x590] sm:$0xff]  ;;  %v12967_v48 = vld [vmem:[%s16975_s5 + $0x598] sm:$0xff] }
  0x57   :  { %17527 = vst [vmem:[#allocation165_spill] sm:$0xff] %v12962_v50  ;;  %17528 = vst [vmem:[#allocation166_spill] sm:$0xff] %v12967_v48  ;;  %v12972_v49 = vld [vmem:[%s16975_s5 + $0x5a0] sm:$0xff]  ;;  %v12977_v16 = vld [vmem:[%s16975_s5 + $0x5a8] sm:$0xff] }
  0x58   :  { %17529 = vst [vmem:[#allocation167_spill] sm:$0xff] %v12972_v49  ;;  %17530 = vst [vmem:[#allocation168_spill] sm:$0xff] %v12977_v16  ;;  %v12982_v17 = vld [vmem:[%s16975_s5 + $0x5b0] sm:$0xff]  ;;  %v12987_v50 = vld [vmem:[%s16975_s5 + $0x5b8] sm:$0xff] }
  0x59   :  { %17531 = vst [vmem:[#allocation169_spill] sm:$0xff] %v12982_v17  ;;  %17532 = vst [vmem:[#allocation170_spill] sm:$0xff] %v12987_v50  ;;  %v12992_v48 = vld [vmem:[%s16975_s5 + $0x5c0] sm:$0xff]  ;;  %v12997_v49 = vld [vmem:[%s16975_s5 + $0x5c8] sm:$0xff] }
  0x5a   :  { %17533 = vst [vmem:[#allocation171_spill] sm:$0xff] %v12992_v48  ;;  %17534 = vst [vmem:[#allocation172_spill] sm:$0xff] %v12997_v49  ;;  %v13002_v16 = vld [vmem:[%s16975_s5 + $0x5d0] sm:$0xff]  ;;  %v13007_v17 = vld [vmem:[%s16975_s5 + $0x5d8] sm:$0xff] }
  0x5b   :  { %17535 = vst [vmem:[#allocation173_spill] sm:$0xff] %v13002_v16  ;;  %17536 = vst [vmem:[#allocation174_spill] sm:$0xff] %v13007_v17  ;;  %v13012_v50 = vld [vmem:[%s16975_s5 + $0x5e0] sm:$0xff]  ;;  %v13017_v48 = vld [vmem:[%s16975_s5 + $0x5e8] sm:$0xff] }
  0x5c   :  { %17537 = vst [vmem:[#allocation175_spill] sm:$0xff] %v13012_v50  ;;  %17538 = vst [vmem:[#allocation176_spill] sm:$0xff] %v13017_v48  ;;  %v13022_v49 = vld [vmem:[%s16975_s5 + $0x5f0] sm:$0xff]  ;;  %v13027_v16 = vld [vmem:[%s16975_s5 + $0x5f8] sm:$0xff] }
  0x5d   :  { %17539 = vst [vmem:[#allocation177_spill] sm:$0xff] %v13022_v49  ;;  %17540 = vst [vmem:[#allocation178_spill] sm:$0xff] %v13027_v16  ;;  %v13032_v17 = vld [vmem:[%s16975_s5 + $0x600] sm:$0xff]  ;;  %v13037_v50 = vld [vmem:[%s16975_s5 + $0x608] sm:$0xff] }
  0x5e   :  { %17541 = vst [vmem:[#allocation179_spill] sm:$0xff] %v13032_v17  ;;  %17542 = vst [vmem:[#allocation180_spill] sm:$0xff] %v13037_v50  ;;  %v13042_v48 = vld [vmem:[%s16975_s5 + $0x610] sm:$0xff]  ;;  %v13047_v49 = vld [vmem:[%s16975_s5 + $0x618] sm:$0xff] }
  0x5f   :  { %17543 = vst [vmem:[#allocation181_spill] sm:$0xff] %v13042_v48  ;;  %17544 = vst [vmem:[#allocation182_spill] sm:$0xff] %v13047_v49  ;;  %v13052_v16 = vld [vmem:[%s16975_s5 + $0x620] sm:$0xff]  ;;  %v13057_v17 = vld [vmem:[%s16975_s5 + $0x628] sm:$0xff] }
  0x60   :  { %17545 = vst [vmem:[#allocation183_spill] sm:$0xff] %v13052_v16  ;;  %17546 = vst [vmem:[#allocation184_spill] sm:$0xff] %v13057_v17  ;;  %v13062_v50 = vld [vmem:[%s16975_s5 + $0x630] sm:$0xff]  ;;  %v13067_v48 = vld [vmem:[%s16975_s5 + $0x638] sm:$0xff] }
  0x61   :  { %17547 = vst [vmem:[#allocation185_spill] sm:$0xff] %v13062_v50  ;;  %17548 = vst [vmem:[#allocation186_spill] sm:$0xff] %v13067_v48  ;;  %v13072_v49 = vld [vmem:[%s16975_s5 + $0x640] sm:$0xff]  ;;  %v13077_v16 = vld [vmem:[%s16975_s5 + $0x648] sm:$0xff] }
  0x62   :  { %17549 = vst [vmem:[#allocation187_spill] sm:$0xff] %v13072_v49  ;;  %17550 = vst [vmem:[#allocation188_spill] sm:$0xff] %v13077_v16  ;;  %v13082_v17 = vld [vmem:[%s16975_s5 + $0x650] sm:$0xff]  ;;  %v13087_v50 = vld [vmem:[%s16975_s5 + $0x658] sm:$0xff] }
  0x63   :  { %17551 = vst [vmem:[#allocation189_spill] sm:$0xff] %v13082_v17  ;;  %17552 = vst [vmem:[#allocation190_spill] sm:$0xff] %v13087_v50  ;;  %v13092_v48 = vld [vmem:[%s16975_s5 + $0x660] sm:$0xff]  ;;  %v13097_v49 = vld [vmem:[%s16975_s5 + $0x668] sm:$0xff] }
  0x64   :  { %17553 = vst [vmem:[#allocation191_spill] sm:$0xff] %v13092_v48  ;;  %17554 = vst [vmem:[#allocation192_spill] sm:$0xff] %v13097_v49  ;;  %v13102_v16 = vld [vmem:[%s16975_s5 + $0x670] sm:$0xff]  ;;  %v13107_v17 = vld [vmem:[%s16975_s5 + $0x678] sm:$0xff] }
  0x65   :  { %17555 = vst [vmem:[#allocation193_spill] sm:$0xff] %v13102_v16  ;;  %17556 = vst [vmem:[#allocation194_spill] sm:$0xff] %v13107_v17  ;;  %v13112_v50 = vld [vmem:[%s16975_s5 + $0x680] sm:$0xff]  ;;  %v13117_v48 = vld [vmem:[%s16975_s5 + $0x688] sm:$0xff] }
  0x66   :  { %17557 = vst [vmem:[#allocation195_spill] sm:$0xff] %v13112_v50  ;;  %17558 = vst [vmem:[#allocation196_spill] sm:$0xff] %v13117_v48  ;;  %v13122_v49 = vld [vmem:[%s16975_s5 + $0x690] sm:$0xff]  ;;  %v13127_v16 = vld [vmem:[%s16975_s5 + $0x698] sm:$0xff] }
  0x67   :  { %17559 = vst [vmem:[#allocation197_spill] sm:$0xff] %v13122_v49  ;;  %17560 = vst [vmem:[#allocation198_spill] sm:$0xff] %v13127_v16  ;;  %v13132_v17 = vld [vmem:[%s16975_s5 + $0x6a0] sm:$0xff]  ;;  %v13137_v50 = vld [vmem:[%s16975_s5 + $0x6a8] sm:$0xff] }
  0x68   :  { %17561 = vst [vmem:[#allocation199_spill] sm:$0xff] %v13132_v17  ;;  %17562 = vst [vmem:[#allocation200_spill] sm:$0xff] %v13137_v50  ;;  %v13142_v48 = vld [vmem:[%s16975_s5 + $0x6b0] sm:$0xff]  ;;  %v13147_v49 = vld [vmem:[%s16975_s5 + $0x6b8] sm:$0xff] }
  0x69   :  { %17563 = vst [vmem:[#allocation201_spill] sm:$0xff] %v13142_v48  ;;  %17564 = vst [vmem:[#allocation202_spill] sm:$0xff] %v13147_v49  ;;  %v13152_v16 = vld [vmem:[%s16975_s5 + $0x6c0] sm:$0xff]  ;;  %v13157_v17 = vld [vmem:[%s16975_s5 + $0x6c8] sm:$0xff] }
  0x6a   :  { %17565 = vst [vmem:[#allocation203_spill] sm:$0xff] %v13152_v16  ;;  %17566 = vst [vmem:[#allocation204_spill] sm:$0xff] %v13157_v17  ;;  %v13162_v50 = vld [vmem:[%s16975_s5 + $0x6d0] sm:$0xff]  ;;  %v13167_v48 = vld [vmem:[%s16975_s5 + $0x6d8] sm:$0xff] }
  0x6b   :  { %17567 = vst [vmem:[#allocation205_spill] sm:$0xff] %v13162_v50  ;;  %17568 = vst [vmem:[#allocation206_spill] sm:$0xff] %v13167_v48  ;;  %v13172_v49 = vld [vmem:[%s16975_s5 + $0x6e0] sm:$0xff]  ;;  %v13177_v16 = vld [vmem:[%s16975_s5 + $0x6e8] sm:$0xff] }
  0x6c   :  { %17569 = vst [vmem:[#allocation207_spill] sm:$0xff] %v13172_v49  ;;  %17570 = vst [vmem:[#allocation208_spill] sm:$0xff] %v13177_v16  ;;  %v13182_v17 = vld [vmem:[%s16975_s5 + $0x6f0] sm:$0xff]  ;;  %v13187_v50 = vld [vmem:[%s16975_s5 + $0x6f8] sm:$0xff] }
  0x6d   :  { %17571 = vst [vmem:[#allocation209_spill] sm:$0xff] %v13182_v17  ;;  %17572 = vst [vmem:[#allocation210_spill] sm:$0xff] %v13187_v50  ;;  %v13192_v48 = vld [vmem:[%s16975_s5 + $0x700] sm:$0xff]  ;;  %v13197_v49 = vld [vmem:[%s16975_s5 + $0x708] sm:$0xff] }
  0x6e   :  { %17573 = vst [vmem:[#allocation211_spill] sm:$0xff] %v13192_v48  ;;  %17574 = vst [vmem:[#allocation212_spill] sm:$0xff] %v13197_v49  ;;  %v13202_v16 = vld [vmem:[%s16975_s5 + $0x710] sm:$0xff]  ;;  %v13207_v17 = vld [vmem:[%s16975_s5 + $0x718] sm:$0xff] }
  0x6f   :  { %17575 = vst [vmem:[#allocation213_spill] sm:$0xff] %v13202_v16  ;;  %17576 = vst [vmem:[#allocation214_spill] sm:$0xff] %v13207_v17  ;;  %v13212_v50 = vld [vmem:[%s16975_s5 + $0x720] sm:$0xff]  ;;  %v13217_v48 = vld [vmem:[%s16975_s5 + $0x728] sm:$0xff] }
  0x70   :  { %17577 = vst [vmem:[#allocation215_spill] sm:$0xff] %v13212_v50  ;;  %17578 = vst [vmem:[#allocation216_spill] sm:$0xff] %v13217_v48  ;;  %v13222_v49 = vld [vmem:[%s16975_s5 + $0x730] sm:$0xff]  ;;  %v13227_v16 = vld [vmem:[%s16975_s5 + $0x738] sm:$0xff] }
  0x71   :  { %17579 = vst [vmem:[#allocation217_spill] sm:$0xff] %v13222_v49  ;;  %17580 = vst [vmem:[#allocation218_spill] sm:$0xff] %v13227_v16  ;;  %v13232_v17 = vld [vmem:[%s16975_s5 + $0x740] sm:$0xff]  ;;  %v13237_v50 = vld [vmem:[%s16975_s5 + $0x748] sm:$0xff] }
  0x72   :  { %17581 = vst [vmem:[#allocation219_spill] sm:$0xff] %v13232_v17  ;;  %17582 = vst [vmem:[#allocation220_spill] sm:$0xff] %v13237_v50  ;;  %v13242_v48 = vld [vmem:[%s16975_s5 + $0x750] sm:$0xff]  ;;  %v13247_v49 = vld [vmem:[%s16975_s5 + $0x758] sm:$0xff] }
  0x73   :  { %17583 = vst [vmem:[#allocation221_spill] sm:$0xff] %v13242_v48  ;;  %17584 = vst [vmem:[#allocation222_spill] sm:$0xff] %v13247_v49  ;;  %v13252_v16 = vld [vmem:[%s16975_s5 + $0x760] sm:$0xff]  ;;  %v13257_v17 = vld [vmem:[%s16975_s5 + $0x768] sm:$0xff] }
  0x74   :  { %17585 = vst [vmem:[#allocation223_spill] sm:$0xff] %v13252_v16  ;;  %17586 = vst [vmem:[#allocation224_spill] sm:$0xff] %v13257_v17  ;;  %v13262_v50 = vld [vmem:[%s16975_s5 + $0x770] sm:$0xff]  ;;  %v13267_v48 = vld [vmem:[%s16975_s5 + $0x778] sm:$0xff] }
  0x75   :  { %17587 = vst [vmem:[#allocation225_spill] sm:$0xff] %v13262_v50  ;;  %17588 = vst [vmem:[#allocation226_spill] sm:$0xff] %v13267_v48  ;;  %v13272_v49 = vld [vmem:[%s16975_s5 + $0x780] sm:$0xff]  ;;  %v13277_v16 = vld [vmem:[%s16975_s5 + $0x788] sm:$0xff] }
  0x76   :  { %17589 = vst [vmem:[#allocation227_spill] sm:$0xff] %v13272_v49  ;;  %17590 = vst [vmem:[#allocation228_spill] sm:$0xff] %v13277_v16  ;;  %v13282_v17 = vld [vmem:[%s16975_s5 + $0x790] sm:$0xff]  ;;  %v13287_v50 = vld [vmem:[%s16975_s5 + $0x798] sm:$0xff] }
  0x77   :  { %17591 = vst [vmem:[#allocation229_spill] sm:$0xff] %v13282_v17  ;;  %17592 = vst [vmem:[#allocation230_spill] sm:$0xff] %v13287_v50  ;;  %v13292_v48 = vld [vmem:[%s16975_s5 + $0x7a0] sm:$0xff]  ;;  %v13297_v49 = vld [vmem:[%s16975_s5 + $0x7a8] sm:$0xff] }
  0x78   :  { %17593 = vst [vmem:[#allocation231_spill] sm:$0xff] %v13292_v48  ;;  %17594 = vst [vmem:[#allocation232_spill] sm:$0xff] %v13297_v49  ;;  %v13302_v16 = vld [vmem:[%s16975_s5 + $0x7b0] sm:$0xff]  ;;  %v13307_v17 = vld [vmem:[%s16975_s5 + $0x7b8] sm:$0xff] }
  0x79   :  { %17595 = vst [vmem:[#allocation233_spill] sm:$0xff] %v13302_v16  ;;  %17596 = vst [vmem:[#allocation234_spill] sm:$0xff] %v13307_v17  ;;  %v13312_v50 = vld [vmem:[%s16975_s5 + $0x7c0] sm:$0xff]  ;;  %v13317_v48 = vld [vmem:[%s16975_s5 + $0x7c8] sm:$0xff] }
  0x7a   :  { %17597 = vst [vmem:[#allocation235_spill] sm:$0xff] %v13312_v50  ;;  %17598 = vst [vmem:[#allocation236_spill] sm:$0xff] %v13317_v48  ;;  %v13322_v49 = vld [vmem:[%s16975_s5 + $0x7d0] sm:$0xff]  ;;  %v13327_v16 = vld [vmem:[%s16975_s5 + $0x7d8] sm:$0xff] }
  0x7b   :  { %17599 = vst [vmem:[#allocation237_spill] sm:$0xff] %v13322_v49  ;;  %17600 = vst [vmem:[#allocation238_spill] sm:$0xff] %v13327_v16  ;;  %v13332_v17 = vld [vmem:[%s16975_s5 + $0x7e0] sm:$0xff]  ;;  %v13337_v50 = vld [vmem:[%s16975_s5 + $0x7e8] sm:$0xff] }
  0x7c   :  { %17601 = vst [vmem:[#allocation239_spill] sm:$0xff] %v13332_v17  ;;  %17602 = vst [vmem:[#allocation240_spill] sm:$0xff] %v13337_v50  ;;  %v13342_v48 = vld [vmem:[%s16975_s5 + $0x7f0] sm:$0xff]  ;;  %v13347_v49 = vld [vmem:[%s16975_s5 + $0x7f8] sm:$0xff] }
  0x7d   :  { %17603 = vst [vmem:[#allocation241_spill] sm:$0xff] %v13342_v48  ;;  %17604 = vst [vmem:[#allocation242_spill] sm:$0xff] %v13347_v49  ;;  %v13352_v16 = vld [vmem:[%s16975_s5 + $0x800] sm:$0xff]  ;;  %v13357_v17 = vld [vmem:[%s16975_s5 + $0x808] sm:$0xff] }
  0x7e   :  { %17605 = vst [vmem:[#allocation243_spill] sm:$0xff] %v13352_v16  ;;  %17606 = vst [vmem:[#allocation244_spill] sm:$0xff] %v13357_v17  ;;  %v13362_v50 = vld [vmem:[%s16975_s5 + $0x810] sm:$0xff]  ;;  %v13367_v48 = vld [vmem:[%s16975_s5 + $0x818] sm:$0xff] }
  0x7f   :  { %17607 = vst [vmem:[#allocation245_spill] sm:$0xff] %v13362_v50  ;;  %17608 = vst [vmem:[#allocation246_spill] sm:$0xff] %v13367_v48  ;;  %v13372_v49 = vld [vmem:[%s16975_s5 + $0x820] sm:$0xff]  ;;  %v13377_v16 = vld [vmem:[%s16975_s5 + $0x828] sm:$0xff] }
  0x80   :  { %17609 = vst [vmem:[#allocation247_spill] sm:$0xff] %v13372_v49  ;;  %17610 = vst [vmem:[#allocation248_spill] sm:$0xff] %v13377_v16  ;;  %v13382_v17 = vld [vmem:[%s16975_s5 + $0x830] sm:$0xff]  ;;  %v13387_v50 = vld [vmem:[%s16975_s5 + $0x838] sm:$0xff] }
  0x81   :  { %17611 = vst [vmem:[#allocation249_spill] sm:$0xff] %v13382_v17  ;;  %17612 = vst [vmem:[#allocation250_spill] sm:$0xff] %v13387_v50  ;;  %v13392_v48 = vld [vmem:[%s16975_s5 + $0x840] sm:$0xff]  ;;  %v13397_v49 = vld [vmem:[%s16975_s5 + $0x848] sm:$0xff] }
  0x82   :  { %17613 = vst [vmem:[#allocation251_spill] sm:$0xff] %v13392_v48  ;;  %17614 = vst [vmem:[#allocation252_spill] sm:$0xff] %v13397_v49  ;;  %v13402_v16 = vld [vmem:[%s16975_s5 + $0x850] sm:$0xff]  ;;  %v13407_v17 = vld [vmem:[%s16975_s5 + $0x858] sm:$0xff] }
  0x83   :  { %17615 = vst [vmem:[#allocation253_spill] sm:$0xff] %v13402_v16  ;;  %17616 = vst [vmem:[#allocation254_spill] sm:$0xff] %v13407_v17  ;;  %v13412_v50 = vld [vmem:[%s16975_s5 + $0x860] sm:$0xff]  ;;  %v13417_v48 = vld [vmem:[%s16975_s5 + $0x868] sm:$0xff] }
  0x84   :  { %17617 = vst [vmem:[#allocation255_spill] sm:$0xff] %v13412_v50  ;;  %17618 = vst [vmem:[#allocation256_spill] sm:$0xff] %v13417_v48  ;;  %v13422_v49 = vld [vmem:[%s16975_s5 + $0x870] sm:$0xff]  ;;  %v13427_v16 = vld [vmem:[%s16975_s5 + $0x878] sm:$0xff] }
  0x85   :  { %17619 = vst [vmem:[#allocation257_spill] sm:$0xff] %v13422_v49  ;;  %17620 = vst [vmem:[#allocation258_spill] sm:$0xff] %v13427_v16  ;;  %v13432_v17 = vld [vmem:[%s16975_s5 + $0x880] sm:$0xff]  ;;  %v13437_v50 = vld [vmem:[%s16975_s5 + $0x888] sm:$0xff] }
  0x86   :  { %17621 = vst [vmem:[#allocation259_spill] sm:$0xff] %v13432_v17  ;;  %17622 = vst [vmem:[#allocation260_spill] sm:$0xff] %v13437_v50  ;;  %v13442_v48 = vld [vmem:[%s16975_s5 + $0x890] sm:$0xff]  ;;  %v13447_v49 = vld [vmem:[%s16975_s5 + $0x898] sm:$0xff] }
  0x87   :  { %17623 = vst [vmem:[#allocation261_spill] sm:$0xff] %v13442_v48  ;;  %17624 = vst [vmem:[#allocation262_spill] sm:$0xff] %v13447_v49  ;;  %v13452_v16 = vld [vmem:[%s16975_s5 + $0x8a0] sm:$0xff]  ;;  %v13457_v17 = vld [vmem:[%s16975_s5 + $0x8a8] sm:$0xff] }
  0x88   :  { %17625 = vst [vmem:[#allocation263_spill] sm:$0xff] %v13452_v16  ;;  %17626 = vst [vmem:[#allocation264_spill] sm:$0xff] %v13457_v17  ;;  %v13462_v50 = vld [vmem:[%s16975_s5 + $0x8b0] sm:$0xff]  ;;  %v13467_v48 = vld [vmem:[%s16975_s5 + $0x8b8] sm:$0xff] }
  0x89   :  { %17627 = vst [vmem:[#allocation265_spill] sm:$0xff] %v13462_v50  ;;  %17628 = vst [vmem:[#allocation266_spill] sm:$0xff] %v13467_v48  ;;  %v13472_v49 = vld [vmem:[%s16975_s5 + $0x8c0] sm:$0xff]  ;;  %v13477_v16 = vld [vmem:[%s16975_s5 + $0x8c8] sm:$0xff] }
  0x8a   :  { %17629 = vst [vmem:[#allocation267_spill] sm:$0xff] %v13472_v49  ;;  %17630 = vst [vmem:[#allocation268_spill] sm:$0xff] %v13477_v16  ;;  %v13482_v17 = vld [vmem:[%s16975_s5 + $0x8d0] sm:$0xff]  ;;  %v13487_v50 = vld [vmem:[%s16975_s5 + $0x8d8] sm:$0xff] }
  0x8b   :  { %17631 = vst [vmem:[#allocation269_spill] sm:$0xff] %v13482_v17  ;;  %17632 = vst [vmem:[#allocation270_spill] sm:$0xff] %v13487_v50  ;;  %v13492_v48 = vld [vmem:[%s16975_s5 + $0x8e0] sm:$0xff]  ;;  %v13497_v49 = vld [vmem:[%s16975_s5 + $0x8e8] sm:$0xff] }
  0x8c   :  { %17633 = vst [vmem:[#allocation271_spill] sm:$0xff] %v13492_v48  ;;  %17634 = vst [vmem:[#allocation272_spill] sm:$0xff] %v13497_v49  ;;  %v13502_v16 = vld [vmem:[%s16975_s5 + $0x8f0] sm:$0xff]  ;;  %v13507_v17 = vld [vmem:[%s16975_s5 + $0x8f8] sm:$0xff] }
  0x8d   :  { %17635 = vst [vmem:[#allocation273_spill] sm:$0xff] %v13502_v16  ;;  %17636 = vst [vmem:[#allocation274_spill] sm:$0xff] %v13507_v17 }
  0x8e   :  { %639 = vsyncadd [#allocation4], 36864  ;;  %v674_v50 = vld [vmem:[%s16976_s6] sm:$0xff]  ;;  %v676_v48 = vld [vmem:[%s16976_s6 + $0x8] sm:$0xff] }
  0x8f   :  { %675 = vst [vmem:[#allocation3] sm:$0xff] %v674_v50  ;;  %677 = vst [vmem:[#allocation3 + $0x8] sm:$0xff] %v676_v48  ;;  %v678_v49 = vld [vmem:[%s16976_s6 + $0x10] sm:$0xff]  ;;  %v680_v16 = vld [vmem:[%s16976_s6 + $0x18] sm:$0xff] }
  0x90   :  { %v682_v17 = vld [vmem:[%s16976_s6 + $0x20] sm:$0xff]  ;;  %679 = vst [vmem:[#allocation3 + $0x10] sm:$0xff] %v678_v49  ;;  %681 = vst [vmem:[#allocation3 + $0x18] sm:$0xff] %v680_v16  ;;  %v684_v50 = vld [vmem:[%s16976_s6 + $0x28] sm:$0xff] }
  0x91   :  { %683 = vst [vmem:[#allocation3 + $0x20] sm:$0xff] %v682_v17  ;;  %v686_v48 = vld [vmem:[%s16976_s6 + $0x30] sm:$0xff]  ;;  %v688_v51 = vld [vmem:[%s16976_s6 + $0x38] sm:$0xff]  ;;  %685 = vst [vmem:[#allocation3 + $0x28] sm:$0xff] %v684_v50 }
  0x92   :  { %687 = vst [vmem:[#allocation3 + $0x30] sm:$0xff] %v686_v48  ;;  %689 = vst [vmem:[#allocation3 + $0x38] sm:$0xff] %v688_v51  ;;  %v690_v16 = vld [vmem:[%s16976_s6 + $0x40] sm:$0xff]  ;;  %v692_v17 = vld [vmem:[%s16976_s6 + $0x48] sm:$0xff] }
  0x93   :  { %v694_v49 = vld [vmem:[%s16976_s6 + $0x50] sm:$0xff]  ;;  %691 = vst [vmem:[#allocation3 + $0x40] sm:$0xff] %v690_v16  ;;  %693 = vst [vmem:[#allocation3 + $0x48] sm:$0xff] %v692_v17  ;;  %v696_v50 = vld [vmem:[%s16976_s6 + $0x58] sm:$0xff] }
  0x94   :  { %695 = vst [vmem:[#allocation3 + $0x50] sm:$0xff] %v694_v49  ;;  %v698_v51 = vld [vmem:[%s16976_s6 + $0x60] sm:$0xff]  ;;  %v700_v48 = vld [vmem:[%s16976_s6 + $0x68] sm:$0xff]  ;;  %697 = vst [vmem:[#allocation3 + $0x58] sm:$0xff] %v696_v50 }
  0x95   :  { %699 = vst [vmem:[#allocation3 + $0x60] sm:$0xff] %v698_v51  ;;  %701 = vst [vmem:[#allocation3 + $0x68] sm:$0xff] %v700_v48  ;;  %v702_v16 = vld [vmem:[%s16976_s6 + $0x70] sm:$0xff]  ;;  %v704_v17 = vld [vmem:[%s16976_s6 + $0x78] sm:$0xff] }
  0x96   :  { %v706_v49 = vld [vmem:[%s16976_s6 + $0x80] sm:$0xff]  ;;  %703 = vst [vmem:[#allocation3 + $0x70] sm:$0xff] %v702_v16  ;;  %705 = vst [vmem:[#allocation3 + $0x78] sm:$0xff] %v704_v17  ;;  %v708_v50 = vld [vmem:[%s16976_s6 + $0x88] sm:$0xff] }
  0x97   :  { %707 = vst [vmem:[#allocation3 + $0x80] sm:$0xff] %v706_v49  ;;  %v710_v51 = vld [vmem:[%s16976_s6 + $0x90] sm:$0xff]  ;;  %v712_v48 = vld [vmem:[%s16976_s6 + $0x98] sm:$0xff]  ;;  %709 = vst [vmem:[#allocation3 + $0x88] sm:$0xff] %v708_v50 }
  0x98   :  { %711 = vst [vmem:[#allocation3 + $0x90] sm:$0xff] %v710_v51  ;;  %713 = vst [vmem:[#allocation3 + $0x98] sm:$0xff] %v712_v48  ;;  %v714_v16 = vld [vmem:[%s16976_s6 + $0xa0] sm:$0xff]  ;;  %v716_v17 = vld [vmem:[%s16976_s6 + $0xa8] sm:$0xff] }
  0x99   :  { %v718_v49 = vld [vmem:[%s16976_s6 + $0xb0] sm:$0xff]  ;;  %715 = vst [vmem:[#allocation3 + $0xa0] sm:$0xff] %v714_v16  ;;  %717 = vst [vmem:[#allocation3 + $0xa8] sm:$0xff] %v716_v17  ;;  %v720_v50 = vld [vmem:[%s16976_s6 + $0xb8] sm:$0xff] }
  0x9a   :  { %719 = vst [vmem:[#allocation3 + $0xb0] sm:$0xff] %v718_v49  ;;  %v722_v51 = vld [vmem:[%s16976_s6 + $0xc0] sm:$0xff]  ;;  %v724_v48 = vld [vmem:[%s16976_s6 + $0xc8] sm:$0xff]  ;;  %721 = vst [vmem:[#allocation3 + $0xb8] sm:$0xff] %v720_v50 }
  0x9b   :  { %723 = vst [vmem:[#allocation3 + $0xc0] sm:$0xff] %v722_v51  ;;  %725 = vst [vmem:[#allocation3 + $0xc8] sm:$0xff] %v724_v48  ;;  %v726_v16 = vld [vmem:[%s16976_s6 + $0xd0] sm:$0xff]  ;;  %v728_v17 = vld [vmem:[%s16976_s6 + $0xd8] sm:$0xff] }
  0x9c   :  { %v730_v49 = vld [vmem:[%s16976_s6 + $0xe0] sm:$0xff]  ;;  %727 = vst [vmem:[#allocation3 + $0xd0] sm:$0xff] %v726_v16  ;;  %729 = vst [vmem:[#allocation3 + $0xd8] sm:$0xff] %v728_v17  ;;  %v732_v50 = vld [vmem:[%s16976_s6 + $0xe8] sm:$0xff] }
  0x9d   :  { %731 = vst [vmem:[#allocation3 + $0xe0] sm:$0xff] %v730_v49  ;;  %v734_v51 = vld [vmem:[%s16976_s6 + $0xf0] sm:$0xff]  ;;  %v736_v48 = vld [vmem:[%s16976_s6 + $0xf8] sm:$0xff]  ;;  %733 = vst [vmem:[#allocation3 + $0xe8] sm:$0xff] %v732_v50 }
  0x9e   :  { %735 = vst [vmem:[#allocation3 + $0xf0] sm:$0xff] %v734_v51  ;;  %737 = vst [vmem:[#allocation3 + $0xf8] sm:$0xff] %v736_v48  ;;  %v738_v16 = vld [vmem:[%s16976_s6 + $0x100] sm:$0xff]  ;;  %v740_v17 = vld [vmem:[%s16976_s6 + $0x108] sm:$0xff] }
  0x9f   :  { %v742_v49 = vld [vmem:[%s16976_s6 + $0x110] sm:$0xff]  ;;  %739 = vst [vmem:[#allocation3 + $0x100] sm:$0xff] %v738_v16  ;;  %741 = vst [vmem:[#allocation3 + $0x108] sm:$0xff] %v740_v17  ;;  %v744_v50 = vld [vmem:[%s16976_s6 + $0x118] sm:$0xff] }
  0xa0   :  { %743 = vst [vmem:[#allocation3 + $0x110] sm:$0xff] %v742_v49  ;;  %v746_v51 = vld [vmem:[%s16976_s6 + $0x120] sm:$0xff]  ;;  %v748_v48 = vld [vmem:[%s16976_s6 + $0x128] sm:$0xff]  ;;  %745 = vst [vmem:[#allocation3 + $0x118] sm:$0xff] %v744_v50 }
  0xa1   :  { %747 = vst [vmem:[#allocation3 + $0x120] sm:$0xff] %v746_v51  ;;  %749 = vst [vmem:[#allocation3 + $0x128] sm:$0xff] %v748_v48  ;;  %v750_v16 = vld [vmem:[%s16976_s6 + $0x130] sm:$0xff]  ;;  %v752_v17 = vld [vmem:[%s16976_s6 + $0x138] sm:$0xff] }
  0xa2   :  { %v754_v49 = vld [vmem:[%s16976_s6 + $0x140] sm:$0xff]  ;;  %751 = vst [vmem:[#allocation3 + $0x130] sm:$0xff] %v750_v16  ;;  %753 = vst [vmem:[#allocation3 + $0x138] sm:$0xff] %v752_v17  ;;  %v756_v50 = vld [vmem:[%s16976_s6 + $0x148] sm:$0xff] }
  0xa3   :  { %755 = vst [vmem:[#allocation3 + $0x140] sm:$0xff] %v754_v49  ;;  %v758_v51 = vld [vmem:[%s16976_s6 + $0x150] sm:$0xff]  ;;  %v760_v48 = vld [vmem:[%s16976_s6 + $0x158] sm:$0xff]  ;;  %757 = vst [vmem:[#allocation3 + $0x148] sm:$0xff] %v756_v50 }
  0xa4   :  { %759 = vst [vmem:[#allocation3 + $0x150] sm:$0xff] %v758_v51  ;;  %761 = vst [vmem:[#allocation3 + $0x158] sm:$0xff] %v760_v48  ;;  %v762_v16 = vld [vmem:[%s16976_s6 + $0x160] sm:$0xff]  ;;  %v764_v17 = vld [vmem:[%s16976_s6 + $0x168] sm:$0xff] }
  0xa5   :  { %v766_v49 = vld [vmem:[%s16976_s6 + $0x170] sm:$0xff]  ;;  %763 = vst [vmem:[#allocation3 + $0x160] sm:$0xff] %v762_v16  ;;  %765 = vst [vmem:[#allocation3 + $0x168] sm:$0xff] %v764_v17  ;;  %v768_v50 = vld [vmem:[%s16976_s6 + $0x178] sm:$0xff] }
  0xa6   :  { %767 = vst [vmem:[#allocation3 + $0x170] sm:$0xff] %v766_v49  ;;  %v770_v51 = vld [vmem:[%s16976_s6 + $0x180] sm:$0xff]  ;;  %v772_v48 = vld [vmem:[%s16976_s6 + $0x188] sm:$0xff]  ;;  %769 = vst [vmem:[#allocation3 + $0x178] sm:$0xff] %v768_v50 }
  0xa7   :  { %771 = vst [vmem:[#allocation3 + $0x180] sm:$0xff] %v770_v51  ;;  %773 = vst [vmem:[#allocation3 + $0x188] sm:$0xff] %v772_v48  ;;  %v774_v16 = vld [vmem:[%s16976_s6 + $0x190] sm:$0xff]  ;;  %v776_v17 = vld [vmem:[%s16976_s6 + $0x198] sm:$0xff] }
  0xa8   :  { %v778_v49 = vld [vmem:[%s16976_s6 + $0x1a0] sm:$0xff]  ;;  %775 = vst [vmem:[#allocation3 + $0x190] sm:$0xff] %v774_v16  ;;  %777 = vst [vmem:[#allocation3 + $0x198] sm:$0xff] %v776_v17  ;;  %v780_v50 = vld [vmem:[%s16976_s6 + $0x1a8] sm:$0xff] }
  0xa9   :  { %779 = vst [vmem:[#allocation3 + $0x1a0] sm:$0xff] %v778_v49  ;;  %v782_v51 = vld [vmem:[%s16976_s6 + $0x1b0] sm:$0xff]  ;;  %v784_v48 = vld [vmem:[%s16976_s6 + $0x1b8] sm:$0xff]  ;;  %781 = vst [vmem:[#allocation3 + $0x1a8] sm:$0xff] %v780_v50 }
  0xaa   :  { %783 = vst [vmem:[#allocation3 + $0x1b0] sm:$0xff] %v782_v51  ;;  %785 = vst [vmem:[#allocation3 + $0x1b8] sm:$0xff] %v784_v48  ;;  %v786_v16 = vld [vmem:[%s16976_s6 + $0x1c0] sm:$0xff]  ;;  %v788_v17 = vld [vmem:[%s16976_s6 + $0x1c8] sm:$0xff] }
  0xab   :  { %v790_v49 = vld [vmem:[%s16976_s6 + $0x1d0] sm:$0xff]  ;;  %787 = vst [vmem:[#allocation3 + $0x1c0] sm:$0xff] %v786_v16  ;;  %789 = vst [vmem:[#allocation3 + $0x1c8] sm:$0xff] %v788_v17  ;;  %v792_v50 = vld [vmem:[%s16976_s6 + $0x1d8] sm:$0xff] }
  0xac   :  { %791 = vst [vmem:[#allocation3 + $0x1d0] sm:$0xff] %v790_v49  ;;  %v794_v51 = vld [vmem:[%s16976_s6 + $0x1e0] sm:$0xff]  ;;  %v796_v48 = vld [vmem:[%s16976_s6 + $0x1e8] sm:$0xff]  ;;  %793 = vst [vmem:[#allocation3 + $0x1d8] sm:$0xff] %v792_v50 }
  0xad   :  { %795 = vst [vmem:[#allocation3 + $0x1e0] sm:$0xff] %v794_v51  ;;  %797 = vst [vmem:[#allocation3 + $0x1e8] sm:$0xff] %v796_v48  ;;  %v798_v16 = vld [vmem:[%s16976_s6 + $0x1f0] sm:$0xff]  ;;  %v800_v17 = vld [vmem:[%s16976_s6 + $0x1f8] sm:$0xff] }
  0xae   :  { %v802_v49 = vld [vmem:[%s16976_s6 + $0x200] sm:$0xff]  ;;  %799 = vst [vmem:[#allocation3 + $0x1f0] sm:$0xff] %v798_v16  ;;  %801 = vst [vmem:[#allocation3 + $0x1f8] sm:$0xff] %v800_v17  ;;  %v804_v50 = vld [vmem:[%s16976_s6 + $0x208] sm:$0xff] }
  0xaf   :  { %803 = vst [vmem:[#allocation3 + $0x200] sm:$0xff] %v802_v49  ;;  %v806_v51 = vld [vmem:[%s16976_s6 + $0x210] sm:$0xff]  ;;  %v808_v48 = vld [vmem:[%s16976_s6 + $0x218] sm:$0xff]  ;;  %805 = vst [vmem:[#allocation3 + $0x208] sm:$0xff] %v804_v50 }
  0xb0   :  { %807 = vst [vmem:[#allocation3 + $0x210] sm:$0xff] %v806_v51  ;;  %809 = vst [vmem:[#allocation3 + $0x218] sm:$0xff] %v808_v48  ;;  %v810_v16 = vld [vmem:[%s16976_s6 + $0x220] sm:$0xff]  ;;  %v812_v17 = vld [vmem:[%s16976_s6 + $0x228] sm:$0xff] }
  0xb1   :  { %v814_v49 = vld [vmem:[%s16976_s6 + $0x230] sm:$0xff]  ;;  %811 = vst [vmem:[#allocation3 + $0x220] sm:$0xff] %v810_v16  ;;  %813 = vst [vmem:[#allocation3 + $0x228] sm:$0xff] %v812_v17  ;;  %v816_v50 = vld [vmem:[%s16976_s6 + $0x238] sm:$0xff] }
  0xb2   :  { %815 = vst [vmem:[#allocation3 + $0x230] sm:$0xff] %v814_v49  ;;  %v818_v51 = vld [vmem:[%s16976_s6 + $0x240] sm:$0xff]  ;;  %v820_v48 = vld [vmem:[%s16976_s6 + $0x248] sm:$0xff]  ;;  %817 = vst [vmem:[#allocation3 + $0x238] sm:$0xff] %v816_v50 }
  0xb3   :  { %819 = vst [vmem:[#allocation3 + $0x240] sm:$0xff] %v818_v51  ;;  %821 = vst [vmem:[#allocation3 + $0x248] sm:$0xff] %v820_v48  ;;  %v822_v16 = vld [vmem:[%s16976_s6 + $0x250] sm:$0xff]  ;;  %v824_v17 = vld [vmem:[%s16976_s6 + $0x258] sm:$0xff] }
  0xb4   :  { %v826_v49 = vld [vmem:[%s16976_s6 + $0x260] sm:$0xff]  ;;  %823 = vst [vmem:[#allocation3 + $0x250] sm:$0xff] %v822_v16  ;;  %825 = vst [vmem:[#allocation3 + $0x258] sm:$0xff] %v824_v17  ;;  %v828_v50 = vld [vmem:[%s16976_s6 + $0x268] sm:$0xff] }
  0xb5   :  { %827 = vst [vmem:[#allocation3 + $0x260] sm:$0xff] %v826_v49  ;;  %v830_v51 = vld [vmem:[%s16976_s6 + $0x270] sm:$0xff]  ;;  %v832_v48 = vld [vmem:[%s16976_s6 + $0x278] sm:$0xff]  ;;  %829 = vst [vmem:[#allocation3 + $0x268] sm:$0xff] %v828_v50 }
  0xb6   :  { %831 = vst [vmem:[#allocation3 + $0x270] sm:$0xff] %v830_v51  ;;  %833 = vst [vmem:[#allocation3 + $0x278] sm:$0xff] %v832_v48  ;;  %v834_v16 = vld [vmem:[%s16976_s6 + $0x280] sm:$0xff]  ;;  %v836_v17 = vld [vmem:[%s16976_s6 + $0x288] sm:$0xff] }
  0xb7   :  { %v838_v49 = vld [vmem:[%s16976_s6 + $0x290] sm:$0xff]  ;;  %835 = vst [vmem:[#allocation3 + $0x280] sm:$0xff] %v834_v16  ;;  %837 = vst [vmem:[#allocation3 + $0x288] sm:$0xff] %v836_v17  ;;  %v840_v50 = vld [vmem:[%s16976_s6 + $0x298] sm:$0xff] }
  0xb8   :  { %839 = vst [vmem:[#allocation3 + $0x290] sm:$0xff] %v838_v49  ;;  %v842_v51 = vld [vmem:[%s16976_s6 + $0x2a0] sm:$0xff]  ;;  %v844_v48 = vld [vmem:[%s16976_s6 + $0x2a8] sm:$0xff]  ;;  %841 = vst [vmem:[#allocation3 + $0x298] sm:$0xff] %v840_v50 }
  0xb9   :  { %843 = vst [vmem:[#allocation3 + $0x2a0] sm:$0xff] %v842_v51  ;;  %845 = vst [vmem:[#allocation3 + $0x2a8] sm:$0xff] %v844_v48  ;;  %v846_v16 = vld [vmem:[%s16976_s6 + $0x2b0] sm:$0xff]  ;;  %v848_v17 = vld [vmem:[%s16976_s6 + $0x2b8] sm:$0xff] }
  0xba   :  { %v850_v49 = vld [vmem:[%s16976_s6 + $0x2c0] sm:$0xff]  ;;  %847 = vst [vmem:[#allocation3 + $0x2b0] sm:$0xff] %v846_v16  ;;  %849 = vst [vmem:[#allocation3 + $0x2b8] sm:$0xff] %v848_v17  ;;  %v852_v50 = vld [vmem:[%s16976_s6 + $0x2c8] sm:$0xff] }
  0xbb   :  { %851 = vst [vmem:[#allocation3 + $0x2c0] sm:$0xff] %v850_v49  ;;  %v854_v51 = vld [vmem:[%s16976_s6 + $0x2d0] sm:$0xff]  ;;  %v856_v48 = vld [vmem:[%s16976_s6 + $0x2d8] sm:$0xff]  ;;  %853 = vst [vmem:[#allocation3 + $0x2c8] sm:$0xff] %v852_v50 }
  0xbc   :  { %855 = vst [vmem:[#allocation3 + $0x2d0] sm:$0xff] %v854_v51  ;;  %857 = vst [vmem:[#allocation3 + $0x2d8] sm:$0xff] %v856_v48  ;;  %v858_v16 = vld [vmem:[%s16976_s6 + $0x2e0] sm:$0xff]  ;;  %v860_v17 = vld [vmem:[%s16976_s6 + $0x2e8] sm:$0xff] }
  0xbd   :  { %v862_v49 = vld [vmem:[%s16976_s6 + $0x2f0] sm:$0xff]  ;;  %859 = vst [vmem:[#allocation3 + $0x2e0] sm:$0xff] %v858_v16  ;;  %861 = vst [vmem:[#allocation3 + $0x2e8] sm:$0xff] %v860_v17  ;;  %v864_v50 = vld [vmem:[%s16976_s6 + $0x2f8] sm:$0xff] }
  0xbe   :  { %863 = vst [vmem:[#allocation3 + $0x2f0] sm:$0xff] %v862_v49  ;;  %v866_v51 = vld [vmem:[%s16976_s6 + $0x300] sm:$0xff]  ;;  %v868_v48 = vld [vmem:[%s16976_s6 + $0x308] sm:$0xff]  ;;  %865 = vst [vmem:[#allocation3 + $0x2f8] sm:$0xff] %v864_v50 }
  0xbf   :  { %867 = vst [vmem:[#allocation3 + $0x300] sm:$0xff] %v866_v51  ;;  %869 = vst [vmem:[#allocation3 + $0x308] sm:$0xff] %v868_v48  ;;  %v870_v16 = vld [vmem:[%s16976_s6 + $0x310] sm:$0xff]  ;;  %v872_v17 = vld [vmem:[%s16976_s6 + $0x318] sm:$0xff] }
  0xc0   :  { %v874_v49 = vld [vmem:[%s16976_s6 + $0x320] sm:$0xff]  ;;  %871 = vst [vmem:[#allocation3 + $0x310] sm:$0xff] %v870_v16  ;;  %873 = vst [vmem:[#allocation3 + $0x318] sm:$0xff] %v872_v17  ;;  %v876_v50 = vld [vmem:[%s16976_s6 + $0x328] sm:$0xff] }
  0xc1   :  { %875 = vst [vmem:[#allocation3 + $0x320] sm:$0xff] %v874_v49  ;;  %v878_v51 = vld [vmem:[%s16976_s6 + $0x330] sm:$0xff]  ;;  %v880_v48 = vld [vmem:[%s16976_s6 + $0x338] sm:$0xff]  ;;  %877 = vst [vmem:[#allocation3 + $0x328] sm:$0xff] %v876_v50 }
  0xc2   :  { %879 = vst [vmem:[#allocation3 + $0x330] sm:$0xff] %v878_v51  ;;  %881 = vst [vmem:[#allocation3 + $0x338] sm:$0xff] %v880_v48  ;;  %v882_v16 = vld [vmem:[%s16976_s6 + $0x340] sm:$0xff]  ;;  %v884_v17 = vld [vmem:[%s16976_s6 + $0x348] sm:$0xff] }
  0xc3   :  { %v886_v49 = vld [vmem:[%s16976_s6 + $0x350] sm:$0xff]  ;;  %883 = vst [vmem:[#allocation3 + $0x340] sm:$0xff] %v882_v16  ;;  %885 = vst [vmem:[#allocation3 + $0x348] sm:$0xff] %v884_v17  ;;  %v888_v50 = vld [vmem:[%s16976_s6 + $0x358] sm:$0xff] }
  0xc4   :  { %887 = vst [vmem:[#allocation3 + $0x350] sm:$0xff] %v886_v49  ;;  %v890_v51 = vld [vmem:[%s16976_s6 + $0x360] sm:$0xff]  ;;  %v892_v48 = vld [vmem:[%s16976_s6 + $0x368] sm:$0xff]  ;;  %889 = vst [vmem:[#allocation3 + $0x358] sm:$0xff] %v888_v50 }
  0xc5   :  { %891 = vst [vmem:[#allocation3 + $0x360] sm:$0xff] %v890_v51  ;;  %893 = vst [vmem:[#allocation3 + $0x368] sm:$0xff] %v892_v48  ;;  %v894_v16 = vld [vmem:[%s16976_s6 + $0x370] sm:$0xff]  ;;  %v896_v17 = vld [vmem:[%s16976_s6 + $0x378] sm:$0xff] }
  0xc6   :  { %v898_v49 = vld [vmem:[%s16976_s6 + $0x380] sm:$0xff]  ;;  %895 = vst [vmem:[#allocation3 + $0x370] sm:$0xff] %v894_v16  ;;  %897 = vst [vmem:[#allocation3 + $0x378] sm:$0xff] %v896_v17  ;;  %v900_v50 = vld [vmem:[%s16976_s6 + $0x388] sm:$0xff] }
  0xc7   :  { %899 = vst [vmem:[#allocation3 + $0x380] sm:$0xff] %v898_v49  ;;  %v902_v51 = vld [vmem:[%s16976_s6 + $0x390] sm:$0xff]  ;;  %v904_v48 = vld [vmem:[%s16976_s6 + $0x398] sm:$0xff]  ;;  %901 = vst [vmem:[#allocation3 + $0x388] sm:$0xff] %v900_v50 }
  0xc8   :  { %903 = vst [vmem:[#allocation3 + $0x390] sm:$0xff] %v902_v51  ;;  %905 = vst [vmem:[#allocation3 + $0x398] sm:$0xff] %v904_v48  ;;  %v906_v16 = vld [vmem:[%s16976_s6 + $0x3a0] sm:$0xff]  ;;  %v908_v17 = vld [vmem:[%s16976_s6 + $0x3a8] sm:$0xff] }
  0xc9   :  { %v910_v49 = vld [vmem:[%s16976_s6 + $0x3b0] sm:$0xff]  ;;  %907 = vst [vmem:[#allocation3 + $0x3a0] sm:$0xff] %v906_v16  ;;  %909 = vst [vmem:[#allocation3 + $0x3a8] sm:$0xff] %v908_v17  ;;  %v912_v50 = vld [vmem:[%s16976_s6 + $0x3b8] sm:$0xff] }
  0xca   :  { %911 = vst [vmem:[#allocation3 + $0x3b0] sm:$0xff] %v910_v49  ;;  %v914_v51 = vld [vmem:[%s16976_s6 + $0x3c0] sm:$0xff]  ;;  %v916_v48 = vld [vmem:[%s16976_s6 + $0x3c8] sm:$0xff]  ;;  %913 = vst [vmem:[#allocation3 + $0x3b8] sm:$0xff] %v912_v50 }
  0xcb   :  { %915 = vst [vmem:[#allocation3 + $0x3c0] sm:$0xff] %v914_v51  ;;  %917 = vst [vmem:[#allocation3 + $0x3c8] sm:$0xff] %v916_v48  ;;  %v918_v16 = vld [vmem:[%s16976_s6 + $0x3d0] sm:$0xff]  ;;  %v920_v17 = vld [vmem:[%s16976_s6 + $0x3d8] sm:$0xff] }
  0xcc   :  { %v922_v49 = vld [vmem:[%s16976_s6 + $0x3e0] sm:$0xff]  ;;  %919 = vst [vmem:[#allocation3 + $0x3d0] sm:$0xff] %v918_v16  ;;  %921 = vst [vmem:[#allocation3 + $0x3d8] sm:$0xff] %v920_v17  ;;  %v924_v50 = vld [vmem:[%s16976_s6 + $0x3e8] sm:$0xff] }
  0xcd   :  { %923 = vst [vmem:[#allocation3 + $0x3e0] sm:$0xff] %v922_v49  ;;  %v926_v51 = vld [vmem:[%s16976_s6 + $0x3f0] sm:$0xff]  ;;  %v928_v48 = vld [vmem:[%s16976_s6 + $0x3f8] sm:$0xff]  ;;  %925 = vst [vmem:[#allocation3 + $0x3e8] sm:$0xff] %v924_v50 }
  0xce   :  { %927 = vst [vmem:[#allocation3 + $0x3f0] sm:$0xff] %v926_v51  ;;  %929 = vst [vmem:[#allocation3 + $0x3f8] sm:$0xff] %v928_v48  ;;  %v930_v16 = vld [vmem:[%s16976_s6 + $0x400] sm:$0xff]  ;;  %v932_v17 = vld [vmem:[%s16976_s6 + $0x408] sm:$0xff] }
  0xcf   :  { %v934_v49 = vld [vmem:[%s16976_s6 + $0x410] sm:$0xff]  ;;  %931 = vst [vmem:[#allocation3 + $0x400] sm:$0xff] %v930_v16  ;;  %933 = vst [vmem:[#allocation3 + $0x408] sm:$0xff] %v932_v17  ;;  %v936_v50 = vld [vmem:[%s16976_s6 + $0x418] sm:$0xff] }
  0xd0   :  { %935 = vst [vmem:[#allocation3 + $0x410] sm:$0xff] %v934_v49  ;;  %v938_v51 = vld [vmem:[%s16976_s6 + $0x420] sm:$0xff]  ;;  %v940_v48 = vld [vmem:[%s16976_s6 + $0x428] sm:$0xff]  ;;  %937 = vst [vmem:[#allocation3 + $0x418] sm:$0xff] %v936_v50 }
  0xd1   :  { %939 = vst [vmem:[#allocation3 + $0x420] sm:$0xff] %v938_v51  ;;  %941 = vst [vmem:[#allocation3 + $0x428] sm:$0xff] %v940_v48  ;;  %v942_v16 = vld [vmem:[%s16976_s6 + $0x430] sm:$0xff]  ;;  %v944_v17 = vld [vmem:[%s16976_s6 + $0x438] sm:$0xff] }
  0xd2   :  { %v946_v49 = vld [vmem:[%s16976_s6 + $0x440] sm:$0xff]  ;;  %943 = vst [vmem:[#allocation3 + $0x430] sm:$0xff] %v942_v16  ;;  %945 = vst [vmem:[#allocation3 + $0x438] sm:$0xff] %v944_v17  ;;  %v948_v50 = vld [vmem:[%s16976_s6 + $0x448] sm:$0xff] }
  0xd3   :  { %947 = vst [vmem:[#allocation3 + $0x440] sm:$0xff] %v946_v49  ;;  %v950_v51 = vld [vmem:[%s16976_s6 + $0x450] sm:$0xff]  ;;  %v952_v48 = vld [vmem:[%s16976_s6 + $0x458] sm:$0xff]  ;;  %949 = vst [vmem:[#allocation3 + $0x448] sm:$0xff] %v948_v50 }
  0xd4   :  { %951 = vst [vmem:[#allocation3 + $0x450] sm:$0xff] %v950_v51  ;;  %953 = vst [vmem:[#allocation3 + $0x458] sm:$0xff] %v952_v48  ;;  %v954_v16 = vld [vmem:[%s16976_s6 + $0x460] sm:$0xff]  ;;  %v956_v17 = vld [vmem:[%s16976_s6 + $0x468] sm:$0xff] }
  0xd5   :  { %v958_v49 = vld [vmem:[%s16976_s6 + $0x470] sm:$0xff]  ;;  %955 = vst [vmem:[#allocation3 + $0x460] sm:$0xff] %v954_v16  ;;  %957 = vst [vmem:[#allocation3 + $0x468] sm:$0xff] %v956_v17  ;;  %v960_v50 = vld [vmem:[%s16976_s6 + $0x478] sm:$0xff] }
  0xd6   :  { %959 = vst [vmem:[#allocation3 + $0x470] sm:$0xff] %v958_v49  ;;  %961 = vst [vmem:[#allocation3 + $0x478] sm:$0xff] %v960_v50 }
  0xd7   :  { %969 = vsyncadd [#allocation4 + $0x1], 18432  ;;  %v11795_v51 = vld [vmem:[%s16971_s1 + $0x74] ss:$8 sps:$4 sm:$0xff]   ;;  %v11797_v48 = vld [vmem:[%s16971_s1 + $0x70] ss:$8 sps:$4 sm:$0xff]  }
  0xd8   :  { %v17209_v18 = vmov 0   ;;  %v11798_v16 = vld [vmem:[%s16971_s1 + $0x64] ss:$8 sps:$4 sm:$0xff]   ;;  %1368 = vmatprep.subr.bf16.mxu0 %v11795_v51  ;;  %v11800_v17 = vld [vmem:[%s16971_s1 + $0x60] ss:$8 sps:$4 sm:$0xff]   ;;  %vm1361_vm0 = vcmask 1046528  }
  0xd9   :  { %1513 = vmatprep.mubr.bf16.mxu1 %v17209_v18  ;;  %1369 = vmatpush1.bf16.msra.mxu0 %v11797_v48  ;;  %v11801_v49 = vld [vmem:[%s16971_s1 + $0x54] ss:$8 sps:$4 sm:$0xff]   ;;  %v11803_v50 = vld [vmem:[%s16971_s1 + $0x50] ss:$8 sps:$4 sm:$0xff]   ;;  %v11804_v51 = vld [vmem:[%s16971_s1 + $0x44] ss:$8 sps:$4 sm:$0xff]  }
  0xda   :  { %1370 = vmatprep.subr.bf16.mxu0 %v11798_v16  ;;  %v11806_v48 = vld [vmem:[%s16971_s1 + $0x40] ss:$8 sps:$4 sm:$0xff]   ;;  %v11807_v16 = vld [vmem:[%s16971_s1 + $0x34] ss:$8 sps:$4 sm:$0xff]   ;;  %vm1336_vm1 = vcmask 113664  }
  0xdb   :  { %v11845_v19 = vld [vmem:[%s16970_s0 + $0x8] ss:$12 sps:$4 sm:$0xff]   ;;  %v1036_v20 = vld [vmem:[%s16972_s2] sm:$0x3]  ;;  %v12027_v25 = vmov 1966171168  }
  0xdc   :  { %v1967_v58 = vunpack.c.l.s4 %v12027_v25 }
  0xdd   :  { %1371 = vmatpush1.bf16.msra.mxu0 %v11800_v17  ;;  %v11809_v17 = vld [vmem:[%s16971_s1 + $0x30] ss:$8 sps:$4 sm:$0xff]  }
  0xde   :  { %1372 = vmatprep.subr.bf16.mxu0 %v11801_v49  ;;  %v11810_v49 = vld [vmem:[%s16971_s1 + $0x24] ss:$8 sps:$4 sm:$0xff]   ;;  %v1968_v28 = vunpack.c.0.s8 %v1967_v58 }
  0xe1   :  { %1373 = vmatpush1.bf16.msra.mxu0 %v11803_v50  ;;  %v11812_v50 = vld [vmem:[%s16971_s1 + $0x20] ss:$8 sps:$4 sm:$0xff]  }
  0xe2   :  { %1374 = vmatprep.subr.bf16.mxu0 %v11804_v51  ;;  %v11839_v51 = vld [vmem:[%s16971_s1 + $0x104] ss:$8 sps:$4 sm:$0x7f]  }
  0xe3   :  { %10926 = vmatprep.subr.msk.bf16.mxu1 %vm1361_vm0, %v11839_v51  ;;  %v11849_v51 = vld [vmem:[%s16970_s0 + $0x4] ss:$12 sps:$4 sm:$0xff]  }
  0xe4   :  { %1400 = vmatprep.mubr.bf16.mxu0 %v11849_v51  ;;  %v11825_v51 = vld [vmem:[%s16971_s1 + $0xd4] ss:$8 sps:$4 sm:$0xff]  }
  0xe5   :  { %1375 = vmatpush1.bf16.msra.mxu0 %v11806_v48  ;;  %v11813_v48 = vld [vmem:[%s16971_s1 + $0x14] ss:$8 sps:$4 sm:$0xff]  }
  0xe6   :  { %1376 = vmatprep.subr.bf16.mxu0 %v11807_v16  ;;  %v11842_v16 = vld [vmem:[%s16971_s1 + $0x100] ss:$8 sps:$4 sm:$0x7f]  }
  0xe7   :  { %v1363_v18 = vsel %vm1361_vm0, %v11842_v16, 0  ;;  %v17637_v16 = vmov 0  }
  0xe8   :  { %1496 = vmatpush1.bf16.msra.mxu1 %v1363_v18  ;;  %v11819_v18 = vld [vmem:[%s16971_s1 + $0xf4] ss:$8 sps:$4 sm:$0xff]  }
  0xe9   :  { %1377 = vmatpush1.bf16.msra.mxu0 %v11809_v17  ;;  %v11815_v17 = vld [vmem:[%s16971_s1 + $0x10] ss:$8 sps:$4 sm:$0xff]  }
  0xea   :  { %1378 = vmatprep.subr.bf16.mxu0 %v11810_v49  ;;  %v11816_v49 = vld [vmem:[%s16971_s1 + $0x4] ss:$8 sps:$4 sm:$0xff]  }
  0xeb   :  { %10927 = vmatmul.mubr.msk.bf16.vlgmr.msra.gmra.mxu1 %vm1336_vm1, %v11845_v19  ;;  %v11821_v19 = vld [vmem:[%s16971_s1 + $0xf0] ss:$8 sps:$4 sm:$0xff]  }
  0xec   :  { %1523 = vmatprep.mubr.bf16.mxu1 %v17637_v16 }
  0xed   :  { %1379 = vmatpush1.bf16.msra.mxu0 %v11812_v50  ;;  %v11818_v50 = vld [vmem:[%s16971_s1] ss:$8 sps:$4 sm:$0xff]  }
  0xee   :  { %1380 = vmatprep.subr.bf16.mxu0 %v11813_v48  ;;  %v11850_v48 = vld [vmem:[%s16970_s0 + $0x20] ss:$12 sps:$4 sm:$0xff]  }
  0xf1   :  { %1381 = vmatpush1.bf16.msra.mxu0 %v11815_v17  ;;  %v11822_v17 = vld [vmem:[%s16971_s1 + $0xe4] ss:$8 sps:$4 sm:$0xff]  }
  0xf2   :  { %1382 = vmatprep.subr.bf16.mxu0 %v11816_v49  ;;  %v11824_v49 = vld [vmem:[%s16971_s1 + $0xe0] ss:$8 sps:$4 sm:$0xff]  }
  0xf3   :  { %10928 = vmatmul.mubr.msk.bf16.gmra.mxu1 %vm1336_vm1, %v11850_v48  ;;  %v11828_v48 = vld [vmem:[%s16971_s1 + $0xc4] ss:$8 sps:$4 sm:$0xff]  }
  0xf4   :  { %1533 = vmatprep.mubr.bf16.mxu1 %v17637_v16 }
  0xf5   :  { %1383 = vmatpush1.bf16.msra.mxu0 %v11818_v50  ;;  %v11854_v50 = vld [vmem:[%s16970_s0 + $0x38] ss:$12 sps:$4 sm:$0xff]  }
  0xf6   :  { %1384 = vmatprep.subr.bf16.mxu0 %v11819_v18  ;;  %v11827_v18 = vld [vmem:[%s16971_s1 + $0xd0] ss:$8 sps:$4 sm:$0xff]  }
  0xf9   :  { %1385 = vmatpush2.bf16.msra.mxu0 %v11821_v19  ;;  %v11830_v19 = vld [vmem:[%s16971_s1 + $0xc0] ss:$8 sps:$4 sm:$0xff]  }
  0xfa   :  { %1386 = vmatprep.subr.bf16.mxu0 %v11822_v17  ;;  %v11831_v17 = vld [vmem:[%s16971_s1 + $0xb4] ss:$8 sps:$4 sm:$0xff]  }
  0xfb   :  { %10929 = vmatmul.mubr.msk.bf16.gmra.mxu1 %vm1336_vm1, %v11854_v50  ;;  %v11834_v50 = vld [vmem:[%s16971_s1 + $0xa4] ss:$8 sps:$4 sm:$0xff]  }
  0xfc   :  { %1543 = vmatprep.mubr.bf16.mxu1 %v17637_v16 }
  0xfd   :  { %1387 = vmatpush2.bf16.msra.mxu0 %v11824_v49  ;;  %v11858_v49 = vld [vmem:[%s16970_s0 + $0x50] ss:$12 sps:$4 sm:$0xff]  }
  0xfe   :  { %1388 = vmatprep.subr.bf16.mxu0 %v11825_v51  ;;  %v11833_v51 = vld [vmem:[%s16971_s1 + $0xb0] ss:$8 sps:$4 sm:$0xff]  }
 0x101   :  { %1389 = vmatpush2.bf16.msra.mxu0 %v11827_v18  ;;  %v11836_v18 = vld [vmem:[%s16971_s1 + $0xa0] ss:$8 sps:$4 sm:$0xff]  }
 0x102   :  { %1390 = vmatprep.subr.bf16.mxu0 %v11828_v48  ;;  %v11837_v48 = vld [vmem:[%s16971_s1 + $0x94] ss:$8 sps:$4 sm:$0xff]  }
 0x103   :  { %10930 = vmatmul.mubr.msk.bf16.gmra.mxu1 %vm1336_vm1, %v11858_v49  ;;  %v11843_v49 = vld [vmem:[%s16971_s1 + $0x84] ss:$8 sps:$4 sm:$0xff]  }
 0x104   :  { %1553 = vmatprep.mubr.bf16.mxu1 %v17637_v16 }
 0x105   :  { %1391 = vmatpush2.bf16.msra.mxu0 %v11830_v19  ;;  %v11862_v19 = vld [vmem:[%s16970_s0 + $0x68] ss:$12 sps:$4 sm:$0xff]  }
 0x106   :  { %1392 = vmatprep.subr.bf16.mxu0 %v11831_v17  ;;  %v11841_v17 = vld [vmem:[%s16971_s1 + $0x90] ss:$8 sps:$4 sm:$0xff]  }
 0x109   :  { %1393 = vmatpush2.bf16.msra.mxu0 %v11833_v51  ;;  %v11846_v51 = vld [vmem:[%s16971_s1 + $0x80] ss:$8 sps:$4 sm:$0xff]  }
 0x10a   :  { %1394 = vmatprep.subr.bf16.mxu0 %v11834_v50  ;;  %v11847_v50 = vld [vmem:[%s16970_s0] ss:$12 sps:$4 sm:$0xff]  }
 0x10b   :  { %10931 = vmatmul.mubr.msk.bf16.gmra.mxu1 %vm1336_vm1, %v11862_v19  ;;  %v11853_v19 = vld [vmem:[%s16970_s0 + $0x18] ss:$12 sps:$4 sm:$0xff]  }
 0x10c   :  { %1563 = vmatprep.mubr.bf16.mxu1 %v17637_v16 }
 0x10d   :  { %1395 = vmatpush2.bf16.msra.mxu0 %v11836_v18  ;;  %v11866_v18 = vld [vmem:[%s16970_s0 + $0x80] ss:$12 sps:$4 sm:$0xff]  }
 0x10e   :  { %1396 = vmatprep.subr.bf16.mxu0 %v11837_v48  ;;  %v11851_v48 = vld [vmem:[%s16970_s0 + $0x1c] ss:$12 sps:$4 sm:$0xff]  }
 0x111   :  { %1397 = vmatpush2.bf16.msra.mxu0 %v11841_v17  ;;  %v11870_v17 = vld [vmem:[%s16970_s0 + $0x98] ss:$12 sps:$4 sm:$0xff]  }
 0x112   :  { %1398 = vmatprep.subr.bf16.mxu0 %v11843_v49  ;;  %v11855_v49 = vld [vmem:[%s16970_s0 + $0x34] ss:$12 sps:$4 sm:$0xff]  }
 0x113   :  { %10932 = vmatmul.mubr.msk.bf16.gmra.mxu1 %vm1336_vm1, %v11866_v18  ;;  %v11859_v18 = vld [vmem:[%s16970_s0 + $0x4c] ss:$12 sps:$4 sm:$0xff]  }
 0x114   :  { %1573 = vmatprep.mubr.bf16.mxu1 %v17637_v16 }
 0x115   :  { %1399 = vmatpush2.bf16.msra.mxu0 %v11846_v51  ;;  %v11857_v51 = vld [vmem:[%s16970_s0 + $0x30] ss:$12 sps:$4 sm:$0xff]  }
 0x118   :  { %1401 = vmatmul.mubr.bf16.vlgmr.msra.gmra.mxu0 %v11847_v50  ;;  %v11874_v50 = vld [vmem:[%s16970_s0 + $0xb0] ss:$12 sps:$4 sm:$0xff]  }
 0x119   :  { %1410 = vmatprep.mubr.bf16.mxu0 %v11851_v48  ;;  %v11861_v48 = vld [vmem:[%s16970_s0 + $0x48] ss:$12 sps:$4 sm:$0xff]  }
 0x11b   :  { %10933 = vmatmul.mubr.msk.bf16.gmra.mxu1 %vm1336_vm1, %v11870_v17  ;;  %v11865_v17 = vld [vmem:[%s16970_s0 + $0x60] ss:$12 sps:$4 sm:$0xff]  }
 0x11c   :  { %1583 = vmatprep.mubr.bf16.mxu1 %v17637_v16 }
 0x120   :  { %1411 = vmatmul.mubr.bf16.gmra.mxu0 %v11853_v19  ;;  %v11863_v19 = vld [vmem:[%s16970_s0 + $0x64] ss:$12 sps:$4 sm:$0xff]  }
 0x121   :  { %1420 = vmatprep.mubr.bf16.mxu0 %v11855_v49  ;;  %v11867_v49 = vld [vmem:[%s16970_s0 + $0x7c] ss:$12 sps:$4 sm:$0xff]  }
 0x123   :  { %10934 = vmatmul.mubr.msk.bf16.gmra.mxu1 %vm1336_vm1, %v11874_v50  ;;  %v11871_v50 = vld [vmem:[%s16970_s0 + $0x94] ss:$12 sps:$4 sm:$0xff]  }
 0x128   :  { %1421 = vmatmul.mubr.bf16.gmra.mxu0 %v11857_v51  ;;  %v11869_v51 = vld [vmem:[%s16970_s0 + $0x78] ss:$12 sps:$4 sm:$0xff]  }
 0x129   :  { %1430 = vmatprep.mubr.bf16.mxu0 %v11859_v18  ;;  %v11873_v18 = vld [vmem:[%s16970_s0 + $0x90] ss:$12 sps:$4 sm:$0xff]  }
 0x130   :  { %1431 = vmatmul.mubr.bf16.gmra.mxu0 %v11861_v48  ;;  %v11875_v48 = vld [vmem:[%s16970_s0 + $0xac] ss:$12 sps:$4 sm:$0xff]  }
 0x131   :  { %1440 = vmatprep.mubr.bf16.mxu0 %v11863_v19  ;;  %v11877_v19 = vld [vmem:[%s16970_s0 + $0xa8] ss:$12 sps:$4 sm:$0xff]  }
 0x138   :  { %1441 = vmatmul.mubr.bf16.gmra.mxu0 %v11865_v17 }
 0x139   :  { %1450 = vmatprep.mubr.bf16.mxu0 %v11867_v49  ;;  %v1038_v49 = vlaneseq }
 0x140   :  { %1451 = vmatmul.mubr.bf16.gmra.mxu0 %v11869_v51  ;;  %v14131_v51 = vshrl.u32 %v1038_v49, 7 }
 0x141   :  { %1460 = vmatprep.mubr.bf16.mxu0 %v11871_v50 }
 0x142   :  { %17638 = vst [vmem:[#allocation275_spill] sm:$0xff] %v14131_v51  ;;  %v17225_v50 = vsub.s32 0, %v14131_v51 }
 0x148   :  { %1461 = vmatmul.mubr.bf16.gmra.mxu0 %v11873_v18  ;;  %v17230_v18 = vsub.s32 1, %v14131_v51 }
 0x149   :  { %1470 = vmatprep.mubr.bf16.mxu0 %v11875_v48  ;;  %v14140_v48 = vrot.slane %v1036_v20, %v17225_v50 }
 0x14a   :  { %v14144_v54 = vrot.slane %v1036_v20, %v17230_v18 }
 0x150   :  { %1471 = vmatmul.mubr.bf16.gmra.mxu0 %v11877_v19 }
 0x1ab   :  { %v1515_v17 = vpop.f32.mrf.mxu1 }
 0x1ad   :  { %v1517_v52 = vpop.f32.mrf.mxu1 }
 0x1af   :  { %v1519_v53 = vpop.f32.mrf.mxu1 }
 0x1b1   :  { %v1521_v21 = vpop.f32.mrf.mxu1 }
 0x1b3   :  { %v1525_v22 = vpop.f32.mrf.mxu1 }
 0x1b5   :  { %v1527_v27 = vpop.f32.mrf.mxu1 }
 0x1d8   :  { %v1402_v19 = vpop.f32.mrf.mxu0 }
 0x1d9   :  { %v1403_v55 = vadd.f32 %v1402_v19, %v14140_v48 }
 0x1da   :  { %v1404_v49 = vpop.f32.mrf.mxu0 }
 0x1db   :  { %v1405_v56 = vadd.f32 %v1404_v49, %v14144_v54  ;;  %v1516_v50 = vadd.f32 %v1515_v17, %v1403_v55 }
 0x1dc   :  { %v1406_v23 = vpop.f32.mrf.mxu0 }
 0x1dd   :  { %v1407_v57 = vadd.f32 %v1406_v23, %v14140_v48  ;;  %v1518_v20 = vadd.f32 %v1517_v52, %v1405_v56  ;;  %v1529_v23 = vpop.f32.mrf.mxu1 }
 0x1de   :  { %v1408_v24 = vpop.f32.mrf.mxu0 }
 0x1df   :  { %v1520_v59 = vadd.f32 %v1519_v53, %v1407_v57  ;;  %v1409_v26 = vadd.f32 %v1408_v24, %v14144_v54  ;;  %v14155_v57 = vsub.s32 %v1968_v28, %v14131_v51  ;;  %v1531_v17 = vpop.f32.mrf.mxu1 }
 0x1e0   :  { %v1412_v60 = vpop.f32.mrf.mxu0 }
 0x1e1   :  { %v1594_v18 = vpack.c.bf16 %v1520_v59, %v1516_v50  ;;  %v1522_v61 = vadd.f32 %v1521_v21, %v1409_v26  ;;  %v1413_v19 = vadd.f32 %v1412_v60, %v14140_v48  ;;  %v1535_v34 = vpop.f32.mrf.mxu1 }
 0x1e2   :  { %v1414_v29 = vpop.f32.mrf.mxu0 }
 0x1e3   :  { %v1610_v49 = vmax.bf16 %v17637_v16, %v1594_v18  ;;  %v1595_v62 = vpack.c.bf16 %v1522_v61, %v1518_v20  ;;  %v1415_v63 = vadd.f32 %v1414_v29, %v14144_v54  ;;  %v1526_v52 = vadd.f32 %v1525_v22, %v1413_v19 }
 0x1e4   :  { %v1416_v25 = vpop.f32.mrf.mxu0 }
 0x1e5   :  { %v10935_v55 = vcombine.low %v1610_v49, %v1610_v49  ;;  %v10937_v53 = vcombine.high %v1610_v49, %v1610_v49  ;;  %v1611_v24 = vmax.bf16 %v17637_v16, %v1595_v62  ;;  %v14157_v21 = vadd.f32 %v1527_v27, %v1415_v63 }
 0x1e6   :  { %v1417_v26 = vadd.f32 %v1416_v25, %v14140_v48  ;;  %v1418_v56 = vpop.f32.mrf.mxu0 }
 0x1e7   :  { %v1699_v58 = vshrl.u32 %v10935_v55, 16  ;;  %v1701_v59 = vshll.u32 %v10935_v55, 16  ;;  %v1713_v60 = vshrl.u32 %v10937_v53, 16  ;;  %v1715_v61 = vshll.u32 %v10937_v53, 16 }
 0x1e8   :  { %v1866_v29 = vrot.slane %v10935_v55, 1  ;;  %v1868_v50 = vrot.slane %v10937_v53, 1  ;;  %v10936_v18 = vcombine.low %v1611_v24, %v1611_v24  ;;  %v10938_v20 = vcombine.high %v1611_v24, %v1611_v24  ;;  %v1422_v30 = vpop.f32.mrf.mxu0 }
 0x1e9   :  { %v1703_v62 = vrot.slane %v1701_v59, 1  ;;  %v1717_v31 = vrot.slane %v1715_v61, 1  ;;  %v10967_v28 = vcombine.low %v1610_v49, %v1611_v24  ;;  %v10968_v51 = vcombine.high %v1610_v49, %v1611_v24 }
 0x1ea   :  { %v1706_v22 = vshrl.u32 %v10936_v18, 16  ;;  %v1708_v27 = vshll.u32 %v10936_v18, 16  ;;  %v1720_v63 = vshrl.u32 %v10938_v20, 16  ;;  %v1722_v19 = vshll.u32 %v10938_v20, 16  ;;  %v1424_v25 = vpop.f32.mrf.mxu0 }
 0x1eb   :  { %v1704_v32 = vor.u32 %v1703_v62, %v1699_v58  ;;  %v1718_v33 = vor.u32 %v1717_v31, %v1713_v60  ;;  %v1867_v0 = vrot.slane %v10936_v18, 1  ;;  %v1869_v1 = vrot.slane %v10938_v20, 1 }
 0x1ec   :  { %v1710_v35 = vrot.slane %v1708_v27, 1  ;;  %v1724_v55 = vrot.slane %v1722_v19, 1  ;;  %v1972_v53 = vrot.slane %v10967_v28, %v14155_v57  ;;  %v1993_v2 = vrot.slane %v10968_v51, %v14155_v57  ;;  %v1426_v59 = vpop.f32.mrf.mxu0  ;;  %v1537_v51 = vpop.f32.mrf.mxu1 }
 0x1ed   :  { %v1964_v61 = vcombine.low %v1866_v29, %v1867_v0  ;;  %v2030_v3 = vcombine.low %v1868_v50, %v1869_v1  ;;  %v1530_v49 = vadd.f32 %v1529_v23, %v1417_v26  ;;  %v1419_v24 = vadd.f32 %v1418_v56, %v14144_v54 }
 0x1ee   :  { %v1711_v36 = vor.u32 %v1710_v35, %v1706_v22  ;;  %v1725_v37 = vor.u32 %v1724_v55, %v1720_v63  ;;  %v1423_v58 = vadd.f32 %v1422_v30, %v14140_v48  ;;  %v1425_v31 = vadd.f32 %v1424_v25, %v14144_v54  ;;  %v1428_v28 = vpop.f32.mrf.mxu0 }
 0x1ef   :  { %v1986_v60 = vrot.slane %v1964_v61, %v14155_v57  ;;  %v14167_v18 = vrot.slane %v2030_v3, %v14155_v57  ;;  %v1596_v20 = vpack.c.bf16 %v1530_v49, %v1526_v52  ;;  %v1532_v62 = vadd.f32 %v1531_v17, %v1419_v24 }
 0x1f0   :  { %v1963_v0 = vcombine.low %v1704_v32, %v1711_v36  ;;  %v2029_v1 = vcombine.low %v1718_v33, %v1725_v37  ;;  %v1536_v23 = vadd.f32 %v1535_v34, %v1423_v58  ;;  %v14169_v26 = vadd.f32 %v1537_v51, %v1425_v31  ;;  %v1539_v58 = vpop.f32.mrf.mxu1 }
 0x1f1   :  { %v1996_v35 = vcombine.low %v1986_v60, %v1993_v2  ;;  %v1997_v56 = vcombine.high %v1986_v60, %v1993_v2  ;;  %v1612_v30 = vmax.bf16 %v17637_v16, %v1596_v20  ;;  %v1597_v29 = vpack.c.bf16 %v1532_v62, %v14157_v21 }
 0x1f2   :  { %v1979_v50 = vrot.slane %v1963_v0, %v14155_v57  ;;  %v2039_v3 = vrot.slane %v2029_v1, %v14155_v57  ;;  %v1427_v52 = vadd.f32 %v1426_v59, %v14140_v48  ;;  %v1429_v17 = vadd.f32 %v1428_v28, %v14144_v54  ;;  %v1432_v0 = vpop.f32.mrf.mxu0 }
 0x1f3   :  { %v14178_v32 = vrot.slane %v1996_v35, %v14155_v57  ;;  %v14181_v33 = vrot.slane %v1997_v56, %v14155_v57  ;;  %v10939_v34 = vcombine.low %v1612_v30, %v1612_v30  ;;  %v10941_v36 = vcombine.high %v1612_v30, %v1612_v30 }
 0x1f4   :  { %v1994_v37 = vcombine.low %v1972_v53, %v1979_v50  ;;  %v1995_v22 = vcombine.high %v1972_v53, %v1979_v50  ;;  %v2061_v21 = vcombine.low %v2039_v3, %v14167_v18  ;;  %v2062_v27 = vcombine.high %v2039_v3, %v14167_v18 }
 0x1f5   :  { %17639 = vst [vmem:[#allocation276_spill] sm:$0xff] %v14178_v32  ;;  %17640 = vst [vmem:[#allocation277_spill] sm:$0xff] %v14181_v33  ;;  %v2120_v63 = vcombine.low %v1993_v2, %v2039_v3  ;;  %v2121_v19 = vcombine.high %v1993_v2, %v2039_v3  ;;  %v1727_v25 = vshrl.u32 %v10939_v34, 16  ;;  %v1729_v55 = vshll.u32 %v10939_v34, 16 }
 0x1f6   :  { %v14186_v59 = vrot.slane %v1994_v37, %v14155_v57  ;;  %v14189_v61 = vrot.slane %v1995_v22, %v14155_v57  ;;  %v14192_v49 = vrot.slane %v2062_v27, %v14155_v57  ;;  %v1741_v24 = vshrl.u32 %v10941_v36, 16 }
 0x1f7   :  { %v14195_v53 = vrot.slane %v2120_v63, %v14155_v57  ;;  %v14198_v31 = vrot.slane %v2121_v19, %v14155_v57  ;;  %v1731_v2 = vrot.slane %v1729_v55, 1  ;;  %v1743_v60 = vshll.u32 %v10941_v36, 16  ;;  %v1541_v63 = vpop.f32.mrf.mxu1 }
 0x1f8   :  { %17641 = vst [vmem:[#allocation278_spill] sm:$0xff] %v14186_v59  ;;  %17642 = vst [vmem:[#allocation279_spill] sm:$0xff] %v14189_v61  ;;  %v1870_v62 = vrot.slane %v10939_v34, 1  ;;  %v1872_v51 = vrot.slane %v10941_v36, 1  ;;  %v1613_v28 = vmax.bf16 %v17637_v16, %v1597_v29  ;;  %v14204_v56 = vrot.slane %v2061_v21, %v14155_v57 }
 0x1f9   :  { %17643 = vst [vmem:[#allocation280_spill] sm:$0xff] %v14192_v49  ;;  %17644 = vst [vmem:[#allocation281_spill] sm:$0xff] %v14195_v53  ;;  %v1732_v1 = vor.u32 %v1731_v2, %v1727_v25  ;;  %v1745_v35 = vrot.slane %v1743_v60, 1  ;;  %v1540_v50 = vadd.f32 %v1539_v58, %v1427_v52  ;;  %v14206_v49 = vadd.f32 %v1541_v63, %v1429_v17 }
 0x1fa   :  { %17645 = vst [vmem:[#allocation282_spill] sm:$0xff] %v14198_v31  ;;  %17646 = vst [vmem:[#allocation283_spill] sm:$0xff] %v14204_v56  ;;  %v10940_v3 = vcombine.low %v1613_v28, %v1613_v28  ;;  %v10942_v37 = vcombine.high %v1613_v28, %v1613_v28  ;;  %v10969_v22 = vcombine.low %v1612_v30, %v1613_v28 }
 0x1fb   :  { %v10970_v27 = vcombine.high %v1612_v30, %v1613_v28  ;;  %v1746_v19 = vor.u32 %v1745_v35, %v1741_v24  ;;  %v1598_v55 = vpack.c.bf16 %v1540_v50, %v1536_v23  ;;  %v14209_v34 = vadd.f32 %v1432_v0, %v14140_v48 }
 0x1fc   :  { %v1734_v29 = vshrl.u32 %v10940_v3, 16  ;;  %v1736_v36 = vshll.u32 %v10940_v3, 16  ;;  %v1748_v25 = vshrl.u32 %v10942_v37, 16  ;;  %v1750_v2 = vshll.u32 %v10942_v37, 16 }
 0x1fd   :  { %v1871_v60 = vrot.slane %v10940_v3, 1  ;;  %v1873_v21 = vrot.slane %v10942_v37, 1  ;;  %v2053_v52 = vrot.slane %v10969_v22, %v14155_v57  ;;  %v2163_v58 = vrot.slane %v10970_v27, %v14155_v57 }
 0x1fe   :  { %v1738_v20 = vrot.slane %v1736_v36, 1  ;;  %v1752_v30 = vrot.slane %v1750_v2, 1  ;;  %v14214_v24 = vmax.bf16 %v17637_v16, %v1598_v55  ;;  %v1545_v2 = vpop.f32.mrf.mxu1 }
 0x1ff   :  { %v2096_v17 = vcombine.low %v1870_v62, %v1871_v60  ;;  %v2122_v28 = vcombine.low %v14167_v18, %v2053_v52  ;;  %v2123_v0 = vcombine.high %v14167_v18, %v2053_v52  ;;  %v2206_v35 = vcombine.low %v1872_v51, %v1873_v21 }
 0x200   :  { %v1739_v50 = vor.u32 %v1738_v20, %v1734_v29  ;;  %v1753_v3 = vor.u32 %v1752_v30, %v1748_v25  ;;  %v14222_v37 = vcombine.low %v14214_v24, %v14214_v24  ;;  %v14226_v22 = vcombine.high %v14214_v24, %v14214_v24 }
 0x201   :  { %v2103_v27 = vrot.slane %v2096_v17, %v14155_v57  ;;  %v14230_v63 = vrot.slane %v2122_v28, %v14155_v57  ;;  %v14233_v62 = vrot.slane %v2123_v0, %v14155_v57  ;;  %v14236_v18 = vrot.slane %v2206_v35, %v14155_v57 }
 0x202   :  { %v2032_v20 = vcombine.low %v1732_v1, %v1739_v50  ;;  %v2156_v51 = vcombine.low %v1746_v19, %v1753_v3  ;;  %v1755_v55 = vshrl.u32 %v14222_v37, 16  ;;  %v1757_v29 = vshll.u32 %v14222_v37, 16 }
 0x203   :  { %17647 = vst [vmem:[#allocation284_spill] sm:$0xff] %v14230_v63  ;;  %17648 = vst [vmem:[#allocation285_spill] sm:$0xff] %v14233_v62  ;;  %v2104_v36 = vcombine.high %v2103_v27, %v2103_v27  ;;  %v14241_v25 = vrot.slane %v2103_v27, %v14155_v57  ;;  %v2214_v30 = vcombine.high %v14236_v18, %v14236_v18  ;;  %v1771_v56 = vshll.u32 %v14226_v22, 16 }
 0x204   :  { %v2060_v21 = vrot.slane %v2032_v20, %v14155_v57  ;;  %v2170_v19 = vrot.slane %v2156_v51, %v14155_v57  ;;  %v14260_v0 = vrot.slane %v14236_v18, %v14155_v57  ;;  %v2230_v35 = vcombine.low %v2103_v27, %v2163_v58  ;;  %v1434_v51 = vpop.f32.mrf.mxu0 }
 0x205   :  { %17649 = vst [vmem:[#allocation286_spill] sm:$0xff] %v14241_v25  ;;  %v14254_v17 = vrot.slane %v2104_v36, %v14155_v57  ;;  %v14263_v62 = vrot.slane %v2214_v30, %v14155_v57 }
 0x206   :  { %17651 = vst [vmem:[#allocation288_spill] sm:$0xff] %v14260_v0  ;;  %v2063_v50 = vcombine.low %v2053_v52, %v2060_v21  ;;  %v2064_v3 = vcombine.high %v2053_v52, %v2060_v21  ;;  %v2171_v20 = vcombine.low %v2060_v21, %v2103_v27  ;;  %v2172_v1 = vcombine.high %v2060_v21, %v2103_v27  ;;  %v1436_v33 = vpop.f32.mrf.mxu0 }
 0x207   :  { %17650 = vst [vmem:[#allocation287_spill] sm:$0xff] %v14254_v17  ;;  %v2173_v60 = vcombine.low %v2163_v58, %v2170_v19  ;;  %v2174_v23 = vcombine.high %v2163_v58, %v2170_v19  ;;  %17652 = vst [vmem:[#allocation289_spill] sm:$0xff] %v14263_v62  ;;  %v2231_v62 = vcombine.high %v2103_v27, %v2163_v58  ;;  %v1769_v0 = vshrl.u32 %v14226_v22, 16 }
 0x208   :  { %v14268_v28 = vrot.slane %v2063_v50, %v14155_v57  ;;  %v14271_v25 = vrot.slane %v2064_v3, %v14155_v57  ;;  %v14274_v52 = vrot.slane %v2171_v20, %v14155_v57  ;;  %v14277_v21 = vrot.slane %v2172_v1, %v14155_v57  ;;  %v1547_v1 = vpop.f32.mrf.mxu1 }
 0x209   :  { %v14280_v17 = vrot.slane %v2173_v60, %v14155_v57  ;;  %v14283_v30 = vrot.slane %v2174_v23, %v14155_v57  ;;  %v14286_v36 = vrot.slane %v2230_v35, %v14155_v57  ;;  %v2266_v3 = vcombine.high %v2170_v19, %v14236_v18 }
 0x20a   :  { %17653 = vst [vmem:[#allocation290_spill] sm:$0xff] %v14268_v28  ;;  %17654 = vst [vmem:[#allocation291_spill] sm:$0xff] %v14271_v25  ;;  %v1759_v20 = vrot.slane %v1757_v29, 1  ;;  %v14299_v27 = vrot.slane %v2231_v62, %v14155_v57  ;;  %v1874_v60 = vrot.slane %v14222_v37, 1  ;;  %v1876_v25 = vrot.slane %v14226_v22, 1 }
 0x20b   :  { %17655 = vst [vmem:[#allocation292_spill] sm:$0xff] %v14274_v52  ;;  %17656 = vst [vmem:[#allocation293_spill] sm:$0xff] %v14277_v21  ;;  %v14304_v29 = vrot.slane %v2266_v3, %v14155_v57  ;;  %v17662_v23 = vpack.c.bf16 %v14206_v49, %v14169_v26  ;;  %v2265_v62 = vcombine.low %v2170_v19, %v14236_v18  ;;  %v1773_v21 = vrot.slane %v1771_v56, 1  ;;  %v1549_v52 = vpop.f32.mrf.mxu1 }
 0x20c   :  { %17657 = vst [vmem:[#allocation294_spill] sm:$0xff] %v14280_v17  ;;  %17658 = vst [vmem:[#allocation295_spill] sm:$0xff] %v14283_v30  ;;  %v1760_v50 = vor.u32 %v1759_v20, %v1755_v55  ;;  %v1546_v35 = vadd.f32 %v1545_v2, %v14209_v34  ;;  %v1435_v3 = vadd.f32 %v1434_v51, %v14144_v54  ;;  %v1438_v20 = vpop.f32.mrf.mxu0 }
 0x20d   :  { %17659 = vst [vmem:[#allocation296_spill] sm:$0xff] %v14286_v36  ;;  %17660 = vst [vmem:[#allocation297_spill] sm:$0xff] %v14299_v27  ;;  %v1615_v58 = vmax.bf16 %v17637_v16, %v17662_v23  ;;  %v1437_v55 = vadd.f32 %v1436_v33, %v14140_v48  ;;  %v14319_v27 = vrot.slane %v2265_v62, %v14155_v57  ;;  %v1551_v63 = vpop.f32.mrf.mxu1 }
 0x20e   :  { %17661 = vst [vmem:[#allocation298_spill] sm:$0xff] %v14304_v29  ;;  %v1774_v26 = vor.u32 %v1773_v21, %v1769_v0  ;;  %v14322_v19 = vadd.f32 %v1547_v1, %v1435_v3  ;;  %v14328_v62 = vpop.f32.mrf.mxu0  ;;  %v1439_v1 = vadd.f32 %v1438_v20, %v14144_v54 }
 0x20f   :  { %v10944_v29 = vcombine.low %v1615_v58, %v1615_v58  ;;  %v10946_v37 = vcombine.high %v1615_v58, %v1615_v58  ;;  %v10971_v22 = vcombine.low %v14214_v24, %v1615_v58  ;;  %17663 = vst [vmem:[#allocation299_spill] sm:$0xff] %v14319_v27  ;;  %v10972_v49 = vcombine.high %v14214_v24, %v1615_v58 }
 0x210   :  { %v1550_v56 = vadd.f32 %v1549_v52, %v1437_v55 }
 0x211   :  { %v1762_v34 = vshrl.u32 %v10944_v29, 16  ;;  %v1764_v2 = vshll.u32 %v10944_v29, 16  ;;  %v1776_v23 = vshrl.u32 %v10946_v37, 16  ;;  %v1778_v51 = vshll.u32 %v10946_v37, 16 }
 0x212   :  { %v1875_v36 = vrot.slane %v10944_v29, 1  ;;  %v1877_v33 = vrot.slane %v10946_v37, 1  ;;  %v2257_v28 = vrot.slane %v10971_v22, %v14155_v57  ;;  %v14326_v31 = vrot.slane %v10972_v49, %v14155_v57 }
 0x213   :  { %v1766_v0 = vrot.slane %v1764_v2, 1  ;;  %v1780_v21 = vrot.slane %v1778_v51, 1  ;;  %v1600_v24 = vpack.c.bf16 %v1550_v56, %v1546_v35  ;;  %v14336_v49 = vadd.f32 %v1551_v63, %v1439_v1 }
 0x214   :  { %v2300_v52 = vcombine.low %v1874_v60, %v1875_v36  ;;  %v2324_v58 = vcombine.low %v14236_v18, %v2257_v28  ;;  %v2325_v3 = vcombine.high %v14236_v18, %v2257_v28  ;;  %v2394_v29 = vcombine.low %v1876_v25, %v1877_v33  ;;  %v14348_v18 = vpop.f32.mrf.mxu1  ;;  %v1444_v25 = vpop.f32.mrf.mxu0 }
 0x215   :  { %v1767_v55 = vor.u32 %v1766_v0, %v1762_v34  ;;  %v1781_v37 = vor.u32 %v1780_v21, %v1776_v23  ;;  %v14334_v22 = vmax.bf16 %v17637_v16, %v1600_v24 }
 0x216   :  { %v2307_v32 = vrot.slane %v2300_v52, %v14155_v57  ;;  %v14340_v2 = vrot.slane %v2324_v58, %v14155_v57  ;;  %v14343_v35 = vrot.slane %v2325_v3, %v14155_v57  ;;  %v14346_v36 = vrot.slane %v2394_v29, %v14155_v57  ;;  %v1557_v3 = vpop.f32.mrf.mxu1  ;;  %v1446_v29 = vpop.f32.mrf.mxu0 }
 0x217   :  { %v2250_v60 = vcombine.low %v1760_v50, %v1767_v55  ;;  %v2344_v20 = vcombine.low %v1774_v26, %v1781_v37  ;;  %v14352_v63 = vcombine.low %v14334_v22, %v14334_v22  ;;  %v14356_v56 = vcombine.high %v14334_v22, %v14334_v22 }
 0x218   :  { %17664 = vst [vmem:[#allocation300_spill] sm:$0xff] %v14340_v2  ;;  %17665 = vst [vmem:[#allocation301_spill] sm:$0xff] %v14343_v35  ;;  %v2308_v34 = vcombine.high %v2307_v32, %v2307_v32  ;;  %v14359_v23 = vrot.slane %v2307_v32, %v14155_v57  ;;  %v2402_v21 = vcombine.high %v14346_v36, %v14346_v36 }
 0x219   :  { %v2264_v50 = vrot.slane %v2250_v60, %v14155_v57  ;;  %v2358_v0 = vrot.slane %v2344_v20, %v14155_v57  ;;  %v14378_v52 = vrot.slane %v14346_v36, %v14155_v57  ;;  %v2418_v58 = vcombine.low %v2307_v32, %v14326_v31 }
 0x21a   :  { %17666 = vst [vmem:[#allocation302_spill] sm:$0xff] %v14359_v23  ;;  %v14372_v24 = vrot.slane %v2308_v34, %v14155_v57  ;;  %v14384_v51 = vrot.slane %v2402_v21, %v14155_v57  ;;  %v2419_v1 = vcombine.high %v2307_v32, %v14326_v31  ;;  %v1922_v30 = vrot.slane %v14352_v63, 1 }
 0x21b   :  { %17668 = vst [vmem:[#allocation304_spill] sm:$0xff] %v14378_v52  ;;  %v2267_v55 = vcombine.low %v2257_v28, %v2264_v50  ;;  %v2268_v37 = vcombine.high %v2257_v28, %v2264_v50  ;;  %v2359_v60 = vcombine.low %v2264_v50, %v2307_v32  ;;  %v2360_v20 = vcombine.high %v2264_v50, %v2307_v32 }
 0x21c   :  { %17667 = vst [vmem:[#allocation303_spill] sm:$0xff] %v14372_v24  ;;  %v2361_v26 = vcombine.low %v14326_v31, %v2358_v0  ;;  %v2362_v34 = vcombine.high %v14326_v31, %v2358_v0  ;;  %17669 = vst [vmem:[#allocation305_spill] sm:$0xff] %v14384_v51  ;;  %v1559_v51 = vpop.f32.mrf.mxu1  ;;  %v2454_v52 = vcombine.high %v2358_v0, %v14346_v36  ;;  %v1933_v2 = vshll.u32 %v14356_v56, 16 }
 0x21d   :  { %v14389_v33 = vrot.slane %v2267_v55, %v14155_v57  ;;  %v14392_v23 = vrot.slane %v2268_v37, %v14155_v57  ;;  %v14395_v28 = vrot.slane %v2359_v60, %v14155_v57  ;;  %v14398_v50 = vrot.slane %v2360_v20, %v14155_v57  ;;  %v1448_v37 = vpop.f32.mrf.mxu0 }
 0x21e   :  { %v14401_v24 = vrot.slane %v2361_v26, %v14155_v57  ;;  %v14404_v21 = vrot.slane %v2362_v34, %v14155_v57  ;;  %v14408_v55 = vrot.slane %v2418_v58, %v14155_v57  ;;  %v1895_v20 = vshrl.u32 %v14352_v63, 16 }
 0x21f   :  { %17670 = vst [vmem:[#allocation306_spill] sm:$0xff] %v14389_v33  ;;  %17671 = vst [vmem:[#allocation307_spill] sm:$0xff] %v14392_v23  ;;  %v1897_v26 = vshll.u32 %v14352_v63, 16  ;;  %v14422_v58 = vrot.slane %v2419_v1, %v14155_v57  ;;  %v14427_v27 = vrot.slane %v2454_v52, %v14155_v57  ;;  %v1931_v34 = vshrl.u32 %v14356_v56, 16  ;;  %v1561_v1 = vpop.f32.mrf.mxu1 }
 0x220   :  { %17672 = vst [vmem:[#allocation308_spill] sm:$0xff] %v14395_v28  ;;  %17673 = vst [vmem:[#allocation309_spill] sm:$0xff] %v14398_v50  ;;  %v1958_v32 = vrot.slane %v14356_v56, 1  ;;  %v1601_v31 = vpack.c.bf16 %v14336_v49, %v14322_v19  ;;  %v1452_v50 = vpop.f32.mrf.mxu0  ;;  %v2453_v60 = vcombine.low %v2358_v0, %v14346_v36  ;;  %v1443_v52 = vadd.f32 %v14328_v62, %v14140_v48 }
 0x221   :  { %17674 = vst [vmem:[#allocation310_spill] sm:$0xff] %v14404_v21  ;;  %17675 = vst [vmem:[#allocation311_spill] sm:$0xff] %v14408_v55  ;;  %v1899_v35 = vrot.slane %v1897_v26, 1  ;;  %v1445_v26 = vadd.f32 %v1444_v25, %v14144_v54  ;;  %v1935_v63 = vrot.slane %v1933_v2, 1  ;;  %v1449_v56 = vadd.f32 %v1448_v37, %v14144_v54  ;;  %v1565_v2 = vpop.f32.mrf.mxu1 }
 0x222   :  { %17676 = vst [vmem:[#allocation312_spill] sm:$0xff] %v14422_v58  ;;  %17677 = vst [vmem:[#allocation313_spill] sm:$0xff] %v14427_v27  ;;  %v1617_v27 = vmax.bf16 %v17637_v16, %v1601_v31  ;;  %v1447_v58 = vadd.f32 %v1446_v29, %v14140_v48  ;;  %v14443_v55 = vrot.slane %v2453_v60, %v14155_v57 }
 0x223   :  { %v1900_v28 = vor.u32 %v1899_v35, %v1895_v20  ;;  %v1556_v19 = vadd.f32 %v14348_v18, %v1443_v52  ;;  %v1558_v49 = vadd.f32 %v1557_v3, %v1445_v26  ;;  %v1453_v35 = vadd.f32 %v1452_v50, %v14140_v48 }
 0x224   :  { %17678 = vst [vmem:[#allocation314_spill] sm:$0xff] %v14443_v55  ;;  %v1936_v0 = vor.u32 %v1935_v63, %v1931_v34  ;;  %v10960_v20 = vcombine.low %v1617_v27, %v1617_v27  ;;  %v10964_v62 = vcombine.high %v1617_v27, %v1617_v27  ;;  %v10973_v25 = vcombine.low %v14334_v22, %v1617_v27 }
 0x225   :  { %v10974_v31 = vcombine.high %v14334_v22, %v1617_v27  ;;  %v1560_v17 = vadd.f32 %v1559_v51, %v1447_v58  ;;  %v1562_v29 = vadd.f32 %v1561_v1, %v1449_v56  ;;  %v14449_v33 = vadd.f32 %v1565_v2, %v1453_v35  ;;  %v1454_v58 = vpop.f32.mrf.mxu0  ;;  %v1567_v2 = vpop.f32.mrf.mxu1 }
 0x226   :  { %v1902_v37 = vshrl.u32 %v10960_v20, 16  ;;  %v1904_v60 = vshll.u32 %v10960_v20, 16  ;;  %v1923_v23 = vrot.slane %v10960_v20, 1  ;;  %v1938_v53 = vshrl.u32 %v10964_v62, 16 }
 0x227   :  { %v1940_v18 = vshll.u32 %v10964_v62, 16  ;;  %v1959_v3 = vrot.slane %v10964_v62, 1  ;;  %v2445_v50 = vrot.slane %v10973_v25, %v14155_v57  ;;  %v2539_v34 = vrot.slane %v10974_v31, %v14155_v57 }
 0x228   :  { %v1906_v52 = vrot.slane %v1904_v60, 1  ;;  %v2488_v26 = vcombine.low %v1922_v30, %v1923_v23  ;;  %v1602_v63 = vpack.c.bf16 %v1560_v17, %v1556_v19  ;;  %v1603_v59 = vpack.c.bf16 %v1562_v29, %v1558_v49 }
 0x229   :  { %v1942_v61 = vrot.slane %v1940_v18, 1  ;;  %v2512_v27 = vcombine.low %v14346_v36, %v2445_v50  ;;  %v2513_v22 = vcombine.high %v14346_v36, %v2445_v50  ;;  %v2582_v51 = vcombine.low %v1958_v32, %v1959_v3 }
 0x22a   :  { %v1907_v1 = vor.u32 %v1906_v52, %v1902_v37  ;;  %v2495_v56 = vrot.slane %v2488_v26, %v14155_v57  ;;  %v14457_v35 = vmax.bf16 %v17637_v16, %v1602_v63  ;;  %v14460_v20 = vmax.bf16 %v17637_v16, %v1603_v59 }
 0x22b   :  { %v1943_v62 = vor.u32 %v1942_v61, %v1938_v53  ;;  %v14463_v17 = vrot.slane %v2512_v27, %v14155_v57  ;;  %v14466_v30 = vrot.slane %v2513_v22, %v14155_v57  ;;  %v2589_v36 = vrot.slane %v2582_v51, %v14155_v57 }
 0x22c   :  { %v2438_v23 = vcombine.low %v1900_v28, %v1907_v1  ;;  %v2496_v32 = vcombine.high %v2495_v56, %v2495_v56  ;;  %v14470_v19 = vrot.slane %v2495_v56, %v14155_v57  ;;  %v14474_v49 = vcombine.low %v14457_v35, %v14457_v35  ;;  %v1456_v28 = vpop.f32.mrf.mxu0 }
 0x22d   :  { %17679 = vst [vmem:[#allocation315_spill] sm:$0xff] %v14466_v30  ;;  %v2532_v25 = vcombine.low %v1936_v0, %v1943_v62  ;;  %v2590_v60 = vcombine.high %v2589_v36, %v2589_v36  ;;  %v14490_v3 = vrot.slane %v2589_v36, %v14155_v57  ;;  %v10949_v52 = vcombine.high %v14457_v35, %v14457_v35 }
 0x22e   :  { %17680 = vst [vmem:[#allocation316_spill] sm:$0xff] %v14470_v19  ;;  %v2452_v31 = vrot.slane %v2438_v23, %v14155_v57  ;;  %v14484_v29 = vrot.slane %v2496_v32, %v14155_v57  ;;  %v1783_v0 = vshrl.u32 %v14474_v49, 16  ;;  %v1569_v32 = vpop.f32.mrf.mxu1  ;;  %v1458_v36 = vpop.f32.mrf.mxu0  ;;  %v1878_v23 = vrot.slane %v14474_v49, 1 }
 0x22f   :  { %v2546_v18 = vrot.slane %v2532_v25, %v14155_v57  ;;  %17682 = vst [vmem:[#allocation318_spill] sm:$0xff] %v14490_v3  ;;  %v14496_v62 = vrot.slane %v2590_v60, %v14155_v57  ;;  %v1785_v60 = vshll.u32 %v14474_v49, 16  ;;  %v10950_v49 = vcombine.high %v14460_v20, %v14460_v20 }
 0x230   :  { %17681 = vst [vmem:[#allocation317_spill] sm:$0xff] %v14484_v29  ;;  %v2455_v26 = vcombine.low %v2445_v50, %v2452_v31  ;;  %v2456_v63 = vcombine.high %v2445_v50, %v2452_v31  ;;  %v2547_v27 = vcombine.low %v2452_v31, %v2495_v56  ;;  %v2548_v22 = vcombine.high %v2452_v31, %v2495_v56  ;;  %v1571_v59 = vpop.f32.mrf.mxu1  ;;  %v1462_v61 = vpop.f32.mrf.mxu0 }
 0x231   :  { %v2549_v51 = vcombine.low %v2539_v34, %v2546_v18  ;;  %v2550_v1 = vcombine.high %v2539_v34, %v2546_v18  ;;  %17683 = vst [vmem:[#allocation319_spill] sm:$0xff] %v14496_v62  ;;  %v1797_v18 = vshrl.u32 %v10949_v52, 16  ;;  %v1787_v53 = vrot.slane %v1785_v60, 1 }
 0x232   :  { %v14501_v25 = vrot.slane %v2455_v26, %v14155_v57  ;;  %v14504_v37 = vrot.slane %v2456_v63, %v14155_v57  ;;  %v14507_v50 = vrot.slane %v2547_v27, %v14155_v57  ;;  %v14510_v56 = vrot.slane %v2548_v22, %v14155_v57 }
 0x233   :  { %v14513_v34 = vrot.slane %v2549_v51, %v14155_v57  ;;  %v14516_v31 = vrot.slane %v2550_v1, %v14155_v57  ;;  %v1799_v63 = vshll.u32 %v10949_v52, 16  ;;  %v1880_v27 = vrot.slane %v10949_v52, 1 }
 0x234   :  { %17684 = vst [vmem:[#allocation320_spill] sm:$0xff] %v14501_v25  ;;  %17685 = vst [vmem:[#allocation321_spill] sm:$0xff] %v14504_v37  ;;  %v10948_v26 = vcombine.low %v14460_v20, %v14460_v20  ;;  %v10975_v52 = vcombine.low %v14457_v35, %v14460_v20  ;;  %v1788_v22 = vor.u32 %v1787_v53, %v1783_v0  ;;  %v1804_v29 = vshrl.u32 %v10950_v49, 16  ;;  %v1575_v25 = vpop.f32.mrf.mxu1 }
 0x235   :  { %17686 = vst [vmem:[#allocation322_spill] sm:$0xff] %v14507_v50  ;;  %17687 = vst [vmem:[#allocation323_spill] sm:$0xff] %v14510_v56  ;;  %v1801_v62 = vrot.slane %v1799_v63, 1  ;;  %v10976_v51 = vcombine.high %v14457_v35, %v14460_v20  ;;  %v1455_v3 = vadd.f32 %v1454_v58, %v14144_v54  ;;  %v1457_v60 = vadd.f32 %v1456_v28, %v14140_v48  ;;  %v1464_v50 = vpop.f32.mrf.mxu0 }
 0x236   :  { %17688 = vst [vmem:[#allocation324_spill] sm:$0xff] %v14513_v34  ;;  %17689 = vst [vmem:[#allocation325_spill] sm:$0xff] %v14516_v31  ;;  %v1790_v19 = vshrl.u32 %v10948_v26, 16  ;;  %v1792_v63 = vshll.u32 %v10948_v26, 16  ;;  %v1806_v31 = vshll.u32 %v10950_v49, 16  ;;  %v1879_v37 = vrot.slane %v10948_v26, 1 }
 0x237   :  { %v1802_v1 = vor.u32 %v1801_v62, %v1797_v18  ;;  %v1881_v56 = vrot.slane %v10950_v49, 1  ;;  %v2616_v34 = vrot.slane %v10975_v52, %v14155_v57  ;;  %v2637_v53 = vrot.slane %v10976_v51, %v14155_v57 }
 0x238   :  { %v1794_v55 = vrot.slane %v1792_v63, 1  ;;  %v1568_v0 = vadd.f32 %v1567_v2, %v1455_v3  ;;  %v1570_v35 = vadd.f32 %v1569_v32, %v1457_v60  ;;  %v1808_v20 = vrot.slane %v1806_v31, 1  ;;  %v1577_v3 = vpop.f32.mrf.mxu1  ;;  %v1466_v32 = vpop.f32.mrf.mxu0 }
 0x239   :  { %v2608_v58 = vcombine.low %v1878_v23, %v1879_v37  ;;  %v2674_v30 = vcombine.low %v1880_v27, %v1881_v56  ;;  %v1459_v28 = vadd.f32 %v1458_v36, %v14144_v54  ;;  %v1463_v26 = vadd.f32 %v1462_v61, %v14140_v48 }
 0x23a   :  { %v1795_v62 = vor.u32 %v1794_v55, %v1790_v19  ;;  %v1604_v18 = vpack.c.bf16 %v1570_v35, %v14449_v33  ;;  %v1465_v49 = vadd.f32 %v1464_v50, %v14144_v54  ;;  %v1809_v52 = vor.u32 %v1808_v20, %v1804_v29 }
 0x23b   :  { %v2630_v21 = vrot.slane %v2608_v58, %v14155_v57  ;;  %v14546_v63 = vrot.slane %v2674_v30, %v14155_v57  ;;  %v1572_v2 = vadd.f32 %v1571_v59, %v1459_v28  ;;  %v14549_v36 = vadd.f32 %v1575_v25, %v1463_v26 }
 0x23c   :  { %v2607_v37 = vcombine.low %v1788_v22, %v1795_v62  ;;  %v1620_v23 = vmax.bf16 %v17637_v16, %v1604_v18  ;;  %v14551_v55 = vadd.f32 %v1577_v3, %v1465_v49  ;;  %v2673_v61 = vcombine.low %v1802_v1, %v1809_v52  ;;  %v1468_v3 = vpop.f32.mrf.mxu0 }
 0x23d   :  { %v2640_v33 = vcombine.low %v2630_v21, %v2637_v53  ;;  %v2641_v19 = vcombine.high %v2630_v21, %v2637_v53  ;;  %v1605_v50 = vpack.c.bf16 %v1572_v2, %v1568_v0  ;;  %v1467_v30 = vadd.f32 %v1466_v32, %v14140_v48 }
 0x23e   :  { %v2623_v29 = vrot.slane %v2607_v37, %v14155_v57  ;;  %v10951_v56 = vcombine.low %v1620_v23, %v1620_v23  ;;  %v10953_v31 = vcombine.high %v1620_v23, %v1620_v23  ;;  %v2683_v25 = vrot.slane %v2673_v61, %v14155_v57 }
 0x23f   :  { %v14556_v59 = vrot.slane %v2640_v33, %v14155_v57  ;;  %v14559_v27 = vrot.slane %v2641_v19, %v14155_v57  ;;  %v1621_v22 = vmax.bf16 %v17637_v16, %v1605_v50  ;;  %v1579_v19 = vpop.f32.mrf.mxu1 }
 0x240   :  { %v2638_v51 = vcombine.low %v2616_v34, %v2623_v29  ;;  %v2639_v21 = vcombine.high %v2616_v34, %v2623_v29  ;;  %v1811_v1 = vshrl.u32 %v10951_v56, 16  ;;  %v1813_v60 = vshll.u32 %v10951_v56, 16 }
 0x241   :  { %17690 = vst [vmem:[#allocation326_spill] sm:$0xff] %v14556_v59  ;;  %17691 = vst [vmem:[#allocation327_spill] sm:$0xff] %v14559_v27  ;;  %v2705_v0 = vcombine.low %v2683_v25, %v14546_v63  ;;  %v2706_v35 = vcombine.high %v2683_v25, %v14546_v63  ;;  %v2764_v20 = vcombine.low %v2637_v53, %v2683_v25  ;;  %v1825_v26 = vshrl.u32 %v10953_v31, 16 }
 0x242   :  { %v2765_v58 = vcombine.high %v2637_v53, %v2683_v25  ;;  %v14566_v28 = vrot.slane %v2638_v51, %v14155_v57  ;;  %v14569_v62 = vrot.slane %v2639_v21, %v14155_v57  ;;  %v1815_v18 = vrot.slane %v1813_v60, 1 }
 0x243   :  { %v14572_v49 = vrot.slane %v2706_v35, %v14155_v57  ;;  %v14575_v34 = vrot.slane %v2764_v20, %v14155_v57  ;;  %v1827_v2 = vshll.u32 %v10953_v31, 16  ;;  %v1882_v37 = vrot.slane %v10951_v56, 1 }
 0x244   :  { %17692 = vst [vmem:[#allocation328_spill] sm:$0xff] %v14566_v28  ;;  %17693 = vst [vmem:[#allocation329_spill] sm:$0xff] %v14569_v62  ;;  %v14578_v52 = vrot.slane %v2765_v58, %v14155_v57  ;;  %v1816_v32 = vor.u32 %v1815_v18, %v1811_v1  ;;  %v1884_v33 = vrot.slane %v10953_v31, 1  ;;  %v10952_v50 = vcombine.low %v1621_v22, %v1621_v22  ;;  %v1581_v18 = vpop.f32.mrf.mxu1 }
 0x245   :  { %17694 = vst [vmem:[#allocation330_spill] sm:$0xff] %v14572_v49  ;;  %17695 = vst [vmem:[#allocation331_spill] sm:$0xff] %v14575_v34  ;;  %v1829_v61 = vrot.slane %v1827_v2, 1  ;;  %v10954_v29 = vcombine.high %v1621_v22, %v1621_v22  ;;  %v10977_v25 = vcombine.low %v1620_v23, %v1621_v22  ;;  %v14583_v51 = vrot.slane %v2705_v0, %v14155_v57 }
 0x246   :  { %17696 = vst [vmem:[#allocation332_spill] sm:$0xff] %v14578_v52  ;;  %v10978_v21 = vcombine.high %v1620_v23, %v1621_v22  ;;  %v1580_v60 = vadd.f32 %v1579_v19, %v1467_v30  ;;  %v1469_v35 = vadd.f32 %v1468_v3, %v14144_v54  ;;  %v1818_v58 = vshrl.u32 %v10952_v50, 16 }
 0x247   :  { %17697 = vst [vmem:[#allocation333_spill] sm:$0xff] %v14583_v51  ;;  %v1830_v20 = vor.u32 %v1829_v61, %v1825_v26  ;;  %v1820_v49 = vshll.u32 %v10952_v50, 16  ;;  %v1832_v27 = vshrl.u32 %v10954_v29, 16  ;;  %v1834_v53 = vshll.u32 %v10954_v29, 16 }
 0x248   :  { %v1883_v1 = vrot.slane %v10952_v50, 1  ;;  %v1885_v56 = vrot.slane %v10954_v29, 1  ;;  %v2697_v31 = vrot.slane %v10977_v25, %v14155_v57  ;;  %v2807_v59 = vrot.slane %v10978_v21, %v14155_v57  ;;  %v1472_v50 = vpop.f32.mrf.mxu0 }
 0x249   :  { %v1822_v2 = vrot.slane %v1820_v49, 1  ;;  %v1606_v0 = vpack.c.bf16 %v1580_v60, %v14549_v36  ;;  %v14589_v28 = vadd.f32 %v1581_v18, %v1469_v35  ;;  %v1836_v23 = vrot.slane %v1834_v53, 1 }
 0x24a   :  { %v2740_v30 = vcombine.low %v1882_v37, %v1883_v1  ;;  %v2766_v22 = vcombine.low %v14546_v63, %v2697_v31  ;;  %v2767_v26 = vcombine.high %v14546_v63, %v2697_v31  ;;  %v2850_v19 = vcombine.low %v1884_v33, %v1885_v56  ;;  %v1474_v56 = vpop.f32.mrf.mxu0 }
 0x24b   :  { %v1823_v3 = vor.u32 %v1822_v2, %v1818_v58  ;;  %v14594_v61 = vmax.bf16 %v17637_v16, %v1606_v0  ;;  %v1607_v49 = vpack.c.bf16 %v14589_v28, %v14551_v55  ;;  %v1837_v29 = vor.u32 %v1836_v23, %v1832_v27 }
 0x24c   :  { %v2747_v36 = vrot.slane %v2740_v30, %v14155_v57  ;;  %v14600_v25 = vrot.slane %v2766_v22, %v14155_v57  ;;  %v14603_v53 = vrot.slane %v2767_v26, %v14155_v57  ;;  %v14606_v63 = vrot.slane %v2850_v19, %v14155_v57 }
 0x24d   :  { %v2676_v37 = vcombine.low %v1816_v32, %v1823_v3  ;;  %v14610_v33 = vcombine.low %v14594_v61, %v14594_v61  ;;  %v14614_v55 = vcombine.high %v14594_v61, %v14594_v61  ;;  %v2800_v58 = vcombine.low %v1830_v20, %v1837_v29  ;;  %v1476_v32 = vpop.f32.mrf.mxu0 }
 0x24e   :  { %17698 = vst [vmem:[#allocation334_spill] sm:$0xff] %v14600_v25  ;;  %17699 = vst [vmem:[#allocation335_spill] sm:$0xff] %v14603_v53  ;;  %v2748_v27 = vcombine.high %v2747_v36, %v2747_v36  ;;  %v14617_v28 = vrot.slane %v2747_v36, %v14155_v57  ;;  %v2858_v1 = vcombine.high %v14606_v63, %v14606_v63 }
 0x24f   :  { %v2704_v60 = vrot.slane %v2676_v37, %v14155_v57  ;;  %v14635_v0 = vrot.slane %v14606_v63, %v14155_v57  ;;  %v2874_v23 = vcombine.low %v2747_v36, %v2807_v59  ;;  %v2814_v26 = vrot.slane %v2800_v58, %v14155_v57 }
 0x250   :  { %17700 = vst [vmem:[#allocation336_spill] sm:$0xff] %v14617_v28  ;;  %v14629_v18 = vrot.slane %v2748_v27, %v14155_v57  ;;  %v14639_v19 = vrot.slane %v2858_v1, %v14155_v57  ;;  %v2875_v37 = vcombine.high %v2747_v36, %v2807_v59  ;;  %v1585_v27 = vpop.f32.mrf.mxu1  ;;  %v1841_v29 = vshll.u32 %v14610_v33, 16 }
 0x251   :  { %17702 = vst [vmem:[#allocation338_spill] sm:$0xff] %v14635_v0  ;;  %v2707_v30 = vcombine.low %v2697_v31, %v2704_v60  ;;  %v2708_v22 = vcombine.high %v2697_v31, %v2704_v60  ;;  %v2815_v20 = vcombine.low %v2704_v60, %v2747_v36  ;;  %v2816_v3 = vcombine.high %v2704_v60, %v2747_v36 }
 0x252   :  { %17701 = vst [vmem:[#allocation337_spill] sm:$0xff] %v14629_v18  ;;  %17703 = vst [vmem:[#allocation339_spill] sm:$0xff] %v14639_v19  ;;  %v2817_v21 = vcombine.low %v2807_v59, %v2814_v26  ;;  %v2818_v31 = vcombine.high %v2807_v59, %v2814_v26  ;;  %v14656_v1 = vrot.slane %v2874_v23, %v14155_v57  ;;  %v1839_v23 = vshrl.u32 %v14610_v33, 16  ;;  %v1587_v19 = vpop.f32.mrf.mxu1 }
 0x253   :  { %v14644_v2 = vrot.slane %v2707_v30, %v14155_v57  ;;  %v14647_v35 = vrot.slane %v2708_v22, %v14155_v57  ;;  %v14650_v58 = vrot.slane %v2815_v20, %v14155_v57  ;;  %v14653_v60 = vrot.slane %v2816_v3, %v14155_v57  ;;  %v1478_v3 = vpop.f32.mrf.mxu0 }
 0x254   :  { %17708 = vst [vmem:[#allocation344_spill] sm:$0xff] %v14656_v1  ;;  %v14659_v36 = vrot.slane %v2875_v37, %v14155_v57  ;;  %v14664_v22 = vrot.slane %v2817_v21, %v14155_v57  ;;  %v14667_v59 = vrot.slane %v2818_v31, %v14155_v57  ;;  %v2910_v20 = vcombine.high %v2814_v26, %v14606_v63 }
 0x255   :  { %17704 = vst [vmem:[#allocation340_spill] sm:$0xff] %v14644_v2  ;;  %17705 = vst [vmem:[#allocation341_spill] sm:$0xff] %v14647_v35  ;;  %v1853_v37 = vshrl.u32 %v14614_v55, 16  ;;  %v1843_v28 = vrot.slane %v1841_v29, 1  ;;  %v1855_v18 = vshll.u32 %v14614_v55, 16  ;;  %v1886_v51 = vrot.slane %v14610_v33, 1 }
 0x256   :  { %17706 = vst [vmem:[#allocation342_spill] sm:$0xff] %v14650_v58  ;;  %17707 = vst [vmem:[#allocation343_spill] sm:$0xff] %v14653_v60  ;;  %v14682_v0 = vrot.slane %v2910_v20, %v14155_v57  ;;  %v1623_v53 = vmax.bf16 %v17637_v16, %v1607_v49  ;;  %v2909_v30 = vcombine.low %v2814_v26, %v14606_v63  ;;  %v1589_v20 = vpop.f32.mrf.mxu1 }
 0x257   :  { %17709 = vst [vmem:[#allocation345_spill] sm:$0xff] %v14659_v36  ;;  %v1888_v36 = vrot.slane %v14614_v55, 1  ;;  %v1473_v21 = vadd.f32 %v1472_v50, %v14140_v48  ;;  %v1475_v58 = vadd.f32 %v1474_v56, %v14144_v54  ;;  %v1844_v31 = vor.u32 %v1843_v28, %v1839_v23 }
 0x258   :  { %17710 = vst [vmem:[#allocation346_spill] sm:$0xff] %v14682_v0  ;;  %v1857_v60 = vrot.slane %v1855_v18, 1  ;;  %v1477_v0 = vadd.f32 %v1476_v32, %v14140_v48  ;;  %v1479_v29 = vadd.f32 %v1478_v3, %v14144_v54  ;;  %v10956_v1 = vcombine.low %v1623_v53, %v1623_v53  ;;  %v1591_v3 = vpop.f32.mrf.mxu1 }
 0x259   :  { %v10958_v2 = vcombine.high %v1623_v53, %v1623_v53  ;;  %v10979_v33 = vcombine.low %v14594_v61, %v1623_v53  ;;  %v14695_v55 = vrot.slane %v2909_v30, %v14155_v57  ;;  %v10980_v26 = vcombine.high %v14594_v61, %v1623_v53 }
 0x25a   :  { %v1858_v49 = vor.u32 %v1857_v60, %v1853_v37  ;;  %v1586_v50 = vadd.f32 %v1585_v27, %v1473_v21  ;;  %v1588_v35 = vadd.f32 %v1587_v19, %v1475_v58  ;;  %v1846_v56 = vshrl.u32 %v10956_v1, 16 }
 0x25b   :  { %17711 = vst [vmem:[#allocation347_spill] sm:$0xff] %v14695_v55  ;;  %v1848_v28 = vshll.u32 %v10956_v1, 16  ;;  %v1860_v18 = vshrl.u32 %v10958_v2, 16  ;;  %v1862_v23 = vshll.u32 %v10958_v2, 16  ;;  %v1887_v52 = vrot.slane %v10956_v1, 1 }
 0x25c   :  { %v1889_v48 = vrot.slane %v10958_v2, 1  ;;  %v2901_v54 = vrot.slane %v10979_v33, %v14155_v57  ;;  %v2995_v32 = vrot.slane %v10980_v26, %v14155_v57  ;;  %v1590_v30 = vadd.f32 %v1589_v20, %v1477_v0 }
 0x25d   :  { %v1850_v25 = vrot.slane %v1848_v28, 1  ;;  %v1864_v34 = vrot.slane %v1862_v23, 1  ;;  %v1592_v62 = vadd.f32 %v1591_v3, %v1479_v29  ;;  %v2944_v60 = vcombine.low %v1886_v51, %v1887_v52 }
 0x25e   :  { %v2968_v61 = vcombine.low %v14606_v63, %v2901_v54  ;;  %v2969_v53 = vcombine.high %v14606_v63, %v2901_v54  ;;  %v3038_v19 = vcombine.low %v1888_v36, %v1889_v48  ;;  %v1608_v37 = vpack.c.bf16 %v1590_v30, %v1586_v50 }
 0x25f   :  { %v1851_v27 = vor.u32 %v1850_v25, %v1846_v56  ;;  %v1865_v58 = vor.u32 %v1864_v34, %v1860_v18  ;;  %v1609_v1 = vpack.c.bf16 %v1592_v62, %v1588_v35  ;;  %v2951_v2 = vrot.slane %v2944_v60, %v14155_v57 }
 0x260   :  { %v14704_v21 = vrot.slane %v2968_v61, %v14155_v57  ;;  %v14707_v33 = vrot.slane %v2969_v53, %v14155_v57  ;;  %v14710_v0 = vrot.slane %v3038_v19, %v14155_v57  ;;  %v14713_v63 = vmax.bf16 %v17637_v16, %v1608_v37 }
 0x261   :  { %v2894_v52 = vcombine.low %v1844_v31, %v1851_v27  ;;  %v2988_v51 = vcombine.low %v1858_v49, %v1865_v58  ;;  %v14716_v34 = vmax.bf16 %v17637_v16, %v1609_v1  ;;  %v2952_v62 = vcombine.high %v2951_v2, %v2951_v2 }
 0x262   :  { %17712 = vst [vmem:[#allocation348_spill] sm:$0xff] %v14707_v33  ;;  %v14719_v25 = vrot.slane %v2951_v2, %v14155_v57  ;;  %v3046_v49 = vcombine.high %v14710_v0, %v14710_v0  ;;  %v14740_v56 = vrot.slane %v14710_v0, %v14155_v57  ;;  %v3062_v28 = vcombine.low %v2951_v2, %v2995_v32 }
 0x263   :  { %v2908_v20 = vrot.slane %v2894_v52, %v14155_v57  ;;  %v14729_v29 = vrot.slane %v2988_v51, %v14155_v57  ;;  %v14734_v26 = vrot.slane %v2952_v62, %v14155_v57  ;;  %v3063_v52 = vcombine.high %v2951_v2, %v2995_v32 }
 0x264   :  { %17713 = vst [vmem:[#allocation349_spill] sm:$0xff] %v14719_v25  ;;  %17715 = vst [vmem:[#allocation351_spill] sm:$0xff] %v14740_v56  ;;  %v14745_v61 = vrot.slane %v3046_v49, %v14155_v57  ;;  %v14768_v51 = vrot.slane %v3062_v28, %v14155_v57  ;;  %v10961_v49 = vcombine.low %v14713_v63, %v14713_v63 }
 0x265   :  { %17714 = vst [vmem:[#allocation350_spill] sm:$0xff] %v14734_v26  ;;  %v2911_v18 = vcombine.low %v2901_v54, %v2908_v20  ;;  %v2912_v23 = vcombine.high %v2901_v54, %v2908_v20  ;;  %v3003_v48 = vcombine.low %v2908_v20, %v2951_v2  ;;  %v3004_v3 = vcombine.high %v2908_v20, %v2951_v2 }
 0x266   :  { %v3005_v30 = vcombine.low %v2995_v32, %v14729_v29  ;;  %v3006_v60 = vcombine.high %v2995_v32, %v14729_v29  ;;  %17716 = vst [vmem:[#allocation352_spill] sm:$0xff] %v14745_v61  ;;  %17719 = vst [vmem:[#allocation355_spill] sm:$0xff] %v14768_v51  ;;  %v3098_v20 = vcombine.high %v14729_v29, %v14710_v0  ;;  %v1924_v32 = vrot.slane %v10961_v49, 1 }
 0x267   :  { %v14750_v19 = vrot.slane %v2911_v18, %v14155_v57  ;;  %v14753_v27 = vrot.slane %v2912_v23, %v14155_v57  ;;  %v14756_v54 = vrot.slane %v3003_v48, %v14155_v57  ;;  %v14759_v58 = vrot.slane %v3004_v3, %v14155_v57 }
 0x268   :  { %v14762_v37 = vrot.slane %v3005_v30, %v14155_v57  ;;  %v14765_v1 = vrot.slane %v3006_v60, %v14155_v57  ;;  %v10965_v18 = vcombine.high %v14713_v63, %v14713_v63  ;;  %v14785_v28 = vrot.slane %v3063_v52, %v14155_v57 }
 0x269   :  { %17717 = vst [vmem:[#allocation353_spill] sm:$0xff] %v14756_v54  ;;  %17718 = vst [vmem:[#allocation354_spill] sm:$0xff] %v14759_v58  ;;  %v14790_v3 = vrot.slane %v3098_v20, %v14155_v57  ;;  %v1911_v30 = vshll.u32 %v10961_v49, 16  ;;  %v10962_v53 = vcombine.low %v14716_v34, %v14716_v34  ;;  %v10966_v50 = vcombine.high %v14716_v34, %v14716_v34 }
 0x26a   :  { %17720 = vst [vmem:[#allocation356_spill] sm:$0xff] %v14785_v28  ;;  %v1947_v60 = vshll.u32 %v10965_v18, 16  ;;  %v10981_v2 = vcombine.low %v14713_v63, %v14716_v34  ;;  %v1909_v23 = vshrl.u32 %v10961_v49, 16  ;;  %v1945_v62 = vshrl.u32 %v10965_v18, 16 }
 0x26b   :  { %17721 = vst [vmem:[#allocation357_spill] sm:$0xff] %v14790_v3  ;;  %v1913_v52 = vrot.slane %v1911_v30, 1  ;;  %v1960_v35 = vrot.slane %v10965_v18, 1  ;;  %v1918_v48 = vshll.u32 %v10962_v53, 16  ;;  %v1925_v20 = vrot.slane %v10962_v53, 1 }
 0x26c   :  { %v1949_v31 = vrot.slane %v1947_v60, 1  ;;  %v1954_v36 = vshll.u32 %v10966_v50, 16  ;;  %v1961_v16 = vrot.slane %v10966_v50, 1  ;;  %v3097_v61 = vcombine.low %v14729_v29, %v14710_v0 }
 0x26d   :  { %v10982_v56 = vcombine.high %v14713_v63, %v14716_v34  ;;  %v1916_v25 = vshrl.u32 %v10962_v53, 16  ;;  %v1920_v26 = vrot.slane %v1918_v48, 1  ;;  %v3089_v3 = vrot.slane %v10981_v2, %v14155_v57 }
 0x26e   :  { %v3132_v58 = vcombine.low %v1924_v32, %v1925_v20  ;;  %v1914_v30 = vor.u32 %v1913_v52, %v1909_v23  ;;  %v1952_v49 = vshrl.u32 %v10966_v50, 16  ;;  %v1956_v54 = vrot.slane %v1954_v36, 1 }
 0x26f   :  { %v3226_v60 = vcombine.low %v1960_v35, %v1961_v16  ;;  %v1921_v18 = vor.u32 %v1920_v26, %v1916_v25  ;;  %v3156_v28 = vcombine.low %v14710_v0, %v3089_v3  ;;  %v3157_v33 = vcombine.high %v14710_v0, %v3089_v3 }
 0x270   :  { %v3139_v55 = vrot.slane %v3132_v58, %v14155_v57  ;;  %v1950_v29 = vor.u32 %v1949_v31, %v1945_v62  ;;  %v1957_v51 = vor.u32 %v1956_v54, %v1952_v49  ;;  %v3183_v63 = vrot.slane %v10982_v56, %v14155_v57 }
 0x271   :  { %v3233_v34 = vrot.slane %v3226_v60, %v14155_v57  ;;  %v3082_v53 = vcombine.low %v1914_v30, %v1921_v18  ;;  %v14812_v16 = vrot.slane %v3156_v28, %v14155_v57  ;;  %v14815_v25 = vrot.slane %v3157_v33, %v14155_v57 }
 0x272   :  { %v3140_v2 = vcombine.high %v3139_v55, %v3139_v55  ;;  %v14809_v23 = vrot.slane %v3139_v55, %v14155_v57  ;;  %v3176_v35 = vcombine.low %v1950_v29, %v1957_v51  ;;  %v14837_v52 = vrot.slane %v3097_v61, %v14155_v57 }
 0x273   :  { %v3234_v36 = vcombine.high %v3233_v34, %v3233_v34  ;;  %v14818_v0 = vrot.slane %v3233_v34, %v14155_v57  ;;  %v3096_v31 = vrot.slane %v3082_v53, %v14155_v57 }
 0x274   :  { %17722 = vst [vmem:[#allocation358_spill] sm:$0xff] %v14809_v23  ;;  %v14822_v26 = vrot.slane %v3140_v2, %v14155_v57  ;;  %v3190_v58 = vrot.slane %v3176_v35, %v14155_v57  ;;  %v11070_v35 = vcombine.high %v12142_v14, %v12147_v15 }
 0x275   :  { %17723 = vst [vmem:[#allocation359_spill] sm:$0xff] %v14818_v0  ;;  %v14834_v51 = vrot.slane %v3234_v36, %v14155_v57  ;;  %v3099_v62 = vcombine.low %v3089_v3, %v3096_v31  ;;  %v3100_v32 = vcombine.high %v3089_v3, %v3096_v31  ;;  %v3191_v28 = vcombine.low %v3096_v31, %v3139_v55 }
 0x276   :  { %17724 = vst [vmem:[#allocation360_spill] sm:$0xff] %v14822_v26  ;;  %v3192_v48 = vcombine.high %v3096_v31, %v3139_v55  ;;  %v3193_v20 = vcombine.low %v3183_v63, %v3190_v58  ;;  %v3194_v30 = vcombine.high %v3183_v63, %v3190_v58  ;;  %v11069_v36 = vcombine.low %v12142_v14, %v12147_v15 }
 0x277   :  { %17725 = vst [vmem:[#allocation361_spill] sm:$0xff] %v14834_v51  ;;  %v14842_v60 = vrot.slane %v3099_v62, %v14155_v57  ;;  %v14845_v18 = vrot.slane %v3100_v32, %v14155_v57  ;;  %v14848_v29 = vrot.slane %v3191_v28, %v14155_v57  ;;  %v11102_v31 = vcombine.high %v12302_v46, %v12307_v47 }
 0x278   :  { %v14851_v3 = vrot.slane %v3192_v48, %v14155_v57  ;;  %v14854_v55 = vrot.slane %v3193_v20, %v14155_v57  ;;  %v14857_v61 = vrot.slane %v3194_v30, %v14155_v57  ;;  %v11101_v58 = vcombine.low %v12302_v46, %v12307_v47 }
 0x279   :  { %17726 = vst [vmem:[#allocation362_spill] sm:$0xff] %v14842_v60  ;;  %17727 = vst [vmem:[#allocation363_spill] sm:$0xff] %v14845_v18 }
 0x27a   :  { %17728 = vst [vmem:[#allocation364_spill] sm:$0xff] %v14848_v29  ;;  %17729 = vst [vmem:[#allocation365_spill] sm:$0xff] %v14851_v3 }
 0x27b   :  { %17730 = vst [vmem:[#allocation366_spill] sm:$0xff] %v14854_v55  ;;  %17731 = vst [vmem:[#allocation367_spill] sm:$0xff] %v14857_v61 }
 0x27c   :  { %12022 = dma.done.wait [#allocation4], 36864 }
 0x27d   :  { %12023 = vsyncadd [#allocation4], 4294930432  ;;  %v11068_v62 = vcombine.high %v12132_v12, %v12137_v13  ;;  %v11100_v32 = vcombine.high %v12292_v44, %v12297_v45  ;;  %6604 = vmatprep.subr.bf16.mxu1 %v11070_v35  ;;  %6685 = vmatprep.subr.bf16.mxu0 %v11102_v31  ;;  %v11067_v14 = vcombine.low %v12132_v12, %v12137_v13  ;;  %v17734_v30 = vld [vmem:[#allocation279_spill] sm:$0xff]  ;;  %v17735_v35 = vld [vmem:[#allocation278_spill] sm:$0xff] }
 0x27e   :  { %6605 = vmatpush1.bf16.msra.mxu1 %v11069_v36  ;;  %6686 = vmatpush1.bf16.msra.mxu0 %v11101_v58  ;;  %v11099_v15 = vcombine.low %v12292_v44, %v12297_v45  ;;  %v11066_v46 = vcombine.high %v12122_v10, %v12127_v11  ;;  %v11098_v47 = vcombine.high %v12282_v42, %v12287_v43  ;;  %v17736_v31 = vld [vmem:[#allocation281_spill] sm:$0xff]  ;;  %v17789_v2 = vld [vmem:[#allocation38_spill] sm:$0xff]  ;;  %v17800_v63 = vld [vmem:[#allocation331_spill] sm:$0xff] }
 0x27f   :  { %6606 = vmatprep.subr.bf16.mxu1 %v11068_v62  ;;  %6687 = vmatprep.subr.bf16.mxu0 %v11100_v32  ;;  %v11065_v28 = vcombine.low %v12122_v10, %v12127_v11  ;;  %v11097_v48 = vcombine.low %v12282_v42, %v12287_v43  ;;  %v11064_v12 = vcombine.high %v12112_v8, %v12117_v9  ;;  %v17741_v62 = vld [vmem:[#allocation282_spill] sm:$0xff]  ;;  %v17790_v34 = vld [vmem:[#allocation37_spill] sm:$0xff]  ;;  %v17805_v56 = vld [vmem:[#allocation332_spill] sm:$0xff] }
 0x280   :  { %v11096_v13 = vcombine.high %v12272_v40, %v12277_v41  ;;  %v11063_v44 = vcombine.low %v12112_v8, %v12117_v9  ;;  %v11095_v45 = vcombine.low %v12272_v40, %v12277_v41  ;;  %v11062_v10 = vcombine.high %v12102_v6, %v12107_v7  ;;  %v17732_v9 = vld [vmem:[#allocation34_spill] sm:$0xff]  ;;  %v17733_v40 = vld [vmem:[#allocation33_spill] sm:$0xff]  ;;  %v17815_v60 = vld [vmem:[#allocation340_spill] sm:$0xff] }
 0x281   :  { %v11094_v11 = vcombine.high %v12262_v38, %v12267_v39  ;;  %v11061_v42 = vcombine.low %v12102_v6, %v12107_v7  ;;  %v11093_v43 = vcombine.low %v12262_v38, %v12267_v39  ;;  %v11060_v8 = vcombine.high %v12092_v4, %v12097_v5  ;;  %v17737_v6 = vld [vmem:[#allocation276_spill] sm:$0xff]  ;;  %v17801_v54 = vld [vmem:[#allocation326_spill] sm:$0xff]  ;;  %v17807_v26 = vld [vmem:[#allocation65_spill] sm:$0xff] }
 0x282   :  { %6607 = vmatpush1.bf16.msra.mxu1 %v11067_v14  ;;  %6688 = vmatpush1.bf16.msra.mxu0 %v11099_v15  ;;  %v11092_v41 = vcombine.high %v17733_v40, %v17732_v9  ;;  %v11059_v20 = vcombine.low %v12092_v4, %v12097_v5  ;;  %v10983_v36 = vcombine.low %v17735_v35, %v17734_v30  ;;  %v17739_v38 = vld [vmem:[#allocation284_spill] sm:$0xff]  ;;  %v17742_v14 = vld [vmem:[#allocation291_spill] sm:$0xff]  ;;  %v17743_v15 = vld [vmem:[#allocation290_spill] sm:$0xff] }
 0x283   :  { %6608 = vmatprep.subr.bf16.mxu1 %v11066_v46  ;;  %6689 = vmatprep.subr.bf16.mxu0 %v11098_v47  ;;  %v17738_v7 = vcombine.high %v17735_v35, %v17737_v6  ;;  %v17740_v39 = vcombine.high %v17736_v31, %v17739_v38  ;;  %v10989_v46 = vcombine.low %v17743_v15, %v17742_v14  ;;  %v17744_v5 = vld [vmem:[#allocation12_spill] sm:$0xff]  ;;  %v17745_v47 = vld [vmem:[#allocation11_spill] sm:$0xff]  ;;  %v17751_v35 = vld [vmem:[#allocation30_spill] sm:$0xff] }
 0x284   :  { %v11091_v4 = vcombine.low %v17733_v40, %v17732_v9  ;;  %v17749_v40 = vld [vmem:[#allocation10_spill] sm:$0xff]  ;;  %v11106_v53 = vcombine.high %v17790_v34, %v17789_v2  ;;  %v17809_v61 = vld [vmem:[#allocation97_spill] sm:$0xff] }
 0x285   :  { %v10985_v58 = vcombine.low %v17738_v7, %v17736_v31  ;;  %v10987_v32 = vcombine.low %v17741_v62, %v17740_v39  ;;  %v17806_v23 = vld [vmem:[#allocation66_spill] sm:$0xff] }
 0x286   :  { %6609 = vmatpush1.bf16.msra.mxu1 %v11065_v28  ;;  %6690 = vmatpush1.bf16.msra.mxu0 %v11097_v48  ;;  %v11058_v28 = vcombine.high %v17745_v47, %v17744_v5  ;;  %v17746_v48 = vld [vmem:[#allocation32_spill] sm:$0xff] }
 0x287   :  { %6610 = vmatprep.subr.bf16.mxu1 %v11064_v12  ;;  %6691 = vmatprep.subr.bf16.mxu0 %v11096_v13  ;;  %v17747_v12 = vld [vmem:[#allocation31_spill] sm:$0xff] }
 0x288   :  { %v11090_v13 = vcombine.high %v17747_v12, %v17746_v48 }
 0x28a   :  { %6611 = vmatpush1.bf16.msra.mxu1 %v11063_v44  ;;  %6692 = vmatpush1.bf16.msra.mxu0 %v11095_v45  ;;  %v14932_v44 = vrot.slane %v10983_v36, %v14155_v57  ;;  %v14935_v45 = vrot.slane %v10985_v58, %v14155_v57  ;;  %v17752_v36 = vld [vmem:[#allocation29_spill] sm:$0xff] }
 0x28b   :  { %6612 = vmatprep.subr.bf16.mxu1 %v11062_v10  ;;  %6693 = vmatprep.subr.bf16.mxu0 %v11094_v11  ;;  %v14938_v10 = vrot.slane %v10987_v32, %v14155_v57  ;;  %v14941_v11 = vrot.slane %v10989_v46, %v14155_v57  ;;  %v11088_v7 = vcombine.high %v17752_v36, %v17751_v35 }
 0x28c   :  { %v11087_v32 = vcombine.low %v17752_v36, %v17751_v35 }
 0x28d   :  { %17748 = vst [vmem:[#allocation34_spill] sm:$0xff] %v14941_v11  ;;  %v3623_v9 = vcombine.high %v14938_v10, %v14941_v11 }
 0x28e   :  { %6613 = vmatpush1.bf16.msra.mxu1 %v11061_v42  ;;  %6694 = vmatpush1.bf16.msra.mxu0 %v11093_v43  ;;  %v3619_v42 = vcombine.high %v14932_v44, %v14935_v45  ;;  %v11057_v43 = vcombine.low %v17745_v47, %v17744_v5  ;;  %v17754_v5 = vld [vmem:[#allocation27_spill] sm:$0xff] }
 0x28f   :  { %6614 = vmatprep.subr.bf16.mxu1 %v11060_v8  ;;  %6695 = vmatprep.subr.bf16.mxu0 %v11092_v41  ;;  %v11089_v8 = vcombine.low %v17747_v12, %v17746_v48  ;;  %v17750_v41 = vld [vmem:[#allocation9_spill] sm:$0xff]  ;;  %v3674_v58 = vrot.slane %v3623_v9, %v14155_v57 }
 0x290   :  { %v11056_v30 = vcombine.high %v17750_v41, %v17749_v40  ;;  %v11055_v39 = vcombine.low %v17750_v41, %v17749_v40  ;;  %v17756_v48 = vld [vmem:[#allocation49_spill] sm:$0xff]  ;;  %v17759_v40 = vld [vmem:[#allocation48_spill] sm:$0xff]  ;;  %v17760_v41 = vld [vmem:[#allocation47_spill] sm:$0xff] }
 0x291   :  { %v11115_v36 = vcombine.low %v17760_v41, %v17759_v40 }
 0x292   :  { %6615 = vmatpush1.bf16.msra.mxu1 %v11059_v20  ;;  %6696 = vmatpush1.bf16.msra.mxu0 %v11091_v4  ;;  %v3646_v20 = vrot.slane %v3619_v42, %v14155_v57  ;;  %v17753_v4 = vld [vmem:[#allocation28_spill] sm:$0xff] }
 0x293   :  { %6616 = vmatprep.subr.bf16.mxu1 %v11058_v28  ;;  %6697 = vmatprep.subr.bf16.mxu0 %v11090_v13  ;;  %v11086_v47 = vcombine.high %v17754_v5, %v17753_v4  ;;  %v17755_v28 = vld [vmem:[#allocation50_spill] sm:$0xff]  ;;  %v11085_v13 = vcombine.low %v17754_v5, %v17753_v4 }
 0x294   :  { %v3686_v14 = vcombine.low %v3646_v20, %v3674_v58  ;;  %v3687_v46 = vcombine.high %v3646_v20, %v3674_v58  ;;  %v11118_v12 = vcombine.high %v17756_v48, %v17755_v28  ;;  %v11117_v42 = vcombine.low %v17756_v48, %v17755_v28  ;;  %v17762_v20 = vld [vmem:[#allocation23_spill] sm:$0xff]  ;;  %v17765_v5 = vld [vmem:[#allocation22_spill] sm:$0xff]  ;;  %v17767_v48 = vld [vmem:[#allocation44_spill] sm:$0xff] }
 0x296   :  { %6617 = vmatpush1.bf16.msra.mxu1 %v11057_v43  ;;  %6698 = vmatpush1.bf16.msra.mxu0 %v11089_v8  ;;  %v17757_v43 = vld [vmem:[#allocation26_spill] sm:$0xff]  ;;  %v17758_v8 = vld [vmem:[#allocation25_spill] sm:$0xff] }
 0x297   :  { %6618 = vmatprep.subr.bf16.mxu1 %v11056_v30  ;;  %6699 = vmatprep.subr.bf16.mxu0 %v11088_v7  ;;  %v11084_v9 = vcombine.high %v17758_v8, %v17757_v43  ;;  %v11116_v30 = vcombine.high %v17760_v41, %v17759_v40  ;;  %v11083_v35 = vcombine.low %v17758_v8, %v17757_v43  ;;  %v17761_v7 = vld [vmem:[#allocation24_spill] sm:$0xff]  ;;  %v17771_v41 = vld [vmem:[#allocation42_spill] sm:$0xff] }
 0x298   :  { %6636 = vmatprep.mubr.bf16.mxu1 %v3686_v14  ;;  %6717 = vmatprep.mubr.bf16.mxu0 %v3687_v46  ;;  %v11082_v58 = vcombine.high %v17762_v20, %v17761_v7  ;;  %v11081_v46 = vcombine.low %v17762_v20, %v17761_v7  ;;  %v17769_v8 = vld [vmem:[#allocation20_spill] sm:$0xff]  ;;  %v17773_v20 = vld [vmem:[#allocation18_spill] sm:$0xff] }
 0x29a   :  { %6619 = vmatpush1.bf16.msra.mxu1 %v11055_v39  ;;  %6700 = vmatpush1.bf16.msra.mxu0 %v11087_v32  ;;  %v17763_v39 = vld [vmem:[#allocation46_spill] sm:$0xff]  ;;  %v17764_v32 = vld [vmem:[#allocation45_spill] sm:$0xff] }
 0x29b   :  { %6620 = vmatprep.subr.bf16.mxu1 %v11086_v47  ;;  %6701 = vmatprep.subr.bf16.mxu0 %v11118_v12  ;;  %v11114_v14 = vcombine.high %v17764_v32, %v17763_v39  ;;  %v11113_v4 = vcombine.low %v17764_v32, %v17763_v39  ;;  %v17766_v47 = vld [vmem:[#allocation21_spill] sm:$0xff]  ;;  %v17768_v12 = vld [vmem:[#allocation43_spill] sm:$0xff]  ;;  %v17775_v32 = vld [vmem:[#allocation40_spill] sm:$0xff] }
 0x29c   :  { %v11080_v28 = vcombine.high %v17766_v47, %v17765_v5  ;;  %v11111_v43 = vcombine.low %v17768_v12, %v17767_v48 }
 0x29e   :  { %6621 = vmatpush2.bf16.msra.mxu1 %v11085_v13  ;;  %6702 = vmatpush2.bf16.msra.mxu0 %v11117_v42  ;;  %v11112_v13 = vcombine.high %v17768_v12, %v17767_v48  ;;  %v11079_v42 = vcombine.low %v17766_v47, %v17765_v5  ;;  %v17778_v5 = vld [vmem:[#allocation306_spill] sm:$0xff]  ;;  %v17780_v48 = vld [vmem:[#allocation296_spill] sm:$0xff] }
 0x29f   :  { %6622 = vmatprep.subr.bf16.mxu1 %v11084_v9  ;;  %6703 = vmatprep.subr.bf16.mxu0 %v11116_v30  ;;  %v17770_v9 = vld [vmem:[#allocation19_spill] sm:$0xff]  ;;  %v17772_v30 = vld [vmem:[#allocation41_spill] sm:$0xff]  ;;  %v17781_v12 = vcombine.high %v17743_v15, %v17780_v48 }
 0x2a0   :  { %v11078_v40 = vcombine.high %v17770_v9, %v17769_v8  ;;  %v11109_v7 = vcombine.low %v17772_v30, %v17771_v41 }
 0x2a2   :  { %6623 = vmatpush2.bf16.msra.mxu1 %v11083_v35  ;;  %6704 = vmatpush2.bf16.msra.mxu0 %v11115_v36  ;;  %v11110_v35 = vcombine.high %v17772_v30, %v17771_v41  ;;  %v11077_v36 = vcombine.low %v17770_v9, %v17769_v8  ;;  %v17782_v8 = vld [vmem:[#allocation300_spill] sm:$0xff]  ;;  %v17785_v41 = vld [vmem:[#allocation311_spill] sm:$0xff] }
 0x2a3   :  { %6624 = vmatprep.subr.bf16.mxu1 %v11082_v58  ;;  %6705 = vmatprep.subr.bf16.mxu0 %v11114_v14  ;;  %v17774_v58 = vld [vmem:[#allocation17_spill] sm:$0xff]  ;;  %v17776_v14 = vld [vmem:[#allocation39_spill] sm:$0xff]  ;;  %v17786_v30 = vcombine.high %v17778_v5, %v17785_v41 }
 0x2a4   :  { %v11076_v39 = vcombine.high %v17774_v58, %v17773_v20 }
 0x2a5   :  { %v11005_v49 = vcombine.low %v17786_v30, %v14401_v24 }
 0x2a6   :  { %6625 = vmatpush2.bf16.msra.mxu1 %v11081_v46  ;;  %6706 = vmatpush2.bf16.msra.mxu0 %v11113_v4  ;;  %v11108_v46 = vcombine.high %v17776_v14, %v17775_v32  ;;  %v17777_v4 = vld [vmem:[#allocation307_spill] sm:$0xff] }
 0x2a7   :  { %6626 = vmatprep.subr.bf16.mxu1 %v11080_v28  ;;  %6707 = vmatprep.subr.bf16.mxu0 %v11112_v13  ;;  %v10998_v47 = vcombine.low %v17778_v5, %v17777_v4  ;;  %v17779_v28 = vld [vmem:[#allocation294_spill] sm:$0xff]  ;;  %v11075_v4 = vcombine.low %v17774_v58, %v17773_v20  ;;  %v3948_v58 = vrot.slane %v11005_v49, %v14155_v57 }
 0x2a8   :  { %v10999_v13 = vcombine.low %v17781_v12, %v17779_v28  ;;  %v17788_v12 = vld [vmem:[#allocation15_spill] sm:$0xff] }
 0x2aa   :  { %6627 = vmatpush2.bf16.msra.mxu1 %v11079_v42  ;;  %6708 = vmatpush2.bf16.msra.mxu0 %v11111_v43  ;;  %v17783_v42 = vcombine.high %v17779_v28, %v17782_v8  ;;  %v17784_v43 = vld [vmem:[#allocation295_spill] sm:$0xff]  ;;  %v3906_v30 = vrot.slane %v10999_v13, %v14155_v57  ;;  %v17794_v13 = vld [vmem:[#allocation36_spill] sm:$0xff] }
 0x2ab   :  { %6628 = vmatprep.subr.bf16.mxu1 %v11078_v40  ;;  %6709 = vmatprep.subr.bf16.mxu0 %v11110_v35  ;;  %v11107_v40 = vcombine.low %v17776_v14, %v17775_v32  ;;  %v17787_v35 = vld [vmem:[#allocation16_spill] sm:$0xff]  ;;  %v3622_v32 = vcombine.low %v14938_v10, %v14941_v11  ;;  %v17792_v14 = vld [vmem:[#allocation14_spill] sm:$0xff]  ;;  %v17796_v10 = vcombine.high %v14401_v24, %v14463_v17 }
 0x2ac   :  { %v11001_v9 = vcombine.low %v17784_v43, %v17783_v42  ;;  %v11074_v50 = vcombine.high %v17788_v12, %v17787_v35  ;;  %v15028_v42 = vrot.slane %v10998_v47, %v14155_v57 }
 0x2ae   :  { %6629 = vmatpush2.bf16.msra.mxu1 %v11077_v36  ;;  %6710 = vmatpush2.bf16.msra.mxu0 %v11109_v7  ;;  %17791 = vst [vmem:[#allocation33_spill] sm:$0xff] %v15028_v42  ;;  %v3920_v20 = vrot.slane %v11001_v9, %v14155_v57  ;;  %v11073_v36 = vcombine.low %v17788_v12, %v17787_v35  ;;  %v17795_v9 = vld [vmem:[#allocation35_spill] sm:$0xff] }
 0x2af   :  { %6630 = vmatprep.subr.bf16.mxu1 %v11076_v39  ;;  %6711 = vmatprep.subr.bf16.mxu0 %v11108_v46  ;;  %v3618_v7 = vcombine.low %v14932_v44, %v14935_v45  ;;  %v11105_v39 = vcombine.low %v17790_v34, %v17789_v2  ;;  %v17793_v46 = vld [vmem:[#allocation13_spill] sm:$0xff]  ;;  %v11104_v35 = vcombine.high %v17795_v9, %v17794_v13  ;;  %v17799_v2 = vld [vmem:[#allocation328_spill] sm:$0xff] }
 0x2b0   :  { %v11072_v47 = vcombine.high %v17793_v46, %v17792_v14  ;;  %v11071_v49 = vcombine.low %v17793_v46, %v17792_v14  ;;  %v3957_v44 = vcombine.high %v3906_v30, %v3920_v20  ;;  %v3961_v45 = vcombine.high %v15028_v42, %v3948_v58  ;;  %v17798_v34 = vld [vmem:[#allocation329_spill] sm:$0xff] }
 0x2b1   :  { %v11017_v12 = vcombine.low %v17799_v2, %v17798_v34  ;;  %v17802_v14 = vcombine.high %v17799_v2, %v17801_v54  ;;  %v11103_v51 = vcombine.low %v17795_v9, %v17794_v13  ;;  %v3632_v0 = vrot.slane %v3618_v7, %v14155_v57  ;;  %v17810_v13 = vld [vmem:[#allocation64_spill] sm:$0xff]  ;;  %v17811_v7 = vld [vmem:[#allocation63_spill] sm:$0xff] }
 0x2b2   :  { %6631 = vmatpush2.bf16.msra.mxu1 %v11075_v4  ;;  %6712 = vmatpush2.bf16.msra.mxu0 %v11107_v40  ;;  %v17797_v4 = vld [vmem:[#allocation310_spill] sm:$0xff]  ;;  %v11134_v34 = vcombine.high %v17807_v26, %v17806_v23  ;;  %v11133_v2 = vcombine.low %v17807_v26, %v17806_v23  ;;  %v11132_v9 = vcombine.high %v17811_v7, %v17810_v13 }
 0x2b3   :  { %6632 = vmatprep.subr.bf16.mxu1 %v11074_v50  ;;  %6713 = vmatprep.subr.bf16.mxu0 %v11106_v53  ;;  %v11015_v40 = vcombine.low %v17797_v4, %v17796_v10  ;;  %v11019_v50 = vcombine.low %v17802_v14, %v17800_v63  ;;  %v17803_v53 = vld [vmem:[#allocation334_spill] sm:$0xff]  ;;  %v3660_v10 = vrot.slane %v3622_v32, %v14155_v57 }
 0x2b4   :  { %v17804_v46 = vcombine.high %v17800_v63, %v17803_v53  ;;  %v17808_v14 = vld [vmem:[#allocation98_spill] sm:$0xff]  ;;  %v3984_v32 = vrot.slane %v3957_v44, %v14155_v57  ;;  %v4012_v11 = vrot.slane %v3961_v45, %v14155_v57  ;;  %v17812_v44 = vld [vmem:[#allocation96_spill] sm:$0xff]  ;;  %v17813_v45 = vld [vmem:[#allocation95_spill] sm:$0xff] }
 0x2b5   :  { %v11166_v18 = vcombine.high %v17809_v61, %v17808_v14  ;;  %v4272_v23 = vrot.slane %v11019_v50, %v14155_v57  ;;  %v3682_v3 = vcombine.low %v3632_v0, %v3660_v10  ;;  %v3683_v55 = vcombine.high %v3632_v0, %v3660_v10 }
 0x2b6   :  { %v11021_v33 = vcombine.low %v17805_v56, %v17804_v46  ;;  %6633 = vmatpush2.bf16.msra.mxu1 %v11073_v36  ;;  %6714 = vmatpush2.bf16.msra.mxu0 %v11105_v39  ;;  %v11165_v46 = vcombine.low %v17809_v61, %v17808_v14  ;;  %v4244_v36 = vrot.slane %v11015_v40, %v14155_v57  ;;  %v17814_v40 = vld [vmem:[#allocation341_spill] sm:$0xff] }
 0x2b7   :  { %6634 = vmatprep.subr.bf16.mxu1 %v11072_v47  ;;  %6715 = vmatprep.subr.bf16.mxu0 %v11104_v35  ;;  %v4258_v39 = vrot.slane %v11017_v12, %v14155_v57  ;;  %v3956_v61 = vcombine.low %v3906_v30, %v3920_v20  ;;  %v3960_v47 = vcombine.low %v15028_v42, %v3948_v58  ;;  %v17821_v42 = vld [vmem:[#allocation94_spill] sm:$0xff] }
 0x2b8   :  { %v4286_v26 = vrot.slane %v11021_v33, %v14155_v57  ;;  %v11131_v35 = vcombine.low %v17811_v7, %v17810_v13  ;;  %v11164_v14 = vcombine.high %v17813_v45, %v17812_v44  ;;  %v11026_v12 = vcombine.low %v17815_v60, %v17814_v40  ;;  %v17816_v33 = vld [vmem:[#allocation344_spill] sm:$0xff]  ;;  %v17819_v40 = vld [vmem:[#allocation62_spill] sm:$0xff] }
 0x2b9   :  { %v17817_v0 = vcombine.high %v17815_v60, %v17816_v33  ;;  %v17818_v20 = vcombine.high %v14664_v22, %v14704_v21  ;;  %v11037_v58 = vcombine.low %v14750_v19, %v14753_v27  ;;  %v4025_v50 = vcombine.high %v3984_v32, %v4012_v11  ;;  %v17822_v27 = vld [vmem:[#allocation93_spill] sm:$0xff] }
 0x2ba   :  { %6635 = vmatpush2.bf16.msra.mxu1 %v11071_v49  ;;  %6716 = vmatpush2.bf16.msra.mxu0 %v11103_v51  ;;  %v4024_v49 = vcombine.low %v3984_v32, %v4012_v11  ;;  %v4295_v10 = vcombine.high %v4244_v36, %v4258_v39  ;;  %v4299_v13 = vcombine.high %v4272_v23, %v4286_v26 }
 0x2bb   :  { %6766 = vmatprep.subr.bf16.mxu1 %v11134_v34  ;;  %6847 = vmatprep.subr.bf16.mxu0 %v11166_v18  ;;  %v11033_v30 = vcombine.low %v17817_v0, %v14664_v22  ;;  %v11035_v51 = vcombine.low %v14667_v59, %v17818_v20  ;;  %v11163_v18 = vcombine.low %v17813_v45, %v17812_v44  ;;  %v17820_v0 = vld [vmem:[#allocation61_spill] sm:$0xff] }
 0x2bc   :  { %v3970_v34 = vrot.slane %v3956_v61, %v14155_v57  ;;  %v3998_v7 = vrot.slane %v3960_v47, %v14155_v57  ;;  %v11130_v20 = vcombine.high %v17820_v0, %v17819_v40  ;;  %v11162_v29 = vcombine.high %v17822_v27, %v17821_v42 }
 0x2bd   :  { %6637 = vmatmul.mubr.bf16.vlgmr.msra.gmra.mxu1 %v3682_v3  ;;  %6718 = vmatmul.mubr.bf16.vlgmr.msra.gmra.mxu0 %v3683_v55  ;;  %v15108_v11 = vrot.slane %v11026_v12, %v14155_v57  ;;  %v15111_v3 = vrot.slane %v11033_v30, %v14155_v57  ;;  %v15114_v55 = vrot.slane %v11035_v51, %v14155_v57  ;;  %v17823_v12 = vld [vmem:[#allocation60_spill] sm:$0xff]  ;;  %v17824_v30 = vld [vmem:[#allocation59_spill] sm:$0xff] }
 0x2be   :  { %6767 = vmatpush1.bf16.msra.mxu1 %v11133_v2  ;;  %6848 = vmatpush1.bf16.msra.mxu0 %v11165_v46  ;;  %v15117_v2 = vrot.slane %v11037_v58, %v14155_v57  ;;  %v4322_v46 = vrot.slane %v4295_v10, %v14155_v57  ;;  %v4350_v32 = vrot.slane %v4299_v13, %v14155_v57  ;;  %v17825_v58 = vld [vmem:[#allocation92_spill] sm:$0xff]  ;;  %v17827_v13 = vld [vmem:[#allocation58_spill] sm:$0xff] }
 0x2bf   :  { %6768 = vmatprep.subr.bf16.mxu1 %v11132_v9  ;;  %6849 = vmatprep.subr.bf16.mxu0 %v11164_v14  ;;  %v4020_v61 = vcombine.low %v3970_v34, %v3998_v7  ;;  %v4021_v47 = vcombine.high %v3970_v34, %v3998_v7  ;;  %v4294_v44 = vcombine.low %v4244_v36, %v4258_v39  ;;  %v17829_v7 = vld [vmem:[#allocation355_spill] sm:$0xff] }
 0x2c0   :  { %6646 = vmatprep.mubr.bf16.mxu1 %v4024_v49  ;;  %6727 = vmatprep.mubr.bf16.mxu0 %v4025_v50  ;;  %v4298_v9 = vcombine.low %v4272_v23, %v4286_v26  ;;  %v11129_v45 = vcombine.low %v17820_v0, %v17819_v40  ;;  %v11161_v14 = vcombine.low %v17822_v27, %v17821_v42  ;;  %v17826_v49 = vld [vmem:[#allocation91_spill] sm:$0xff] }
 0x2c1   :  { %v11128_v51 = vcombine.high %v17824_v30, %v17823_v12  ;;  %v11160_v50 = vcombine.high %v17826_v49, %v17825_v58  ;;  %v4633_v36 = vcombine.high %v15108_v11, %v15111_v3  ;;  %v4637_v39 = vcombine.high %v15114_v55, %v15117_v2 }
 0x2c2   :  { %6769 = vmatpush1.bf16.msra.mxu1 %v11131_v35  ;;  %6850 = vmatpush1.bf16.msra.mxu0 %v11163_v18  ;;  %v11127_v23 = vcombine.low %v17824_v30, %v17823_v12  ;;  %v4362_v26 = vcombine.low %v4322_v46, %v4350_v32  ;;  %v4363_v35 = vcombine.high %v4322_v46, %v4350_v32  ;;  %v17828_v18 = vld [vmem:[#allocation57_spill] sm:$0xff]  ;;  %v17832_v46 = vld [vmem:[#allocation90_spill] sm:$0xff] }
 0x2c3   :  { %6770 = vmatprep.subr.bf16.mxu1 %v11130_v20  ;;  %6851 = vmatprep.subr.bf16.mxu0 %v11162_v29  ;;  %v11159_v42 = vcombine.low %v17826_v49, %v17825_v58  ;;  %v4308_v29 = vrot.slane %v4294_v44, %v14155_v57  ;;  %v4336_v10 = vrot.slane %v4298_v9, %v14155_v57  ;;  %v17833_v32 = vld [vmem:[#allocation89_spill] sm:$0xff]  ;;  %v17834_v58 = vld [vmem:[#allocation56_spill] sm:$0xff]  ;;  %v17835_v49 = vld [vmem:[#allocation55_spill] sm:$0xff] }
 0x2c4   :  { %v11126_v34 = vcombine.high %v17828_v18, %v17827_v13  ;;  %v17830_v40 = vcombine.high %v14750_v19, %v17829_v7  ;;  %v17831_v20 = vcombine.high %v14762_v37, %v14812_v16  ;;  %v4688_v44 = vrot.slane %v4637_v39, %v14155_v57 }
 0x2c5   :  { %6647 = vmatmul.mubr.bf16.gmra.mxu1 %v4020_v61  ;;  %6728 = vmatmul.mubr.bf16.gmra.mxu0 %v4021_v47  ;;  %v11158_v61 = vcombine.high %v17833_v32, %v17832_v46  ;;  %v4660_v47 = vrot.slane %v4633_v36, %v14155_v57  ;;  %v11125_v9 = vcombine.low %v17828_v18, %v17827_v13  ;;  %v17838_v13 = vld [vmem:[#allocation277_spill] sm:$0xff] }
 0x2c6   :  { %6771 = vmatpush1.bf16.msra.mxu1 %v11129_v45  ;;  %6852 = vmatpush1.bf16.msra.mxu0 %v11161_v14  ;;  %v11047_v0 = vcombine.low %v17830_v40, %v14762_v37  ;;  %v11049_v27 = vcombine.low %v14765_v1, %v17831_v20  ;;  %v11157_v45 = vcombine.low %v17833_v32, %v17832_v46 }
 0x2c7   :  { %6772 = vmatprep.subr.bf16.mxu1 %v11128_v51  ;;  %6853 = vmatprep.subr.bf16.mxu0 %v11160_v50  ;;  %v4358_v14 = vcombine.low %v4308_v29, %v4336_v10  ;;  %v4359_v12 = vcombine.high %v4308_v29, %v4336_v10  ;;  %v4632_v30 = vcombine.low %v15108_v11, %v15111_v3 }
 0x2c8   :  { %6656 = vmatprep.mubr.bf16.mxu1 %v4362_v26  ;;  %6737 = vmatprep.mubr.bf16.mxu0 %v4363_v35  ;;  %v4636_v51 = vcombine.low %v15114_v55, %v15117_v2  ;;  %v11124_v50 = vcombine.high %v17835_v49, %v17834_v58  ;;  %v4916_v36 = vrot.slane %v11047_v0, %v14155_v57  ;;  %v17836_v26 = vld [vmem:[#allocation88_spill] sm:$0xff]  ;;  %v17837_v35 = vld [vmem:[#allocation87_spill] sm:$0xff] }
 0x2c9   :  { %v4930_v39 = vrot.slane %v11049_v27, %v14155_v57  ;;  %v11156_v29 = vcombine.high %v17837_v35, %v17836_v26  ;;  %v4700_v10 = vcombine.low %v4660_v47, %v4688_v44  ;;  %v10984_v3 = vcombine.low %v17737_v6, %v17838_v13  ;;  %v17849_v13 = vld [vmem:[#allocation84_spill] sm:$0xff] }
 0x2ca   :  { %6773 = vmatpush1.bf16.msra.mxu1 %v11127_v23  ;;  %6854 = vmatpush1.bf16.msra.mxu0 %v11159_v42  ;;  %v4701_v18 = vcombine.high %v4660_v47, %v4688_v44  ;;  %v17839_v55 = vcombine.low %v17736_v31, %v17739_v38  ;;  %v17840_v42 = vld [vmem:[#allocation285_spill] sm:$0xff]  ;;  %v4646_v27 = vrot.slane %v4632_v30, %v14155_v57  ;;  %v17845_v47 = vld [vmem:[#allocation86_spill] sm:$0xff] }
 0x2cb   :  { %6774 = vmatprep.subr.bf16.mxu1 %v11126_v34  ;;  %6855 = vmatprep.subr.bf16.mxu0 %v11158_v61  ;;  %v17841_v40 = vcombine.low %v17741_v62, %v17840_v42  ;;  %v17842_v34 = vld [vmem:[#allocation297_spill] sm:$0xff]  ;;  %v4674_v46 = vrot.slane %v4636_v51, %v14155_v57  ;;  %v11123_v31 = vcombine.low %v17835_v49, %v17834_v58 }
 0x2cc   :  { %v10986_v23 = vcombine.high %v17737_v6, %v17839_v55  ;;  %v10990_v20 = vcombine.low %v17780_v48, %v17842_v34  ;;  %v11155_v6 = vcombine.low %v17837_v35, %v17836_v26  ;;  %v4939_v32 = vcombine.high %v4916_v36, %v4930_v39  ;;  %v17844_v62 = vld [vmem:[#allocation53_spill] sm:$0xff]  ;;  %v17847_v35 = vld [vmem:[#allocation52_spill] sm:$0xff] }
 0x2cd   :  { %v10988_v0 = vcombine.high %v17841_v40, %v17739_v38  ;;  %6657 = vmatmul.mubr.bf16.gmra.mxu1 %v4358_v14  ;;  %6738 = vmatmul.mubr.bf16.gmra.mxu0 %v4359_v12  ;;  %v17843_v38 = vld [vmem:[#allocation54_spill] sm:$0xff]  ;;  %v17846_v44 = vld [vmem:[#allocation85_spill] sm:$0xff]  ;;  %v15190_v12 = vrot.slane %v10984_v3, %v14155_v57  ;;  %v4696_v51 = vcombine.low %v4646_v27, %v4674_v46  ;;  %v17850_v3 = vld [vmem:[#allocation83_spill] sm:$0xff] }
 0x2ce   :  { %6775 = vmatpush1.bf16.msra.mxu1 %v11125_v9  ;;  %6856 = vmatpush1.bf16.msra.mxu0 %v11157_v45  ;;  %v11122_v61 = vcombine.high %v17844_v62, %v17843_v38  ;;  %v11154_v14 = vcombine.high %v17846_v44, %v17845_v47  ;;  %v15193_v9 = vrot.slane %v10986_v23, %v14155_v57 }
 0x2cf   :  { %6776 = vmatprep.subr.bf16.mxu1 %v11124_v50  ;;  %6857 = vmatprep.subr.bf16.mxu0 %v11156_v29  ;;  %v15196_v45 = vrot.slane %v10988_v0, %v14155_v57  ;;  %v15199_v30 = vrot.slane %v10990_v20, %v14155_v57  ;;  %v4697_v58 = vcombine.high %v4646_v27, %v4674_v46  ;;  %v17848_v29 = vld [vmem:[#allocation51_spill] sm:$0xff]  ;;  %v17853_v27 = vld [vmem:[#allocation114_spill] sm:$0xff]  ;;  %v17854_v46 = vld [vmem:[#allocation113_spill] sm:$0xff] }
 0x2d0   :  { %6666 = vmatprep.mubr.bf16.mxu1 %v4700_v10  ;;  %6747 = vmatprep.mubr.bf16.mxu0 %v4701_v18  ;;  %v11121_v49 = vcombine.low %v17844_v62, %v17843_v38  ;;  %v11153_v50 = vcombine.low %v17846_v44, %v17845_v47  ;;  %v4962_v26 = vrot.slane %v4939_v32, %v14155_v57  ;;  %v17855_v44 = vld [vmem:[#allocation80_spill] sm:$0xff] }
 0x2d1   :  { %v11120_v10 = vcombine.high %v17848_v29, %v17847_v35  ;;  %v11152_v18 = vcombine.high %v17850_v3, %v17849_v13  ;;  %v4938_v55 = vcombine.low %v4916_v36, %v4930_v39  ;;  %v3621_v42 = vcombine.high %v15190_v12, %v15193_v9  ;;  %v17851_v36 = vld [vmem:[#allocation82_spill] sm:$0xff]  ;;  %v17852_v39 = vld [vmem:[#allocation81_spill] sm:$0xff] }
 0x2d2   :  { %6777 = vmatpush1.bf16.msra.mxu1 %v11123_v31  ;;  %6858 = vmatpush1.bf16.msra.mxu0 %v11155_v6  ;;  %v4972_v23 = vcombine.high %v4962_v26, %v4962_v26  ;;  %v3625_v40 = vcombine.high %v15196_v45, %v15199_v30  ;;  %v11119_v0 = vcombine.low %v17848_v29, %v17847_v35 }
 0x2d3   :  { %6778 = vmatprep.subr.bf16.mxu1 %v11122_v61  ;;  %6859 = vmatprep.subr.bf16.mxu0 %v11154_v14  ;;  %v11151_v34 = vcombine.low %v17850_v3, %v17849_v13  ;;  %v11150_v20 = vcombine.high %v17852_v39, %v17851_v36  ;;  %v11182_v31 = vcombine.high %v17854_v46, %v17853_v27  ;;  %v17856_v14 = vld [vmem:[#allocation79_spill] sm:$0xff]  ;;  %v17859_v13 = vld [vmem:[#allocation78_spill] sm:$0xff]  ;;  %v17860_v3 = vld [vmem:[#allocation77_spill] sm:$0xff] }
 0x2d4   :  { %v4948_v6 = vrot.slane %v4938_v55, %v14155_v57  ;;  %v3653_v32 = vrot.slane %v3621_v42, %v14155_v57  ;;  %v3681_v38 = vrot.slane %v3625_v40, %v14155_v57  ;;  %v11149_v61 = vcombine.low %v17852_v39, %v17851_v36  ;;  %v17861_v55 = vld [vmem:[#allocation110_spill] sm:$0xff]  ;;  %v17864_v36 = vld [vmem:[#allocation75_spill] sm:$0xff] }
 0x2d5   :  { %6667 = vmatmul.mubr.bf16.gmra.mxu1 %v4696_v51  ;;  %6748 = vmatmul.mubr.bf16.gmra.mxu0 %v4697_v58  ;;  %v11181_v47 = vcombine.low %v17854_v46, %v17853_v27  ;;  %v11148_v51 = vcombine.high %v17856_v14, %v17855_v44  ;;  %v17857_v58 = vld [vmem:[#allocation112_spill] sm:$0xff]  ;;  %v11147_v29 = vcombine.low %v17856_v14, %v17855_v44  ;;  %v17866_v27 = vld [vmem:[#allocation107_spill] sm:$0xff] }
 0x2d6   :  { %6779 = vmatpush1.bf16.msra.mxu1 %v11121_v49  ;;  %6860 = vmatpush1.bf16.msra.mxu0 %v11153_v50  ;;  %v4970_v62 = vcombine.high %v4948_v6, %v4948_v6  ;;  %v17858_v49 = vld [vmem:[#allocation111_spill] sm:$0xff]  ;;  %v3689_v35 = vcombine.high %v3653_v32, %v3681_v38  ;;  %v11145_v40 = vcombine.low %v17860_v3, %v17859_v13 }
 0x2d7   :  { %6780 = vmatprep.subr.bf16.mxu1 %v11120_v10  ;;  %6861 = vmatprep.subr.bf16.mxu0 %v11152_v18  ;;  %v11180_v50 = vcombine.high %v17858_v49, %v17857_v58  ;;  %v11179_v10 = vcombine.low %v17858_v49, %v17857_v58  ;;  %v11146_v18 = vcombine.high %v17860_v3, %v17859_v13  ;;  %v17871_v58 = vld [vmem:[#allocation72_spill] sm:$0xff]  ;;  %v17872_v49 = vld [vmem:[#allocation71_spill] sm:$0xff]  ;;  %v17876_v3 = vld [vmem:[#allocation301_spill] sm:$0xff] }
 0x2d8   :  { %6676 = vmatprep.mubr.bf16.mxu1 %v4962_v26  ;;  %6757 = vmatprep.mubr.bf16.mxu0 %v4972_v23  ;;  %v3688_v26 = vcombine.low %v3653_v32, %v3681_v38  ;;  %v17862_v23 = vld [vmem:[#allocation109_spill] sm:$0xff]  ;;  %v17867_v32 = vld [vmem:[#allocation74_spill] sm:$0xff] }
 0x2d9   :  { %v11178_v42 = vcombine.high %v17862_v23, %v17861_v55  ;;  %v17868_v38 = vld [vmem:[#allocation73_spill] sm:$0xff] }
 0x2da   :  { %6781 = vmatpush1.bf16.msra.mxu1 %v11119_v0  ;;  %6862 = vmatpush1.bf16.msra.mxu0 %v11151_v34  ;;  %v11177_v0 = vcombine.low %v17862_v23, %v17861_v55  ;;  %v17863_v34 = vld [vmem:[#allocation76_spill] sm:$0xff]  ;;  %v11141_v14 = vcombine.low %v17868_v38, %v17867_v32 }
 0x2db   :  { %6782 = vmatprep.subr.bf16.mxu1 %v11150_v20  ;;  %6863 = vmatprep.subr.bf16.mxu0 %v11182_v31  ;;  %v11144_v39 = vcombine.high %v17864_v36, %v17863_v34  ;;  %v17865_v20 = vld [vmem:[#allocation108_spill] sm:$0xff]  ;;  %v11143_v31 = vcombine.low %v17864_v36, %v17863_v34  ;;  %v11139_v34 = vcombine.low %v17872_v49, %v17871_v58  ;;  %v17880_v36 = vld [vmem:[#allocation70_spill] sm:$0xff] }
 0x2dc   :  { %v11176_v46 = vcombine.high %v17866_v27, %v17865_v20  ;;  %v17878_v23 = vld [vmem:[#allocation312_spill] sm:$0xff] }
 0x2dd   :  { %6677 = vmatmul.mubr.bf16.gmra.mxu1 %v4948_v6  ;;  %6758 = vmatmul.mubr.bf16.gmra.mxu0 %v4970_v62  ;;  %v11175_v6 = vcombine.low %v17866_v27, %v17865_v20  ;;  %v11142_v62 = vcombine.high %v17868_v38, %v17867_v32  ;;  %v17883_v27 = vld [vmem:[#allocation101_spill] sm:$0xff] }
 0x2de   :  { %6783 = vmatpush2.bf16.msra.mxu1 %v11149_v61  ;;  %6864 = vmatpush2.bf16.msra.mxu0 %v11181_v47  ;;  %v17869_v61 = vld [vmem:[#allocation106_spill] sm:$0xff]  ;;  %v17870_v47 = vld [vmem:[#allocation105_spill] sm:$0xff] }
 0x2df   :  { %6784 = vmatprep.subr.bf16.mxu1 %v11148_v51  ;;  %6865 = vmatprep.subr.bf16.mxu0 %v11180_v50  ;;  %v11174_v44 = vcombine.high %v17870_v47, %v17869_v61  ;;  %v11173_v51 = vcombine.low %v17870_v47, %v17869_v61  ;;  %v11140_v50 = vcombine.high %v17872_v49, %v17871_v58  ;;  %v17886_v49 = vld [vmem:[#allocation100_spill] sm:$0xff] }
 0x2e0   :  { %6798 = vmatprep.mubr.bf16.mxu1 %v3688_v26  ;;  %6879 = vmatprep.mubr.bf16.mxu0 %v3689_v35  ;;  %v17873_v26 = vld [vmem:[#allocation104_spill] sm:$0xff]  ;;  %v17874_v35 = vld [vmem:[#allocation103_spill] sm:$0xff]  ;;  %v3620_v61 = vcombine.low %v15190_v12, %v15193_v9  ;;  %v3624_v47 = vcombine.low %v15196_v45, %v15199_v30 }
 0x2e1   :  { %v17888_v45 = vld [vmem:[#allocation315_spill] sm:$0xff] }
 0x2e2   :  { %6785 = vmatpush2.bf16.msra.mxu1 %v11147_v29  ;;  %6866 = vmatpush2.bf16.msra.mxu0 %v11179_v10  ;;  %v11172_v29 = vcombine.high %v17874_v35, %v17873_v26  ;;  %v17875_v10 = vcombine.low %v17779_v28, %v17782_v8  ;;  %v17889_v30 = vcombine.low %v17797_v4, %v17888_v45 }
 0x2e3   :  { %6786 = vmatprep.subr.bf16.mxu1 %v11146_v18  ;;  %6867 = vmatprep.subr.bf16.mxu0 %v11178_v42  ;;  %v17877_v18 = vcombine.low %v17784_v43, %v17876_v3  ;;  %v11004_v42 = vcombine.low %v17785_v41, %v17878_v23  ;;  %v17891_v3 = vcombine.low %v17800_v63, %v17803_v53  ;;  %v17896_v63 = vld [vmem:[#allocation162_spill] sm:$0xff] }
 0x2e4   :  { %v11000_v13 = vcombine.high %v17780_v48, %v17875_v10  ;;  %v11171_v48 = vcombine.low %v17874_v35, %v17873_v26  ;;  %v17890_v10 = vld [vmem:[#allocation327_spill] sm:$0xff] }
 0x2e5   :  { %v11002_v55 = vcombine.high %v17877_v18, %v17782_v8  ;;  %v17882_v8 = vld [vmem:[#allocation102_spill] sm:$0xff]  ;;  %v11020_v18 = vcombine.high %v17801_v54, %v17891_v3 }
 0x2e6   :  { %6787 = vmatpush2.bf16.msra.mxu1 %v11145_v40  ;;  %6868 = vmatpush2.bf16.msra.mxu0 %v11177_v0  ;;  %v17879_v40 = vcombine.low %v14401_v24, %v14463_v17 }
 0x2e7   :  { %6788 = vmatprep.subr.bf16.mxu1 %v11144_v39  ;;  %6869 = vmatprep.subr.bf16.mxu0 %v11176_v46  ;;  %v17881_v39 = vld [vmem:[#allocation69_spill] sm:$0xff]  ;;  %v11170_v46 = vcombine.high %v17883_v27, %v17882_v8 }
 0x2e8   :  { %v11006_v0 = vcombine.high %v17785_v41, %v17879_v40  ;;  %v11138_v20 = vcombine.high %v17881_v39, %v17880_v36  ;;  %v3927_v41 = vrot.slane %v11002_v55, %v14155_v57  ;;  %v11137_v38 = vcombine.low %v17881_v39, %v17880_v36  ;;  %v17892_v55 = vld [vmem:[#allocation335_spill] sm:$0xff]  ;;  %v17897_v39 = vld [vmem:[#allocation161_spill] sm:$0xff] }
 0x2e9   :  { %v17893_v23 = vcombine.low %v17805_v56, %v17892_v55  ;;  %v3639_v40 = vrot.slane %v3620_v61, %v14155_v57  ;;  %v17898_v56 = vld [vmem:[#allocation128_spill] sm:$0xff] }
 0x2ea   :  { %6789 = vmatpush2.bf16.msra.mxu1 %v11143_v31  ;;  %6870 = vmatpush2.bf16.msra.mxu0 %v11175_v6  ;;  %v15288_v31 = vrot.slane %v11000_v13, %v14155_v57  ;;  %v3941_v6 = vrot.slane %v11004_v42, %v14155_v57  ;;  %v3955_v32 = vrot.slane %v11006_v0, %v14155_v57 }
 0x2eb   :  { %6790 = vmatprep.subr.bf16.mxu1 %v11142_v62  ;;  %6871 = vmatprep.subr.bf16.mxu0 %v11174_v44  ;;  %v11169_v62 = vcombine.low %v17883_v27, %v17882_v8  ;;  %v17884_v44 = vld [vmem:[#allocation68_spill] sm:$0xff]  ;;  %v11018_v13 = vcombine.low %v17801_v54, %v17890_v10  ;;  %v11022_v42 = vcombine.high %v17893_v23, %v17803_v53  ;;  %v17899_v53 = vld [vmem:[#allocation127_spill] sm:$0xff] }
 0x2ec   :  { %v3959_v12 = vcombine.high %v15288_v31, %v3927_v41  ;;  %v3963_v9 = vcombine.high %v3941_v6, %v3955_v32  ;;  %v3667_v0 = vrot.slane %v3624_v47, %v14155_v57  ;;  %v11230_v54 = vcombine.high %v17897_v39, %v17896_v63 }
 0x2ed   :  { %v11196_v8 = vcombine.high %v17899_v53, %v17898_v56  ;;  %v11195_v27 = vcombine.low %v17899_v53, %v17898_v56  ;;  %v4279_v47 = vrot.slane %v11020_v18, %v14155_v57 }
 0x2ee   :  { %6791 = vmatpush2.bf16.msra.mxu1 %v11141_v14  ;;  %6872 = vmatpush2.bf16.msra.mxu0 %v11173_v51  ;;  %v17885_v14 = vld [vmem:[#allocation67_spill] sm:$0xff]  ;;  %v4019_v61 = vrot.slane %v3963_v9, %v14155_v57  ;;  %v17902_v9 = vld [vmem:[#allocation345_spill] sm:$0xff] }
 0x2ef   :  { %6792 = vmatprep.subr.bf16.mxu1 %v11140_v50  ;;  %6873 = vmatprep.subr.bf16.mxu0 %v11172_v29  ;;  %v11136_v51 = vcombine.high %v17885_v14, %v17884_v44  ;;  %v11135_v58 = vcombine.low %v17885_v14, %v17884_v44  ;;  %v17887_v50 = vld [vmem:[#allocation99_spill] sm:$0xff]  ;;  %v11016_v29 = vcombine.high %v17889_v30, %v14463_v17 }
 0x2f0   :  { %v11168_v26 = vcombine.high %v17887_v50, %v17886_v49  ;;  %v11167_v35 = vcombine.low %v17887_v50, %v17886_v49  ;;  %v4293_v44 = vrot.slane %v11022_v42, %v14155_v57  ;;  %v3684_v14 = vcombine.low %v3639_v40, %v3667_v0  ;;  %v17907_v42 = vld [vmem:[#allocation126_spill] sm:$0xff] }
 0x2f1   :  { %v3685_v49 = vcombine.high %v3639_v40, %v3667_v0  ;;  %v3962_v50 = vcombine.low %v3941_v6, %v3955_v32  ;;  %v11032_v30 = vcombine.low %v17816_v33, %v17902_v9  ;;  %v17906_v32 = vld [vmem:[#allocation356_spill] sm:$0xff]  ;;  %v17908_v40 = vld [vmem:[#allocation125_spill] sm:$0xff] }
 0x2f2   :  { %6793 = vmatpush2.bf16.msra.mxu1 %v11139_v34  ;;  %6874 = vmatpush2.bf16.msra.mxu0 %v11171_v48  ;;  %v17894_v34 = vld [vmem:[#allocation130_spill] sm:$0xff]  ;;  %v17895_v48 = vld [vmem:[#allocation129_spill] sm:$0xff]  ;;  %v4301_v55 = vcombine.high %v4279_v47, %v4293_v44  ;;  %v11194_v0 = vcombine.high %v17908_v40, %v17907_v42 }
 0x2f3   :  { %6794 = vmatprep.subr.bf16.mxu1 %v11138_v20  ;;  %6875 = vmatprep.subr.bf16.mxu0 %v11170_v46  ;;  %v11198_v17 = vcombine.high %v17895_v48, %v17894_v34  ;;  %v11197_v36 = vcombine.low %v17895_v48, %v17894_v34  ;;  %v11229_v20 = vcombine.low %v17897_v39, %v17896_v63  ;;  %v17910_v63 = vld [vmem:[#allocation157_spill] sm:$0xff] }
 0x2f4   :  { %v3991_v46 = vrot.slane %v3959_v12, %v14155_v57  ;;  %v17901_v12 = vld [vmem:[#allocation159_spill] sm:$0xff]  ;;  %v4005_v23 = vrot.slane %v3962_v50, %v14155_v57  ;;  %v15371_v34 = vrot.slane %v11032_v30, %v14155_v57  ;;  %v4357_v53 = vrot.slane %v4301_v55, %v14155_v57 }
 0x2f6   :  { %6795 = vmatpush2.bf16.msra.mxu1 %v11137_v38  ;;  %6876 = vmatpush2.bf16.msra.mxu0 %v11169_v62  ;;  %v15341_v38 = vrot.slane %v11016_v29, %v14155_v57  ;;  %v4265_v62 = vrot.slane %v11018_v13, %v14155_v57  ;;  %v17903_v29 = vcombine.low %v14664_v22, %v14704_v21 }
 0x2f7   :  { %6796 = vmatprep.subr.bf16.mxu1 %v11136_v51  ;;  %6877 = vmatprep.subr.bf16.mxu0 %v11168_v26  ;;  %v3958_v51 = vcombine.low %v15288_v31, %v3927_v41  ;;  %v17900_v26 = vld [vmem:[#allocation160_spill] sm:$0xff]  ;;  %v4027_v3 = vcombine.high %v3991_v46, %v4019_v61 }
 0x2f8   :  { %v11228_v45 = vcombine.high %v17901_v12, %v17900_v26  ;;  %v11034_v10 = vcombine.high %v17816_v33, %v17903_v29  ;;  %v11227_v13 = vcombine.low %v17901_v12, %v17900_v26  ;;  %v17904_v31 = vld [vmem:[#allocation348_spill] sm:$0xff]  ;;  %v4297_v18 = vcombine.high %v15341_v38, %v4265_v62  ;;  %v17914_v12 = vld [vmem:[#allocation155_spill] sm:$0xff] }
 0x2f9   :  { %v17905_v41 = vcombine.low %v14667_v59, %v17904_v31  ;;  %v3977_v33 = vrot.slane %v3958_v51, %v14155_v57  ;;  %v17912_v51 = vld [vmem:[#allocation123_spill] sm:$0xff]  ;;  %v17913_v26 = vld [vmem:[#allocation156_spill] sm:$0xff] }
 0x2fa   :  { %6797 = vmatpush2.bf16.msra.mxu1 %v11135_v58  ;;  %6878 = vmatpush2.bf16.msra.mxu0 %v11167_v35  ;;  %v11038_v58 = vcombine.low %v17829_v7, %v17906_v32  ;;  %v4026_v35 = vcombine.low %v3991_v46, %v4019_v61  ;;  %v15374_v48 = vrot.slane %v11034_v10, %v14155_v57  ;;  %v17920_v32 = vld [vmem:[#allocation153_spill] sm:$0xff] }
 0x2fb   :  { %6928 = vmatprep.subr.bf16.mxu1 %v11198_v17  ;;  %7009 = vmatprep.subr.bf16.mxu0 %v11230_v54  ;;  %v11036_v6 = vcombine.high %v17905_v41, %v14704_v21  ;;  %v11193_v21 = vcombine.low %v17908_v40, %v17907_v42  ;;  %v17909_v17 = vld [vmem:[#allocation158_spill] sm:$0xff]  ;;  %v4329_v56 = vrot.slane %v4297_v18, %v14155_v57 }
 0x2fc   :  { %v11226_v39 = vcombine.high %v17910_v63, %v17909_v17  ;;  %v4023_v46 = vcombine.high %v3977_v33, %v4005_v23  ;;  %v4296_v61 = vcombine.low %v15341_v38, %v4265_v62  ;;  %v4635_v9 = vcombine.high %v15371_v34, %v15374_v48 }
 0x2fd   :  { %6799 = vmatmul.mubr.bf16.vlgmr.msra.gmra.mxu1 %v3684_v14  ;;  %6880 = vmatmul.mubr.bf16.vlgmr.msra.gmra.mxu0 %v3685_v49  ;;  %v15379_v54 = vrot.slane %v11036_v6, %v14155_v57  ;;  %v4300_v14 = vcombine.low %v4279_v47, %v4293_v44  ;;  %v17911_v49 = vld [vmem:[#allocation124_spill] sm:$0xff]  ;;  %v17915_v38 = vcombine.low %v14762_v37, %v14812_v16  ;;  %v17918_v6 = vld [vmem:[#allocation121_spill] sm:$0xff] }
 0x2fe   :  { %6929 = vmatpush1.bf16.msra.mxu1 %v11197_v36  ;;  %7010 = vmatpush1.bf16.msra.mxu0 %v11229_v20  ;;  %v15382_v36 = vrot.slane %v11038_v58, %v14155_v57  ;;  %v11225_v20 = vcombine.low %v17910_v63, %v17909_v17  ;;  %v11192_v50 = vcombine.high %v17912_v51, %v17911_v49  ;;  %v17921_v17 = vld [vmem:[#allocation120_spill] sm:$0xff]  ;;  %v17922_v63 = vld [vmem:[#allocation119_spill] sm:$0xff] }
 0x2ff   :  { %6930 = vmatprep.subr.bf16.mxu1 %v11196_v8  ;;  %7011 = vmatprep.subr.bf16.mxu0 %v11228_v45  ;;  %v4022_v8 = vcombine.low %v3977_v33, %v4005_v23  ;;  %v11224_v45 = vcombine.high %v17914_v12, %v17913_v26  ;;  %v17916_v62 = vcombine.low %v14765_v1, %v14815_v25 }
 0x300   :  { %6808 = vmatprep.mubr.bf16.mxu1 %v4026_v35  ;;  %6889 = vmatprep.mubr.bf16.mxu0 %v4027_v3  ;;  %v4639_v30 = vcombine.high %v15379_v54, %v15382_v36  ;;  %v11191_v44 = vcombine.low %v17912_v51, %v17911_v49  ;;  %v4364_v29 = vcombine.low %v4329_v56, %v4357_v53 }
 0x301   :  { %v11050_v47 = vcombine.high %v17916_v62, %v14812_v16  ;;  %v4365_v10 = vcombine.high %v4329_v56, %v4357_v53  ;;  %v4315_v31 = vrot.slane %v4296_v61, %v14155_v57  ;;  %v4343_v41 = vrot.slane %v4300_v14, %v14155_v57  ;;  %v17919_v16 = vld [vmem:[#allocation154_spill] sm:$0xff]  ;;  %v17924_v56 = vld [vmem:[#allocation151_spill] sm:$0xff]  ;;  %v17925_v61 = vld [vmem:[#allocation280_spill] sm:$0xff] }
 0x302   :  { %6931 = vmatpush1.bf16.msra.mxu1 %v11195_v27  ;;  %7012 = vmatpush1.bf16.msra.mxu0 %v11227_v13  ;;  %v11048_v27 = vcombine.high %v17829_v7, %v17915_v38  ;;  %v11223_v13 = vcombine.low %v17914_v12, %v17913_v26  ;;  %v17917_v7 = vld [vmem:[#allocation122_spill] sm:$0xff]  ;;  %v11222_v58 = vcombine.high %v17920_v32, %v17919_v16 }
 0x303   :  { %6932 = vmatprep.subr.bf16.mxu1 %v11194_v0  ;;  %7013 = vmatprep.subr.bf16.mxu0 %v11226_v39  ;;  %v11190_v25 = vcombine.high %v17918_v6, %v17917_v7  ;;  %v4667_v35 = vrot.slane %v4635_v9, %v14155_v57  ;;  %v4695_v3 = vrot.slane %v4639_v30, %v14155_v57  ;;  %v17931_v12 = vld [vmem:[#allocation298_spill] sm:$0xff] }
 0x304   :  { %v4923_v18 = vrot.slane %v11048_v27, %v14155_v57  ;;  %v4937_v55 = vrot.slane %v11050_v47, %v14155_v57  ;;  %v11189_v33 = vcombine.low %v17918_v6, %v17917_v7  ;;  %v4360_v23 = vcombine.low %v4315_v31, %v4343_v41  ;;  %v17933_v47 = vld [vmem:[#allocation118_spill] sm:$0xff] }
 0x305   :  { %6809 = vmatmul.mubr.bf16.gmra.mxu1 %v4022_v8  ;;  %6890 = vmatmul.mubr.bf16.gmra.mxu0 %v4023_v46  ;;  %v4361_v42 = vcombine.high %v4315_v31, %v4343_v41  ;;  %v4634_v40 = vcombine.low %v15371_v34, %v15374_v48  ;;  %v4638_v0 = vcombine.low %v15379_v54, %v15382_v36  ;;  %v17926_v34 = vld [vmem:[#allocation283_spill] sm:$0xff]  ;;  %v17927_v54 = vld [vmem:[#allocation292_spill] sm:$0xff] }
 0x306   :  { %6933 = vmatpush1.bf16.msra.mxu1 %v11193_v21  ;;  %7014 = vmatpush1.bf16.msra.mxu0 %v11225_v20  ;;  %v11221_v21 = vcombine.low %v17920_v32, %v17919_v16  ;;  %v11188_v39 = vcombine.high %v17922_v63, %v17921_v17  ;;  %v17923_v20 = vld [vmem:[#allocation152_spill] sm:$0xff]  ;;  %v4702_v8 = vcombine.low %v4667_v35, %v4695_v3 }
 0x307   :  { %6934 = vmatprep.subr.bf16.mxu1 %v11192_v50  ;;  %7015 = vmatprep.subr.bf16.mxu0 %v11224_v45  ;;  %v11220_v53 = vcombine.high %v17924_v56, %v17923_v20  ;;  %v4941_v46 = vcombine.high %v4923_v18, %v4937_v55  ;;  %v10991_v48 = vcombine.low %v17926_v34, %v17925_v61  ;;  %v17930_v50 = vld [vmem:[#allocation293_spill] sm:$0xff]  ;;  %v17932_v45 = vld [vmem:[#allocation299_spill] sm:$0xff]  ;;  %v17943_v61 = vld [vmem:[#allocation178_spill] sm:$0xff] }
 0x308   :  { %6818 = vmatprep.mubr.bf16.mxu1 %v4364_v29  ;;  %6899 = vmatprep.mubr.bf16.mxu0 %v4365_v10  ;;  %v4703_v14 = vcombine.high %v4667_v35, %v4695_v3  ;;  %v17928_v36 = vcombine.high %v17926_v34, %v17743_v15  ;;  %v17929_v51 = vcombine.high %v17927_v54, %v17779_v28  ;;  %v17935_v10 = vld [vmem:[#allocation150_spill] sm:$0xff]  ;;  %v17944_v34 = vld [vmem:[#allocation177_spill] sm:$0xff] }
 0x309   :  { %v10997_v9 = vcombine.low %v17932_v45, %v17931_v12  ;;  %v4653_v30 = vrot.slane %v4634_v40, %v14155_v57  ;;  %v4681_v38 = vrot.slane %v4638_v0, %v14155_v57  ;;  %v11187_v27 = vcombine.low %v17922_v63, %v17921_v17  ;;  %v17939_v0 = vld [vmem:[#allocation148_spill] sm:$0xff] }
 0x30a   :  { %6935 = vmatpush1.bf16.msra.mxu1 %v11191_v44  ;;  %7016 = vmatpush1.bf16.msra.mxu0 %v11223_v13  ;;  %v10993_v49 = vcombine.low %v17928_v36, %v17927_v54  ;;  %v10995_v26 = vcombine.low %v17930_v50, %v17929_v51  ;;  %v11219_v62 = vcombine.low %v17924_v56, %v17923_v20  ;;  %v17934_v44 = vld [vmem:[#allocation117_spill] sm:$0xff]  ;;  %v17945_v12 = vld [vmem:[#allocation144_spill] sm:$0xff] }
 0x30b   :  { %6936 = vmatprep.subr.bf16.mxu1 %v11190_v25  ;;  %7017 = vmatprep.subr.bf16.mxu0 %v11222_v58  ;;  %v11186_v29 = vcombine.high %v17934_v44, %v17933_v47  ;;  %v17936_v13 = vld [vmem:[#allocation149_spill] sm:$0xff]  ;;  %v4969_v41 = vrot.slane %v4941_v46, %v14155_v57  ;;  %v15455_v7 = vrot.slane %v10991_v48, %v14155_v57 }
 0x30c   :  { %v11218_v31 = vcombine.high %v17936_v13, %v17935_v10  ;;  %v15458_v6 = vrot.slane %v10993_v49, %v14155_v57  ;;  %v15461_v25 = vrot.slane %v10995_v26, %v14155_v57  ;;  %v15464_v16 = vrot.slane %v10997_v9, %v14155_v57  ;;  %v17946_v9 = vld [vmem:[#allocation143_spill] sm:$0xff] }
 0x30d   :  { %6819 = vmatmul.mubr.bf16.gmra.mxu1 %v4360_v23  ;;  %6900 = vmatmul.mubr.bf16.gmra.mxu0 %v4361_v42  ;;  %v4698_v32 = vcombine.low %v4653_v30, %v4681_v38  ;;  %v4699_v58 = vcombine.high %v4653_v30, %v4681_v38  ;;  %v4940_v35 = vcombine.low %v4923_v18, %v4937_v55  ;;  %v17937_v23 = vld [vmem:[#allocation116_spill] sm:$0xff]  ;;  %v17938_v42 = vld [vmem:[#allocation115_spill] sm:$0xff] }
 0x30e   :  { %6937 = vmatpush1.bf16.msra.mxu1 %v11189_v33  ;;  %7018 = vmatpush1.bf16.msra.mxu0 %v11221_v21  ;;  %v11185_v3 = vcombine.low %v17934_v44, %v17933_v47  ;;  %v11217_v33 = vcombine.low %v17936_v13, %v17935_v10  ;;  %v11184_v40 = vcombine.high %v17938_v42, %v17937_v23  ;;  %v17940_v21 = vld [vmem:[#allocation147_spill] sm:$0xff]  ;;  %v17947_v38 = vld [vmem:[#allocation176_spill] sm:$0xff]  ;;  %v17949_v13 = vld [vmem:[#allocation142_spill] sm:$0xff] }
 0x30f   :  { %6938 = vmatprep.subr.bf16.mxu1 %v11188_v39  ;;  %7019 = vmatprep.subr.bf16.mxu0 %v11220_v53  ;;  %v11216_v17 = vcombine.high %v17940_v21, %v17939_v0  ;;  %v4973_v63 = vcombine.high %v4969_v41, %v4969_v41  ;;  %v3755_v18 = vcombine.high %v15455_v7, %v15458_v6  ;;  %v17941_v53 = vld [vmem:[#allocation146_spill] sm:$0xff] }
 0x310   :  { %6828 = vmatprep.mubr.bf16.mxu1 %v4702_v8  ;;  %6909 = vmatprep.mubr.bf16.mxu0 %v4703_v14  ;;  %v3759_v55 = vcombine.high %v15461_v25, %v15464_v16  ;;  %v4955_v39 = vrot.slane %v4940_v35, %v14155_v57  ;;  %v11183_v20 = vcombine.low %v17938_v42, %v17937_v23  ;;  %v17942_v8 = vld [vmem:[#allocation145_spill] sm:$0xff]  ;;  %v17953_v23 = vld [vmem:[#allocation140_spill] sm:$0xff]  ;;  %v17954_v42 = vld [vmem:[#allocation139_spill] sm:$0xff] }
 0x311   :  { %v11215_v56 = vcombine.low %v17940_v21, %v17939_v0  ;;  %v11214_v46 = vcombine.high %v17942_v8, %v17941_v53  ;;  %v11246_v48 = vcombine.high %v17944_v34, %v17943_v61  ;;  %v3782_v14 = vrot.slane %v3755_v18, %v14155_v57  ;;  %v17955_v0 = vld [vmem:[#allocation172_spill] sm:$0xff]  ;;  %v17956_v21 = vld [vmem:[#allocation171_spill] sm:$0xff] }
 0x312   :  { %6939 = vmatpush1.bf16.msra.mxu1 %v11187_v27  ;;  %7020 = vmatpush1.bf16.msra.mxu0 %v11219_v62  ;;  %v3810_v36 = vrot.slane %v3759_v55, %v14155_v57  ;;  %v4971_v49 = vcombine.high %v4955_v39, %v4955_v39  ;;  %v11213_v51 = vcombine.low %v17942_v8, %v17941_v53  ;;  %v17948_v27 = vld [vmem:[#allocation175_spill] sm:$0xff]  ;;  %v17957_v55 = vld [vmem:[#allocation138_spill] sm:$0xff]  ;;  %v17960_v53 = vld [vmem:[#allocation169_spill] sm:$0xff] }
 0x313   :  { %6940 = vmatprep.subr.bf16.mxu1 %v11186_v29  ;;  %7021 = vmatprep.subr.bf16.mxu0 %v11218_v31  ;;  %v11245_v26 = vcombine.low %v17944_v34, %v17943_v61  ;;  %v11212_v30 = vcombine.high %v17946_v9, %v17945_v12  ;;  %v11244_v62 = vcombine.high %v17948_v27, %v17947_v38  ;;  %v17950_v31 = vld [vmem:[#allocation141_spill] sm:$0xff]  ;;  %v17961_v34 = vld [vmem:[#allocation136_spill] sm:$0xff] }
 0x314   :  { %v3822_v47 = vcombine.low %v3782_v14, %v3810_v36  ;;  %v3823_v44 = vcombine.high %v3782_v14, %v3810_v36  ;;  %v11211_v29 = vcombine.low %v17946_v9, %v17945_v12  ;;  %v11243_v10 = vcombine.low %v17948_v27, %v17947_v38  ;;  %v17963_v36 = vld [vmem:[#allocation168_spill] sm:$0xff]  ;;  %v17968_v38 = vld [vmem:[#allocation309_spill] sm:$0xff] }
 0x315   :  { %6829 = vmatmul.mubr.bf16.gmra.mxu1 %v4698_v32  ;;  %6910 = vmatmul.mubr.bf16.gmra.mxu0 %v4699_v58  ;;  %v17951_v32 = vld [vmem:[#allocation174_spill] sm:$0xff]  ;;  %v17952_v58 = vld [vmem:[#allocation173_spill] sm:$0xff]  ;;  %v11239_v18 = vcombine.low %v17956_v21, %v17955_v0  ;;  %v17966_v12 = vcombine.high %v17932_v45, %v17778_v5 }
 0x316   :  { %6941 = vmatpush1.bf16.msra.mxu1 %v11185_v3  ;;  %7022 = vmatpush1.bf16.msra.mxu0 %v11217_v33  ;;  %v11242_v35 = vcombine.high %v17952_v58, %v17951_v32  ;;  %v11209_v3 = vcombine.low %v17950_v31, %v17949_v13  ;;  %v11241_v33 = vcombine.low %v17952_v58, %v17951_v32  ;;  %v17974_v32 = vld [vmem:[#allocation134_spill] sm:$0xff]  ;;  %v17975_v58 = vld [vmem:[#allocation133_spill] sm:$0xff] }
 0x317   :  { %6942 = vmatprep.subr.bf16.mxu1 %v11184_v40  ;;  %7023 = vmatprep.subr.bf16.mxu0 %v11216_v17  ;;  %v11208_v40 = vcombine.high %v17954_v42, %v17953_v23  ;;  %v11240_v17 = vcombine.high %v17956_v21, %v17955_v0 }
 0x318   :  { %6838 = vmatprep.mubr.bf16.mxu1 %v4969_v41  ;;  %6919 = vmatprep.mubr.bf16.mxu0 %v4973_v63  ;;  %v11210_v41 = vcombine.high %v17950_v31, %v17949_v13  ;;  %v11207_v63 = vcombine.low %v17954_v42, %v17953_v23 }
 0x31a   :  { %6943 = vmatpush1.bf16.msra.mxu1 %v11183_v20  ;;  %7024 = vmatpush1.bf16.msra.mxu0 %v11215_v56  ;;  %v17959_v56 = vld [vmem:[#allocation170_spill] sm:$0xff] }
 0x31b   :  { %6944 = vmatprep.subr.bf16.mxu1 %v11214_v46  ;;  %7025 = vmatprep.subr.bf16.mxu0 %v11246_v48  ;;  %v11238_v8 = vcombine.high %v17960_v53, %v17959_v56  ;;  %v11237_v61 = vcombine.low %v17960_v53, %v17959_v56  ;;  %v17962_v48 = vld [vmem:[#allocation135_spill] sm:$0xff] }
 0x31c   :  { %v11204_v14 = vcombine.high %v17962_v48, %v17961_v34 }
 0x31d   :  { %6839 = vmatmul.mubr.bf16.gmra.mxu1 %v4955_v39  ;;  %6920 = vmatmul.mubr.bf16.gmra.mxu0 %v4971_v49  ;;  %v17958_v39 = vld [vmem:[#allocation137_spill] sm:$0xff]  ;;  %v17964_v49 = vld [vmem:[#allocation167_spill] sm:$0xff] }
 0x31e   :  { %6945 = vmatpush2.bf16.msra.mxu1 %v11213_v51  ;;  %7026 = vmatpush2.bf16.msra.mxu0 %v11245_v26  ;;  %v11206_v20 = vcombine.high %v17958_v39, %v17957_v55  ;;  %v11205_v46 = vcombine.low %v17958_v39, %v17957_v55  ;;  %v11236_v51 = vcombine.high %v17964_v49, %v17963_v36  ;;  %v17965_v26 = vld [vmem:[#allocation308_spill] sm:$0xff] }
 0x31f   :  { %6946 = vmatprep.subr.bf16.mxu1 %v11212_v30  ;;  %7027 = vmatprep.subr.bf16.mxu0 %v11244_v62  ;;  %v11007_v9 = vcombine.low %v17966_v12, %v17965_v26  ;;  %v17967_v30 = vcombine.high %v17965_v26, %v14401_v24  ;;  %v17969_v62 = vld [vmem:[#allocation313_spill] sm:$0xff]  ;;  %v11235_v45 = vcombine.low %v17964_v49, %v17963_v36  ;;  %v17978_v39 = vld [vmem:[#allocation132_spill] sm:$0xff] }
 0x320   :  { %6960 = vmatprep.mubr.bf16.mxu1 %v3822_v47  ;;  %7041 = vmatprep.mubr.bf16.mxu0 %v3823_v44  ;;  %v17970_v47 = vld [vmem:[#allocation314_spill] sm:$0xff]  ;;  %v17986_v36 = vld [vmem:[#allocation333_spill] sm:$0xff] }
 0x321   :  { %v11009_v27 = vcombine.low %v17968_v38, %v17967_v30  ;;  %v11011_v44 = vcombine.low %v17970_v47, %v17969_v62  ;;  %v15552_v42 = vrot.slane %v11007_v9, %v14155_v57  ;;  %v17988_v12 = vcombine.high %v17986_v36, %v17815_v60 }
 0x322   :  { %6947 = vmatpush2.bf16.msra.mxu1 %v11211_v29  ;;  %7028 = vmatpush2.bf16.msra.mxu0 %v11243_v10  ;;  %v17971_v29 = vld [vmem:[#allocation322_spill] sm:$0xff]  ;;  %v17972_v10 = vld [vmem:[#allocation320_spill] sm:$0xff] }
 0x323   :  { %6948 = vmatprep.subr.bf16.mxu1 %v11210_v41  ;;  %7029 = vmatprep.subr.bf16.mxu0 %v11242_v35  ;;  %v17973_v13 = vcombine.high %v17970_v47, %v17972_v10  ;;  %v11203_v41 = vcombine.low %v17962_v48, %v17961_v34  ;;  %v11202_v35 = vcombine.high %v17975_v58, %v17974_v32  ;;  %v17984_v34 = vld [vmem:[#allocation323_spill] sm:$0xff] }
 0x324   :  { %v4070_v0 = vrot.slane %v11011_v44, %v14155_v57 }
 0x325   :  { %v11013_v31 = vcombine.low %v17973_v13, %v17971_v29 }
 0x326   :  { %6949 = vmatpush2.bf16.msra.mxu1 %v11209_v3  ;;  %7030 = vmatpush2.bf16.msra.mxu0 %v11241_v33  ;;  %v17976_v3 = vld [vmem:[#allocation166_spill] sm:$0xff]  ;;  %v17977_v33 = vld [vmem:[#allocation165_spill] sm:$0xff] }
 0x327   :  { %6950 = vmatprep.subr.bf16.mxu1 %v11208_v40  ;;  %7031 = vmatprep.subr.bf16.mxu0 %v11240_v17  ;;  %v11234_v23 = vcombine.high %v17977_v33, %v17976_v3  ;;  %v4056_v40 = vrot.slane %v11009_v27, %v14155_v57  ;;  %v4084_v21 = vrot.slane %v11013_v31, %v14155_v57  ;;  %v17990_v27 = vld [vmem:[#allocation343_spill] sm:$0xff]  ;;  %v17991_v31 = vld [vmem:[#allocation194_spill] sm:$0xff] }
 0x328   :  { %v11201_v17 = vcombine.low %v17975_v58, %v17974_v32  ;;  %v11233_v55 = vcombine.low %v17977_v33, %v17976_v3  ;;  %v17993_v58 = vld [vmem:[#allocation226_spill] sm:$0xff] }
 0x32a   :  { %6951 = vmatpush2.bf16.msra.mxu1 %v11207_v63  ;;  %7032 = vmatpush2.bf16.msra.mxu0 %v11239_v18  ;;  %v3754_v63 = vcombine.low %v15455_v7, %v15458_v6  ;;  %v3758_v18 = vcombine.low %v15461_v25, %v15464_v16  ;;  %v4093_v7 = vcombine.high %v15552_v42, %v4056_v40  ;;  %v17982_v25 = vld [vmem:[#allocation324_spill] sm:$0xff] }
 0x32b   :  { %6952 = vmatprep.subr.bf16.mxu1 %v11206_v20  ;;  %7033 = vmatprep.subr.bf16.mxu0 %v11238_v8  ;;  %v17979_v20 = vld [vmem:[#allocation131_spill] sm:$0xff]  ;;  %v17980_v8 = vld [vmem:[#allocation164_spill] sm:$0xff]  ;;  %v4097_v6 = vcombine.high %v4070_v0, %v4084_v21  ;;  %v17983_v16 = vcombine.high %v17971_v29, %v17982_v25 }
 0x32c   :  { %v11200_v56 = vcombine.high %v17979_v20, %v17978_v39  ;;  %v11199_v53 = vcombine.low %v17979_v20, %v17978_v39  ;;  %v3768_v47 = vrot.slane %v3754_v63, %v14155_v57  ;;  %v3796_v44 = vrot.slane %v3758_v18, %v14155_v57  ;;  %v17996_v63 = vld [vmem:[#allocation191_spill] sm:$0xff] }
 0x32d   :  { %v11023_v48 = vcombine.low %v17984_v34, %v17983_v16  ;;  %v4120_v39 = vrot.slane %v4093_v7, %v14155_v57  ;;  %v4148_v20 = vrot.slane %v4097_v6, %v14155_v57  ;;  %v17998_v6 = vld [vmem:[#allocation223_spill] sm:$0xff] }
 0x32e   :  { %6953 = vmatpush2.bf16.msra.mxu1 %v11205_v46  ;;  %7034 = vmatpush2.bf16.msra.mxu0 %v11237_v61  ;;  %v17981_v46 = vld [vmem:[#allocation163_spill] sm:$0xff]  ;;  %v3818_v16 = vcombine.low %v3768_v47, %v3796_v44 }
 0x32f   :  { %6954 = vmatprep.subr.bf16.mxu1 %v11204_v14  ;;  %7035 = vmatprep.subr.bf16.mxu0 %v11236_v51  ;;  %v11232_v61 = vcombine.high %v17981_v46, %v17980_v8  ;;  %v17985_v14 = vld [vmem:[#allocation330_spill] sm:$0xff]  ;;  %v11231_v13 = vcombine.low %v17981_v46, %v17980_v8 }
 0x330   :  { %v11025_v49 = vcombine.low %v17986_v36, %v17985_v14  ;;  %v17987_v51 = vld [vmem:[#allocation342_spill] sm:$0xff]  ;;  %v3819_v14 = vcombine.high %v3768_v47, %v3796_v44  ;;  %v17997_v36 = vld [vmem:[#allocation224_spill] sm:$0xff]  ;;  %v4160_v44 = vcombine.low %v4120_v39, %v4148_v20 }
 0x331   :  { %v11027_v9 = vcombine.low %v17988_v12, %v17987_v51  ;;  %v17989_v30 = vcombine.high %v17987_v51, %v14664_v22  ;;  %v11292_v12 = vcombine.high %v17998_v6, %v17997_v36 }
 0x332   :  { %6955 = vmatpush2.bf16.msra.mxu1 %v11203_v41  ;;  %7036 = vmatpush2.bf16.msra.mxu0 %v11235_v45  ;;  %v17992_v41 = vld [vmem:[#allocation193_spill] sm:$0xff] }
 0x333   :  { %6956 = vmatprep.subr.bf16.mxu1 %v11202_v35  ;;  %7037 = vmatprep.subr.bf16.mxu0 %v11234_v23  ;;  %v11029_v62 = vcombine.low %v17990_v27, %v17989_v30  ;;  %v11262_v45 = vcombine.high %v17992_v41, %v17991_v31  ;;  %v11261_v32 = vcombine.low %v17992_v41, %v17991_v31  ;;  %v17994_v35 = vld [vmem:[#allocation225_spill] sm:$0xff]  ;;  %v17995_v23 = vld [vmem:[#allocation192_spill] sm:$0xff]  ;;  %v18000_v30 = vld [vmem:[#allocation347_spill] sm:$0xff] }
 0x334   :  { %v11294_v3 = vcombine.high %v17994_v35, %v17993_v58  ;;  %v11293_v33 = vcombine.low %v17994_v35, %v17993_v58  ;;  %v11260_v18 = vcombine.high %v17996_v63, %v17995_v23  ;;  %v4408_v8 = vrot.slane %v11027_v9, %v14155_v57  ;;  %v18001_v9 = vld [vmem:[#allocation353_spill] sm:$0xff] }
 0x335   :  { %v4422_v46 = vrot.slane %v11029_v62, %v14155_v57  ;;  %v11259_v7 = vcombine.low %v17996_v63, %v17995_v23  ;;  %v18002_v62 = vcombine.high %v18000_v30, %v14750_v19  ;;  %v18007_v23 = vld [vmem:[#allocation189_spill] sm:$0xff] }
 0x336   :  { %6957 = vmatpush2.bf16.msra.mxu1 %v11201_v17  ;;  %7038 = vmatpush2.bf16.msra.mxu0 %v11233_v55  ;;  %v4380_v17 = vrot.slane %v11023_v48, %v14155_v57  ;;  %v4394_v55 = vrot.slane %v11025_v49, %v14155_v57  ;;  %v17999_v48 = vld [vmem:[#allocation346_spill] sm:$0xff] }
 0x337   :  { %6958 = vmatprep.subr.bf16.mxu1 %v11200_v56  ;;  %7039 = vmatprep.subr.bf16.mxu0 %v11232_v61  ;;  %v4092_v56 = vcombine.low %v15552_v42, %v4056_v40  ;;  %v4096_v61 = vcombine.low %v4070_v0, %v4084_v21  ;;  %v11039_v49 = vcombine.low %v18000_v30, %v17999_v48  ;;  %v18004_v40 = vld [vmem:[#allocation354_spill] sm:$0xff]  ;;  %v18005_v21 = vld [vmem:[#allocation357_spill] sm:$0xff] }
 0x338   :  { %v11041_v47 = vcombine.low %v18002_v62, %v18001_v9  ;;  %v18003_v42 = vcombine.high %v18001_v9, %v14762_v37  ;;  %v4431_v31 = vcombine.high %v4380_v17, %v4394_v55  ;;  %v4435_v41 = vcombine.high %v4408_v8, %v4422_v46  ;;  %v18008_v48 = vld [vmem:[#allocation222_spill] sm:$0xff]  ;;  %v18009_v30 = vld [vmem:[#allocation221_spill] sm:$0xff] }
 0x339   :  { %v4106_v58 = vrot.slane %v4092_v56, %v14155_v57  ;;  %v4134_v35 = vrot.slane %v4096_v61, %v14155_v57  ;;  %v11290_v62 = vcombine.high %v18009_v30, %v18008_v48 }
 0x33a   :  { %6959 = vmatpush2.bf16.msra.mxu1 %v11199_v53  ;;  %7040 = vmatpush2.bf16.msra.mxu0 %v11231_v13  ;;  %v11043_v0 = vcombine.low %v18004_v40, %v18003_v42  ;;  %v11045_v53 = vcombine.low %v14837_v52, %v18005_v21  ;;  %v4161_v13 = vcombine.high %v4120_v39, %v4148_v20  ;;  %v18013_v21 = vld [vmem:[#allocation219_spill] sm:$0xff] }
 0x33b   :  { %7090 = vmatprep.subr.bf16.mxu1 %v11262_v45  ;;  %7171 = vmatprep.subr.bf16.mxu0 %v11294_v3  ;;  %v11291_v45 = vcombine.low %v17998_v6, %v17997_v36  ;;  %v18006_v3 = vld [vmem:[#allocation190_spill] sm:$0xff]  ;;  %v15632_v39 = vrot.slane %v11039_v49, %v14155_v57  ;;  %v15635_v20 = vrot.slane %v11041_v47, %v14155_v57  ;;  %v18010_v49 = vld [vmem:[#allocation188_spill] sm:$0xff]  ;;  %v18011_v47 = vld [vmem:[#allocation187_spill] sm:$0xff] }
 0x33c   :  { %v11258_v63 = vcombine.high %v18007_v23, %v18006_v3  ;;  %v4156_v56 = vcombine.low %v4106_v58, %v4134_v35  ;;  %v4157_v61 = vcombine.high %v4106_v58, %v4134_v35  ;;  %v4430_v36 = vcombine.low %v4380_v17, %v4394_v55  ;;  %v18019_v58 = vld [vmem:[#allocation365_spill] sm:$0xff] }
 0x33d   :  { %6961 = vmatmul.mubr.bf16.vlgmr.msra.gmra.mxu1 %v3818_v16  ;;  %7042 = vmatmul.mubr.bf16.vlgmr.msra.gmra.mxu0 %v3819_v14  ;;  %v15638_v16 = vrot.slane %v11043_v0, %v14155_v57  ;;  %v4486_v14 = vrot.slane %v4435_v41, %v14155_v57  ;;  %v4434_v6 = vcombine.low %v4408_v8, %v4422_v46  ;;  %v18012_v0 = vld [vmem:[#allocation220_spill] sm:$0xff]  ;;  %v18017_v41 = vld [vmem:[#allocation366_spill] sm:$0xff] }
 0x33e   :  { %7091 = vmatpush1.bf16.msra.mxu1 %v11261_v32  ;;  %7172 = vmatpush1.bf16.msra.mxu0 %v11293_v33  ;;  %v4760_v32 = vrot.slane %v11045_v53, %v14155_v57  ;;  %v4458_v33 = vrot.slane %v4431_v31, %v14155_v57  ;;  %v11256_v42 = vcombine.high %v18011_v47, %v18010_v49 }
 0x33f   :  { %7092 = vmatprep.subr.bf16.mxu1 %v11260_v18  ;;  %7173 = vmatprep.subr.bf16.mxu0 %v11292_v12  ;;  %v11257_v18 = vcombine.low %v18007_v23, %v18006_v3  ;;  %v11289_v12 = vcombine.low %v18009_v30, %v18008_v48  ;;  %v11288_v53 = vcombine.high %v18013_v21, %v18012_v0  ;;  %v18020_v48 = vld [vmem:[#allocation186_spill] sm:$0xff]  ;;  %v18021_v30 = vld [vmem:[#allocation185_spill] sm:$0xff] }
 0x340   :  { %6970 = vmatprep.mubr.bf16.mxu1 %v4160_v44  ;;  %7051 = vmatprep.mubr.bf16.mxu0 %v4161_v13  ;;  %v4769_v17 = vcombine.high %v15632_v39, %v15635_v20  ;;  %v4773_v55 = vcombine.high %v15638_v16, %v4760_v32  ;;  %v4498_v8 = vcombine.low %v4458_v33, %v4486_v14  ;;  %v18015_v44 = vld [vmem:[#allocation362_spill] sm:$0xff] }
 0x341   :  { %v4499_v46 = vcombine.high %v4458_v33, %v4486_v14  ;;  %v18016_v13 = vcombine.high %v14837_v52, %v18015_v44  ;;  %v4444_v3 = vrot.slane %v4430_v36, %v14155_v57  ;;  %v4472_v23 = vrot.slane %v4434_v6, %v14155_v57  ;;  %v18022_v33 = vld [vmem:[#allocation218_spill] sm:$0xff]  ;;  %v18023_v14 = vld [vmem:[#allocation217_spill] sm:$0xff] }
 0x342   :  { %7093 = vmatpush1.bf16.msra.mxu1 %v11259_v7  ;;  %7174 = vmatpush1.bf16.msra.mxu0 %v11291_v45  ;;  %v18014_v7 = vld [vmem:[#allocation364_spill] sm:$0xff]  ;;  %v11287_v52 = vcombine.low %v18013_v21, %v18012_v0  ;;  %v4824_v36 = vrot.slane %v4773_v55, %v14155_v57  ;;  %v11253_v0 = vcombine.low %v18021_v30, %v18020_v48 }
 0x343   :  { %7094 = vmatprep.subr.bf16.mxu1 %v11258_v63  ;;  %7175 = vmatprep.subr.bf16.mxu0 %v11290_v62  ;;  %v11051_v31 = vcombine.low %v18016_v13, %v18014_v7  ;;  %v18018_v45 = vcombine.high %v18014_v7, %v18017_v41  ;;  %v11255_v63 = vcombine.low %v18011_v47, %v18010_v49 }
 0x344   :  { %v11254_v62 = vcombine.high %v18021_v30, %v18020_v48  ;;  %v4495_v49 = vcombine.high %v4444_v3, %v4472_v23  ;;  %v4768_v47 = vcombine.low %v15632_v39, %v15635_v20  ;;  %v11285_v21 = vcombine.low %v18023_v14, %v18022_v33 }
 0x345   :  { %v11053_v35 = vcombine.low %v18019_v58, %v18018_v45  ;;  %6971 = vmatmul.mubr.bf16.gmra.mxu1 %v4156_v56  ;;  %7052 = vmatmul.mubr.bf16.gmra.mxu0 %v4157_v61  ;;  %v11286_v56 = vcombine.high %v18023_v14, %v18022_v33  ;;  %v4796_v61 = vrot.slane %v4769_v17, %v14155_v57  ;;  %v18025_v17 = vld [vmem:[#allocation183_spill] sm:$0xff] }
 0x346   :  { %7095 = vmatpush1.bf16.msra.mxu1 %v11257_v18  ;;  %7176 = vmatpush1.bf16.msra.mxu0 %v11289_v12  ;;  %v4984_v6 = vrot.slane %v11051_v31, %v14155_v57  ;;  %v4494_v12 = vcombine.low %v4444_v3, %v4472_v23  ;;  %v18029_v45 = vcombine.low %v17930_v50, %v17784_v43  ;;  %v18033_v50 = vld [vmem:[#allocation213_spill] sm:$0xff] }
 0x347   :  { %7096 = vmatprep.subr.bf16.mxu1 %v11256_v42  ;;  %7177 = vmatprep.subr.bf16.mxu0 %v11288_v53  ;;  %v4998_v18 = vrot.slane %v11053_v35, %v14155_v57  ;;  %v4772_v42 = vcombine.low %v15638_v16, %v4760_v32  ;;  %v18024_v53 = vld [vmem:[#allocation184_spill] sm:$0xff]  ;;  %v4836_v31 = vcombine.low %v4796_v61, %v4824_v36 }
 0x348   :  { %6980 = vmatprep.mubr.bf16.mxu1 %v4498_v8  ;;  %7061 = vmatprep.mubr.bf16.mxu0 %v4499_v46  ;;  %v11252_v55 = vcombine.high %v18025_v17, %v18024_v53  ;;  %v18026_v8 = vld [vmem:[#allocation216_spill] sm:$0xff]  ;;  %v18027_v46 = vld [vmem:[#allocation215_spill] sm:$0xff]  ;;  %v4837_v39 = vcombine.high %v4796_v61, %v4824_v36  ;;  %v18028_v16 = vcombine.low %v17927_v54, %v17779_v28 }
 0x349   :  { %v11284_v13 = vcombine.high %v18027_v46, %v18026_v8  ;;  %v5007_v20 = vcombine.high %v4984_v6, %v4998_v18  ;;  %v10996_v35 = vcombine.high %v18029_v45, %v17779_v28  ;;  %v4782_v3 = vrot.slane %v4768_v47, %v14155_v57  ;;  %v18032_v28 = vld [vmem:[#allocation214_spill] sm:$0xff]  ;;  %v18035_v47 = vld [vmem:[#allocation179_spill] sm:$0xff]  ;;  %v18043_v45 = vld [vmem:[#allocation241_spill] sm:$0xff] }
 0x34a   :  { %7097 = vmatpush1.bf16.msra.mxu1 %v11255_v63  ;;  %7178 = vmatpush1.bf16.msra.mxu0 %v11287_v52  ;;  %v10994_v32 = vcombine.high %v17743_v15, %v18028_v16  ;;  %v4810_v23 = vrot.slane %v4772_v42, %v14155_v57  ;;  %v11251_v63 = vcombine.low %v18025_v17, %v18024_v53  ;;  %v18030_v15 = vld [vmem:[#allocation182_spill] sm:$0xff]  ;;  %v18031_v52 = vld [vmem:[#allocation181_spill] sm:$0xff] }
 0x34b   :  { %7098 = vmatprep.subr.bf16.mxu1 %v11254_v62  ;;  %7179 = vmatprep.subr.bf16.mxu0 %v11286_v56  ;;  %v11283_v54 = vcombine.low %v18027_v46, %v18026_v8  ;;  %v11250_v43 = vcombine.high %v18031_v52, %v18030_v15  ;;  %v11282_v48 = vcombine.high %v18033_v50, %v18032_v28 }
 0x34c   :  { %v5030_v30 = vrot.slane %v5007_v20, %v14155_v57  ;;  %v15707_v62 = vrot.slane %v10994_v32, %v14155_v57  ;;  %v15710_v33 = vrot.slane %v10996_v35, %v14155_v57  ;;  %v4832_v14 = vcombine.low %v4782_v3, %v4810_v23  ;;  %v18041_v20 = vld [vmem:[#allocation209_spill] sm:$0xff]  ;;  %v18042_v32 = vld [vmem:[#allocation242_spill] sm:$0xff] }
 0x34d   :  { %6981 = vmatmul.mubr.bf16.gmra.mxu1 %v4494_v12  ;;  %7062 = vmatmul.mubr.bf16.gmra.mxu0 %v4495_v49  ;;  %v4833_v56 = vcombine.high %v4782_v3, %v4810_v23  ;;  %v5006_v61 = vcombine.low %v4984_v6, %v4998_v18  ;;  %v11249_v36 = vcombine.low %v18031_v52, %v18030_v15  ;;  %v18034_v49 = vld [vmem:[#allocation180_spill] sm:$0xff]  ;;  %v18039_v18 = vld [vmem:[#allocation33_spill] sm:$0xff] }
 0x34e   :  { %7099 = vmatpush1.bf16.msra.mxu1 %v11253_v0  ;;  %7180 = vmatpush1.bf16.msra.mxu0 %v11285_v21  ;;  %v11281_v12 = vcombine.low %v18033_v50, %v18032_v28  ;;  %v11248_v42 = vcombine.high %v18035_v47, %v18034_v49  ;;  %v18036_v0 = vld [vmem:[#allocation212_spill] sm:$0xff]  ;;  %v18037_v21 = vld [vmem:[#allocation211_spill] sm:$0xff]  ;;  %v5040_v17 = vcombine.high %v5030_v30, %v5030_v30 }
 0x34f   :  { %7100 = vmatprep.subr.bf16.mxu1 %v11252_v55  ;;  %7181 = vmatprep.subr.bf16.mxu0 %v11284_v13  ;;  %v11280_v53 = vcombine.high %v18037_v21, %v18036_v0  ;;  %v18038_v55 = vld [vmem:[#allocation34_spill] sm:$0xff]  ;;  %v3761_v8 = vcombine.high %v15710_v33, %v18039_v18  ;;  %v5016_v46 = vrot.slane %v5006_v61, %v14155_v57  ;;  %v18044_v52 = vld [vmem:[#allocation208_spill] sm:$0xff] }
 0x350   :  { %6990 = vmatprep.mubr.bf16.mxu1 %v4836_v31  ;;  %7071 = vmatprep.mubr.bf16.mxu0 %v4837_v39  ;;  %v3757_v6 = vcombine.high %v18038_v55, %v15707_v62  ;;  %v11247_v13 = vcombine.low %v18035_v47, %v18034_v49  ;;  %v11279_v31 = vcombine.low %v18037_v21, %v18036_v0  ;;  %v18040_v39 = vld [vmem:[#allocation210_spill] sm:$0xff]  ;;  %v18046_v50 = vld [vmem:[#allocation240_spill] sm:$0xff]  ;;  %v18049_v49 = vld [vmem:[#allocation205_spill] sm:$0xff] }
 0x351   :  { %v11278_v16 = vcombine.high %v18041_v20, %v18040_v39  ;;  %v11310_v35 = vcombine.high %v18043_v45, %v18042_v32  ;;  %v3817_v23 = vrot.slane %v3761_v8, %v14155_v57  ;;  %v11309_v15 = vcombine.low %v18043_v45, %v18042_v32  ;;  %v18051_v0 = vld [vmem:[#allocation237_spill] sm:$0xff]  ;;  %v18053_v8 = vld [vmem:[#allocation203_spill] sm:$0xff]  ;;  %v18056_v32 = vld [vmem:[#allocation202_spill] sm:$0xff] }
 0x352   :  { %7101 = vmatpush1.bf16.msra.mxu1 %v11251_v63  ;;  %7182 = vmatpush1.bf16.msra.mxu0 %v11283_v54  ;;  %v3789_v3 = vrot.slane %v3757_v6, %v14155_v57  ;;  %v5038_v63 = vcombine.high %v5016_v46, %v5016_v46  ;;  %v11277_v54 = vcombine.low %v18041_v20, %v18040_v39  ;;  %v18052_v6 = vld [vmem:[#allocation204_spill] sm:$0xff]  ;;  %v18057_v45 = vld [vmem:[#allocation201_spill] sm:$0xff] }
 0x353   :  { %7102 = vmatprep.subr.bf16.mxu1 %v11250_v43  ;;  %7183 = vmatprep.subr.bf16.mxu0 %v11282_v48  ;;  %v18045_v43 = vld [vmem:[#allocation207_spill] sm:$0xff]  ;;  %v11271_v20 = vcombine.low %v18053_v8, %v18052_v6 }
 0x354   :  { %v11276_v28 = vcombine.high %v18045_v43, %v18044_v52  ;;  %v18047_v48 = vld [vmem:[#allocation239_spill] sm:$0xff]  ;;  %v11275_v61 = vcombine.low %v18045_v43, %v18044_v52  ;;  %v18060_v52 = vcombine.low %v17965_v26, %v14401_v24  ;;  %v18064_v26 = vld [vmem:[#allocation200_spill] sm:$0xff] }
 0x355   :  { %6991 = vmatmul.mubr.bf16.gmra.mxu1 %v4832_v14  ;;  %7072 = vmatmul.mubr.bf16.gmra.mxu0 %v4833_v56  ;;  %v3824_v14 = vcombine.low %v3789_v3, %v3817_v23  ;;  %v3825_v56 = vcombine.high %v3789_v3, %v3817_v23  ;;  %v18058_v3 = vld [vmem:[#allocation234_spill] sm:$0xff]  ;;  %v18059_v23 = vld [vmem:[#allocation233_spill] sm:$0xff] }
 0x356   :  { %7103 = vmatpush1.bf16.msra.mxu1 %v11249_v36  ;;  %7184 = vmatpush1.bf16.msra.mxu0 %v11281_v12  ;;  %v11307_v36 = vcombine.low %v18047_v48, %v18046_v50  ;;  %v18048_v12 = vld [vmem:[#allocation206_spill] sm:$0xff]  ;;  %v11008_v43 = vcombine.high %v17778_v5, %v18060_v52 }
 0x357   :  { %7104 = vmatprep.subr.bf16.mxu1 %v11248_v42  ;;  %7185 = vmatprep.subr.bf16.mxu0 %v11280_v53  ;;  %v11274_v47 = vcombine.high %v18049_v49, %v18048_v12  ;;  %v18050_v42 = vld [vmem:[#allocation238_spill] sm:$0xff]  ;;  %v11273_v53 = vcombine.low %v18049_v49, %v18048_v12  ;;  %v18067_v12 = vld [vmem:[#allocation231_spill] sm:$0xff] }
 0x358   :  { %7000 = vmatprep.mubr.bf16.mxu1 %v5030_v30  ;;  %7081 = vmatprep.mubr.bf16.mxu0 %v5040_v17  ;;  %v11308_v30 = vcombine.high %v18047_v48, %v18046_v50  ;;  %v11306_v21 = vcombine.high %v18051_v0, %v18050_v42  ;;  %v11305_v17 = vcombine.low %v18051_v0, %v18050_v42  ;;  %v18062_v48 = vld [vmem:[#allocation321_spill] sm:$0xff]  ;;  %v18068_v42 = vld [vmem:[#allocation198_spill] sm:$0xff] }
 0x359   :  { %v18069_v0 = vld [vmem:[#allocation197_spill] sm:$0xff] }
 0x35a   :  { %7105 = vmatpush1.bf16.msra.mxu1 %v11247_v13  ;;  %7186 = vmatpush1.bf16.msra.mxu0 %v11279_v31  ;;  %v18054_v13 = vld [vmem:[#allocation236_spill] sm:$0xff]  ;;  %v18055_v31 = vld [vmem:[#allocation235_spill] sm:$0xff] }
 0x35b   :  { %7106 = vmatprep.subr.bf16.mxu1 %v11278_v16  ;;  %7187 = vmatprep.subr.bf16.mxu0 %v11310_v35  ;;  %v11304_v39 = vcombine.high %v18055_v31, %v18054_v13  ;;  %v11303_v16 = vcombine.low %v18055_v31, %v18054_v13  ;;  %v11270_v35 = vcombine.high %v18057_v45, %v18056_v32  ;;  %v18072_v31 = vld [vmem:[#allocation325_spill] sm:$0xff] }
 0x35c   :  { %v11265_v13 = vcombine.low %v18069_v0, %v18068_v42 }
 0x35d   :  { %7001 = vmatmul.mubr.bf16.gmra.mxu1 %v5016_v46  ;;  %7082 = vmatmul.mubr.bf16.gmra.mxu0 %v5038_v63  ;;  %v11272_v46 = vcombine.high %v18053_v8, %v18052_v6  ;;  %v11302_v63 = vcombine.high %v18059_v23, %v18058_v3  ;;  %v3756_v8 = vcombine.low %v18038_v55, %v15707_v62 }
 0x35e   :  { %7107 = vmatpush2.bf16.msra.mxu1 %v11277_v54  ;;  %7188 = vmatpush2.bf16.msra.mxu0 %v11309_v15  ;;  %v11269_v54 = vcombine.low %v18057_v45, %v18056_v32  ;;  %v11301_v15 = vcombine.low %v18059_v23, %v18058_v3  ;;  %v18075_v62 = vcombine.low %v17990_v27, %v14667_v59  ;;  %v18079_v3 = vld [vmem:[#allocation227_spill] sm:$0xff]  ;;  %v3542_v59 = vld [vmem:[%s16973_s3] sm:$0x3] }
 0x35f   :  { %7108 = vmatprep.subr.bf16.mxu1 %v11276_v28  ;;  %7189 = vmatprep.subr.bf16.mxu0 %v11308_v30  ;;  %v18061_v28 = vcombine.low %v17968_v38, %v17797_v4  ;;  %v11012_v30 = vcombine.low %v17972_v10, %v18062_v48  ;;  %v4049_v38 = vrot.slane %v11008_v43, %v14155_v57 }
 0x360   :  { %7122 = vmatprep.mubr.bf16.mxu1 %v3824_v14  ;;  %7203 = vmatprep.mubr.bf16.mxu0 %v3825_v56  ;;  %v18063_v14 = vcombine.low %v17971_v29, %v17982_v25  ;;  %v11030_v55 = vcombine.high %v18075_v62, %v14664_v22 }
 0x361   :  { %v11010_v50 = vcombine.high %v18061_v28, %v14401_v24 }
 0x362   :  { %7109 = vmatpush2.bf16.msra.mxu1 %v11275_v61  ;;  %7190 = vmatpush2.bf16.msra.mxu0 %v11307_v36  ;;  %v11014_v56 = vcombine.high %v17972_v10, %v18063_v14  ;;  %v18065_v61 = vld [vmem:[#allocation199_spill] sm:$0xff]  ;;  %v18066_v36 = vld [vmem:[#allocation232_spill] sm:$0xff]  ;;  %v4077_v10 = vrot.slane %v11012_v30, %v14155_v57  ;;  %v18082_v14 = vld [vmem:[#allocation258_spill] sm:$0xff] }
 0x363   :  { %7110 = vmatprep.subr.bf16.mxu1 %v11274_v47  ;;  %7191 = vmatprep.subr.bf16.mxu0 %v11306_v21  ;;  %v11268_v5 = vcombine.high %v18065_v61, %v18064_v26  ;;  %v11300_v49 = vcombine.high %v18067_v12, %v18066_v36  ;;  %v11267_v4 = vcombine.low %v18065_v61, %v18064_v26 }
 0x364   :  { %v11299_v24 = vcombine.low %v18067_v12, %v18066_v36  ;;  %v4063_v29 = vrot.slane %v11010_v50, %v14155_v57  ;;  %v4091_v47 = vrot.slane %v11014_v56, %v14155_v57  ;;  %v11266_v21 = vcombine.high %v18069_v0, %v18068_v42  ;;  %v18080_v50 = vld [vmem:[#allocation275_spill] sm:$0xff]  ;;  %v18083_v56 = vld [vmem:[#allocation257_spill] sm:$0xff] }
 0x365   :  { %v18081_v48 = vsub.s32 0, %v18080_v50  ;;  %v11326_v26 = vcombine.high %v18083_v56, %v18082_v14  ;;  %v18084_v42 = vcombine.low %v18001_v9, %v14762_v37  ;;  %v18089_v9 = vld [vmem:[#allocation255_spill] sm:$0xff] }
 0x366   :  { %7111 = vmatpush2.bf16.msra.mxu1 %v11273_v53  ;;  %7192 = vmatpush2.bf16.msra.mxu0 %v11305_v17  ;;  %v18070_v53 = vld [vmem:[#allocation230_spill] sm:$0xff]  ;;  %v18071_v17 = vld [vmem:[#allocation229_spill] sm:$0xff]  ;;  %v4099_v45 = vcombine.high %v4077_v10, %v4091_v47  ;;  %v4094_v36 = vcombine.low %v4049_v38, %v4063_v29  ;;  %v4098_v12 = vcombine.low %v4077_v10, %v4091_v47  ;;  %v18087_v47 = vsub.s32 1, %v18080_v50 }
 0x367   :  { %7112 = vmatprep.subr.bf16.mxu1 %v11272_v46  ;;  %7193 = vmatprep.subr.bf16.mxu0 %v11304_v39  ;;  %v11298_v6 = vcombine.high %v18071_v17, %v18070_v53  ;;  %v3760_v46 = vcombine.low %v15710_v33, %v18039_v18  ;;  %v18073_v39 = vcombine.low %v17984_v34, %v18072_v31  ;;  %v18077_v34 = vld [vmem:[#allocation195_spill] sm:$0xff] }
 0x368   :  { %v11297_v33 = vcombine.low %v18071_v17, %v18070_v53  ;;  %v4095_v18 = vcombine.high %v4049_v38, %v4063_v29  ;;  %v4155_v28 = vrot.slane %v4099_v45, %v14155_v57  ;;  %v15845_v30 = vrot.slane %v3542_v59, %v18081_v48  ;;  %v18086_v29 = vld [vmem:[#allocation363_spill] sm:$0xff]  ;;  %v18091_v45 = vld [vmem:[#allocation253_spill] sm:$0xff] }
 0x369   :  { %v3803_v27 = vrot.slane %v3760_v46, %v14155_v57  ;;  %v11042_v0 = vcombine.high %v14750_v19, %v18084_v42  ;;  %v18085_v53 = vcombine.low %v18004_v40, %v14765_v1  ;;  %v11046_v10 = vcombine.low %v18015_v44, %v18086_v29 }
 0x36a   :  { %7113 = vmatpush2.bf16.msra.mxu1 %v11271_v20  ;;  %7194 = vmatpush2.bf16.msra.mxu0 %v11303_v16  ;;  %v11024_v20 = vcombine.high %v18073_v39, %v17982_v25  ;;  %v18074_v16 = vcombine.low %v17987_v51, %v14664_v22  ;;  %v18076_v25 = vld [vmem:[#allocation196_spill] sm:$0xff]  ;;  %v3775_v22 = vrot.slane %v3756_v8, %v14155_v57 }
 0x36b   :  { %7114 = vmatprep.subr.bf16.mxu1 %v11270_v35  ;;  %7195 = vmatprep.subr.bf16.mxu0 %v11302_v63  ;;  %v11264_v35 = vcombine.high %v18077_v34, %v18076_v25  ;;  %v18078_v51 = vld [vmem:[#allocation228_spill] sm:$0xff]  ;;  %v11263_v23 = vcombine.low %v18077_v34, %v18076_v25  ;;  %v4127_v43 = vrot.slane %v4095_v18, %v14155_v57  ;;  %v18090_v18 = vld [vmem:[#allocation254_spill] sm:$0xff] }
 0x36c   :  { %v11028_v32 = vcombine.high %v17815_v60, %v18074_v16  ;;  %v11296_v60 = vcombine.high %v18079_v3, %v18078_v51  ;;  %v4387_v63 = vrot.slane %v11024_v20, %v14155_v57  ;;  %v11295_v52 = vcombine.low %v18079_v3, %v18078_v51 }
 0x36d   :  { %v3820_v61 = vcombine.low %v3775_v22, %v3803_v27  ;;  %v11044_v38 = vcombine.high %v18085_v53, %v14762_v37  ;;  %v15866_v17 = vrot.slane %v3542_v59, %v18087_v47  ;;  %v4163_v19 = vcombine.high %v4127_v43, %v4155_v28  ;;  %v18093_v59 = vld [vmem:[#allocation251_spill] sm:$0xff]  ;;  %v18097_v53 = vld [vmem:[#allocation250_spill] sm:$0xff] }
 0x36e   :  { %7115 = vmatpush2.bf16.msra.mxu1 %v11269_v54  ;;  %7196 = vmatpush2.bf16.msra.mxu0 %v11301_v15  ;;  %v15834_v54 = vrot.slane %v11028_v32, %v14155_v57  ;;  %v15837_v15 = vrot.slane %v11030_v55, %v14155_v57  ;;  %v4141_v1 = vrot.slane %v4098_v12, %v14155_v57 }
 0x36f   :  { %7116 = vmatprep.subr.bf16.mxu1 %v11268_v5  ;;  %7197 = vmatprep.subr.bf16.mxu0 %v11300_v49  ;;  %v11325_v5 = vcombine.low %v18083_v56, %v18082_v14  ;;  %v3821_v49 = vcombine.high %v3775_v22, %v3803_v27  ;;  %v4432_v37 = vcombine.low %v4387_v63, %v15108_v11 }
 0x370   :  { %v15878_v16 = vrot.slane %v11042_v0, %v14155_v57  ;;  %v15882_v62 = vrot.slane %v11044_v38, %v14155_v57  ;;  %v11322_v25 = vcombine.high %v18091_v45, %v18090_v18  ;;  %v4436_v34 = vcombine.low %v15834_v54, %v15837_v15  ;;  %v18098_v38 = vld [vmem:[#allocation249_spill] sm:$0xff] }
 0x371   :  { %v11321_v3 = vcombine.low %v18091_v45, %v18090_v18  ;;  %v11318_v29 = vcombine.high %v18098_v38, %v18097_v53  ;;  %v18101_v45 = vld [vmem:[#allocation288_spill] sm:$0xff] }
 0x372   :  { %7117 = vmatpush2.bf16.msra.mxu1 %v11267_v4  ;;  %7198 = vmatpush2.bf16.msra.mxu0 %v11299_v24  ;;  %v4433_v4 = vcombine.high %v4387_v63, %v15108_v11  ;;  %v4437_v24 = vcombine.high %v15834_v54, %v15837_v15  ;;  %v15885_v11 = vrot.slane %v11046_v10, %v14155_v57 }
 0x373   :  { %7118 = vmatprep.subr.bf16.mxu1 %v11266_v21  ;;  %7199 = vmatprep.subr.bf16.mxu0 %v11298_v6  ;;  %v4162_v21 = vcombine.low %v4127_v43, %v4155_v28  ;;  %v18088_v6 = vld [vmem:[#allocation256_spill] sm:$0xff]  ;;  %v15899_v43 = vrot.slane %v4432_v37, %v14155_v57  ;;  %v4771_v54 = vcombine.high %v15117_v2, %v15878_v16 }
 0x374   :  { %v11324_v8 = vcombine.high %v18089_v9, %v18088_v6  ;;  %v11323_v46 = vcombine.low %v18089_v9, %v18088_v6  ;;  %v4465_v39 = vrot.slane %v4433_v4, %v14155_v57  ;;  %v4493_v20 = vrot.slane %v4437_v24, %v14155_v57 }
 0x375   :  { %v4775_v14 = vcombine.high %v15882_v62, %v15885_v11  ;;  %v4774_v37 = vcombine.low %v15882_v62, %v15885_v11 }
 0x376   :  { %7119 = vmatpush2.bf16.msra.mxu1 %v11265_v13  ;;  %7200 = vmatpush2.bf16.msra.mxu0 %v11297_v33  ;;  %v4113_v13 = vrot.slane %v4094_v36, %v14155_v57  ;;  %v4500_v48 = vcombine.low %v4465_v39, %v4493_v20  ;;  %v18094_v36 = vcombine.low %v18014_v7, %v18017_v41 }
 0x377   :  { %7120 = vmatprep.subr.bf16.mxu1 %v11264_v35  ;;  %7201 = vmatprep.subr.bf16.mxu0 %v11296_v60  ;;  %v18092_v60 = vld [vmem:[#allocation252_spill] sm:$0xff]  ;;  %v11317_v7 = vcombine.low %v18098_v38, %v18097_v53  ;;  %v4831_v47 = vrot.slane %v4775_v14, %v14155_v57  ;;  %v18109_v53 = vld [vmem:[#allocation246_spill] sm:$0xff]  ;;  %v18110_v38 = vld [vmem:[#allocation245_spill] sm:$0xff] }
 0x378   :  { %v11320_v22 = vcombine.high %v18093_v59, %v18092_v60  ;;  %v4158_v63 = vcombine.low %v4113_v13, %v4141_v1  ;;  %v11052_v12 = vcombine.high %v18015_v44, %v18094_v36  ;;  %v4803_v44 = vrot.slane %v4771_v54, %v14155_v57 }
 0x37a   :  { %7121 = vmatpush2.bf16.msra.mxu1 %v11263_v23  ;;  %7202 = vmatpush2.bf16.msra.mxu0 %v11295_v52  ;;  %v4159_v52 = vcombine.high %v4113_v13, %v4141_v1  ;;  %v4770_v1 = vcombine.low %v15117_v2, %v15878_v16  ;;  %v18103_v2 = vcombine.high %v18101_v45, %v18101_v45  ;;  %v18104_v16 = vld [vmem:[#allocation289_spill] sm:$0xff] }
 0x37b   :  { %7252 = vmatprep.subr.bf16.mxu1 %v11326_v26  ;;  %v4838_v11 = vcombine.low %v4803_v44, %v4831_v47 }
 0x37c   :  { %v3828_v62 = vcombine.low %v18104_v16, %v18103_v2  ;;  %v4789_v14 = vrot.slane %v4770_v1, %v14155_v57 }
 0x37d   :  { %v6638_v40 = vpop.f32.mrf.mxu1  ;;  %7123 = vmatmul.mubr.bf16.vlgmr.msra.gmra.mxu1 %v3820_v61  ;;  %v6719_v31 = vpop.f32.mrf.mxu0  ;;  %7204 = vmatmul.mubr.bf16.vlgmr.msra.gmra.mxu0 %v3821_v49  ;;  %v4479_v61 = vrot.slane %v4436_v34, %v14155_v57  ;;  %v18095_v49 = vld [vmem:[#allocation367_spill] sm:$0xff] }
 0x37e   :  { %v6639_v32 = vadd.f32 %v6638_v40, %v15845_v30  ;;  %7253 = vmatpush1.bf16.msra.mxu1 %v11325_v5  ;;  %7132 = vmatprep.mubr.bf16.mxu1 %v4162_v21  ;;  %v4501_v5 = vcombine.high %v4465_v39, %v4493_v20  ;;  %v18096_v4 = vcombine.low %v18019_v58, %v18095_v49 }
 0x37f   :  { %v6640_v55 = vpop.f32.mrf.mxu1  ;;  %v6721_v33 = vpop.f32.mrf.mxu0  ;;  %7254 = vmatprep.subr.bf16.mxu1 %v11324_v8  ;;  %7213 = vmatprep.mubr.bf16.mxu0 %v4163_v19  ;;  %v11319_v21 = vcombine.low %v18093_v59, %v18092_v60  ;;  %v4496_v9 = vcombine.low %v15899_v43, %v4479_v61  ;;  %v4497_v39 = vcombine.high %v15899_v43, %v4479_v61  ;;  %v18105_v60 = vld [vmem:[#allocation303_spill] sm:$0xff]  ;;  %v18106_v59 = vld [vmem:[#allocation302_spill] sm:$0xff] }
 0x380   :  { %v6641_v35 = vadd.f32 %v6640_v55, %v15866_v17  ;;  %v15892_v51 = vadd.f32 %v6719_v31, %v6639_v32  ;;  %v11054_v24 = vcombine.high %v18096_v4, %v18017_v41  ;;  %v18099_v55 = vld [vmem:[#allocation287_spill] sm:$0xff]  ;;  %v4839_v43 = vcombine.high %v4803_v44, %v4831_v47 }
 0x381   :  { %v6642_v27 = vpop.f32.mrf.mxu1  ;;  %v6723_v23 = vpop.f32.mrf.mxu0  ;;  %v15979_v4 = vrot.slane %v3828_v62, %v14155_v57 }
 0x382   :  { %v6643_v15 = vadd.f32 %v6642_v27, %v15845_v30  ;;  %v15904_v28 = vadd.f32 %v6721_v33, %v6641_v35  ;;  %7255 = vmatpush1.bf16.msra.mxu1 %v11323_v46  ;;  %v15933_v46 = vrot.slane %v11052_v12, %v14155_v57  ;;  %v15936_v13 = vrot.slane %v11054_v24, %v14155_v57  ;;  %v18100_v33 = vld [vmem:[#allocation286_spill] sm:$0xff]  ;;  %v18107_v27 = vld [vmem:[#allocation248_spill] sm:$0xff] }
 0x383   :  { %v6644_v56 = vpop.f32.mrf.mxu1  ;;  %v6725_v26 = vpop.f32.mrf.mxu0  ;;  %7256 = vmatprep.subr.bf16.mxu1 %v11322_v25  ;;  %v3826_v18 = vcombine.low %v18100_v33, %v18099_v55  ;;  %v18102_v25 = vcombine.high %v18100_v33, %v18100_v33  ;;  %v18111_v55 = vld [vmem:[#allocation244_spill] sm:$0xff]  ;;  %v18112_v33 = vld [vmem:[#allocation243_spill] sm:$0xff] }
 0x384   :  { %v6645_v42 = vadd.f32 %v6644_v56, %v15866_v17  ;;  %v15918_v0 = vadd.f32 %v6723_v23, %v6643_v15  ;;  %v18108_v23 = vld [vmem:[#allocation247_spill] sm:$0xff]  ;;  %v5009_v54 = vcombine.high %v15933_v46, %v15936_v13  ;;  %v4817_v56 = vrot.slane %v4774_v37, %v14155_v57 }
 0x385   :  { %7133 = vmatmul.mubr.bf16.gmra.mxu1 %v4158_v63  ;;  %7214 = vmatmul.mubr.bf16.gmra.mxu0 %v4159_v52  ;;  %v6648_v10 = vpop.f32.mrf.mxu1  ;;  %v6729_v58 = vpop.f32.mrf.mxu0  ;;  %v3827_v34 = vcombine.low %v18102_v25, %v18101_v45  ;;  %v11316_v63 = vcombine.high %v18108_v23, %v18107_v27  ;;  %v11315_v52 = vcombine.low %v18108_v23, %v18107_v27  ;;  %v18113_v23 = vld [vmem:[#allocation274_spill] sm:$0xff] }
 0x386   :  { %v15927_v41 = vadd.f32 %v6725_v26, %v6645_v42  ;;  %7257 = vmatpush1.bf16.msra.mxu1 %v11321_v3  ;;  %7142 = vmatprep.mubr.bf16.mxu1 %v4500_v48  ;;  %v6649_v6 = vadd.f32 %v6648_v10, %v15845_v30  ;;  %v15973_v12 = vrot.slane %v3826_v18, %v14155_v57 }
 0x387   :  { %7258 = vmatprep.subr.bf16.mxu1 %v11320_v22  ;;  %7223 = vmatprep.mubr.bf16.mxu0 %v4501_v5  ;;  %v6650_v8 = vpop.f32.mrf.mxu1  ;;  %v6731_v19 = vpop.f32.mrf.mxu0  ;;  %v3829_v22 = vcombine.low %v18106_v59, %v18105_v60  ;;  %v15976_v49 = vrot.slane %v3827_v34, %v14155_v57  ;;  %v5037_v44 = vrot.slane %v5009_v54, %v14155_v57 }
 0x388   :  { %v6651_v40 = vadd.f32 %v6650_v8, %v15866_v17  ;;  %v15943_v31 = vadd.f32 %v6729_v58, %v6649_v6  ;;  %v4834_v6 = vcombine.low %v4789_v14, %v4817_v56  ;;  %v5008_v8 = vcombine.low %v15933_v46, %v15936_v13 }
 0x389   :  { %v6652_v20 = vpop.f32.mrf.mxu1  ;;  %v6733_v32 = vpop.f32.mrf.mxu0  ;;  %v3859_v37 = vcombine.high %v15973_v12, %v15976_v49  ;;  %v11312_v46 = vcombine.high %v18112_v33, %v18111_v55  ;;  %v5041_v13 = vcombine.high %v5037_v44, %v5037_v44  ;;  %v11311_v2 = vcombine.low %v18112_v33, %v18111_v55 }
 0x38a   :  { %7259 = vmatpush1.bf16.msra.mxu1 %v11319_v21  ;;  %v6653_v35 = vadd.f32 %v6652_v20, %v15845_v30  ;;  %v15957_v3 = vadd.f32 %v6731_v19, %v6651_v40  ;;  %v15985_v21 = vrot.slane %v3829_v22, %v14155_v57  ;;  %v11313_v40 = vcombine.low %v18110_v38, %v18109_v53 }
 0x38b   :  { %7260 = vmatprep.subr.bf16.mxu1 %v11318_v29  ;;  %v6654_v15 = vpop.f32.mrf.mxu1  ;;  %v6735_v48 = vpop.f32.mrf.mxu0  ;;  %v11314_v29 = vcombine.high %v18110_v38, %v18109_v53  ;;  %v5023_v16 = vrot.slane %v5008_v8, %v14155_v57  ;;  %v18115_v38 = vld [vmem:[#allocation272_spill] sm:$0xff] }
 0x38c   :  { %v6655_v26 = vadd.f32 %v6654_v15, %v15866_v17  ;;  %v15970_v61 = vadd.f32 %v6733_v32, %v6653_v35  ;;  %v3861_v32 = vcombine.high %v15979_v4, %v15985_v21  ;;  %v3875_v35 = vrot.slane %v3859_v37, %v14155_v57 }
 0x38d   :  { %7143 = vmatmul.mubr.bf16.gmra.mxu1 %v4496_v9  ;;  %7224 = vmatmul.mubr.bf16.gmra.mxu0 %v4497_v39  ;;  %v6658_v5 = vpop.f32.mrf.mxu1  ;;  %v6739_v36 = vpop.f32.mrf.mxu0  ;;  %v4835_v9 = vcombine.high %v4789_v14, %v4817_v56  ;;  %v5039_v14 = vcombine.high %v5023_v16, %v5023_v16 }
 0x38e   :  { %7261 = vmatpush1.bf16.msra.mxu1 %v11317_v7  ;;  %7152 = vmatprep.mubr.bf16.mxu1 %v4838_v11  ;;  %v6659_v24 = vadd.f32 %v6658_v5, %v15845_v30  ;;  %v15982_v42 = vadd.f32 %v6735_v48, %v6655_v26  ;;  %v3889_v27 = vrot.slane %v3861_v32, %v14155_v57 }
 0x38f   :  { %7262 = vmatprep.subr.bf16.mxu1 %v11316_v63  ;;  %7233 = vmatprep.mubr.bf16.mxu0 %v4839_v43  ;;  %v6660_v10 = vpop.f32.mrf.mxu1  ;;  %v6741_v58 = vpop.f32.mrf.mxu0  ;;  %v18114_v63 = vld [vmem:[#allocation273_spill] sm:$0xff] }
 0x390   :  { %v6661_v47 = vadd.f32 %v6660_v10, %v15866_v17  ;;  %v15991_v7 = vadd.f32 %v6739_v36, %v6659_v24  ;;  %v11341_v5 = vcombine.low %v18114_v63, %v18113_v23  ;;  %v3891_v53 = vcombine.low %v3875_v35, %v3889_v27  ;;  %v18122_v27 = vld [vmem:[#allocation265_spill] sm:$0xff] }
 0x391   :  { %v6662_v19 = vpop.f32.mrf.mxu1  ;;  %v6743_v1 = vpop.f32.mrf.mxu0 }
 0x392   :  { %7263 = vmatpush1.bf16.msra.mxu1 %v11315_v52  ;;  %v6663_v39 = vadd.f32 %v6662_v19, %v15845_v30  ;;  %v16000_v20 = vadd.f32 %v6741_v58, %v6661_v47  ;;  %v11342_v52 = vcombine.high %v18114_v63, %v18113_v23  ;;  %v18123_v63 = vld [vmem:[#allocation304_spill] sm:$0xff] }
 0x393   :  { %7264 = vmatprep.subr.bf16.mxu1 %v11314_v29  ;;  %v6664_v18 = vpop.f32.mrf.mxu1  ;;  %v6745_v45 = vpop.f32.mrf.mxu0  ;;  %v18116_v29 = vld [vmem:[#allocation271_spill] sm:$0xff] }
 0x394   :  { %v6665_v25 = vadd.f32 %v6664_v18, %v15866_v17  ;;  %v16007_v34 = vadd.f32 %v6743_v1, %v6663_v39  ;;  %v11339_v19 = vcombine.low %v18116_v29, %v18115_v38  ;;  %v18118_v39 = vld [vmem:[#allocation269_spill] sm:$0xff] }
 0x395   :  { %7153 = vmatmul.mubr.bf16.gmra.mxu1 %v4834_v6  ;;  %7234 = vmatmul.mubr.bf16.gmra.mxu0 %v4835_v9  ;;  %v6668_v62 = vpop.f32.mrf.mxu1  ;;  %v6749_v11 = vpop.f32.mrf.mxu0 }
 0x396   :  { %7265 = vmatpush1.bf16.msra.mxu1 %v11313_v40  ;;  %7162 = vmatprep.mubr.bf16.mxu1 %v5037_v44  ;;  %v6669_v60 = vadd.f32 %v6668_v62, %v15845_v30  ;;  %v16014_v22 = vadd.f32 %v6745_v45, %v6665_v25  ;;  %v11340_v44 = vcombine.high %v18116_v29, %v18115_v38  ;;  %v18117_v40 = vld [vmem:[#allocation270_spill] sm:$0xff] }
 0x397   :  { %7266 = vmatprep.subr.bf16.mxu1 %v11312_v46  ;;  %7243 = vmatprep.mubr.bf16.mxu0 %v5041_v13  ;;  %v6670_v43 = vpop.f32.mrf.mxu1  ;;  %v6751_v54 = vpop.f32.mrf.mxu0  ;;  %v11338_v32 = vcombine.high %v18118_v39, %v18117_v40  ;;  %v11337_v25 = vcombine.low %v18118_v39, %v18117_v40  ;;  %v18134_v40 = vld [vmem:[#allocation261_spill] sm:$0xff] }
 0x398   :  { %v6671_v15 = vadd.f32 %v6670_v43, %v15866_v17  ;;  %v16020_v48 = vadd.f32 %v6749_v11, %v6669_v60  ;;  %v18121_v60 = vld [vmem:[#allocation266_spill] sm:$0xff] }
 0x399   :  { %v6672_v56 = vpop.f32.mrf.mxu1  ;;  %v6753_v26 = vpop.f32.mrf.mxu0  ;;  %v11334_v23 = vcombine.high %v18122_v27, %v18121_v60  ;;  %v11333_v29 = vcombine.low %v18122_v27, %v18121_v60  ;;  %v18143_v60 = vld [vmem:[#allocation260_spill] sm:$0xff]  ;;  %v18144_v27 = vld [vmem:[#allocation259_spill] sm:$0xff] }
 0x39a   :  { %7267 = vmatpush1.bf16.msra.mxu1 %v11311_v2  ;;  %v6673_v36 = vadd.f32 %v6672_v56, %v15845_v30  ;;  %v16025_v24 = vadd.f32 %v6751_v54, %v6671_v15  ;;  %v18119_v2 = vld [vmem:[#allocation268_spill] sm:$0xff]  ;;  %v18125_v54 = vcombine.high %v18123_v63, %v18123_v63  ;;  %v18126_v15 = vld [vmem:[#allocation305_spill] sm:$0xff] }
 0x39b   :  { %7268 = vmatprep.subr.bf16.mxu1 %v11342_v52  ;;  %v6674_v10 = vpop.f32.mrf.mxu1  ;;  %v6755_v58 = vpop.f32.mrf.mxu0  ;;  %v18124_v52 = vcombine.high %v18106_v59, %v18106_v59  ;;  %v18127_v56 = vld [vmem:[#allocation317_spill] sm:$0xff]  ;;  %v18131_v59 = vld [vmem:[#allocation264_spill] sm:$0xff] }
 0x39c   :  { %v6675_v47 = vadd.f32 %v6674_v10, %v15866_v17  ;;  %v16030_v6 = vadd.f32 %v6753_v26, %v6673_v36  ;;  %v18128_v26 = vld [vmem:[#allocation316_spill] sm:$0xff]  ;;  %v18129_v36 = vld [vmem:[#allocation318_spill] sm:$0xff] }
 0x39d   :  { %7163 = vmatmul.mubr.bf16.gmra.mxu1 %v5023_v16  ;;  %7244 = vmatmul.mubr.bf16.gmra.mxu0 %v5039_v14  ;;  %v6678_v9 = vpop.f32.mrf.mxu1  ;;  %v6759_v8 = vpop.f32.mrf.mxu0  ;;  %v18120_v16 = vld [vmem:[#allocation267_spill] sm:$0xff]  ;;  %v4164_v43 = vcombine.low %v18124_v52, %v18123_v63  ;;  %v4165_v14 = vcombine.low %v18126_v15, %v18125_v54 }
 0x39e   :  { %7269 = vmatpush2.bf16.msra.mxu1 %v11341_v5  ;;  %v6679_v1 = vadd.f32 %v6678_v9, %v15845_v30  ;;  %v16035_v37 = vadd.f32 %v6755_v58, %v6675_v47  ;;  %7284 = vmatprep.mubr.bf16.mxu1 %v3891_v53  ;;  %v11336_v62 = vcombine.high %v18120_v16, %v18119_v2 }
 0x39f   :  { %7270 = vmatprep.subr.bf16.mxu1 %v11340_v44  ;;  %v6680_v55 = vpop.f32.mrf.mxu1  ;;  %v6761_v33 = vpop.f32.mrf.mxu0  ;;  %v4166_v5 = vcombine.low %v18128_v26, %v18127_v56  ;;  %v18130_v53 = vcombine.high %v18128_v26, %v18128_v26  ;;  %v18132_v44 = vld [vmem:[#allocation263_spill] sm:$0xff]  ;;  %v4174_v58 = vrot.slane %v4164_v43, %v14155_v57  ;;  %v4181_v47 = vrot.slane %v4165_v14, %v14155_v57 }
 0x3a0   :  { %v6681_v46 = vadd.f32 %v6680_v55, %v15866_v17  ;;  %v16040_v13 = vadd.f32 %v6759_v8, %v6679_v1  ;;  %v11335_v17 = vcombine.low %v18120_v16, %v18119_v2  ;;  %v11332_v10 = vcombine.high %v18132_v44, %v18131_v59  ;;  %v18133_v1 = vld [vmem:[#allocation262_spill] sm:$0xff]  ;;  %v18137_v16 = vld [vmem:[#allocation337_spill] sm:$0xff] }
 0x3a1   :  { %v6682_v18 = vpop.f32.mrf.mxu1  ;;  %v6763_v45 = vpop.f32.mrf.mxu0  ;;  %v4167_v38 = vcombine.low %v18130_v53, %v18129_v36  ;;  %v4188_v9 = vrot.slane %v4166_v5, %v14155_v57  ;;  %v11330_v39 = vcombine.high %v18134_v40, %v18133_v1  ;;  %v3860_v55 = vcombine.low %v15979_v4, %v15985_v21  ;;  %v18142_v21 = vld [vmem:[#allocation339_spill] sm:$0xff] }
 0x3a2   :  { %7271 = vmatpush2.bf16.msra.mxu1 %v11339_v19  ;;  %v16044_v30 = vadd.f32 %v6761_v33, %v6681_v46  ;;  %v11331_v19 = vcombine.low %v18132_v44, %v18131_v59  ;;  %v11329_v33 = vcombine.low %v18134_v40, %v18133_v1  ;;  %v4197_v46 = vcombine.high %v4174_v58, %v4181_v47  ;;  %v18146_v59 = vld [vmem:[#allocation349_spill] sm:$0xff] }
 0x3a3   :  { %7272 = vmatprep.subr.bf16.mxu1 %v11338_v32  ;;  %v6683_v11 = vpop.f32.mrf.mxu1  ;;  %v6764_v35 = vpop.f32.mrf.mxu0  ;;  %v4195_v8 = vrot.slane %v4167_v38, %v14155_v57  ;;  %v3858_v32 = vcombine.low %v15973_v12, %v15976_v49  ;;  %v18135_v45 = vcombine.high %v18129_v36, %v18129_v36  ;;  %v3882_v52 = vrot.slane %v3860_v55, %v14155_v57  ;;  %v18151_v55 = vld [vmem:[#allocation360_spill] sm:$0xff] }
 0x3a4   :  { %v18139_v35 = vld [vmem:[#allocation338_spill] sm:$0xff]  ;;  %v11327_v43 = vcombine.low %v18144_v27, %v18143_v60  ;;  %v4213_v54 = vrot.slane %v4197_v46, %v14155_v57  ;;  %v4196_v53 = vcombine.low %v4174_v58, %v4181_v47 }
 0x3a5   :  { %v4199_v18 = vcombine.high %v4188_v9, %v4195_v8  ;;  %v18141_v4 = vcombine.high %v18139_v35, %v18139_v35  ;;  %v3868_v63 = vrot.slane %v3858_v32, %v14155_v57  ;;  %v4198_v38 = vcombine.low %v4188_v9, %v4195_v8 }
 0x3a6   :  { %7273 = vmatpush2.bf16.msra.mxu1 %v11337_v25  ;;  %v18136_v25 = vld [vmem:[#allocation319_spill] sm:$0xff]  ;;  %v4206_v9 = vrot.slane %v4196_v53, %v14155_v57 }
 0x3a7   :  { %7274 = vmatprep.subr.bf16.mxu1 %v11336_v62  ;;  %v4502_v2 = vcombine.low %v18136_v25, %v18135_v45  ;;  %v18138_v62 = vld [vmem:[#allocation336_spill] sm:$0xff]  ;;  %v4227_v15 = vrot.slane %v4199_v18, %v14155_v57  ;;  %v3890_v36 = vcombine.low %v3868_v63, %v3882_v52  ;;  %v4220_v8 = vrot.slane %v4198_v38, %v14155_v57 }
 0x3a8   :  { %v4503_v11 = vcombine.low %v18138_v62, %v18137_v16  ;;  %v18140_v12 = vcombine.high %v18138_v62, %v18138_v62 }
 0x3a9   :  { %v4512_v14 = vrot.slane %v4502_v2, %v14155_v57  ;;  %v4229_v18 = vcombine.low %v4213_v54, %v4227_v15 }
 0x3aa   :  { %7275 = vmatpush2.bf16.msra.mxu1 %v11335_v17  ;;  %v4504_v49 = vcombine.low %v18140_v12, %v18139_v35  ;;  %v4505_v17 = vcombine.low %v18142_v21, %v18141_v4  ;;  %v4519_v56 = vrot.slane %v4503_v11, %v14155_v57 }
 0x3ab   :  { %7276 = vmatprep.subr.bf16.mxu1 %v11334_v23  ;;  %v11328_v23 = vcombine.high %v18144_v27, %v18143_v60  ;;  %v4228_v27 = vcombine.low %v4206_v9, %v4220_v8 }
 0x3ac   :  { %v4526_v26 = vrot.slane %v4504_v49, %v14155_v57  ;;  %v4533_v5 = vrot.slane %v4505_v17, %v14155_v57  ;;  %v4535_v58 = vcombine.high %v4512_v14, %v4519_v56  ;;  %v4534_v52 = vcombine.low %v4512_v14, %v4519_v56 }
 0x3ae   :  { %7277 = vmatpush2.bf16.msra.mxu1 %v11333_v29  ;;  %v18145_v29 = vld [vmem:[#allocation350_spill] sm:$0xff]  ;;  %v4537_v47 = vcombine.high %v4526_v26, %v4533_v5  ;;  %v4551_v12 = vrot.slane %v4535_v58, %v14155_v57 }
 0x3af   :  { %7278 = vmatprep.subr.bf16.mxu1 %v11332_v10  ;;  %v4840_v44 = vcombine.low %v18146_v59, %v18145_v29  ;;  %v18147_v10 = vld [vmem:[#allocation351_spill] sm:$0xff] }
 0x3b0   :  { %v18149_v40 = vcombine.high %v18147_v10, %v18147_v10  ;;  %v4565_v49 = vrot.slane %v4537_v47, %v14155_v57 }
 0x3b1   :  { %v4850_v2 = vrot.slane %v4840_v44, %v14155_v57 }
 0x3b2   :  { %7279 = vmatpush2.bf16.msra.mxu1 %v11331_v19  ;;  %v18148_v19 = vcombine.high %v18146_v59, %v18146_v59  ;;  %v4567_v53 = vcombine.low %v4551_v12, %v4565_v49 }
 0x3b3   :  { %7280 = vmatprep.subr.bf16.mxu1 %v11330_v39  ;;  %v18150_v39 = vld [vmem:[#allocation352_spill] sm:$0xff] }
 0x3b4   :  { %v4841_v1 = vcombine.low %v18148_v19, %v18147_v10  ;;  %v4842_v32 = vcombine.low %v18150_v39, %v18149_v40  ;;  %v4544_v19 = vrot.slane %v4534_v52, %v14155_v57 }
 0x3b6   :  { %7281 = vmatpush2.bf16.msra.mxu1 %v11329_v33  ;;  %v18152_v33 = vld [vmem:[#allocation358_spill] sm:$0xff]  ;;  %v4857_v16 = vrot.slane %v4841_v1, %v14155_v57  ;;  %v4864_v62 = vrot.slane %v4842_v32, %v14155_v57  ;;  %v18153_v1 = vld [vmem:[#allocation359_spill] sm:$0xff]  ;;  %v18156_v32 = vld [vmem:[#allocation361_spill] sm:$0xff] }
 0x3b7   :  { %7282 = vmatprep.subr.bf16.mxu1 %v11328_v23  ;;  %v4843_v46 = vcombine.low %v18152_v33, %v18151_v55  ;;  %v18155_v39 = vcombine.high %v18153_v1, %v18153_v1 }
 0x3b8   :  { %v4873_v54 = vcombine.high %v4850_v2, %v4857_v16 }
 0x3b9   :  { %v4871_v11 = vrot.slane %v4843_v46, %v14155_v57  ;;  %v5043_v55 = vcombine.low %v18156_v32, %v18155_v39 }
 0x3ba   :  { %7283 = vmatpush2.bf16.msra.mxu1 %v11327_v43  ;;  %v4536_v43 = vcombine.low %v4526_v26, %v4533_v5  ;;  %v4889_v56 = vrot.slane %v4873_v54, %v14155_v57 }
 0x3bb   :  { %v4875_v15 = vcombine.high %v4864_v62, %v4871_v11 }
 0x3bc   :  { %v4558_v14 = vrot.slane %v4536_v43, %v14155_v57 }
 0x3bd   :  { %v6800_v45 = vpop.f32.mrf.mxu1  ;;  %7285 = vmatmul.mubr.bf16.vlgmr.msra.gmra.mxu1 %v3890_v36  ;;  %v6881_v25 = vpop.f32.mrf.mxu0 }
 0x3be   :  { %v6801_v35 = vadd.f32 %v6800_v45, %v15892_v51  ;;  %7294 = vmatprep.mubr.bf16.mxu1 %v4229_v18  ;;  %v4566_v8 = vcombine.low %v4544_v19, %v4558_v14 }
 0x3bf   :  { %v6802_v4 = vpop.f32.mrf.mxu1  ;;  %v6883_v21 = vpop.f32.mrf.mxu0 }
 0x3c0   :  { %v6803_v17 = vadd.f32 %v6802_v4, %v15904_v28  ;;  %v16132_v60 = vadd.f32 %v6881_v25, %v6801_v35  ;;  %v4872_v25 = vcombine.low %v4850_v2, %v4857_v16  ;;  %v4874_v35 = vcombine.low %v4864_v62, %v4871_v11 }
 0x3c1   :  { %v6804_v23 = vpop.f32.mrf.mxu1  ;;  %v6885_v63 = vpop.f32.mrf.mxu0  ;;  %v5057_v4 = vrot.slane %v5043_v55, %v14155_v57 }
 0x3c2   :  { %v6805_v51 = vadd.f32 %v6804_v23, %v15918_v0  ;;  %v16135_v36 = vadd.f32 %v6883_v21, %v6803_v17  ;;  %v4903_v0 = vrot.slane %v4875_v15, %v14155_v57  ;;  %v4882_v2 = vrot.slane %v4872_v25, %v14155_v57 }
 0x3c3   :  { %v6806_v38 = vpop.f32.mrf.mxu1  ;;  %v6887_v29 = vpop.f32.mrf.mxu0  ;;  %v4896_v16 = vrot.slane %v4874_v35, %v14155_v57 }
 0x3c4   :  { %v6807_v59 = vadd.f32 %v6806_v38, %v15927_v41  ;;  %v16138_v44 = vadd.f32 %v6885_v63, %v6805_v51  ;;  %v18154_v41 = vcombine.high %v18152_v33, %v18152_v33  ;;  %v4905_v45 = vcombine.low %v4889_v56, %v4903_v0 }
 0x3c5   :  { %v6810_v28 = vpop.f32.mrf.mxu1  ;;  %7295 = vmatmul.mubr.bf16.gmra.mxu1 %v4228_v27  ;;  %v6891_v10 = vpop.f32.mrf.mxu0 }
 0x3c6   :  { %v6811_v26 = vadd.f32 %v6810_v28, %v15943_v31  ;;  %v16145_v5 = vadd.f32 %v6887_v29, %v6807_v59  ;;  %7304 = vmatprep.mubr.bf16.mxu1 %v4567_v53  ;;  %v5042_v40 = vcombine.low %v18154_v41, %v18153_v1  ;;  %v4904_v53 = vcombine.low %v4882_v2, %v4896_v16 }
 0x3c7   :  { %v6812_v46 = vpop.f32.mrf.mxu1  ;;  %v6893_v18 = vpop.f32.mrf.mxu0 }
 0x3c8   :  { %v6813_v58 = vadd.f32 %v6812_v46, %v15957_v3  ;;  %v16156_v47 = vadd.f32 %v6891_v10, %v6811_v26  ;;  %v5050_v49 = vrot.slane %v5042_v40, %v14155_v57 }
 0x3c9   :  { %v6814_v31 = vpop.f32.mrf.mxu1  ;;  %v6895_v9 = vpop.f32.mrf.mxu0 }
 0x3ca   :  { %v6815_v33 = vadd.f32 %v6814_v31, %v15970_v61  ;;  %v16159_v12 = vadd.f32 %v6893_v18, %v6813_v58  ;;  %v5059_v11 = vcombine.high %v5050_v49, %v5057_v4  ;;  %v5058_v56 = vcombine.low %v5050_v49, %v5057_v4 }
 0x3cb   :  { %v6816_v21 = vpop.f32.mrf.mxu1  ;;  %v6897_v17 = vpop.f32.mrf.mxu0 }
 0x3cc   :  { %v6817_v3 = vadd.f32 %v6816_v21, %v15982_v42  ;;  %v16164_v27 = vadd.f32 %v6895_v9, %v6815_v33  ;;  %v5073_v59 = vrot.slane %v5059_v11, %v14155_v57 }
 0x3cd   :  { %v6820_v23 = vpop.f32.mrf.mxu1  ;;  %7305 = vmatmul.mubr.bf16.gmra.mxu1 %v4566_v8  ;;  %v6901_v63 = vpop.f32.mrf.mxu0 }
 0x3ce   :  { %v6821_v61 = vadd.f32 %v6820_v23, %v15991_v7  ;;  %v16169_v62 = vadd.f32 %v6897_v17, %v6817_v3  ;;  %7314 = vmatprep.mubr.bf16.mxu1 %v4905_v45 }
 0x3cf   :  { %v6822_v52 = vpop.f32.mrf.mxu1  ;;  %v6903_v43 = vpop.f32.mrf.mxu0 }
 0x3d0   :  { %v6823_v54 = vadd.f32 %v6822_v52, %v16000_v20  ;;  %v16172_v42 = vadd.f32 %v6901_v63, %v6821_v61 }
 0x3d1   :  { %v6824_v15 = vpop.f32.mrf.mxu1  ;;  %v6905_v51 = vpop.f32.mrf.mxu0 }
 0x3d2   :  { %v6825_v38 = vadd.f32 %v6824_v15, %v16007_v34  ;;  %v16175_v29 = vadd.f32 %v6903_v43, %v6823_v54 }
 0x3d3   :  { %v6826_v7 = vpop.f32.mrf.mxu1  ;;  %v6907_v28 = vpop.f32.mrf.mxu0 }
 0x3d4   :  { %v6827_v10 = vadd.f32 %v6826_v7, %v16014_v22  ;;  %v16179_v19 = vadd.f32 %v6905_v51, %v6825_v38  ;;  %v5066_v22 = vrot.slane %v5058_v56, %v14155_v57 }
 0x3d5   :  { %v6830_v14 = vpop.f32.mrf.mxu1  ;;  %7315 = vmatmul.mubr.bf16.gmra.mxu1 %v4904_v53  ;;  %v6911_v20 = vpop.f32.mrf.mxu0 }
 0x3d6   :  { %v6831_v0 = vadd.f32 %v6830_v14, %v16020_v48  ;;  %v16182_v26 = vadd.f32 %v6907_v28, %v6827_v10  ;;  %7324 = vmatprep.mubr.bf16.mxu1 %v5073_v59 }
 0x3d7   :  { %v6832_v34 = vpop.f32.mrf.mxu1  ;;  %v6913_v1 = vpop.f32.mrf.mxu0 }
 0x3d8   :  { %v6833_v41 = vadd.f32 %v6832_v34, %v16025_v24  ;;  %v16185_v40 = vadd.f32 %v6911_v20, %v6831_v0 }
 0x3d9   :  { %v6834_v39 = vpop.f32.mrf.mxu1  ;;  %v6915_v32 = vpop.f32.mrf.mxu0 }
 0x3da   :  { %v6835_v55 = vadd.f32 %v6834_v39, %v16030_v6  ;;  %v16189_v46 = vadd.f32 %v6913_v1, %v6833_v41 }
 0x3db   :  { %v6836_v18 = vpop.f32.mrf.mxu1  ;;  %v6917_v58 = vpop.f32.mrf.mxu0 }
 0x3dc   :  { %v6837_v48 = vadd.f32 %v6836_v18, %v16035_v37  ;;  %v16192_v31 = vadd.f32 %v6915_v32, %v6835_v55 }
 0x3dd   :  { %v6840_v9 = vpop.f32.mrf.mxu1  ;;  %7325 = vmatmul.mubr.bf16.gmra.mxu1 %v5066_v22  ;;  %v6921_v8 = vpop.f32.mrf.mxu0 }
 0x3de   :  { %v6841_v24 = vadd.f32 %v6840_v9, %v16040_v13  ;;  %v16195_v45 = vadd.f32 %v6917_v58, %v6837_v48 }
 0x3df   :  { %v6842_v25 = vpop.f32.mrf.mxu1  ;;  %v6923_v35 = vpop.f32.mrf.mxu0 }
 0x3e0   :  { %v6843_v33 = vadd.f32 %v6842_v25, %v16044_v30  ;;  %v16198_v6 = vadd.f32 %v6921_v8, %v6841_v24 }
 0x3e1   :  { %v6844_v49 = vpop.f32.mrf.mxu1  ;;  %v6925_v4 = vpop.f32.mrf.mxu0 }
 0x3e2   :  { %v16200_v21 = vadd.f32 %v6923_v35, %v6843_v33 }
 0x3e3   :  { %v6845_v37 = vpop.f32.mrf.mxu1  ;;  %v6926_v17 = vpop.f32.mrf.mxu0 }
 0x3fd   :  { %v6962_v3 = vpop.f32.mrf.mxu1  ;;  %v7043_v23 = vpop.f32.mrf.mxu0 }
 0x3fe   :  { %v6963_v63 = vadd.f32 %v6962_v3, %v16132_v60 }
 0x3ff   :  { %v6964_v2 = vpop.f32.mrf.mxu1  ;;  %v7045_v13 = vpop.f32.mrf.mxu0 }
 0x400   :  { %v6965_v16 = vadd.f32 %v6964_v2, %v16135_v36  ;;  %v16204_v61 = vadd.f32 %v7043_v23, %v6963_v63 }
 0x401   :  { %v6966_v11 = vpop.f32.mrf.mxu1  ;;  %v7047_v30 = vpop.f32.mrf.mxu0 }
 0x402   :  { %v6967_v52 = vadd.f32 %v6966_v11, %v16138_v44  ;;  %v16207_v43 = vadd.f32 %v7045_v13, %v6965_v16 }
 0x403   :  { %v6968_v54 = vpop.f32.mrf.mxu1  ;;  %v7049_v15 = vpop.f32.mrf.mxu0 }
 0x404   :  { %v6969_v51 = vadd.f32 %v6968_v54, %v16145_v5  ;;  %v16210_v53 = vadd.f32 %v7047_v30, %v6967_v52 }
 0x405   :  { %v6972_v38 = vpop.f32.mrf.mxu1  ;;  %v7053_v60 = vpop.f32.mrf.mxu0 }
 0x406   :  { %v6973_v59 = vadd.f32 %v6972_v38, %v16156_v47  ;;  %v16213_v7 = vadd.f32 %v7049_v15, %v6969_v51 }
 0x407   :  { %v6974_v36 = vpop.f32.mrf.mxu1  ;;  %v7055_v28 = vpop.f32.mrf.mxu0 }
 0x408   :  { %v6975_v10 = vadd.f32 %v6974_v36, %v16159_v12  ;;  %v16216_v14 = vadd.f32 %v7053_v60, %v6973_v59 }
 0x409   :  { %v6976_v44 = vpop.f32.mrf.mxu1  ;;  %v7057_v20 = vpop.f32.mrf.mxu0 }
 0x40a   :  { %v6977_v56 = vadd.f32 %v6976_v44, %v16164_v27  ;;  %v16219_v0 = vadd.f32 %v7055_v28, %v6975_v10 }
 0x40b   :  { %v6978_v5 = vpop.f32.mrf.mxu1  ;;  %v7059_v34 = vpop.f32.mrf.mxu0 }
 0x40c   :  { %v6979_v1 = vadd.f32 %v6978_v5, %v16169_v62  ;;  %v16222_v41 = vadd.f32 %v7057_v20, %v6977_v56 }
 0x40d   :  { %v6982_v47 = vpop.f32.mrf.mxu1  ;;  %v7063_v39 = vpop.f32.mrf.mxu0 }
 0x40e   :  { %v6983_v32 = vadd.f32 %v6982_v47, %v16172_v42  ;;  %v16225_v22 = vadd.f32 %v7059_v34, %v6979_v1 }
 0x40f   :  { %v6984_v12 = vpop.f32.mrf.mxu1  ;;  %v7065_v55 = vpop.f32.mrf.mxu0 }
 0x410   :  { %v6985_v18 = vadd.f32 %v6984_v12, %v16175_v29  ;;  %v16228_v58 = vadd.f32 %v7063_v39, %v6983_v32 }
 0x411   :  { %v6986_v27 = vpop.f32.mrf.mxu1  ;;  %v7067_v48 = vpop.f32.mrf.mxu0 }
 0x412   :  { %v6987_v9 = vadd.f32 %v6986_v27, %v16179_v19  ;;  %v16231_v8 = vadd.f32 %v7065_v55, %v6985_v18 }
 0x413   :  { %v6988_v62 = vpop.f32.mrf.mxu1  ;;  %v7069_v24 = vpop.f32.mrf.mxu0 }
 0x414   :  { %v6989_v25 = vadd.f32 %v6988_v62, %v16182_v26  ;;  %v16234_v35 = vadd.f32 %v7067_v48, %v6987_v9 }
 0x415   :  { %v6992_v42 = vpop.f32.mrf.mxu1  ;;  %v7073_v33 = vpop.f32.mrf.mxu0 }
 0x416   :  { %v6993_v49 = vadd.f32 %v6992_v42, %v16185_v40  ;;  %v16237_v4 = vadd.f32 %v7069_v24, %v6989_v25 }
 0x417   :  { %v6994_v29 = vpop.f32.mrf.mxu1  ;;  %v7075_v37 = vpop.f32.mrf.mxu0 }
 0x418   :  { %v6995_v17 = vadd.f32 %v6994_v29, %v16189_v46  ;;  %v16240_v3 = vadd.f32 %v7073_v33, %v6993_v49 }
 0x419   :  { %v6996_v19 = vpop.f32.mrf.mxu1  ;;  %v7077_v23 = vpop.f32.mrf.mxu0 }
 0x41a   :  { %v6997_v63 = vadd.f32 %v6996_v19, %v16192_v31  ;;  %v16243_v2 = vadd.f32 %v7075_v37, %v6995_v17 }
 0x41b   :  { %v6998_v26 = vpop.f32.mrf.mxu1  ;;  %v7079_v13 = vpop.f32.mrf.mxu0 }
 0x41c   :  { %v6999_v16 = vadd.f32 %v6998_v26, %v16195_v45  ;;  %v16246_v11 = vadd.f32 %v7077_v23, %v6997_v63 }
 0x41d   :  { %v7002_v40 = vpop.f32.mrf.mxu1  ;;  %v7083_v30 = vpop.f32.mrf.mxu0 }
 0x41e   :  { %v7003_v52 = vadd.f32 %v7002_v40, %v16198_v6  ;;  %v16249_v54 = vadd.f32 %v7079_v13, %v6999_v16 }
 0x41f   :  { %v7004_v46 = vpop.f32.mrf.mxu1  ;;  %v7085_v15 = vpop.f32.mrf.mxu0 }
 0x420   :  { %v7005_v51 = vadd.f32 %v7004_v46, %v16200_v21  ;;  %v16252_v38 = vadd.f32 %v7083_v30, %v7003_v52 }
 0x421   :  { %v7006_v31 = vpop.f32.mrf.mxu1  ;;  %v7087_v60 = vpop.f32.mrf.mxu0 }
 0x422   :  { %v16254_v59 = vadd.f32 %v7085_v15, %v7005_v51 }
 0x423   :  { %v7007_v36 = vpop.f32.mrf.mxu1  ;;  %v7088_v45 = vpop.f32.mrf.mxu0 }
 0x43d   :  { %v7124_v28 = vpop.f32.mrf.mxu1  ;;  %v7205_v10 = vpop.f32.mrf.mxu0 }
 0x43e   :  { %v7125_v44 = vadd.f32 %v7124_v28, %v16204_v61 }
 0x43f   :  { %v7126_v20 = vpop.f32.mrf.mxu1  ;;  %v7207_v6 = vpop.f32.mrf.mxu0 }
 0x440   :  { %v7127_v56 = vadd.f32 %v7126_v20, %v16207_v43  ;;  %v16258_v5 = vadd.f32 %v7205_v10, %v7125_v44 }
 0x441   :  { %v7128_v34 = vpop.f32.mrf.mxu1  ;;  %v7209_v21 = vpop.f32.mrf.mxu0 }
 0x442   :  { %v7129_v1 = vadd.f32 %v7128_v34, %v16210_v53  ;;  %v16261_v47 = vadd.f32 %v7207_v6, %v7127_v56 }
 0x443   :  { %v7130_v39 = vpop.f32.mrf.mxu1  ;;  %v7211_v32 = vpop.f32.mrf.mxu0 }
 0x444   :  { %v7131_v12 = vadd.f32 %v7130_v39, %v16213_v7  ;;  %v16264_v55 = vadd.f32 %v7209_v21, %v7129_v1 }
 0x445   :  { %v7134_v18 = vpop.f32.mrf.mxu1  ;;  %v7215_v61 = vpop.f32.mrf.mxu0 }
 0x446   :  { %v7135_v27 = vadd.f32 %v7134_v18, %v16216_v14  ;;  %v16267_v48 = vadd.f32 %v7211_v32, %v7131_v12 }
 0x447   :  { %v7136_v43 = vpop.f32.mrf.mxu1  ;;  %v7217_v9 = vpop.f32.mrf.mxu0 }
 0x448   :  { %v7137_v62 = vadd.f32 %v7136_v43, %v16219_v0  ;;  %v16270_v24 = vadd.f32 %v7215_v61, %v7135_v27 }
 0x449   :  { %v7138_v53 = vpop.f32.mrf.mxu1  ;;  %v7219_v25 = vpop.f32.mrf.mxu0 }
 0x44a   :  { %v7139_v42 = vadd.f32 %v7138_v53, %v16222_v41  ;;  %v16273_v33 = vadd.f32 %v7217_v9, %v7137_v62 }
 0x44b   :  { %v7140_v7 = vpop.f32.mrf.mxu1  ;;  %v7221_v49 = vpop.f32.mrf.mxu0 }
 0x44c   :  { %v7141_v29 = vadd.f32 %v7140_v7, %v16225_v22  ;;  %v16276_v37 = vadd.f32 %v7219_v25, %v7139_v42 }
 0x44d   :  { %v7144_v14 = vpop.f32.mrf.mxu1  ;;  %v7225_v17 = vpop.f32.mrf.mxu0 }
 0x44e   :  { %v7145_v19 = vadd.f32 %v7144_v14, %v16228_v58  ;;  %v16279_v23 = vadd.f32 %v7221_v49, %v7141_v29 }
 0x44f   :  { %v7146_v0 = vpop.f32.mrf.mxu1  ;;  %v7227_v63 = vpop.f32.mrf.mxu0 }
 0x450   :  { %v7147_v26 = vadd.f32 %v7146_v0, %v16231_v8  ;;  %v16282_v13 = vadd.f32 %v7225_v17, %v7145_v19  ;;  %v18157_v0 = vmov 0  }
 0x451   :  { %v7148_v41 = vpop.f32.mrf.mxu1  ;;  %v7229_v16 = vpop.f32.mrf.mxu0 }
 0x452   :  { %v7149_v40 = vadd.f32 %v7148_v41, %v16234_v35  ;;  %v16285_v30 = vadd.f32 %v7227_v63, %v7147_v26  ;;  %v12028_v41 = vmov 1983009808  }
 0x453   :  { %v7150_v22 = vpop.f32.mrf.mxu1  ;;  %v7231_v52 = vpop.f32.mrf.mxu0 }
 0x454   :  { %v7151_v46 = vadd.f32 %v7150_v22, %v16237_v4  ;;  %v16288_v15 = vadd.f32 %v7229_v16, %v7149_v40 }
 0x455   :  { %v7154_v58 = vpop.f32.mrf.mxu1  ;;  %v7235_v51 = vpop.f32.mrf.mxu0 }
 0x456   :  { %v7155_v31 = vadd.f32 %v7154_v58, %v16240_v3  ;;  %v16291_v60 = vadd.f32 %v7231_v52, %v7151_v46 }
 0x457   :  { %v7156_v8 = vpop.f32.mrf.mxu1  ;;  %v7237_v36 = vpop.f32.mrf.mxu0 }
 0x458   :  { %v7157_v45 = vadd.f32 %v7156_v8, %v16243_v2  ;;  %v16294_v28 = vadd.f32 %v7235_v51, %v7155_v31 }
 0x459   :  { %v7158_v35 = vpop.f32.mrf.mxu1  ;;  %v7239_v10 = vpop.f32.mrf.mxu0 }
 0x45a   :  { %v7159_v44 = vadd.f32 %v7158_v35, %v16246_v11  ;;  %v16297_v20 = vadd.f32 %v7237_v36, %v7157_v45 }
 0x45b   :  { %v7160_v4 = vpop.f32.mrf.mxu1  ;;  %v7241_v6 = vpop.f32.mrf.mxu0 }
 0x45c   :  { %v7161_v56 = vadd.f32 %v7160_v4, %v16249_v54  ;;  %v16300_v34 = vadd.f32 %v7239_v10, %v7159_v44 }
 0x45d   :  { %v7164_v3 = vpop.f32.mrf.mxu1  ;;  %v7245_v21 = vpop.f32.mrf.mxu0 }
 0x45e   :  { %v7165_v1 = vadd.f32 %v7164_v3, %v16252_v38  ;;  %v16303_v39 = vadd.f32 %v7241_v6, %v7161_v56 }
 0x45f   :  { %v7166_v2 = vpop.f32.mrf.mxu1  ;;  %v7247_v32 = vpop.f32.mrf.mxu0 }
 0x460   :  { %v7167_v12 = vadd.f32 %v7166_v2, %v16254_v59  ;;  %v16306_v18 = vadd.f32 %v7245_v21, %v7165_v1 }
 0x461   :  { %v7168_v11 = vpop.f32.mrf.mxu1  ;;  %v7249_v61 = vpop.f32.mrf.mxu0 }
 0x462   :  { %v16308_v27 = vadd.f32 %v7247_v32, %v7167_v12 }
 0x463   :  { %v7169_v43 = vpop.f32.mrf.mxu1  ;;  %v7250_v54 = vpop.f32.mrf.mxu0 }
 0x47d   :  { %v7286_v9 = vpop.f32.mrf.mxu1 }
 0x47e   :  { %v7287_v62 = vadd.f32 %v7286_v9, %v16258_v5 }
 0x47f   :  { %v7288_v53 = vpop.f32.mrf.mxu1 }
 0x480   :  { %v7289_v38 = vadd.f32 %v7288_v53, %v16261_v47  ;;  %v8587_v47 = vunpack.c.l.s4 %v12028_v41 }
 0x481   :  { %v7290_v25 = vpop.f32.mrf.mxu1 }
 0x482   :  { %v7291_v42 = vadd.f32 %v7290_v25, %v16264_v55  ;;  %v8588_v51 = vunpack.c.0.s8 %v8587_v47 }
 0x483   :  { %v7292_v7 = vpop.f32.mrf.mxu1 }
 0x484   :  { %v7333_v49 = vpack.c.bf16 %v7291_v42, %v7287_v62  ;;  %v7293_v59 = vadd.f32 %v7292_v7, %v16267_v48  ;;  %v16335_v56 = vsub.s32 %v8588_v51, %v18080_v50 }
 0x485   :  { %v7296_v29 = vpop.f32.mrf.mxu1 }
 0x486   :  { %v7334_v14 = vpack.c.bf16 %v7293_v59, %v7289_v38  ;;  %v7297_v17 = vadd.f32 %v7296_v29, %v16270_v24  ;;  %v7343_v63 = vmax.bf16 %v18157_v0, %v7333_v49 }
 0x487   :  { %v7298_v19 = vpop.f32.mrf.mxu1 }
 0x488   :  { %v7344_v26 = vmax.bf16 %v18157_v0, %v7334_v14  ;;  %v7299_v5 = vadd.f32 %v7298_v19, %v16273_v33 }
 0x489   :  { %v7300_v16 = vpop.f32.mrf.mxu1 }
 0x48a   :  { %v7363_v40 = vcombine.low %v7343_v63, %v7344_v26  ;;  %v7364_v55 = vcombine.high %v7343_v63, %v7344_v26  ;;  %v7301_v22 = vadd.f32 %v7300_v16, %v16276_v37 }
 0x48b   :  { %v7302_v52 = vpop.f32.mrf.mxu1 }
 0x48c   :  { %v7371_v48 = vrot.slane %v7363_v40, %v14155_v57  ;;  %v7378_v46 = vrot.slane %v7364_v55, %v14155_v57  ;;  %v7335_v24 = vpack.c.bf16 %v7301_v22, %v7297_v17  ;;  %v7303_v58 = vadd.f32 %v7302_v52, %v16279_v23 }
 0x48d   :  { %v7306_v31 = vpop.f32.mrf.mxu1 }
 0x48e   :  { %v7379_v8 = vcombine.high %v7371_v48, %v7371_v48  ;;  %v7380_v36 = vcombine.high %v7378_v46, %v7378_v46  ;;  %v7387_v33 = vrot.slane %v7371_v48, %v14155_v57  ;;  %v7394_v45 = vrot.slane %v7378_v46, %v14155_v57 }
 0x48f   :  { %v7336_v35 = vpack.c.bf16 %v7303_v58, %v7299_v5  ;;  %v16325_v10 = vadd.f32 %v7306_v31, %v16282_v13  ;;  %v7308_v37 = vpop.f32.mrf.mxu1  ;;  %v16342_v32 = vmax.bf16 %v18157_v0, %v7335_v24 }
 0x490   :  { %v7401_v44 = vrot.slane %v7379_v8, %v14155_v57  ;;  %v16329_v4 = vrot.slane %v7380_v36, %v14155_v57  ;;  %v7409_v6 = vcombine.high %v7387_v33, %v7387_v33  ;;  %v16332_v23 = vadd.f32 %v7308_v37, %v16285_v30 }
 0x491   :  { %v16338_v3 = vmax.bf16 %v18157_v0, %v7336_v35  ;;  %v7310_v21 = vpop.f32.mrf.mxu1 }
 0x492   :  { %v7411_v1 = vcombine.high %v7401_v44, %v7401_v44  ;;  %v7588_v13 = vcombine.low %v7387_v33, %v7401_v44  ;;  %v11343_v2 = vcombine.high %v7394_v45, %v16329_v4  ;;  %v7778_v12 = vrot.slane %v7409_v6, %v14155_v57 }
 0x493   :  { %v7801_v30 = vrot.slane %v16329_v4, %v14155_v57  ;;  %v8068_v11 = vcombine.low %v7401_v44, %v7409_v6  ;;  %v8091_v50 = vcombine.low %v7394_v45, %v16329_v4  ;;  %v16348_v61 = vpop.f32.mrf.mxu1  ;;  %v7413_v62 = vcombine.low %v16342_v32, %v16338_v3 }
 0x494   :  { %v7595_v43 = vrot.slane %v7588_v13, %v14155_v57  ;;  %v7611_v54 = vcombine.low %v7411_v1, %v7394_v45  ;;  %v16352_v9 = vrot.slane %v11343_v2, %v14155_v57  ;;  %v7414_v25 = vcombine.high %v16342_v32, %v16338_v3 }
 0x495   :  { %v8075_v53 = vrot.slane %v8068_v11, %v14155_v57  ;;  %v8098_v38 = vrot.slane %v8091_v50, %v14155_v57  ;;  %v16361_v42 = vadd.f32 %v7310_v21, %v16288_v15  ;;  %v7316_v7 = vpop.f32.mrf.mxu1 }
 0x496   :  { %v7596_v49 = vcombine.high %v7595_v43, %v7595_v43  ;;  %v7603_v59 = vrot.slane %v7595_v43, %v14155_v57  ;;  %v7618_v29 = vrot.slane %v7611_v54, %v14155_v57  ;;  %v7642_v14 = vcombine.high %v16352_v9, %v16352_v9 }
 0x497   :  { %v7649_v17 = vrot.slane %v16352_v9, %v14155_v57  ;;  %v7779_v19 = vcombine.low %v7595_v43, %v7778_v12  ;;  %v7780_v63 = vcombine.high %v7595_v43, %v7778_v12  ;;  %v8076_v26 = vcombine.high %v8075_v53, %v8075_v53  ;;  %v16369_v5 = vpop.f32.mrf.mxu1 }
 0x498   :  { %v7610_v15 = vrot.slane %v7596_v49, %v14155_v57  ;;  %v7619_v41 = vcombine.high %v7618_v29, %v7618_v29  ;;  %v7626_v47 = vrot.slane %v7618_v29, %v14155_v57  ;;  %v7656_v16 = vrot.slane %v7642_v14, %v14155_v57 }
 0x499   :  { %v7787_v40 = vrot.slane %v7779_v19, %v14155_v57  ;;  %v7794_v55 = vrot.slane %v7780_v63, %v14155_v57  ;;  %v7802_v22 = vcombine.low %v7618_v29, %v7801_v30  ;;  %v7803_v52 = vcombine.high %v7618_v29, %v7801_v30  ;;  %v16376_v48 = vpop.f32.mrf.mxu1 }
 0x49a   :  { %v7633_v46 = vrot.slane %v7619_v41, %v14155_v57  ;;  %v8083_v24 = vrot.slane %v8075_v53, %v14155_v57  ;;  %v8090_v58 = vrot.slane %v8076_v26, %v14155_v57  ;;  %v8099_v51 = vcombine.high %v8098_v38, %v8098_v38 }
 0x49b   :  { %v7810_v31 = vrot.slane %v7802_v22, %v14155_v57  ;;  %v7817_v8 = vrot.slane %v7803_v52, %v14155_v57  ;;  %v7957_v36 = vshrl.u32 %v7787_v40, 16  ;;  %v7959_v33 = vshll.u32 %v7787_v40, 16  ;;  %v16383_v45 = vpop.f32.mrf.mxu1 }
 0x49c   :  { %v7964_v35 = vshrl.u32 %v7794_v55, 16  ;;  %v7966_v37 = vshll.u32 %v7794_v55, 16  ;;  %v8106_v44 = vrot.slane %v8098_v38, %v14155_v57  ;;  %v8113_v6 = vrot.slane %v8099_v51, %v14155_v57 }
 0x49d   :  { %v7961_v3 = vrot.slane %v7959_v33, 1  ;;  %v7971_v21 = vshrl.u32 %v7810_v31, 16  ;;  %v7973_v1 = vshll.u32 %v7810_v31, 16  ;;  %v7978_v13 = vshrl.u32 %v7817_v8, 16  ;;  %v16387_v2 = vpop.f32.mrf.mxu1 }
 0x49e   :  { %v7968_v32 = vrot.slane %v7966_v37, 1  ;;  %v7980_v12 = vshll.u32 %v7817_v8, 16  ;;  %v16389_v30 = vcombine.low %v7603_v59, %v7610_v15  ;;  %v16391_v11 = vcombine.low %v8083_v24, %v8090_v58 }
 0x49f   :  { %v7962_v50 = vor.u32 %v7961_v3, %v7957_v36  ;;  %v7975_v43 = vrot.slane %v7973_v1, 1  ;;  %v8602_v54 = vcombine.low %v7626_v47, %v7633_v46  ;;  %v8619_v53 = vcombine.low %v8106_v44, %v8113_v6  ;;  %v16393_v49 = vpop.f32.mrf.mxu1 }
 0x4a0   :  { %v7969_v38 = vor.u32 %v7968_v32, %v7964_v35  ;;  %v7982_v29 = vrot.slane %v7980_v12, 1  ;;  %v8635_v15 = vcombine.low %v7649_v17, %v7656_v16  ;;  %v7421_v55 = vrot.slane %v7413_v62, %v14155_v57 }
 0x4a1   :  { %v7976_v63 = vor.u32 %v7975_v43, %v7971_v21  ;;  %v16400_v59 = vrot.slane %v8602_v54, %v16335_v56  ;;  %v16403_v26 = vrot.slane %v8619_v53, %v16335_v56  ;;  %v7330_v41 = vpop.f32.mrf.mxu1  ;;  %v7428_v22 = vrot.slane %v7414_v25, %v14155_v57 }
 0x4a2   :  { %v7983_v47 = vor.u32 %v7982_v29, %v7978_v13  ;;  %v8585_v40 = vcombine.low %v7962_v50, %v7969_v38  ;;  %v16408_v52 = vrot.slane %v8635_v15, %v16335_v56  ;;  %v7337_v46 = vpack.c.bf16 %v16361_v42, %v16325_v10 }
 0x4a3   :  { %v16414_v24 = vadd.f32 %v16348_v61, %v16291_v60  ;;  %v16417_v58 = vadd.f32 %v7316_v7, %v16294_v28  ;;  %v7331_v17 = vpop.f32.mrf.mxu1  ;;  %v7429_v51 = vcombine.high %v7421_v55, %v7421_v55  ;;  %v7430_v25 = vcombine.high %v7428_v22, %v7428_v22 }
 0x4a4   :  { %v16420_v16 = vrot.slane %v8585_v40, %v16335_v56  ;;  %v8618_v62 = vcombine.low %v7976_v63, %v7983_v47  ;;  %v7412_v31 = vcombine.high %v16329_v4, %v16329_v4  ;;  %v7437_v8 = vrot.slane %v7421_v55, %v14155_v57 }
 0x4a5   :  { %v7444_v10 = vrot.slane %v7428_v22, %v14155_v57  ;;  %v7338_v60 = vpack.c.bf16 %v16414_v24, %v16332_v23  ;;  %v7451_v61 = vrot.slane %v7429_v51, %v14155_v57  ;;  %v16433_v42 = vrot.slane %v7430_v25, %v14155_v57 }
 0x4a6   :  { %v16429_v28 = vrot.slane %v8618_v62, %v16335_v56  ;;  %v16437_v7 = vadd.f32 %v16369_v5, %v16297_v20  ;;  %v7459_v4 = vcombine.high %v7437_v8, %v7437_v8  ;;  %v7824_v33 = vrot.slane %v7437_v8, %v14155_v57 }
 0x4a7   :  { %v7460_v36 = vcombine.high %v7444_v10, %v7444_v10  ;;  %v8114_v35 = vcombine.low %v7412_v31, %v7437_v8  ;;  %v7461_v37 = vcombine.high %v7451_v61, %v7451_v61  ;;  %v11345_v44 = vcombine.high %v7437_v8, %v7451_v61 }
 0x4a8   :  { %v8252_v6 = vcombine.low %v7444_v10, %v16433_v42  ;;  %v16442_v3 = vmax.bf16 %v18157_v0, %v7337_v46  ;;  %v7657_v21 = vcombine.low %v7451_v61, %v7459_v4  ;;  %v7825_v1 = vcombine.low %v16352_v9, %v7824_v33 }
 0x4a9   :  { %v7826_v13 = vcombine.high %v16352_v9, %v7824_v33  ;;  %v8121_v20 = vrot.slane %v8114_v35, %v14155_v57  ;;  %v7847_v5 = vrot.slane %v7461_v37, %v14155_v57  ;;  %v8144_v32 = vrot.slane %v11345_v44, %v14155_v57 }
 0x4aa   :  { %v8259_v12 = vrot.slane %v8252_v6, %v14155_v57  ;;  %v8304_v50 = vrot.slane %v7460_v36, %v14155_v57  ;;  %v7664_v43 = vrot.slane %v7657_v21, %v14155_v57  ;;  %v7833_v54 = vrot.slane %v7825_v1, %v14155_v57 }
 0x4ab   :  { %v7840_v53 = vrot.slane %v7826_v13, %v14155_v57  ;;  %v8122_v38 = vcombine.high %v8121_v20, %v8121_v20  ;;  %v8129_v29 = vrot.slane %v8121_v20, %v14155_v57  ;;  %v8145_v9 = vcombine.high %v8144_v32, %v8144_v32 }
 0x4ac   :  { %v8152_v63 = vrot.slane %v8144_v32, %v14155_v57  ;;  %v8260_v15 = vcombine.high %v8259_v12, %v8259_v12  ;;  %v7665_v41 = vcombine.high %v7664_v43, %v7664_v43  ;;  %v7672_v47 = vrot.slane %v7664_v43, %v14155_v57 }
 0x4ad   :  { %v7848_v40 = vcombine.low %v7664_v43, %v7847_v5  ;;  %v7849_v55 = vcombine.high %v7664_v43, %v7847_v5  ;;  %v7985_v22 = vshrl.u32 %v7833_v54, 16  ;;  %v7987_v46 = vshll.u32 %v7833_v54, 16 }
 0x4ae   :  { %v7992_v17 = vshrl.u32 %v7840_v53, 16  ;;  %v7994_v62 = vshll.u32 %v7840_v53, 16  ;;  %v7679_v51 = vrot.slane %v7665_v41, %v14155_v57  ;;  %v8136_v8 = vrot.slane %v8122_v38, %v14155_v57 }
 0x4af   :  { %v7856_v25 = vrot.slane %v7848_v40, %v14155_v57  ;;  %v7863_v31 = vrot.slane %v7849_v55, %v14155_v57  ;;  %v7989_v10 = vrot.slane %v7987_v46, 1  ;;  %v8159_v4 = vrot.slane %v8145_v9, %v14155_v57 }
 0x4b0   :  { %v7996_v61 = vrot.slane %v7994_v62, 1  ;;  %v8267_v33 = vrot.slane %v8259_v12, %v14155_v57  ;;  %v8274_v13 = vrot.slane %v8260_v15, %v14155_v57  ;;  %v8305_v20 = vcombine.low %v8259_v12, %v8304_v50 }
 0x4b1   :  { %v7999_v35 = vshrl.u32 %v7856_v25, 16  ;;  %v8001_v37 = vshll.u32 %v7856_v25, 16  ;;  %v8006_v44 = vshrl.u32 %v7863_v31, 16  ;;  %v8008_v6 = vshll.u32 %v7863_v31, 16 }
 0x4b2   :  { %v7990_v21 = vor.u32 %v7989_v10, %v7985_v22  ;;  %v7997_v1 = vor.u32 %v7996_v61, %v7992_v17  ;;  %v8306_v43 = vcombine.high %v8259_v12, %v8304_v50  ;;  %v8372_v54 = vcombine.low %v16433_v42, %v7460_v36 }
 0x4b3   :  { %v8003_v5 = vrot.slane %v8001_v37, 1  ;;  %v8010_v32 = vrot.slane %v8008_v6, 1  ;;  %v8313_v53 = vrot.slane %v8305_v20, %v14155_v57  ;;  %v8652_v9 = vcombine.low %v8129_v29, %v8136_v8 }
 0x4b4   :  { %v8636_v38 = vcombine.low %v7990_v21, %v7997_v1  ;;  %v8663_v41 = vcombine.low %v7672_v47, %v7679_v51  ;;  %v8320_v46 = vrot.slane %v8306_v43, %v14155_v57  ;;  %v8379_v22 = vrot.slane %v8372_v54, %v14155_v57 }
 0x4b5   :  { %v8004_v40 = vor.u32 %v8003_v5, %v7999_v35  ;;  %v8011_v55 = vor.u32 %v8010_v32, %v8006_v44  ;;  %v8345_v17 = vshrl.u32 %v8313_v53, 16  ;;  %v8347_v62 = vshll.u32 %v8313_v53, 16 }
 0x4b6   :  { %v16469_v15 = vrot.slane %v8636_v38, %v16335_v56  ;;  %v16472_v12 = vrot.slane %v8652_v9, %v16335_v56  ;;  %v8352_v36 = vshrl.u32 %v8320_v46, 16  ;;  %v8354_v50 = vshll.u32 %v8320_v46, 16 }
 0x4b7   :  { %v8380_v25 = vcombine.high %v8379_v22, %v8379_v22  ;;  %v8387_v29 = vrot.slane %v8379_v22, %v14155_v57  ;;  %v8349_v47 = vrot.slane %v8347_v62, 1  ;;  %v8664_v51 = vcombine.low %v8004_v40, %v8011_v55 }
 0x4b8   :  { %v16476_v31 = vrot.slane %v8663_v41, %v16335_v56  ;;  %v8680_v8 = vcombine.low %v8152_v63, %v8159_v4  ;;  %v8356_v10 = vrot.slane %v8354_v50, 1  ;;  %v8690_v35 = vcombine.low %v8267_v33, %v8274_v13 }
 0x4b9   :  { %v8394_v61 = vrot.slane %v8380_v25, %v14155_v57  ;;  %v7348_v37 = vmax.bf16 %v18157_v0, %v7338_v60  ;;  %v8350_v44 = vor.u32 %v8349_v47, %v8345_v17  ;;  %v16484_v6 = vrot.slane %v8664_v51, %v16335_v56 }
 0x4ba   :  { %v16487_v21 = vrot.slane %v8680_v8, %v16335_v56  ;;  %v7321_v1 = vadd.f32 %v16376_v48, %v16300_v34  ;;  %v8357_v63 = vor.u32 %v8356_v10, %v8352_v36  ;;  %v16492_v4 = vrot.slane %v8690_v35, %v16335_v56 }
 0x4bb   :  { %v8707_v33 = vcombine.low %v8387_v29, %v8394_v61  ;;  %v7463_v13 = vcombine.low %v16442_v3, %v7348_v37  ;;  %v7464_v23 = vcombine.high %v16442_v3, %v7348_v37  ;;  %v7323_v60 = vadd.f32 %v16383_v45, %v16303_v39 }
 0x4bc   :  { %v7339_v24 = vpack.c.bf16 %v7321_v1, %v16417_v58  ;;  %v7327_v20 = vadd.f32 %v16387_v2, %v16306_v18  ;;  %v8691_v5 = vcombine.low %v8350_v44, %v8357_v63  ;;  %v7329_v32 = vadd.f32 %v16393_v49, %v16308_v27 }
 0x4bd   :  { %v16502_v34 = vrot.slane %v8707_v33, %v16335_v56  ;;  %v7471_v48 = vrot.slane %v7463_v13, %v14155_v57  ;;  %v7462_v3 = vcombine.high %v16433_v42, %v16433_v42  ;;  %v7478_v58 = vrot.slane %v7464_v23, %v14155_v57 }
 0x4be   :  { %v7340_v43 = vpack.c.bf16 %v7323_v60, %v16437_v7  ;;  %v7341_v39 = vpack.c.bf16 %v7327_v20, %v7327_v20  ;;  %v16512_v45 = vrot.slane %v8691_v5, %v16335_v56  ;;  %v7342_v54 = vpack.c.bf16 %v7329_v32, %v7329_v32 }
 0x4bf   :  { %v7479_v18 = vcombine.high %v7471_v48, %v7471_v48  ;;  %v16515_v2 = vrot.slane %v7471_v48, %v14155_v57  ;;  %v7480_v53 = vcombine.high %v7478_v58, %v7478_v58  ;;  %v7494_v38 = vrot.slane %v7478_v58, %v14155_v57 }
 0x4c0   :  { %v16519_v27 = vmax.bf16 %v18157_v0, %v7339_v24  ;;  %v16522_v49 = vmax.bf16 %v18157_v0, %v7340_v43  ;;  %v16529_v9 = vmax.bf16 %v18157_v0, %v7341_v39  ;;  %v16532_v41 = vmax.bf16 %v18157_v0, %v7342_v54 }
 0x4c1   :  { %v16525_v42 = vrot.slane %v7479_v18, %v14155_v57  ;;  %v8418_v7 = vcombine.low %v7462_v3, %v16515_v2  ;;  %v7508_v40 = vrot.slane %v7480_v53, %v14155_v57  ;;  %v7510_v55 = vcombine.high %v7494_v38, %v7494_v38 }
 0x4c2   :  { %v7870_v46 = vrot.slane %v7494_v38, %v14155_v57  ;;  %v7513_v22 = vcombine.low %v16519_v27, %v16522_v49 }
 0x4c3   :  { %v7511_v17 = vcombine.high %v16525_v42, %v16525_v42  ;;  %v11344_v62 = vcombine.high %v16515_v2, %v16525_v42  ;;  %v8425_v36 = vrot.slane %v8418_v7, %v14155_v57  ;;  %v8470_v0 = vrot.slane %v16525_v42, %v14155_v57 }
 0x4c4   :  { %v7512_v50 = vcombine.high %v7508_v40, %v7508_v40  ;;  %v7703_v25 = vcombine.low %v7508_v40, %v7510_v55  ;;  %v11346_v29 = vcombine.high %v7494_v38, %v7508_v40  ;;  %v8538_v47 = vcombine.low %v16515_v2, %v16525_v42 }
 0x4c5   :  { %v7687_v51 = vrot.slane %v11344_v62, %v14155_v57  ;;  %v8160_v8 = vcombine.low %v7511_v17, %v7494_v38  ;;  %v8426_v10 = vcombine.high %v8425_v36, %v8425_v36  ;;  %v8433_v61 = vrot.slane %v8425_v36, %v14155_v57 }
 0x4c6   :  { %v7710_v35 = vrot.slane %v7703_v25, %v14155_v57  ;;  %v7893_v37 = vrot.slane %v7512_v50, %v14155_v57  ;;  %v16552_v44 = vrot.slane %v11346_v29, %v14155_v57  ;;  %v8471_v1 = vcombine.low %v8425_v36, %v8470_v0 }
 0x4c7   :  { %v7688_v63 = vcombine.high %v7687_v51, %v7687_v51  ;;  %v7695_v33 = vrot.slane %v7687_v51, %v14155_v57  ;;  %v7871_v13 = vcombine.low %v7687_v51, %v7870_v46  ;;  %v7872_v23 = vcombine.high %v7687_v51, %v7870_v46 }
 0x4c8   :  { %v7711_v24 = vcombine.high %v7710_v35, %v7710_v35  ;;  %v7718_v60 = vrot.slane %v7710_v35, %v14155_v57  ;;  %v7894_v20 = vcombine.low %v7710_v35, %v7893_v37  ;;  %v7895_v5 = vcombine.high %v7710_v35, %v7893_v37 }
 0x4c9   :  { %v7702_v48 = vrot.slane %v7688_v63, %v14155_v57  ;;  %v7879_v32 = vrot.slane %v7871_v13, %v14155_v57  ;;  %v7886_v3 = vrot.slane %v7872_v23, %v14155_v57  ;;  %v8167_v58 = vrot.slane %v8160_v8, %v14155_v57 }
 0x4ca   :  { %v7725_v43 = vrot.slane %v7711_v24, %v14155_v57  ;;  %v7902_v39 = vrot.slane %v7894_v20, %v14155_v57  ;;  %v7909_v18 = vrot.slane %v7895_v5, %v14155_v57  ;;  %v8191_v2 = vcombine.high %v16552_v44, %v16552_v44 }
 0x4cb   :  { %v8013_v54 = vshrl.u32 %v7879_v32, 16  ;;  %v8015_v53 = vshll.u32 %v7879_v32, 16  ;;  %v8020_v38 = vshrl.u32 %v7886_v3, 16  ;;  %v8022_v42 = vshll.u32 %v7886_v3, 16 }
 0x4cc   :  { %v8027_v7 = vshrl.u32 %v7902_v39, 16  ;;  %v8029_v40 = vshll.u32 %v7902_v39, 16  ;;  %v8034_v55 = vshrl.u32 %v7909_v18, 16  ;;  %v8036_v46 = vshll.u32 %v7909_v18, 16 }
 0x4cd   :  { %v8017_v17 = vrot.slane %v8015_v53, 1  ;;  %v8024_v62 = vrot.slane %v8022_v42, 1  ;;  %v8168_v50 = vcombine.high %v8167_v58, %v8167_v58  ;;  %v8175_v25 = vrot.slane %v8167_v58, %v14155_v57 }
 0x4ce   :  { %v8031_v29 = vrot.slane %v8029_v40, 1  ;;  %v8038_v51 = vrot.slane %v8036_v46, 1  ;;  %v8198_v8 = vrot.slane %v16552_v44, %v14155_v57  ;;  %v8205_v35 = vrot.slane %v8191_v2, %v14155_v57 }
 0x4cf   :  { %v8018_v37 = vor.u32 %v8017_v17, %v8013_v54  ;;  %v8025_v63 = vor.u32 %v8024_v62, %v8020_v38  ;;  %v8182_v13 = vrot.slane %v8168_v50, %v14155_v57  ;;  %v8440_v23 = vrot.slane %v8426_v10, %v14155_v57 }
 0x4d0   :  { %v8032_v24 = vor.u32 %v8031_v29, %v8027_v7  ;;  %v8039_v20 = vor.u32 %v8038_v51, %v8034_v55  ;;  %v8472_v5 = vcombine.high %v8425_v36, %v8470_v0  ;;  %v8479_v32 = vrot.slane %v8471_v1, %v14155_v57 }
 0x4d1   :  { %v8545_v3 = vrot.slane %v8538_v47, %v14155_v57  ;;  %v16573_v58 = vcombine.low %v8433_v61, %v8440_v23  ;;  %v16575_v39 = vcombine.low %v7695_v33, %v7702_v48  ;;  %v8743_v44 = vcombine.low %v8018_v37, %v8025_v63 }
 0x4d2   :  { %v8486_v18 = vrot.slane %v8472_v5, %v14155_v57  ;;  %v8511_v2 = vshrl.u32 %v8479_v32, 16  ;;  %v8513_v54 = vshll.u32 %v8479_v32, 16  ;;  %v16578_v53 = vcombine.low %v8175_v25, %v8182_v13 }
 0x4d3   :  { %v8546_v38 = vcombine.high %v8545_v3, %v8545_v3  ;;  %v8553_v10 = vrot.slane %v8545_v3, %v14155_v57  ;;  %v16586_v33 = vrot.slane %v8743_v44, %v16335_v56  ;;  %v8760_v42 = vcombine.low %v7718_v60, %v7725_v43 }
 0x4d4   :  { %v8515_v47 = vrot.slane %v8513_v54, 1  ;;  %v8518_v61 = vshrl.u32 %v8486_v18, 16  ;;  %v8520_v1 = vshll.u32 %v8486_v18, 16  ;;  %v8776_v40 = vcombine.low %v8032_v24, %v8039_v20 }
 0x4d5   :  { %v8560_v48 = vrot.slane %v8546_v38, %v14155_v57  ;;  %v8777_v17 = vcombine.low %v8198_v8, %v8205_v35  ;;  %v7514_v62 = vcombine.high %v16519_v27, %v16522_v49  ;;  %v16596_v25 = vrot.slane %v8760_v42, %v16335_v56 }
 0x4d6   :  { %v8516_v55 = vor.u32 %v8515_v47, %v8511_v2  ;;  %v8522_v46 = vrot.slane %v8520_v1, 1  ;;  %v16599_v29 = vrot.slane %v8776_v40, %v16335_v56  ;;  %v7521_v60 = vrot.slane %v7513_v22, %v14155_v57 }
 0x4d7   :  { %v16593_v50 = vcombine.low %v8553_v10, %v8560_v48  ;;  %v16606_v51 = vrot.slane %v8777_v17, %v16335_v56  ;;  %v7528_v8 = vrot.slane %v7514_v62, %v14155_v57  ;;  %v7563_v35 = vcombine.low %v16529_v9, %v16532_v41 }
 0x4d8   :  { %v8523_v43 = vor.u32 %v8522_v46, %v8518_v61  ;;  %v7529_v63 = vcombine.high %v7521_v60, %v7521_v60  ;;  %v7537_v13 = vrot.slane %v7521_v60, %v14155_v57 }
 0x4d9   :  { %18158 = vst [vmem:[#allocation279_spill] sm:$0xff] %v16593_v50  ;;  %v7530_v24 = vcombine.high %v7528_v8, %v7528_v8  ;;  %v7570_v27 = vrot.slane %v7563_v35, %v14155_v57  ;;  %v7544_v49 = vrot.slane %v7528_v8, %v14155_v57 }
 0x4da   :  { %v8718_v23 = vcombine.low %v8516_v55, %v8523_v43  ;;  %v7551_v22 = vrot.slane %v7529_v63, %v14155_v57  ;;  %v7559_v20 = vcombine.high %v7537_v13, %v7537_v13 }
 0x4db   :  { %v16621_v9 = vrot.slane %v7530_v24, %v14155_v57  ;;  %v7571_v41 = vcombine.high %v7570_v27, %v7570_v27  ;;  %v16624_v32 = vrot.slane %v7570_v27, %v14155_v57 }
 0x4dc   :  { %v16618_v5 = vrot.slane %v8718_v23, %v16335_v56  ;;  %v7561_v3 = vcombine.high %v7551_v22, %v7551_v22  ;;  %v7726_v44 = vcombine.low %v7537_v13, %v7551_v22  ;;  %v7916_v18 = vrot.slane %v7559_v20, %v14155_v57 }
 0x4dd   :  { %v8206_v2 = vcombine.low %v7551_v22, %v7559_v20  ;;  %v7939_v54 = vrot.slane %v16621_v9, %v14155_v57  ;;  %v8229_v38 = vcombine.low %v7544_v49, %v16621_v9  ;;  %v11347_v10 = vcombine.high %v7544_v49, %v16621_v9 }
 0x4de   :  { %v7733_v61 = vrot.slane %v7726_v44, %v14155_v57  ;;  %v7749_v1 = vcombine.low %v7561_v3, %v7544_v49  ;;  %v16636_v42 = vrot.slane %v7571_v41, %v14155_v57  ;;  %v7586_v46 = vcombine.high %v16624_v32, %v16624_v32 }
 0x4df   :  { %v8213_v48 = vrot.slane %v8206_v2, %v14155_v57  ;;  %v8236_v40 = vrot.slane %v8229_v38, %v14155_v57  ;;  %v16640_v55 = vrot.slane %v11347_v10, %v14155_v57  ;;  %v8327_v17 = vrot.slane %v16624_v32, %v14155_v57 }
 0x4e0   :  { %v7734_v62 = vcombine.high %v7733_v61, %v7733_v61  ;;  %v7741_v60 = vrot.slane %v7733_v61, %v14155_v57  ;;  %v7756_v43 = vrot.slane %v7749_v1, %v14155_v57  ;;  %v7917_v8 = vcombine.low %v7733_v61, %v7916_v18 }
 0x4e1   :  { %v7918_v35 = vcombine.high %v7733_v61, %v7916_v18  ;;  %v8214_v63 = vcombine.high %v8213_v48, %v8213_v48  ;;  %v8221_v13 = vrot.slane %v8213_v48, %v14155_v57  ;;  %v8237_v23 = vcombine.high %v8236_v40, %v8236_v40 }
 0x4e2   :  { %v7748_v24 = vrot.slane %v7734_v62, %v14155_v57  ;;  %v7757_v27 = vcombine.high %v7756_v43, %v7756_v43  ;;  %v7764_v49 = vrot.slane %v7756_v43, %v14155_v57  ;;  %v7925_v22 = vrot.slane %v7917_v8, %v14155_v57 }
 0x4e3   :  { %v7932_v20 = vrot.slane %v7918_v35, %v14155_v57  ;;  %v7940_v41 = vcombine.low %v7756_v43, %v7939_v54  ;;  %v7941_v3 = vcombine.high %v7756_v43, %v7939_v54  ;;  %v8228_v44 = vrot.slane %v8214_v63, %v14155_v57 }
 0x4e4   :  { %v7771_v2 = vrot.slane %v7757_v27, %v14155_v57  ;;  %v8041_v18 = vshrl.u32 %v7925_v22, 16  ;;  %v8043_v38 = vshll.u32 %v7925_v22, 16  ;;  %v8244_v10 = vrot.slane %v8236_v40, %v14155_v57 }
 0x4e5   :  { %v7948_v61 = vrot.slane %v7940_v41, %v14155_v57  ;;  %v7955_v1 = vrot.slane %v7941_v3, %v14155_v57  ;;  %v8048_v48 = vshrl.u32 %v7932_v20, 16  ;;  %v8050_v62 = vshll.u32 %v7932_v20, 16 }
 0x4e6   :  { %v8045_v37 = vrot.slane %v8043_v38, 1  ;;  %v8251_v8 = vrot.slane %v8237_v23, %v14155_v57  ;;  %v8283_v54 = vcombine.high %v16640_v55, %v16640_v55  ;;  %v8290_v43 = vrot.slane %v16640_v55, %v14155_v57 }
 0x4e7   :  { %v8052_v35 = vrot.slane %v8050_v62, 1  ;;  %v8055_v63 = vshrl.u32 %v7948_v61, 16  ;;  %v8057_v27 = vshll.u32 %v7948_v61, 16  ;;  %v8062_v22 = vshrl.u32 %v7955_v1, 16 }
 0x4e8   :  { %v8046_v40 = vor.u32 %v8045_v37, %v8041_v18  ;;  %v8064_v36 = vshll.u32 %v7955_v1, 16  ;;  %v8297_v41 = vrot.slane %v8283_v54, %v14155_v57  ;;  %v8793_v3 = vcombine.low %v7741_v60, %v7748_v24 }
 0x4e9   :  { %v8053_v7 = vor.u32 %v8052_v35, %v8048_v48  ;;  %v8059_v20 = vrot.slane %v8057_v27, 1  ;;  %v8810_v38 = vcombine.low %v8221_v13, %v8228_v44  ;;  %v8821_v19 = vcombine.low %v7764_v49, %v7771_v2 }
 0x4ea   :  { %v8066_v23 = vrot.slane %v8064_v36, 1  ;;  %v16665_v0 = vrot.slane %v8793_v3, %v16335_v56  ;;  %v8838_v14 = vcombine.low %v8244_v10, %v8251_v8  ;;  %v8848_v47 = vcombine.low %v8290_v43, %v8297_v41 }
 0x4eb   :  { %v8060_v50 = vor.u32 %v8059_v20, %v8055_v63  ;;  %v8794_v62 = vcombine.low %v8046_v40, %v8053_v7  ;;  %v16668_v61 = vrot.slane %v8810_v38, %v16335_v56  ;;  %v16671_v37 = vrot.slane %v8821_v19, %v16335_v56 }
 0x4ec   :  { %v8067_v18 = vor.u32 %v8066_v23, %v8062_v22  ;;  %v16674_v60 = vrot.slane %v8838_v14, %v16335_v56  ;;  %v16677_v13 = vrot.slane %v8848_v47, %v16335_v56  ;;  %v7587_v36 = vcombine.high %v16636_v42, %v16636_v42 }
 0x4ed   :  { %v16682_v24 = vrot.slane %v8794_v62, %v16335_v56  ;;  %v8328_v7 = vcombine.low %v16640_v55, %v8327_v17  ;;  %v8329_v49 = vcombine.high %v16640_v55, %v8327_v17  ;;  %v18159_v19 = vcombine.high %v16621_v9, %v16621_v9 }
 0x4ee   :  { %v8822_v14 = vcombine.low %v8060_v50, %v8067_v18  ;;  %v8441_v2 = vcombine.low %v16636_v42, %v7586_v46  ;;  %v11348_v47 = vcombine.high %v16624_v32, %v16636_v42  ;;  %v8493_v8 = vrot.slane %v7587_v36, %v14155_v57 }
 0x4ef   :  { %v8395_v44 = vcombine.low %v18159_v19, %v16624_v32  ;;  %v8336_v10 = vrot.slane %v8328_v7, %v14155_v57  ;;  %v8343_v1 = vrot.slane %v8329_v49, %v14155_v57 }
 0x4f0   :  { %v16698_v55 = vrot.slane %v8822_v14, %v16335_v56  ;;  %v8448_v9 = vrot.slane %v8441_v2, %v14155_v57  ;;  %v8568_v50 = vrot.slane %v11348_v47, %v14155_v57 }
 0x4f1   :  { %v8402_v48 = vrot.slane %v8395_v44, %v14155_v57  ;;  %v8359_v17 = vshrl.u32 %v8336_v10, 16  ;;  %v8361_v46 = vshll.u32 %v8336_v10, 16  ;;  %v8368_v54 = vshll.u32 %v8343_v1, 16 }
 0x4f2   :  { %v8366_v43 = vshrl.u32 %v8343_v1, 16  ;;  %v8449_v35 = vcombine.high %v8448_v9, %v8448_v9  ;;  %v8494_v22 = vcombine.low %v8448_v9, %v8493_v8  ;;  %v8495_v40 = vcombine.high %v8448_v9, %v8493_v8 }
 0x4f3   :  { %v8403_v32 = vcombine.high %v8402_v48, %v8402_v48  ;;  %v8410_v42 = vrot.slane %v8402_v48, %v14155_v57  ;;  %v8363_v63 = vrot.slane %v8361_v46, 1  ;;  %v8370_v27 = vrot.slane %v8368_v54, 1 }
 0x4f4   :  { %v8456_v3 = vrot.slane %v8448_v9, %v14155_v57  ;;  %v8463_v20 = vrot.slane %v8449_v35, %v14155_v57  ;;  %v8569_v38 = vcombine.high %v8568_v50, %v8568_v50  ;;  %v8502_v18 = vrot.slane %v8494_v22, %v14155_v57 }
 0x4f5   :  { %v8417_v41 = vrot.slane %v8403_v32, %v14155_v57  ;;  %v8364_v23 = vor.u32 %v8363_v63, %v8359_v17  ;;  %v8371_v62 = vor.u32 %v8370_v27, %v8366_v43  ;;  %v8509_v36 = vrot.slane %v8495_v40, %v14155_v57 }
 0x4f6   :  { %v8576_v7 = vrot.slane %v8568_v50, %v14155_v57  ;;  %v8583_v49 = vrot.slane %v8569_v38, %v14155_v57  ;;  %v16710_v44 = vcombine.low %v8456_v3, %v8463_v20  ;;  %v8527_v14 = vshll.u32 %v8502_v18, 16 }
 0x4f7   :  { %v8865_v19 = vcombine.low %v8410_v42, %v8417_v41  ;;  %v8534_v2 = vshll.u32 %v8509_v36, 16  ;;  %v8849_v47 = vcombine.low %v8364_v23, %v8371_v62  ;;  %v8525_v8 = vshrl.u32 %v8502_v18, 16 }
 0x4f8   :  { %v8883_v1 = vrot.slane %v16710_v44, %v16335_v56  ;;  %v16717_v48 = vcombine.low %v8576_v7, %v8583_v49  ;;  %v8529_v9 = vrot.slane %v8527_v14, 1  ;;  %v8532_v17 = vshrl.u32 %v8509_v36, 16 }
 0x4f9   :  { %v16713_v10 = vrot.slane %v8865_v19, %v16335_v56  ;;  %v8536_v50 = vrot.slane %v8534_v2, 1  ;;  %v16720_v57 = vrot.slane %v8849_v47, %v16335_v56 }
 0x4fa   :  { %v8899_v46 = vrot.slane %v16717_v48, %v16335_v56  ;;  %v8530_v54 = vor.u32 %v8529_v9, %v8525_v8 }
 0x4fb   :  { %v8537_v43 = vor.u32 %v8536_v50, %v8532_v17 }
 0x4fd   :  { %v8876_v32 = vcombine.low %v8530_v54, %v8537_v43 }
 0x4ff   :  { %v16725_v42 = vrot.slane %v8876_v32, %v16335_v56 }
 0x500   :  { %12024 = dma.done.wait [#allocation4 + $0x1], 18432 }
 0x501   :  { %12025 = vsyncadd [#allocation4 + $0x1], 4294948864  ;;  %v18160_v35 = vrot.slane %v16389_v30, %v16335_v56  ;;  %v11352_v27 = vcombine.low %v16408_v52, %v16476_v31  ;;  %v11351_v22 = vcombine.low %v16420_v16, %v16429_v28  ;;  %v11353_v40 = vcombine.low %v16469_v15, %v16484_v6  ;;  %v11878_v23 = vld [vmem:[#allocation3 + $0x78] sm:$0xff]   ;;  %v11882_v7 = vld [vmem:[#allocation3 + $0x70] sm:$0xff]  }
 0x502   :  { %v11879_v62 = vld [vmem:[#allocation3 + $0xf8] sm:$0xff]   ;;  %11524 = vmatprep.subr.bf16.mxu0 %v11878_v23  ;;  %v11883_v49 = vld [vmem:[#allocation3 + $0xf0] sm:$0xff]   ;;  %v11886_v2 = vld [vmem:[#allocation3 + $0x68] sm:$0xff]  }
 0x503   :  { %v11350_v63 = vcombine.low %v18160_v35, %v16400_v59  ;;  %v16741_v3 = vrot.slane %v11352_v27, %v16335_v56  ;;  %v16744_v20 = vrot.slane %v11351_v22, %v16335_v56  ;;  %v16747_v30 = vrot.slane %v11353_v40, %v16335_v56  ;;  %v11880_v18 = vld [vmem:[#allocation3 + $0x38] sm:$0xff]   ;;  %11552 = vmatprep.subr.bf16.mxu1 %v11879_v62  ;;  %v11884_v19 = vld [vmem:[#allocation3 + $0x30] sm:$0xff]   ;;  %v11887_v47 = vld [vmem:[#allocation3 + $0xe8] sm:$0xff]  }
 0x504   :  { %v11881_v36 = vld [vmem:[#allocation3 + $0xb8] sm:$0xff]   ;;  %11525 = vmatpush3.bf16.msra.mxu0 %v11880_v18  ;;  %v11885_v14 = vld [vmem:[#allocation3 + $0xb0] sm:$0xff]   ;;  %v11888_v8 = vld [vmem:[#allocation3 + $0x28] sm:$0xff]   ;;  %v18161_v18 = vrot.slane %v16575_v39, %v16335_v56 }
 0x505   :  { %v16738_v41 = vrot.slane %v11350_v63, %v16335_v56  ;;  %v9233_v16 = vcombine.high %v16744_v20, %v16747_v30  ;;  %11553 = vmatpush3.bf16.msra.mxu1 %v11881_v36  ;;  %11526 = vmatprep.subr.bf16.mxu0 %v11882_v7  ;;  %v11889_v9 = vld [vmem:[#allocation3 + $0xa8] sm:$0xff]   ;;  %v11890_v17 = vld [vmem:[#allocation3 + $0x60] sm:$0xff]   ;;  %v11894_v32 = vld [vmem:[#allocation3 + $0x58] sm:$0xff]   ;;  %v11366_v7 = vcombine.low %v16665_v0, %v16671_v37 }
 0x506   :  { %11554 = vmatprep.subr.bf16.mxu1 %v11883_v49  ;;  %v11891_v50 = vld [vmem:[#allocation3 + $0xe0] sm:$0xff]   ;;  %v11895_v35 = vld [vmem:[#allocation3 + $0xd8] sm:$0xff]   ;;  %v11898_v22 = vld [vmem:[#allocation3 + $0x50] sm:$0xff]   ;;  %v11364_v36 = vcombine.low %v18161_v18, %v16596_v25 }
 0x507   :  { %v9231_v38 = vcombine.high %v16738_v41, %v16741_v3  ;;  %10471 = vmatprep.mubr.bf16.mxu1 %v9233_v16  ;;  %v11892_v54 = vld [vmem:[#allocation3 + $0x20] sm:$0xff]   ;;  %v11896_v63 = vld [vmem:[#allocation3 + $0x18] sm:$0xff]   ;;  %v11899_v40 = vld [vmem:[#allocation3 + $0xd0] sm:$0xff]  }
 0x508   :  { %11527 = vmatpush3.bf16.msra.mxu0 %v11884_v19  ;;  %v11893_v43 = vld [vmem:[#allocation3 + $0xa0] sm:$0xff]   ;;  %v11897_v27 = vld [vmem:[#allocation3 + $0x98] sm:$0xff]   ;;  %v11901_v16 = vld [vmem:[#allocation3 + $0x90] sm:$0xff]   ;;  %v11365_v19 = vcombine.low %v16586_v33, %v16599_v29  ;;  %v9354_v39 = vrot.slane %v11364_v36, %v16335_v56 }
 0x509   :  { %10422 = vmatprep.mubr.bf16.mxu0 %v9231_v38  ;;  %11555 = vmatpush3.bf16.msra.mxu1 %v11885_v14  ;;  %v11900_v38 = vld [vmem:[#allocation3 + $0x10] sm:$0xff]   ;;  %v11902_v23 = vld [vmem:[#allocation3 + $0x48] sm:$0xff]   ;;  %v11367_v14 = vcombine.low %v16682_v24, %v16698_v55 }
 0x50a   :  { %11528 = vmatprep.subr.bf16.mxu0 %v11886_v2  ;;  %11556 = vmatprep.subr.bf16.mxu1 %v11887_v47  ;;  %v11903_v62 = vld [vmem:[#allocation3 + $0xc8] sm:$0xff]   ;;  %v11906_v47 = vld [vmem:[#allocation3 + $0x40] sm:$0xff]   ;;  %v11915_v18 = vld [vmem:[#allocation3 + $0x1f0] sm:$0xff]  }
 0x50b   :  { %v11904_v49 = vld [vmem:[#allocation3 + $0x8] sm:$0xff]   ;;  %v16769_v33 = vrot.slane %v11367_v14, %v16335_v56 }
 0x50c   :  { %11529 = vmatpush3.bf16.msra.mxu0 %v11888_v8  ;;  %v11905_v2 = vld [vmem:[#allocation3 + $0x88] sm:$0xff]   ;;  %v11907_v8 = vld [vmem:[#allocation3 + $0xc0] sm:$0xff]  }
 0x50d   :  { %11557 = vmatpush3.bf16.msra.mxu1 %v11889_v9  ;;  %11530 = vmatprep.subr.bf16.mxu0 %v11890_v17  ;;  %v16765_v9 = vrot.slane %v11366_v7, %v16335_v56  ;;  %v11908_v17 = vld [vmem:[#allocation3] sm:$0xff]   ;;  %v11918_v14 = vld [vmem:[#allocation3 + $0x168] sm:$0xff]  }
 0x50e   :  { %11558 = vmatprep.subr.bf16.mxu1 %v11891_v50  ;;  %v9361_v50 = vrot.slane %v11365_v19, %v16335_v56 }
 0x50f   :  { %v9376_v19 = vcombine.low %v9354_v39, %v16765_v9 }
 0x510   :  { %11531 = vmatpush3.bf16.msra.mxu0 %v11892_v54  ;;  %v11909_v54 = vld [vmem:[#allocation3 + $0x80] sm:$0xff]  }
 0x511   :  { %11559 = vmatpush3.bf16.msra.mxu1 %v11893_v43  ;;  %11532 = vmatprep.subr.bf16.mxu0 %v11894_v32  ;;  %v9230_v43 = vcombine.low %v16738_v41, %v16741_v3  ;;  %v9232_v32 = vcombine.low %v16744_v20, %v16747_v30  ;;  %v9379_v41 = vcombine.high %v9361_v50, %v16769_v33 }
 0x512   :  { %11560 = vmatprep.subr.bf16.mxu1 %v11895_v35  ;;  %v11910_v35 = vld [vmem:[#allocation3 + $0x178] sm:$0xff]   ;;  %v11355_v20 = vcombine.low %v16400_v59, %v16408_v52  ;;  %v11916_v59 = vld [vmem:[#allocation3 + $0x130] sm:$0xff]  }
 0x514   :  { %11533 = vmatpush3.bf16.msra.mxu0 %v11896_v63  ;;  %v11911_v63 = vld [vmem:[#allocation3 + $0x1f8] sm:$0xff]   ;;  %v16794_v52 = vrot.slane %v11355_v20, %v16335_v56  ;;  %v11933_v20 = vld [vmem:[#allocation3 + $0x190] sm:$0xff]  }
 0x515   :  { %11561 = vmatpush3.bf16.msra.mxu1 %v11897_v27  ;;  %11534 = vmatprep.subr.bf16.mxu0 %v11898_v22  ;;  %v9377_v27 = vcombine.high %v9354_v39, %v16765_v9  ;;  %v18162_v22 = vrot.slane %v16391_v11, %v16335_v56  ;;  %v11914_v11 = vld [vmem:[#allocation3 + $0x170] sm:$0xff]   ;;  %v11923_v39 = vld [vmem:[#allocation3 + $0x1e0] sm:$0xff]  }
 0x516   :  { %11562 = vmatprep.subr.bf16.mxu1 %v11899_v40 }
 0x517   :  { %v11354_v40 = vcombine.low %v18162_v22, %v16403_v26  ;;  %v11928_v22 = vld [vmem:[#allocation3 + $0x118] sm:$0xff]  }
 0x518   :  { %11535 = vmatpush3.bf16.msra.mxu0 %v11900_v38  ;;  %v11356_v38 = vcombine.low %v16472_v12, %v16487_v21 }
 0x519   :  { %11563 = vmatpush3.bf16.msra.mxu1 %v11901_v16  ;;  %11536 = vmatprep.subr.bf16.mxu0 %v11902_v23  ;;  %v11912_v16 = vld [vmem:[#allocation3 + $0x138] sm:$0xff]   ;;  %v11357_v23 = vcombine.low %v16476_v31, %v16492_v4  ;;  %v16788_v36 = vrot.slane %v11354_v40, %v16335_v56 }
 0x51a   :  { %11564 = vmatprep.subr.bf16.mxu1 %v11903_v62  ;;  %v11913_v62 = vld [vmem:[#allocation3 + $0x1b8] sm:$0xff]   ;;  %v16791_v7 = vrot.slane %v11356_v38, %v16335_v56  ;;  %v11930_v38 = vld [vmem:[#allocation3 + $0x150] sm:$0xff]  }
 0x51b   :  { %v16797_v31 = vrot.slane %v11357_v23, %v16335_v56  ;;  %v11929_v40 = vld [vmem:[#allocation3 + $0x198] sm:$0xff]   ;;  %v11934_v23 = vld [vmem:[#allocation3 + $0x148] sm:$0xff]  }
 0x51c   :  { %11537 = vmatpush3.bf16.msra.mxu0 %v11904_v49  ;;  %v11917_v49 = vld [vmem:[#allocation3 + $0x1b0] sm:$0xff]  }
 0x51d   :  { %11565 = vmatpush3.bf16.msra.mxu1 %v11905_v2  ;;  %11538 = vmatprep.subr.bf16.mxu0 %v11906_v47  ;;  %v9378_v2 = vcombine.low %v9361_v50, %v16769_v33  ;;  %v11919_v47 = vld [vmem:[#allocation3 + $0x1e8] sm:$0xff]   ;;  %v11924_v50 = vld [vmem:[#allocation3 + $0x120] sm:$0xff]  }
 0x51e   :  { %11566 = vmatprep.subr.bf16.mxu1 %v11907_v8  ;;  %v9267_v8 = vcombine.high %v16788_v36, %v16791_v7 }
 0x520   :  { %11539 = vmatpush3.bf16.msra.mxu0 %v11908_v17  ;;  %v11920_v17 = vld [vmem:[#allocation3 + $0x128] sm:$0xff]  }
 0x521   :  { %11567 = vmatpush3.bf16.msra.mxu1 %v11909_v54  ;;  %11580 = vmatprep.subr.bf16.mxu0 %v11910_v35  ;;  %v9269_v54 = vcombine.high %v16794_v52, %v16797_v31  ;;  %v11925_v35 = vld [vmem:[#allocation3 + $0x1a0] sm:$0xff]  }
 0x522   :  { %11608 = vmatprep.subr.bf16.mxu1 %v11911_v63  ;;  %v11926_v63 = vld [vmem:[#allocation3 + $0x158] sm:$0xff]  }
 0x523   :  { %10423 = vmatmul.mubr.bf16.vlgmr.msra.gmra.mxu0 %v9230_v43  ;;  %v11921_v43 = vld [vmem:[#allocation3 + $0x1a8] sm:$0xff]  }
 0x524   :  { %10472 = vmatmul.mubr.bf16.vlgmr.msra.gmra.mxu1 %v9232_v32  ;;  %11581 = vmatpush3.bf16.msra.mxu0 %v11912_v16  ;;  %v11922_v32 = vld [vmem:[#allocation3 + $0x160] sm:$0xff]   ;;  %v11931_v16 = vld [vmem:[#allocation3 + $0x1d0] sm:$0xff]  }
 0x525   :  { %11609 = vmatpush3.bf16.msra.mxu1 %v11913_v62  ;;  %10430 = vmatprep.mubr.bf16.mxu0 %v9377_v27  ;;  %v11927_v27 = vld [vmem:[#allocation3 + $0x1d8] sm:$0xff]   ;;  %v11935_v62 = vld [vmem:[#allocation3 + $0x1c8] sm:$0xff]  }
 0x526   :  { %11582 = vmatprep.subr.bf16.mxu0 %v11914_v11  ;;  %10479 = vmatprep.mubr.bf16.mxu1 %v9379_v41  ;;  %v11932_v41 = vld [vmem:[#allocation3 + $0x110] sm:$0xff]   ;;  %v18163_v11 = vrot.slane %v16578_v53, %v16335_v56 }
 0x527   :  { %11610 = vmatprep.subr.bf16.mxu1 %v11915_v18 }
 0x528   :  { %11583 = vmatpush3.bf16.msra.mxu0 %v11916_v59  ;;  %v11368_v18 = vcombine.low %v18163_v11, %v16606_v51  ;;  %v11370_v59 = vcombine.low %v16668_v61, %v16674_v60 }
 0x529   :  { %11611 = vmatpush3.bf16.msra.mxu1 %v11917_v49  ;;  %11584 = vmatprep.subr.bf16.mxu0 %v11918_v14  ;;  %v11936_v49 = vld [vmem:[#allocation3 + $0x108] sm:$0xff]   ;;  %v11371_v14 = vcombine.low %v16671_v37, %v16677_v13  ;;  %v9266_v37 = vcombine.low %v16788_v36, %v16791_v7  ;;  %v11359_v36 = vcombine.low %v16403_v26, %v16472_v12  ;;  %v11948_v26 = vld [vmem:[#allocation3 + $0x230] sm:$0xff]  }
 0x52a   :  { %11612 = vmatprep.subr.bf16.mxu1 %v11919_v47  ;;  %v11938_v47 = vld [vmem:[#allocation3 + $0x140] sm:$0xff]   ;;  %v9390_v53 = vrot.slane %v11368_v18, %v16335_v56  ;;  %v11952_v18 = vld [vmem:[#allocation3 + $0x228] sm:$0xff]  }
 0x52b   :  { %10431 = vmatmul.mubr.bf16.gmra.mxu0 %v9376_v19  ;;  %v11369_v19 = vcombine.low %v16596_v25, %v16665_v0  ;;  %v9411_v0 = vrot.slane %v11371_v14, %v16335_v56  ;;  %v11941_v25 = vld [vmem:[#allocation3 + $0x180] sm:$0xff]   ;;  %v16841_v12 = vrot.slane %v11359_v36, %v16335_v56  ;;  %v11969_v36 = vld [vmem:[#allocation3 + $0x288] sm:$0xff]  }
 0x52c   :  { %11585 = vmatpush3.bf16.msra.mxu0 %v11920_v17  ;;  %10480 = vmatmul.mubr.bf16.gmra.mxu1 %v9378_v2  ;;  %v11937_v2 = vld [vmem:[#allocation3 + $0x188] sm:$0xff]   ;;  %v16817_v17 = vrot.slane %v11370_v59, %v16335_v56  ;;  %v11955_v14 = vld [vmem:[#allocation3 + $0x2e0] sm:$0xff]  }
 0x52d   :  { %11613 = vmatpush3.bf16.msra.mxu1 %v11921_v43  ;;  %10520 = vmatprep.mubr.bf16.mxu0 %v9267_v8  ;;  %v11939_v8 = vld [vmem:[#allocation3 + $0x1c0] sm:$0xff]   ;;  %v9397_v43 = vrot.slane %v11369_v19, %v16335_v56 }
 0x52e   :  { %11586 = vmatprep.subr.bf16.mxu0 %v11922_v32  ;;  %10569 = vmatprep.mubr.bf16.mxu1 %v9269_v54  ;;  %v11940_v54 = vld [vmem:[#allocation3 + $0x100] sm:$0xff]   ;;  %v9268_v32 = vcombine.low %v16794_v52, %v16797_v31  ;;  %v11361_v52 = vcombine.low %v16487_v21, %v16502_v34  ;;  %v11945_v31 = vld [vmem:[#allocation3 + $0x2b8] sm:$0xff]  }
 0x52f   :  { %11614 = vmatprep.subr.bf16.mxu1 %v11923_v39  ;;  %v11942_v39 = vld [vmem:[#allocation3 + $0x278] sm:$0xff]   ;;  %v11954_v19 = vld [vmem:[#allocation3 + $0x260] sm:$0xff]  }
 0x530   :  { %11587 = vmatpush3.bf16.msra.mxu0 %v11924_v50  ;;  %v11943_v50 = vld [vmem:[#allocation3 + $0x2f8] sm:$0xff]   ;;  %v16844_v21 = vrot.slane %v11361_v52, %v16335_v56  ;;  %v11970_v52 = vld [vmem:[#allocation3 + $0x240] sm:$0xff]  }
 0x531   :  { %11615 = vmatpush3.bf16.msra.mxu1 %v11925_v35  ;;  %11588 = vmatprep.subr.bf16.mxu0 %v11926_v63  ;;  %v9413_v35 = vcombine.high %v9390_v53, %v16817_v17  ;;  %v11358_v63 = vcombine.low %v16429_v28, %v16469_v15  ;;  %v11947_v28 = vld [vmem:[#allocation3 + $0x2f0] sm:$0xff]  }
 0x532   :  { %11616 = vmatprep.subr.bf16.mxu1 %v11927_v27  ;;  %v11360_v27 = vcombine.low %v16484_v6, %v16512_v45  ;;  %v9305_v59 = vcombine.high %v16841_v12, %v16844_v21 }
 0x533   :  { %v16835_v15 = vrot.slane %v11358_v63, %v16335_v56  ;;  %v11374_v63 = vcombine.low %v16698_v55, %v16720_v57 }
 0x534   :  { %11589 = vmatpush3.bf16.msra.mxu0 %v11928_v22  ;;  %v11944_v22 = vld [vmem:[#allocation3 + $0x238] sm:$0xff]   ;;  %v16838_v6 = vrot.slane %v11360_v27, %v16335_v56  ;;  %v11968_v27 = vld [vmem:[#allocation3 + $0x208] sm:$0xff]  }
 0x535   :  { %11617 = vmatpush3.bf16.msra.mxu1 %v11929_v40  ;;  %11590 = vmatprep.subr.bf16.mxu0 %v11930_v38  ;;  %v9415_v40 = vcombine.high %v9397_v43, %v9411_v0  ;;  %v11946_v38 = vld [vmem:[#allocation3 + $0x270] sm:$0xff]  }
 0x536   :  { %11618 = vmatprep.subr.bf16.mxu1 %v11931_v16  ;;  %v11949_v16 = vld [vmem:[#allocation3 + $0x2b0] sm:$0xff]   ;;  %v9303_v11 = vcombine.high %v16835_v15, %v16838_v6 }
 0x538   :  { %11591 = vmatpush3.bf16.msra.mxu0 %v11932_v41  ;;  %v9412_v41 = vcombine.low %v9390_v53, %v16817_v17  ;;  %v11959_v53 = vld [vmem:[#allocation3 + $0x2d8] sm:$0xff]  }
 0x539   :  { %11619 = vmatpush3.bf16.msra.mxu1 %v11933_v20  ;;  %11592 = vmatprep.subr.bf16.mxu0 %v11934_v23  ;;  %v11950_v20 = vld [vmem:[#allocation3 + $0x268] sm:$0xff]   ;;  %v9414_v23 = vcombine.low %v9397_v43, %v9411_v0  ;;  %v11961_v43 = vld [vmem:[#allocation3 + $0x298] sm:$0xff]   ;;  %v11962_v0 = vld [vmem:[#allocation3 + $0x250] sm:$0xff]  }
 0x53a   :  { %11620 = vmatprep.subr.bf16.mxu1 %v11935_v62  ;;  %v11951_v62 = vld [vmem:[#allocation3 + $0x2e8] sm:$0xff]  }
 0x53c   :  { %11593 = vmatpush3.bf16.msra.mxu0 %v11936_v49  ;;  %v11953_v49 = vld [vmem:[#allocation3 + $0x2a8] sm:$0xff]  }
 0x53d   :  { %11621 = vmatpush3.bf16.msra.mxu1 %v11937_v2  ;;  %11594 = vmatprep.subr.bf16.mxu0 %v11938_v47  ;;  %v11956_v2 = vld [vmem:[#allocation3 + $0x220] sm:$0xff]  }
 0x53e   :  { %11622 = vmatprep.subr.bf16.mxu1 %v11939_v8  ;;  %v11957_v47 = vld [vmem:[#allocation3 + $0x2a0] sm:$0xff]   ;;  %v11958_v8 = vld [vmem:[#allocation3 + $0x258] sm:$0xff]  }
 0x540   :  { %11595 = vmatpush3.bf16.msra.mxu0 %v11940_v54  ;;  %v11960_v54 = vld [vmem:[#allocation3 + $0x218] sm:$0xff]  }
 0x541   :  { %11623 = vmatpush3.bf16.msra.mxu1 %v11941_v25  ;;  %11636 = vmatprep.subr.bf16.mxu0 %v11942_v39  ;;  %v11963_v25 = vld [vmem:[#allocation3 + $0x2d0] sm:$0xff]   ;;  %v11966_v39 = vld [vmem:[#allocation3 + $0x248] sm:$0xff]  }
 0x542   :  { %11664 = vmatprep.subr.bf16.mxu1 %v11943_v50  ;;  %v11967_v50 = vld [vmem:[#allocation3 + $0x2c8] sm:$0xff]  }
 0x543   :  { %10521 = vmatmul.mubr.bf16.vlgmr.msra.gmra.mxu0 %v9266_v37  ;;  %v11964_v37 = vld [vmem:[#allocation3 + $0x210] sm:$0xff]  }
 0x544   :  { %10570 = vmatmul.mubr.bf16.vlgmr.msra.gmra.mxu1 %v9268_v32  ;;  %11637 = vmatpush3.bf16.msra.mxu0 %v11944_v22  ;;  %v11965_v32 = vld [vmem:[#allocation3 + $0x290] sm:$0xff]   ;;  %v11373_v22 = vcombine.low %v16606_v51, %v16668_v61  ;;  %v11973_v51 = vld [vmem:[#allocation3 + $0x280] sm:$0xff]   ;;  %v9302_v61 = vcombine.low %v16835_v15, %v16838_v6  ;;  %v11977_v15 = vld [vmem:[#allocation3 + $0x3b8] sm:$0xff]  }
 0x545   :  { %11665 = vmatpush3.bf16.msra.mxu1 %v11945_v31  ;;  %10528 = vmatprep.mubr.bf16.mxu0 %v9413_v35  ;;  %v11372_v35 = vcombine.low %v16599_v29, %v16682_v24  ;;  %v11971_v31 = vld [vmem:[#allocation3 + $0x2c0] sm:$0xff]   ;;  %v9440_v29 = vrot.slane %v11374_v63, %v16335_v56  ;;  %v11978_v6 = vld [vmem:[#allocation3 + $0x370] sm:$0xff]  }
 0x546   :  { %11638 = vmatprep.subr.bf16.mxu0 %v11946_v38  ;;  %10577 = vmatprep.mubr.bf16.mxu1 %v9415_v40  ;;  %v11375_v40 = vcombine.low %v16674_v60, %v16713_v10  ;;  %v11972_v24 = vld [vmem:[#allocation3 + $0x200] sm:$0xff]   ;;  %v9433_v55 = vrot.slane %v11373_v22, %v16335_v56  ;;  %v9304_v60 = vcombine.low %v16841_v12, %v16844_v21  ;;  %v11979_v12 = vld [vmem:[#allocation3 + $0x3f0] sm:$0xff]   ;;  %v11998_v22 = vld [vmem:[#allocation3 + $0x348] sm:$0xff]  }
 0x547   :  { %11666 = vmatprep.subr.bf16.mxu1 %v11947_v28  ;;  %v9426_v38 = vrot.slane %v11372_v35, %v16335_v56  ;;  %v11995_v35 = vld [vmem:[#allocation3 + $0x3d0] sm:$0xff]  }
 0x548   :  { %11639 = vmatpush3.bf16.msra.mxu0 %v11948_v26  ;;  %v9447_v28 = vrot.slane %v11375_v40, %v16335_v56  ;;  %v11974_v26 = vld [vmem:[#allocation3 + $0x378] sm:$0xff]   ;;  %v11996_v63 = vld [vmem:[#allocation3 + $0x310] sm:$0xff]   ;;  %v11999_v40 = vld [vmem:[#allocation3 + $0x3c8] sm:$0xff]  }
 0x549   :  { %11667 = vmatpush3.bf16.msra.mxu1 %v11949_v16  ;;  %11640 = vmatprep.subr.bf16.mxu0 %v11950_v20  ;;  %v11975_v16 = vld [vmem:[#allocation3 + $0x3f8] sm:$0xff]   ;;  %v18164_v20 = vrot.slane %v16573_v58, %v16335_v56 }
 0x54a   :  { %11668 = vmatprep.subr.bf16.mxu1 %v11951_v62  ;;  %v11976_v62 = vld [vmem:[#allocation3 + $0x338] sm:$0xff]  }
 0x54b   :  { %10529 = vmatmul.mubr.bf16.gmra.mxu0 %v9412_v41  ;;  %v9449_v41 = vcombine.high %v9426_v38, %v9440_v29 }
 0x54c   :  { %11641 = vmatpush3.bf16.msra.mxu0 %v11952_v18  ;;  %10578 = vmatmul.mubr.bf16.gmra.mxu1 %v9414_v23  ;;  %v11362_v23 = vcombine.low %v16492_v4, %v18164_v20  ;;  %v11363_v18 = vcombine.low %v16512_v45, %v16618_v5  ;;  %v11980_v4 = vld [vmem:[#allocation3 + $0x330] sm:$0xff]   ;;  %v9448_v5 = vcombine.low %v9426_v38, %v9440_v29  ;;  %v12002_v29 = vld [vmem:[#allocation3 + $0x340] sm:$0xff]  }
 0x54d   :  { %11669 = vmatpush3.bf16.msra.mxu1 %v11953_v49  ;;  %10618 = vmatprep.mubr.bf16.mxu0 %v9303_v11  ;;  %v9451_v11 = vcombine.high %v9433_v55, %v9447_v28  ;;  %v11981_v45 = vld [vmem:[#allocation3 + $0x3b0] sm:$0xff]   ;;  %v9450_v49 = vcombine.low %v9433_v55, %v9447_v28  ;;  %v11377_v38 = vcombine.low %v16720_v57, %v16725_v42  ;;  %v12004_v55 = vld [vmem:[#allocation3 + $0x300] sm:$0xff]   ;;  %v12006_v57 = vld [vmem:[#allocation3 + $0x478] sm:$0xff]  }
 0x54e   :  { %11642 = vmatprep.subr.bf16.mxu0 %v11954_v19  ;;  %10667 = vmatprep.mubr.bf16.mxu1 %v9305_v59  ;;  %v16874_v21 = vrot.slane %v11362_v23, %v16335_v56  ;;  %v16877_v58 = vrot.slane %v11363_v18, %v16335_v56  ;;  %v11982_v59 = vld [vmem:[#allocation3 + $0x368] sm:$0xff]   ;;  %v12007_v42 = vld [vmem:[#allocation3 + $0x438] sm:$0xff]   ;;  %v12009_v20 = vld [vmem:[#allocation3 + $0x430] sm:$0xff]  }
 0x54f   :  { %11670 = vmatprep.subr.bf16.mxu1 %v11955_v14  ;;  %v11983_v19 = vld [vmem:[#allocation3 + $0x3e8] sm:$0xff]  }
 0x550   :  { %11643 = vmatpush3.bf16.msra.mxu0 %v11956_v2  ;;  %v9323_v14 = vcombine.high %v16741_v3, %v16874_v21  ;;  %v11984_v2 = vld [vmem:[#allocation3 + $0x328] sm:$0xff]   ;;  %v9322_v44 = vcombine.low %v16741_v3, %v16874_v21 }
 0x551   :  { %11671 = vmatpush3.bf16.msra.mxu1 %v11957_v47  ;;  %11644 = vmatprep.subr.bf16.mxu0 %v11958_v8  ;;  %v9325_v47 = vcombine.high %v16747_v30, %v16877_v58  ;;  %v11985_v8 = vld [vmem:[#allocation3 + $0x3a8] sm:$0xff]  }
 0x552   :  { %11672 = vmatprep.subr.bf16.mxu1 %v11959_v53  ;;  %v11986_v53 = vld [vmem:[#allocation3 + $0x360] sm:$0xff]   ;;  %v12010_v23 = vld [vmem:[#allocation3 + $0x468] sm:$0xff]  }
 0x553   :  { %v12011_v18 = vld [vmem:[#allocation3 + $0x428] sm:$0xff]  }
 0x554   :  { %11645 = vmatpush3.bf16.msra.mxu0 %v11960_v54  ;;  %v11987_v54 = vld [vmem:[#allocation3 + $0x3e0] sm:$0xff]   ;;  %v12018_v21 = vld [vmem:[#allocation3 + $0x448] sm:$0xff]  }
 0x555   :  { %11673 = vmatpush3.bf16.msra.mxu1 %v11961_v43  ;;  %11646 = vmatprep.subr.bf16.mxu0 %v11962_v0  ;;  %v11988_v43 = vld [vmem:[#allocation3 + $0x320] sm:$0xff]  }
 0x556   :  { %11674 = vmatprep.subr.bf16.mxu1 %v11963_v25  ;;  %v11989_v0 = vld [vmem:[#allocation3 + $0x3a0] sm:$0xff]   ;;  %v11990_v25 = vld [vmem:[#allocation3 + $0x358] sm:$0xff]  }
 0x558   :  { %11647 = vmatpush3.bf16.msra.mxu0 %v11964_v37  ;;  %v11991_v37 = vld [vmem:[#allocation3 + $0x3d8] sm:$0xff]  }
 0x559   :  { %11675 = vmatpush3.bf16.msra.mxu1 %v11965_v32  ;;  %11648 = vmatprep.subr.bf16.mxu0 %v11966_v39  ;;  %v11992_v32 = vld [vmem:[#allocation3 + $0x318] sm:$0xff]  }
 0x55a   :  { %11676 = vmatprep.subr.bf16.mxu1 %v11967_v50  ;;  %v11993_v39 = vld [vmem:[#allocation3 + $0x398] sm:$0xff]   ;;  %v11994_v50 = vld [vmem:[#allocation3 + $0x350] sm:$0xff]  }
 0x55c   :  { %11649 = vmatpush3.bf16.msra.mxu0 %v11968_v27  ;;  %v11997_v27 = vld [vmem:[#allocation3 + $0x390] sm:$0xff]  }
 0x55d   :  { %11677 = vmatpush3.bf16.msra.mxu1 %v11969_v36  ;;  %11650 = vmatprep.subr.bf16.mxu0 %v11970_v52  ;;  %v12000_v36 = vld [vmem:[#allocation3 + $0x308] sm:$0xff]   ;;  %v11376_v52 = vcombine.low %v16677_v13, %v8883_v1  ;;  %v9467_v13 = vrot.slane %v11377_v38, %v16335_v56  ;;  %v9324_v1 = vcombine.low %v16747_v30, %v16877_v58  ;;  %v12020_v58 = vld [vmem:[#allocation3 + $0x440] sm:$0xff]  }
 0x55e   :  { %11678 = vmatprep.subr.bf16.mxu1 %v11971_v31  ;;  %v12001_v31 = vld [vmem:[#allocation3 + $0x388] sm:$0xff]   ;;  %v9473_v30 = vcombine.low %v16713_v10, %v8899_v46  ;;  %v12012_v10 = vld [vmem:[#allocation3 + $0x460] sm:$0xff]  }
 0x55f   :  { %v9460_v28 = vrot.slane %v11376_v52, %v16335_v56  ;;  %v9471_v3 = vcombine.high %v16769_v33, %v9467_v13  ;;  %v9470_v48 = vcombine.low %v16769_v33, %v9467_v13  ;;  %v12016_v33 = vld [vmem:[#allocation3 + $0x450] sm:$0xff]  }
 0x560   :  { %11651 = vmatpush3.bf16.msra.mxu0 %v11972_v24  ;;  %v12003_v24 = vld [vmem:[#allocation3 + $0x3c0] sm:$0xff]  }
 0x561   :  { %11679 = vmatpush3.bf16.msra.mxu1 %v11973_v51  ;;  %11692 = vmatprep.subr.bf16.mxu0 %v11974_v26  ;;  %v12005_v51 = vld [vmem:[#allocation3 + $0x380] sm:$0xff]   ;;  %v18165_v26 = vld [vmem:[#allocation279_spill] sm:$0xff] }
 0x562   :  { %11720 = vmatprep.subr.bf16.mxu1 %v11975_v16  ;;  %v18166_v16 = vrot.slane %v18165_v26, %v16335_v56 }
 0x563   :  { %10619 = vmatmul.mubr.bf16.vlgmr.msra.gmra.mxu0 %v9302_v61  ;;  %v12008_v61 = vld [vmem:[#allocation3 + $0x470] sm:$0xff]  }
 0x564   :  { %10668 = vmatmul.mubr.bf16.vlgmr.msra.gmra.mxu1 %v9304_v60  ;;  %11693 = vmatpush3.bf16.msra.mxu0 %v11976_v62  ;;  %v9469_v60 = vcombine.high %v16765_v9, %v9460_v28 }
 0x565   :  { %11721 = vmatpush3.bf16.msra.mxu1 %v11977_v15  ;;  %10626 = vmatprep.mubr.bf16.mxu0 %v9449_v41  ;;  %v9327_v41 = vcombine.low %v16502_v34, %v18166_v16  ;;  %v9468_v34 = vcombine.low %v16765_v9, %v9460_v28  ;;  %v12014_v9 = vld [vmem:[#allocation3 + $0x458] sm:$0xff]  }
 0x566   :  { %11694 = vmatprep.subr.bf16.mxu0 %v11978_v6  ;;  %10675 = vmatprep.mubr.bf16.mxu1 %v9451_v11  ;;  %v9487_v11 = vrot.slane %v9473_v30, %v16335_v56  ;;  %v12013_v6 = vld [vmem:[#allocation3 + $0x420] sm:$0xff]  }
 0x567   :  { %11722 = vmatprep.subr.bf16.mxu1 %v11979_v12  ;;  %v9341_v62 = vrot.slane %v9327_v41, %v16335_v56  ;;  %v12015_v56 = vld [vmem:[#allocation3 + $0x418] sm:$0xff]   ;;  %v12017_v12 = vld [vmem:[#allocation3 + $0x410] sm:$0xff]  }
 0x568   :  { %11695 = vmatpush3.bf16.msra.mxu0 %v11980_v4  ;;  %v9489_v15 = vcombine.high %v16817_v17, %v9487_v11  ;;  %v12019_v4 = vld [vmem:[#allocation3 + $0x408] sm:$0xff]  }
 0x569   :  { %11723 = vmatpush3.bf16.msra.mxu1 %v11981_v45  ;;  %11696 = vmatprep.subr.bf16.mxu0 %v11982_v59  ;;  %v9343_v46 = vcombine.high %v16791_v7, %v9341_v62  ;;  %v12021_v45 = vld [vmem:[#allocation3 + $0x400] sm:$0xff]   ;;  %v9488_v59 = vcombine.low %v16817_v17, %v9487_v11 }
 0x56a   :  { %11724 = vmatprep.subr.bf16.mxu1 %v11983_v19 }
 0x56b   :  { %10627 = vmatmul.mubr.bf16.gmra.mxu0 %v9448_v5  ;;  %v9342_v5 = vcombine.low %v16791_v7, %v9341_v62 }
 0x56c   :  { %11697 = vmatpush3.bf16.msra.mxu0 %v11984_v2  ;;  %10676 = vmatmul.mubr.bf16.gmra.mxu1 %v9450_v49 }
 0x56d   :  { %11725 = vmatpush3.bf16.msra.mxu1 %v11985_v8  ;;  %10716 = vmatprep.mubr.bf16.mxu0 %v9323_v14 }
 0x56e   :  { %11698 = vmatprep.subr.bf16.mxu0 %v11986_v53  ;;  %10765 = vmatprep.mubr.bf16.mxu1 %v9325_v47 }
 0x56f   :  { %11726 = vmatprep.subr.bf16.mxu1 %v11987_v54 }
 0x570   :  { %11699 = vmatpush3.bf16.msra.mxu0 %v11988_v43 }
 0x571   :  { %11727 = vmatpush3.bf16.msra.mxu1 %v11989_v0  ;;  %11700 = vmatprep.subr.bf16.mxu0 %v11990_v25 }
 0x572   :  { %11728 = vmatprep.subr.bf16.mxu1 %v11991_v37 }
 0x574   :  { %11701 = vmatpush3.bf16.msra.mxu0 %v11992_v32 }
 0x575   :  { %11729 = vmatpush3.bf16.msra.mxu1 %v11993_v39  ;;  %11702 = vmatprep.subr.bf16.mxu0 %v11994_v50 }
 0x576   :  { %11730 = vmatprep.subr.bf16.mxu1 %v11995_v35 }
 0x578   :  { %11703 = vmatpush3.bf16.msra.mxu0 %v11996_v63 }
 0x579   :  { %11731 = vmatpush3.bf16.msra.mxu1 %v11997_v27  ;;  %11704 = vmatprep.subr.bf16.mxu0 %v11998_v22 }
 0x57a   :  { %11732 = vmatprep.subr.bf16.mxu1 %v11999_v40 }
 0x57c   :  { %11705 = vmatpush3.bf16.msra.mxu0 %v12000_v36 }
 0x57d   :  { %11733 = vmatpush3.bf16.msra.mxu1 %v12001_v31  ;;  %11706 = vmatprep.subr.bf16.mxu0 %v12002_v29 }
 0x57e   :  { %11734 = vmatprep.subr.bf16.mxu1 %v12003_v24 }
 0x580   :  { %11707 = vmatpush3.bf16.msra.mxu0 %v12004_v55 }
 0x581   :  { %11735 = vmatpush3.bf16.msra.mxu1 %v12005_v51  ;;  %11748 = vmatprep.subr.bf16.mxu0 %v12006_v57 }
 0x582   :  { %11776 = vmatprep.subr.bf16.mxu1 %v12006_v57 }
 0x583   :  { %10717 = vmatmul.mubr.bf16.vlgmr.msra.gmra.mxu0 %v9322_v44 }
 0x584   :  { %10766 = vmatmul.mubr.bf16.vlgmr.msra.gmra.mxu1 %v9324_v1  ;;  %11749 = vmatpush3.bf16.msra.mxu0 %v12007_v42 }
 0x585   :  { %11784 = vmatpush3.bf16.msra.mxu1 %v12007_v42  ;;  %11750 = vmatprep.subr.bf16.mxu0 %v12008_v61 }
 0x586   :  { %11777 = vmatprep.subr.bf16.mxu1 %v12008_v61  ;;  %10724 = vmatprep.mubr.bf16.mxu0 %v9469_v60 }
 0x587   :  { %10773 = vmatprep.mubr.bf16.mxu1 %v9471_v3 }
 0x588   :  { %11751 = vmatpush3.bf16.msra.mxu0 %v12009_v20 }
 0x589   :  { %11785 = vmatpush3.bf16.msra.mxu1 %v12009_v20  ;;  %11752 = vmatprep.subr.bf16.mxu0 %v12010_v23 }
 0x58a   :  { %11778 = vmatprep.subr.bf16.mxu1 %v12010_v23 }
 0x58b   :  { %10725 = vmatmul.mubr.bf16.gmra.mxu0 %v9468_v34 }
 0x58c   :  { %11753 = vmatpush3.bf16.msra.mxu0 %v12011_v18  ;;  %10774 = vmatmul.mubr.bf16.gmra.mxu1 %v9470_v48 }
 0x58d   :  { %11786 = vmatpush3.bf16.msra.mxu1 %v12011_v18  ;;  %11754 = vmatprep.subr.bf16.mxu0 %v12012_v10 }
 0x58e   :  { %11779 = vmatprep.subr.bf16.mxu1 %v12012_v10  ;;  %10814 = vmatprep.mubr.bf16.mxu0 %v9343_v46 }
 0x58f   :  { %10822 = vmatprep.mubr.bf16.mxu1 %v9489_v15 }
 0x590   :  { %11755 = vmatpush3.bf16.msra.mxu0 %v12013_v6 }
 0x591   :  { %11787 = vmatpush3.bf16.msra.mxu1 %v12013_v6  ;;  %11756 = vmatprep.subr.bf16.mxu0 %v12014_v9 }
 0x592   :  { %11780 = vmatprep.subr.bf16.mxu1 %v12014_v9  ;;  %v11349_v9 = vld [vmem:[%s16974_s4] ss:$0 sm:$0xff] }
 0x594   :  { %11757 = vmatpush3.bf16.msra.mxu0 %v12015_v56 }
 0x595   :  { %11788 = vmatpush3.bf16.msra.mxu1 %v12015_v56  ;;  %11758 = vmatprep.subr.bf16.mxu0 %v12016_v33 }
 0x596   :  { %11781 = vmatprep.subr.bf16.mxu1 %v12016_v33 }
 0x598   :  { %11759 = vmatpush3.bf16.msra.mxu0 %v12017_v12 }
 0x599   :  { %11789 = vmatpush3.bf16.msra.mxu1 %v12017_v12  ;;  %11760 = vmatprep.subr.bf16.mxu0 %v12018_v21 }
 0x59a   :  { %11782 = vmatprep.subr.bf16.mxu1 %v12018_v21 }
 0x59c   :  { %11761 = vmatpush3.bf16.msra.mxu0 %v12019_v4 }
 0x59d   :  { %11790 = vmatpush3.bf16.msra.mxu1 %v12019_v4  ;;  %11762 = vmatprep.subr.bf16.mxu0 %v12020_v58 }
 0x59e   :  { %11783 = vmatprep.subr.bf16.mxu1 %v12020_v58 }
 0x5a0   :  { %11763 = vmatpush3.bf16.msra.mxu0 %v12021_v45 }
 0x5a1   :  { %11791 = vmatpush3.bf16.msra.mxu1 %v12021_v45 }
 0x5a3   :  { %10815 = vmatmul.mubr.bf16.vlgmr.msra.gmra.mxu0 %v9342_v5 }
 0x5a4   :  { %10823 = vmatmul.mubr.bf16.vlgmr.msra.gmra.mxu1 %v9488_v59 }
 0x5e3   :  { %v11540_v49 = vpop.f32.mrf.mxu0 }
 0x5e4   :  { %v11568_v14 = vpop.f32.mrf.mxu1 }
 0x5e5   :  { %v11541_v19 = vpop.f32.mrf.mxu0 }
 0x5e6   :  { %v11569_v47 = vpop.f32.mrf.mxu1  ;;  %v11542_v46 = vadd.f32 %v11541_v19, %v11540_v49 }
 0x5e7   :  { %v11543_v2 = vpop.f32.mrf.mxu0  ;;  %v11570_v59 = vadd.f32 %v11569_v47, %v11568_v14 }
 0x5e8   :  { %v16913_v54 = vpop.f32.mrf.mxu1  ;;  %v10425_v33 = vadd.f32 %v11542_v46, %v11349_v9 }
 0x5e9   :  { %v11544_v8 = vpop.f32.mrf.mxu0 }
 0x5ea   :  { %v16915_v0 = vpop.f32.mrf.mxu1  ;;  %v11545_v12 = vadd.f32 %v11544_v8, %v11543_v2  ;;  %v10474_v49 = vadd.f32 %v11570_v59, %v10425_v33 }
 0x5eb   :  { %v11546_v53 = vpop.f32.mrf.mxu0  ;;  %v11573_v2 = vadd.f32 %v16915_v0, %v16913_v54 }
 0x5ec   :  { %v11574_v25 = vpop.f32.mrf.mxu1  ;;  %v10428_v19 = vadd.f32 %v11545_v12, %v11349_v9 }
 0x5ed   :  { %v11547_v43 = vpop.f32.mrf.mxu0 }
 0x5ee   :  { %v11575_v37 = vpop.f32.mrf.mxu1  ;;  %v11548_v56 = vadd.f32 %v11547_v43, %v11546_v53  ;;  %v10477_v14 = vadd.f32 %v11573_v2, %v10428_v19 }
 0x5ef   :  { %v11549_v7 = vpop.f32.mrf.mxu0  ;;  %v11576_v45 = vadd.f32 %v11575_v37, %v11574_v25 }
 0x5f0   :  { %v11577_v39 = vpop.f32.mrf.mxu1  ;;  %v10433_v58 = vadd.f32 %v11548_v56, %v11349_v9 }
 0x5f1   :  { %v11550_v32 = vpop.f32.mrf.mxu0 }
 0x5f2   :  { %v11578_v35 = vpop.f32.mrf.mxu1  ;;  %v11551_v5 = vadd.f32 %v11550_v32, %v11549_v7 }
 0x603   :  { %v11596_v17 = vpop.f32.mrf.mxu0 }
 0x604   :  { %v16917_v63 = vpop.f32.mrf.mxu1 }
 0x605   :  { %v11597_v50 = vpop.f32.mrf.mxu0 }
 0x606   :  { %v11625_v22 = vpop.f32.mrf.mxu1 }
 0x607   :  { %v11599_v27 = vpop.f32.mrf.mxu0  ;;  %v11626_v47 = vadd.f32 %v11625_v22, %v16917_v63 }
 0x608   :  { %v16919_v36 = vpop.f32.mrf.mxu1 }
 0x609   :  { %v11600_v40 = vpop.f32.mrf.mxu0 }
 0x60a   :  { %v16921_v31 = vpop.f32.mrf.mxu1  ;;  %v11601_v53 = vadd.f32 %v11600_v40, %v11599_v27 }
 0x60b   :  { %v11602_v52 = vpop.f32.mrf.mxu0  ;;  %v11629_v54 = vadd.f32 %v16921_v31, %v16919_v36 }
 0x60c   :  { %v11630_v29 = vpop.f32.mrf.mxu1 }
 0x60d   :  { %v11603_v38 = vpop.f32.mrf.mxu0 }
 0x60e   :  { %v11631_v55 = vpop.f32.mrf.mxu1 }
 0x60f   :  { %v11605_v24 = vpop.f32.mrf.mxu0  ;;  %v11632_v25 = vadd.f32 %v11631_v55, %v11630_v29 }
 0x610   :  { %v11633_v51 = vpop.f32.mrf.mxu1 }
 0x611   :  { %v11606_v28 = vpop.f32.mrf.mxu0 }
 0x612   :  { %v11634_v13 = vpop.f32.mrf.mxu1  ;;  %v11607_v7 = vadd.f32 %v11606_v28, %v11605_v24 }
 0x613   :  { %v11635_v56 = vadd.f32 %v11634_v13, %v11633_v51 }
 0x623   :  { %v11652_v44 = vpop.f32.mrf.mxu0 }
 0x624   :  { %v16923_v57 = vpop.f32.mrf.mxu1 }
 0x625   :  { %v11653_v1 = vpop.f32.mrf.mxu0  ;;  %18167 = vst [vmem:[#allocation278_spill] sm:$0xff] %v16923_v57  ;;  %v11579_v57 = vadd.f32 %v11578_v35, %v11577_v39 }
 0x626   :  { %v16925_v61 = vpop.f32.mrf.mxu1  ;;  %v11654_v37 = vadd.f32 %v11653_v1, %v11652_v44 }
 0x627   :  { %v11655_v42 = vpop.f32.mrf.mxu0  ;;  %18168 = vst [vmem:[#allocation281_spill] sm:$0xff] %v16925_v61  ;;  %v10436_v61 = vadd.f32 %v11551_v5, %v11349_v9 }
 0x628   :  { %v16927_v26 = vpop.f32.mrf.mxu1 }
 0x629   :  { %v11656_v60 = vpop.f32.mrf.mxu0  ;;  %18169 = vst [vmem:[#allocation276_spill] sm:$0xff] %v16927_v26 }
 0x62a   :  { %v16929_v41 = vpop.f32.mrf.mxu1  ;;  %v11657_v27 = vadd.f32 %v11656_v60, %v11655_v42 }
 0x62b   :  { %v11658_v16 = vpop.f32.mrf.mxu0  ;;  %18170 = vst [vmem:[#allocation284_spill] sm:$0xff] %v16929_v41  ;;  %v11604_v41 = vadd.f32 %v11603_v38, %v11602_v52  ;;  %v10526_v38 = vadd.f32 %v11601_v53, %v10477_v14 }
 0x62c   :  { %v11686_v30 = vpop.f32.mrf.mxu1  ;;  %v18174_v22 = vld [vmem:[#allocation278_spill] sm:$0xff] }
 0x62d   :  { %v11659_v3 = vpop.f32.mrf.mxu0  ;;  %v10575_v63 = vadd.f32 %v11629_v54, %v10526_v38 }
 0x62e   :  { %v11687_v23 = vpop.f32.mrf.mxu1  ;;  %v18175_v28 = vld [vmem:[#allocation281_spill] sm:$0xff] }
 0x62f   :  { %v11661_v20 = vpop.f32.mrf.mxu0  ;;  %v11688_v24 = vadd.f32 %v11687_v23, %v11686_v30  ;;  %v11682_v44 = vadd.f32 %v18175_v28, %v18174_v22 }
 0x630   :  { %v16931_v34 = vpop.f32.mrf.mxu1  ;;  %v18177_v42 = vld [vmem:[#allocation276_spill] sm:$0xff] }
 0x631   :  { %v11662_v62 = vpop.f32.mrf.mxu0  ;;  %18171 = vst [vmem:[#allocation282_spill] sm:$0xff] %v16931_v34  ;;  %v10482_v34 = vadd.f32 %v11576_v45, %v10433_v58 }
 0x632   :  { %v11690_v18 = vpop.f32.mrf.mxu1  ;;  %v11663_v55 = vadd.f32 %v11662_v62, %v11661_v20  ;;  %v18178_v60 = vld [vmem:[#allocation284_spill] sm:$0xff] }
 0x633   :  { %v10531_v46 = vadd.f32 %v11604_v41, %v10482_v34 }
 0x635   :  { %v10580_v39 = vadd.f32 %v11632_v25, %v10531_v46 }
 0x638   :  { %v18176_v36 = vld [vmem:[#allocation282_spill] sm:$0xff] }
 0x639   :  { %v11691_v31 = vadd.f32 %v11690_v18, %v18176_v36 }
 0x643   :  { %v11708_v11 = vpop.f32.mrf.mxu0 }
 0x644   :  { %v16933_v48 = vpop.f32.mrf.mxu1 }
 0x645   :  { %18172 = vst [vmem:[#allocation291_spill] sm:$0xff] %v16933_v48  ;;  %v11709_v10 = vpop.f32.mrf.mxu0  ;;  %v11598_v48 = vadd.f32 %v11597_v50, %v11596_v17  ;;  %v10485_v17 = vadd.f32 %v11579_v57, %v10436_v61  ;;  %v11660_v50 = vadd.f32 %v11659_v3, %v11658_v16  ;;  %v10624_v3 = vadd.f32 %v11657_v27, %v10575_v63 }
 0x646   :  { %v16935_v15 = vpop.f32.mrf.mxu1  ;;  %v11710_v1 = vadd.f32 %v11709_v10, %v11708_v11 }
 0x647   :  { %18173 = vst [vmem:[#allocation290_spill] sm:$0xff] %v16935_v15  ;;  %v11711_v6 = vpop.f32.mrf.mxu0  ;;  %v10523_v8 = vadd.f32 %v11598_v48, %v10474_v49  ;;  %v10534_v35 = vadd.f32 %v11607_v7, %v10485_v17  ;;  %v10629_v29 = vadd.f32 %v11660_v50, %v10580_v39  ;;  %v11685_v48 = vadd.f32 %v18178_v60, %v18177_v42 }
 0x648   :  { %v16940_v21 = vpop.f32.mrf.mxu1 }
 0x649   :  { %v11712_v4 = vpop.f32.mrf.mxu0  ;;  %v10572_v52 = vadd.f32 %v11626_v47, %v10523_v8  ;;  %v10583_v61 = vadd.f32 %v11635_v56, %v10534_v35  ;;  %v10678_v13 = vadd.f32 %v11688_v24, %v10629_v29  ;;  %v10673_v10 = vadd.f32 %v11685_v48, %v10624_v3 }
 0x64a   :  { %v16942_v15 = vpop.f32.mrf.mxu1  ;;  %v11713_v20 = vadd.f32 %v11712_v4, %v11711_v6 }
 0x64b   :  { %v11714_v26 = vpop.f32.mrf.mxu0  ;;  %v10621_v0 = vadd.f32 %v11654_v37, %v10572_v52  ;;  %v10632_v34 = vadd.f32 %v11663_v55, %v10583_v61 }
 0x64c   :  { %v11742_v43 = vpop.f32.mrf.mxu1  ;;  %v18179_v58 = vld [vmem:[#allocation291_spill] sm:$0xff]  ;;  %v10722_v2 = vadd.f32 %v11713_v20, %v10673_v10 }
 0x64d   :  { %v11715_v32 = vpop.f32.mrf.mxu0  ;;  %v10670_v41 = vadd.f32 %v11682_v44, %v10621_v0  ;;  %v10681_v59 = vadd.f32 %v11691_v31, %v10632_v34 }
 0x64e   :  { %v11743_v9 = vpop.f32.mrf.mxu1  ;;  %v11716_v16 = vadd.f32 %v11715_v32, %v11714_v26  ;;  %v18180_v26 = vld [vmem:[#allocation290_spill] sm:$0xff] }
 0x64f   :  { %v11717_v40 = vpop.f32.mrf.mxu0  ;;  %v10719_v30 = vadd.f32 %v11710_v1, %v10670_v41  ;;  %v11744_v33 = vadd.f32 %v11743_v9, %v11742_v43  ;;  %v11738_v45 = vadd.f32 %v18180_v26, %v18179_v58  ;;  %v11741_v43 = vadd.f32 %v16942_v15, %v16940_v21 }
 0x650   :  { %v11745_v57 = vpop.f32.mrf.mxu1  ;;  %v10727_v62 = vadd.f32 %v11716_v16, %v10678_v13 }
 0x651   :  { %v11718_v51 = vpop.f32.mrf.mxu0  ;;  %v10768_v19 = vadd.f32 %v11738_v45, %v10719_v30  ;;  %v10771_v32 = vadd.f32 %v11741_v43, %v10722_v2 }
 0x652   :  { %v11746_v23 = vpop.f32.mrf.mxu1  ;;  %v11719_v12 = vadd.f32 %v11718_v51, %v11717_v40  ;;  %v10776_v53 = vadd.f32 %v11744_v33, %v10727_v62 }
 0x653   :  { %v11747_v25 = vadd.f32 %v11746_v23, %v11745_v57 }
 0x654   :  { %v10730_v46 = vadd.f32 %v11719_v12, %v10681_v59 }
 0x656   :  { %v10779_v52 = vadd.f32 %v11747_v25, %v10730_v46 }
 0x663   :  { %v11764_v11 = vpop.f32.mrf.mxu0 }
 0x664   :  { %v11770_v5 = vpop.f32.mrf.mxu1 }
 0x665   :  { %v11765_v49 = vpop.f32.mrf.mxu0 }
 0x666   :  { %v11766_v18 = vadd.f32 %v11765_v49, %v11764_v11  ;;  %v11771_v8 = vpop.f32.mrf.mxu1 }
 0x667   :  { %v11772_v6 = vadd.f32 %v11771_v8, %v11770_v5  ;;  %v11767_v4 = vpop.f32.mrf.mxu0 }
 0x668   :  { %v10817_v7 = vadd.f32 %v11766_v18, %v10768_v19  ;;  %v11773_v14 = vpop.f32.mrf.mxu1 }
 0x669   :  { %v10825_v47 = vadd.f32 %v11772_v6, %v10776_v53  ;;  %v11768_v37 = vpop.f32.mrf.mxu0 }
 0x66a   :  { %10831 = vst [vmem:[%s16977_s7] sm:$0xff] %v10817_v7  ;;  %v11769_v17 = vadd.f32 %v11768_v37, %v11767_v4  ;;  %v11774_v50 = vpop.f32.mrf.mxu1 }
 0x66b   :  { %10833 = vst [vmem:[%s16977_s7 + $0x10] sm:$0xff] %v10825_v47  ;;  %v11775_v38 = vadd.f32 %v11774_v50, %v11773_v14 }
 0x66c   :  { %v10820_v9 = vadd.f32 %v11769_v17, %v10771_v32 }
 0x66d   :  { %v10828_v39 = vadd.f32 %v11775_v38, %v10779_v52 }
 0x66e   :  { %10832 = vst [vmem:[%s16977_s7 + $0x8] sm:$0xff] %v10820_v9 }
 0x66f   :  { %10834 = vst [vmem:[%s16977_s7 + $0x18] sm:$0xff] %v10828_v39 }
 0x670   :  { %10839 = vsyncmov [#allocation4] }
 0x673   :  { %s10840_s24 = vpop.sfrf %10839 }
 0x674   :  { %p11522_p0 = scmp.ne.s32.totalorder %s10840_s24, 0 }
 0x676   :  { %10844 = shalt.err (%p11522_p0)  }
 0x677   :  { %10846 = vsyncmov [#allocation4 + $0x1] }
 0x67a   :  { %s10847_s25 = vpop.sfrf %10846 }
 0x67b   :  { %p11523_p1 = scmp.ne.s32.totalorder %s10847_s25, 0 }
 0x67d   :  { %10851 = shalt.err (%p11523_p1)  }

</bundles_post_ra>
